<compile_context>
chip_gen: v7x
topology: tpu7x:2x2x1
jax: 0.10.0
libtpu: 0.0.40
codegen_flags: <defaults>
</compile_context>

<pallas_src>
import functools

import jax
import jax.numpy as jnp
import numpy as np
from jax.experimental import pallas as pl
from jax.experimental.pallas import tpu as pltpu


# ----------------------------------------------------------------------------
# Pallas kernel: fused BN(folded) + ReLU + Conv3d(3x3x3, pad=1) + channel concat.
# One batch element per grid step.  Spatial (D*H*W) on lanes, channels on sublanes.
# ----------------------------------------------------------------------------
def _dense_layer_kernel(x_ref, scale_ref, bias_ref, w_ref, mask_ref, out_ref,
                        yflat_ref, *, D, H, W):
    # x_ref    : (1, Cin, S)         f32   S = D*H*W (lane axis)
    # scale_ref: (Cin, 1)            f32   gamma / sqrt(var + eps)
    # bias_ref : (Cin, 1)            f32   beta - mean * scale
    # w_ref    : (27, Cout, Cin)     bf16  tap-major conv weights
    # mask_ref : (27, 1, S)          bf16  per-tap boundary-validity masks (0/1)
    # out_ref  : (1, Cin+Cout, S)    f32   [passthrough x ; conv output]
    # yflat_ref: (Cin, S + 2*halo)   bf16  flat activations with zero lane halos
    Cin = x_ref.shape[1]
    S = D * H * W
    Cout = w_ref.shape[1]
    halo = (yflat_ref.shape[-1] - S) // 2

    x = x_ref[0]                                                   # (Cin, S) f32

    # BN (folded into scale/bias) + ReLU in f32 on the VPU.
    y = jnp.maximum(x * scale_ref[...] + bias_ref[...], 0.0)

    # Flat, halo-padded activations in bf16 (MXU operand dtype).  Only the two small
    # lane halos are zeroed each step; the interior is one lane-aligned wide store.
    yflat_ref[:, 0:halo] = jnp.zeros((Cin, halo), yflat_ref.dtype)
    yflat_ref[:, halo + S:] = jnp.zeros((Cin, halo), yflat_ref.dtype)
    yflat_ref[:, halo:halo + S] = y.astype(yflat_ref.dtype)

    # 3x3x3 conv: 27 lane-shifted, boundary-masked bf16 (Cout,Cin)x(Cin,S) MXU dots,
    # accumulated into a small f32 (Cout, S) value (a few vregs, no spilling).
    acc = jnp.zeros((Cout, S), jnp.float32)
    for kd in range(3):
        for kh in range(3):
            for kw in range(3):
                tap = (kd * 3 + kh) * 3 + kw
                off = (kd - 1) * H * W + (kh - 1) * W + (kw - 1)
                start = halo + off
                shifted = yflat_ref[:, start:start + S]            # (Cin, S) bf16
                rhs = shifted * mask_ref[tap]                      # zero-pad boundary
                acc = acc + jnp.dot(w_ref[tap], rhs,
                                    preferred_element_type=jnp.float32)

    # Fused torch.cat([x, out], dim=1): lane-dense stores of both halves.
    out_ref[0, 0:Cin, :] = x
    out_ref[0, Cin:Cin + Cout, :] = acc.astype(out_ref.dtype)


# ----------------------------------------------------------------------------
# Static per-tap boundary masks: mask[tap, 0, s] = 1 iff the shifted flat index
# corresponds to an in-range (non-padding) neighbor of output voxel s.
# ----------------------------------------------------------------------------
def _tap_masks(D, H, W):
    S = D * H * W
    s = np.arange(S)
    d, h, w = s // (H * W), (s // W) % H, s % W
    rows = []
    for kd in range(3):
        for kh in range(3):
            for kw in range(3):
                dd, hh, ww = d + (kd - 1), h + (kh - 1), w + (kw - 1)
                rows.append((dd >= 0) & (dd < D) & (hh >= 0) & (hh < H)
                            & (ww >= 0) & (ww < W))
    m = np.stack(rows).astype(np.float32).reshape(27, 1, S)
    return jnp.asarray(m, dtype=jnp.bfloat16)


# ----------------------------------------------------------------------------
# One _DenseLayer forward: NCDHW in, NCDHW out (channels grow by Cout).
# ----------------------------------------------------------------------------
def dense_layer(x_ncdhw, gamma, beta, w_oidhw, eps=1e-5):
    N, Cin, D, H, W = x_ncdhw.shape
    Cout = w_oidhw.shape[0]
    S = D * H * W
    x2d = x_ncdhw.reshape(N, Cin, S).astype(jnp.float32)

    # Training-mode BN statistics in a single pass (biased variance), folded.
    s1 = jnp.mean(x2d, axis=(0, 2))
    s2 = jnp.mean(x2d * x2d, axis=(0, 2))
    var = jnp.maximum(s2 - s1 * s1, 0.0)
    scale = gamma.astype(jnp.float32) / jnp.sqrt(var + eps)
    bias = beta.astype(jnp.float32) - s1 * scale
    scale2 = scale.reshape(Cin, 1)
    bias2 = bias.reshape(Cin, 1)

    # Conv weights (Cout, Cin, 3,3,3) -> tap-major (27, Cout, Cin), bf16 for the MXU.
    w3 = jnp.transpose(w_oidhw, (2, 3, 4, 0, 1)).reshape(27, Cout, Cin)
    w3 = w3.astype(jnp.bfloat16)

    mask = _tap_masks(D, H, W)                       # (27, 1, S) constant

    # Lane halo >= max |tap shift| = H*W + W + 1, rounded to a 128-lane multiple so
    # the interior activation store stays lane-aligned.
    halo = pl.cdiv(H * W + W + 1, 128) * 128

    out2d = pl.pallas_call(
        functools.partial(_dense_layer_kernel, D=D, H=H, W=W),
        out_shape=jax.ShapeDtypeStruct((N, Cin + Cout, S), jnp.float32),
        grid_spec=pltpu.PrefetchScalarGridSpec(
            num_scalar_prefetch=0,
            grid=(N,),
            in_specs=[
                pl.BlockSpec((1, Cin, S), lambda n: (n, 0, 0)),
                pl.BlockSpec((Cin, 1), lambda n: (0, 0)),
                pl.BlockSpec((Cin, 1), lambda n: (0, 0)),
                pl.BlockSpec((27, Cout, Cin), lambda n: (0, 0, 0)),
                pl.BlockSpec((27, 1, S), lambda n: (0, 0, 0)),
            ],
            out_specs=pl.BlockSpec((1, Cin + Cout, S), lambda n: (n, 0, 0)),
            scratch_shapes=[
                pltpu.VMEM((Cin, S + 2 * halo), jnp.bfloat16),  # flat padded acts
            ],
        ),
        # Batch axis is independent -> shards across TensorCores on multi-TC chips.
        compiler_params=pltpu.CompilerParams(dimension_semantics=("parallel",)),
    )(x2d, scale2, bias2, w3, mask)

    return out2d.reshape(N, Cin + Cout, D, H, W)


# ----------------------------------------------------------------------------
# Pure-JAX reference (lax.conv) for the correctness check.
# ----------------------------------------------------------------------------
def _ref_layer(x_ncdhw, gamma, beta, w, eps=1e-5):
    mean = jnp.mean(x_ncdhw, axis=(0, 2, 3, 4), keepdims=True)
    var = jnp.mean(jnp.square(x_ncdhw - mean), axis=(0, 2, 3, 4), keepdims=True)
    y = (x_ncdhw - mean) / jnp.sqrt(var + eps)
    y = y * gamma.reshape(1, -1, 1, 1, 1) + beta.reshape(1, -1, 1, 1, 1)
    y = jnp.maximum(y, 0.0)
    out = jax.lax.conv_general_dilated(
        y, w, window_strides=(1, 1, 1),
        padding=((1, 1), (1, 1), (1, 1)),
        dimension_numbers=("NCDHW", "OIDHW", "NCDHW"))
    return jnp.concatenate([x_ncdhw, out], axis=1)


if __name__ == "__main__":
    # Small, module-consistent shapes: N=2, in_channels=4, D=H=W=8, growth_rate=8.
    N, C_IN, D, H, W = 2, 4, 8, 8, 8
    GROWTH = 8

    key = jax.random.PRNGKey(0)
    k_x, k_g1, k_b1, k_w1, k_g2, k_b2, k_w2 = jax.random.split(key, 7)

    x = jax.random.normal(k_x, (N, C_IN, D, H, W), dtype=jnp.float32)

    c1_in, c2_in = C_IN, C_IN + GROWTH
    params = {
        "gamma1": 1.0 + 0.1 * jax.random.normal(k_g1, (c1_in,), jnp.float32),
        "beta1": 0.1 * jax.random.normal(k_b1, (c1_in,), jnp.float32),
        "w1": jax.random.normal(k_w1, (GROWTH, c1_in, 3, 3, 3), jnp.float32)
              / np.sqrt(c1_in * 27),
        "gamma2": 1.0 + 0.1 * jax.random.normal(k_g2, (c2_in,), jnp.float32),
        "beta2": 0.1 * jax.random.normal(k_b2, (c2_in,), jnp.float32),
        "w2": jax.random.normal(k_w2, (GROWTH, c2_in, 3, 3, 3), jnp.float32)
              / np.sqrt(c2_in * 27),
    }

    @jax.jit
    def forward(x, params):
        # Two stacked _DenseLayers (exercises Cin=4 and Cin=12, channel growth).
        y = dense_layer(x, params["gamma1"], params["beta1"], params["w1"])
        y = dense_layer(y, params["gamma2"], params["beta2"], params["w2"])
        return y

    out = jax.block_until_ready(forward(x, params))
    assert out.shape == (N, C_IN + 2 * GROWTH, D, H, W), out.shape

    ref = _ref_layer(x, params["gamma1"], params["beta1"], params["w1"])
    ref = _ref_layer(ref, params["gamma2"], params["beta2"], params["w2"])
    ref = jax.block_until_ready(ref)

    # bf16 MXU operands with f32 accumulation -> looser tolerance than pure f32.
    np.testing.assert_allclose(np.asarray(out), np.asarray(ref), rtol=5e-2, atol=5e-2)

    print("KERNEL_OK")
</pallas_src>

<mosaic_0001>
module attributes {stable_mosaic.version = 11 : i64} {
  func.func @_dense_layer_kernel(%arg0: i32, %arg1: memref<1x4x512xf32, #tpu.memory_space<vmem>>, %arg2: memref<4x1xf32, #tpu.memory_space<vmem>>, %arg3: memref<4x1xf32, #tpu.memory_space<vmem>>, %arg4: memref<27x8x4xbf16, #tpu.memory_space<vmem>>, %arg5: memref<27x1x512xbf16, #tpu.memory_space<vmem>>, %arg6: memref<1x12x512xf32, #tpu.memory_space<vmem>>, %arg7: memref<4x768xbf16, #tpu.memory_space<vmem>>) attributes {dimension_semantics = [#tpu.dimension_semantics<parallel>], iteration_bounds = array<i64: 2>, scalar_prefetch = 0 : i64, scratch_operands = 1 : i64, tpu.core_type = #tpu.core_type<tc>, window_params = [{transform_indices = @transform_0, window_bounds = array<i64: 1, 4, 512>}, {pipeline_mode = #tpu.pipeline_mode<synchronous>, transform_indices = @transform_1, window_bounds = array<i64: 4, 1>}, {pipeline_mode = #tpu.pipeline_mode<synchronous>, transform_indices = @transform_2, window_bounds = array<i64: 4, 1>}, {pipeline_mode = #tpu.pipeline_mode<synchronous>, transform_indices = @transform_3, window_bounds = array<i64: 27, 8, 4>}, {pipeline_mode = #tpu.pipeline_mode<synchronous>, transform_indices = @transform_4, window_bounds = array<i64: 27, 1, 512>}, {transform_indices = @transform_5, window_bounds = array<i64: 1, 12, 512>}]} {
    %c0 = arith.constant 0 : index
    %c0_0 = arith.constant 0 : index
    %c0_1 = arith.constant 0 : index
    %0 = vector.load %arg1[%c0, %c0_0, %c0_1] : memref<1x4x512xf32, #tpu.memory_space<vmem>>, vector<1x4x512xf32>
    %1 = vector.shape_cast %0 : vector<1x4x512xf32> to vector<4x512xf32>
    %c0_2 = arith.constant 0 : index
    %c0_3 = arith.constant 0 : index
    %2 = vector.load %arg2[%c0_2, %c0_3] : memref<4x1xf32, #tpu.memory_space<vmem>>, vector<4x1xf32>
    %3 = vector.broadcast %2 : vector<4x1xf32> to vector<4x512xf32>
    %4 = arith.mulf %1, %3 : vector<4x512xf32>
    %c0_4 = arith.constant 0 : index
    %c0_5 = arith.constant 0 : index
    %5 = vector.load %arg3[%c0_4, %c0_5] : memref<4x1xf32, #tpu.memory_space<vmem>>, vector<4x1xf32>
    %6 = vector.broadcast %5 : vector<4x1xf32> to vector<4x512xf32>
    %7 = arith.addf %4, %6 : vector<4x512xf32>
    %cst = arith.constant 0.000000e+00 : f32
    %8 = vector.broadcast %cst : f32 to vector<4x512xf32>
    %9 = arith.maximumf %7, %8 : vector<4x512xf32>
    %cst_6 = arith.constant 0.000000e+00 : bf16
    %10 = vector.broadcast %cst_6 : bf16 to vector<4x128xbf16>
    %c0_7 = arith.constant 0 : index
    %c0_8 = arith.constant 0 : index
    %11 = vector.load %arg7[%c0_7, %c0_8] : memref<4x768xbf16, #tpu.memory_space<vmem>>, vector<4x128xbf16>
    tpu.vector_store %arg7[%c0_7, %c0_8], %10 {strides = array<i32>} : memref<4x768xbf16, #tpu.memory_space<vmem>>, vector<4x128xbf16>,
    %cst_9 = arith.constant 0.000000e+00 : bf16
    %12 = vector.broadcast %cst_9 : bf16 to vector<4x128xbf16>
    %c0_10 = arith.constant 0 : index
    %c640 = arith.constant 640 : index
    %13 = vector.load %arg7[%c0_10, %c640] : memref<4x768xbf16, #tpu.memory_space<vmem>>, vector<4x128xbf16>
    tpu.vector_store %arg7[%c0_10, %c640], %12 {strides = array<i32>} : memref<4x768xbf16, #tpu.memory_space<vmem>>, vector<4x128xbf16>,
    %14 = arith.truncf %9 : vector<4x512xf32> to vector<4x512xbf16>
    %c0_11 = arith.constant 0 : index
    %c128 = arith.constant 128 : index
    %15 = vector.load %arg7[%c0_11, %c128] : memref<4x768xbf16, #tpu.memory_space<vmem>>, vector<4x512xbf16>
    tpu.vector_store %arg7[%c0_11, %c128], %14 {strides = array<i32>} : memref<4x768xbf16, #tpu.memory_space<vmem>>, vector<4x512xbf16>,
    %cst_12 = arith.constant 0.000000e+00 : f32
    %16 = vector.broadcast %cst_12 : f32 to vector<8x512xf32>
    %c0_13 = arith.constant 0 : index
    %c55 = arith.constant 55 : index
    %17 = vector.load %arg7[%c0_13, %c55] : memref<4x768xbf16, #tpu.memory_space<vmem>>, vector<4x512xbf16>
    %c0_14 = arith.constant 0 : index
    %c0_15 = arith.constant 0 : index
    %c0_16 = arith.constant 0 : index
    %18 = vector.load %arg5[%c0_14, %c0_15, %c0_16] : memref<27x1x512xbf16, #tpu.memory_space<vmem>>, vector<1x1x512xbf16>
    %19 = vector.shape_cast %18 : vector<1x1x512xbf16> to vector<1x512xbf16>
    %20 = vector.broadcast %19 : vector<1x512xbf16> to vector<4x512xbf16>
    %21 = arith.mulf %17, %20 : vector<4x512xbf16>
    %c0_17 = arith.constant 0 : index
    %c0_18 = arith.constant 0 : index
    %c0_19 = arith.constant 0 : index
    %22 = vector.load %arg4[%c0_17, %c0_18, %c0_19] : memref<27x8x4xbf16, #tpu.memory_space<vmem>>, vector<1x8x4xbf16>
    %23 = vector.shape_cast %22 : vector<1x8x4xbf16> to vector<8x4xbf16>
    %cst_20 = arith.constant dense<0.000000e+00> : vector<8x512xf32>
    %24 = tpu.matmul %23, %21, %cst_20 {dimension_numbers = #tpu.dot_dimension_numbers<[1], [0], [0], [1], [0, 0, 1, 1], [], []>} : vector<8x4xbf16>, vector<4x512xbf16>, vector<8x512xf32> -> vector<8x512xf32>
    %25 = arith.addf %16, %24 : vector<8x512xf32>
    %c0_21 = arith.constant 0 : index
    %c56 = arith.constant 56 : index
    %26 = vector.load %arg7[%c0_21, %c56] : memref<4x768xbf16, #tpu.memory_space<vmem>>, vector<4x512xbf16>
    %c1 = arith.constant 1 : index
    %c0_22 = arith.constant 0 : index
    %c0_23 = arith.constant 0 : index
    %27 = vector.load %arg5[%c1, %c0_22, %c0_23] : memref<27x1x512xbf16, #tpu.memory_space<vmem>>, vector<1x1x512xbf16>
    %28 = vector.shape_cast %27 : vector<1x1x512xbf16> to vector<1x512xbf16>
    %29 = vector.broadcast %28 : vector<1x512xbf16> to vector<4x512xbf16>
    %30 = arith.mulf %26, %29 : vector<4x512xbf16>
    %c1_24 = arith.constant 1 : index
    %c0_25 = arith.constant 0 : index
    %c0_26 = arith.constant 0 : index
    %31 = vector.load %arg4[%c1_24, %c0_25, %c0_26] : memref<27x8x4xbf16, #tpu.memory_space<vmem>>, vector<1x8x4xbf16>
    %32 = vector.shape_cast %31 : vector<1x8x4xbf16> to vector<8x4xbf16>
    %cst_27 = arith.constant dense<0.000000e+00> : vector<8x512xf32>
    %33 = tpu.matmul %32, %30, %cst_27 {dimension_numbers = #tpu.dot_dimension_numbers<[1], [0], [0], [1], [0, 0, 1, 1], [], []>} : vector<8x4xbf16>, vector<4x512xbf16>, vector<8x512xf32> -> vector<8x512xf32>
    %34 = arith.addf %25, %33 : vector<8x512xf32>
    %c0_28 = arith.constant 0 : index
    %c57 = arith.constant 57 : index
    %35 = vector.load %arg7[%c0_28, %c57] : memref<4x768xbf16, #tpu.memory_space<vmem>>, vector<4x512xbf16>
    %c2 = arith.constant 2 : index
    %c0_29 = arith.constant 0 : index
    %c0_30 = arith.constant 0 : index
    %36 = vector.load %arg5[%c2, %c0_29, %c0_30] : memref<27x1x512xbf16, #tpu.memory_space<vmem>>, vector<1x1x512xbf16>
    %37 = vector.shape_cast %36 : vector<1x1x512xbf16> to vector<1x512xbf16>
    %38 = vector.broadcast %37 : vector<1x512xbf16> to vector<4x512xbf16>
    %39 = arith.mulf %35, %38 : vector<4x512xbf16>
    %c2_31 = arith.constant 2 : index
    %c0_32 = arith.constant 0 : index
    %c0_33 = arith.constant 0 : index
    %40 = vector.load %arg4[%c2_31, %c0_32, %c0_33] : memref<27x8x4xbf16, #tpu.memory_space<vmem>>, vector<1x8x4xbf16>
    %41 = vector.shape_cast %40 : vector<1x8x4xbf16> to vector<8x4xbf16>
    %cst_34 = arith.constant dense<0.000000e+00> : vector<8x512xf32>
    %42 = tpu.matmul %41, %39, %cst_34 {dimension_numbers = #tpu.dot_dimension_numbers<[1], [0], [0], [1], [0, 0, 1, 1], [], []>} : vector<8x4xbf16>, vector<4x512xbf16>, vector<8x512xf32> -> vector<8x512xf32>
    %43 = arith.addf %34, %42 : vector<8x512xf32>
    %c0_35 = arith.constant 0 : index
    %c63 = arith.constant 63 : index
    %44 = vector.load %arg7[%c0_35, %c63] : memref<4x768xbf16, #tpu.memory_space<vmem>>, vector<4x512xbf16>
    %c3 = arith.constant 3 : index
    %c0_36 = arith.constant 0 : index
    %c0_37 = arith.constant 0 : index
    %45 = vector.load %arg5[%c3, %c0_36, %c0_37] : memref<27x1x512xbf16, #tpu.memory_space<vmem>>, vector<1x1x512xbf16>
    %46 = vector.shape_cast %45 : vector<1x1x512xbf16> to vector<1x512xbf16>
    %47 = vector.broadcast %46 : vector<1x512xbf16> to vector<4x512xbf16>
    %48 = arith.mulf %44, %47 : vector<4x512xbf16>
    %c3_38 = arith.constant 3 : index
    %c0_39 = arith.constant 0 : index
    %c0_40 = arith.constant 0 : index
    %49 = vector.load %arg4[%c3_38, %c0_39, %c0_40] : memref<27x8x4xbf16, #tpu.memory_space<vmem>>, vector<1x8x4xbf16>
    %50 = vector.shape_cast %49 : vector<1x8x4xbf16> to vector<8x4xbf16>
    %cst_41 = arith.constant dense<0.000000e+00> : vector<8x512xf32>
    %51 = tpu.matmul %50, %48, %cst_41 {dimension_numbers = #tpu.dot_dimension_numbers<[1], [0], [0], [1], [0, 0, 1, 1], [], []>} : vector<8x4xbf16>, vector<4x512xbf16>, vector<8x512xf32> -> vector<8x512xf32>
    %52 = arith.addf %43, %51 : vector<8x512xf32>
    %c0_42 = arith.constant 0 : index
    %c64 = arith.constant 64 : index
    %53 = vector.load %arg7[%c0_42, %c64] : memref<4x768xbf16, #tpu.memory_space<vmem>>, vector<4x512xbf16>
    %c4 = arith.constant 4 : index
    %c0_43 = arith.constant 0 : index
    %c0_44 = arith.constant 0 : index
    %54 = vector.load %arg5[%c4, %c0_43, %c0_44] : memref<27x1x512xbf16, #tpu.memory_space<vmem>>, vector<1x1x512xbf16>
    %55 = vector.shape_cast %54 : vector<1x1x512xbf16> to vector<1x512xbf16>
    %56 = vector.broadcast %55 : vector<1x512xbf16> to vector<4x512xbf16>
    %57 = arith.mulf %53, %56 : vector<4x512xbf16>
    %c4_45 = arith.constant 4 : index
    %c0_46 = arith.constant 0 : index
    %c0_47 = arith.constant 0 : index
    %58 = vector.load %arg4[%c4_45, %c0_46, %c0_47] : memref<27x8x4xbf16, #tpu.memory_space<vmem>>, vector<1x8x4xbf16>
    %59 = vector.shape_cast %58 : vector<1x8x4xbf16> to vector<8x4xbf16>
    %cst_48 = arith.constant dense<0.000000e+00> : vector<8x512xf32>
    %60 = tpu.matmul %59, %57, %cst_48 {dimension_numbers = #tpu.dot_dimension_numbers<[1], [0], [0], [1], [0, 0, 1, 1], [], []>} : vector<8x4xbf16>, vector<4x512xbf16>, vector<8x512xf32> -> vector<8x512xf32>
    %61 = arith.addf %52, %60 : vector<8x512xf32>
    %c0_49 = arith.constant 0 : index
    %c65 = arith.constant 65 : index
    %62 = vector.load %arg7[%c0_49, %c65] : memref<4x768xbf16, #tpu.memory_space<vmem>>, vector<4x512xbf16>
    %c5 = arith.constant 5 : index
    %c0_50 = arith.constant 0 : index
    %c0_51 = arith.constant 0 : index
    %63 = vector.load %arg5[%c5, %c0_50, %c0_51] : memref<27x1x512xbf16, #tpu.memory_space<vmem>>, vector<1x1x512xbf16>
    %64 = vector.shape_cast %63 : vector<1x1x512xbf16> to vector<1x512xbf16>
    %65 = vector.broadcast %64 : vector<1x512xbf16> to vector<4x512xbf16>
    %66 = arith.mulf %62, %65 : vector<4x512xbf16>
    %c5_52 = arith.constant 5 : index
    %c0_53 = arith.constant 0 : index
    %c0_54 = arith.constant 0 : index
    %67 = vector.load %arg4[%c5_52, %c0_53, %c0_54] : memref<27x8x4xbf16, #tpu.memory_space<vmem>>, vector<1x8x4xbf16>
    %68 = vector.shape_cast %67 : vector<1x8x4xbf16> to vector<8x4xbf16>
    %cst_55 = arith.constant dense<0.000000e+00> : vector<8x512xf32>
    %69 = tpu.matmul %68, %66, %cst_55 {dimension_numbers = #tpu.dot_dimension_numbers<[1], [0], [0], [1], [0, 0, 1, 1], [], []>} : vector<8x4xbf16>, vector<4x512xbf16>, vector<8x512xf32> -> vector<8x512xf32>
    %70 = arith.addf %61, %69 : vector<8x512xf32>
    %c0_56 = arith.constant 0 : index
    %c71 = arith.constant 71 : index
    %71 = vector.load %arg7[%c0_56, %c71] : memref<4x768xbf16, #tpu.memory_space<vmem>>, vector<4x512xbf16>
    %c6 = arith.constant 6 : index
    %c0_57 = arith.constant 0 : index
    %c0_58 = arith.constant 0 : index
    %72 = vector.load %arg5[%c6, %c0_57, %c0_58] : memref<27x1x512xbf16, #tpu.memory_space<vmem>>, vector<1x1x512xbf16>
    %73 = vector.shape_cast %72 : vector<1x1x512xbf16> to vector<1x512xbf16>
    %74 = vector.broadcast %73 : vector<1x512xbf16> to vector<4x512xbf16>
    %75 = arith.mulf %71, %74 : vector<4x512xbf16>
    %c6_59 = arith.constant 6 : index
    %c0_60 = arith.constant 0 : index
    %c0_61 = arith.constant 0 : index
    %76 = vector.load %arg4[%c6_59, %c0_60, %c0_61] : memref<27x8x4xbf16, #tpu.memory_space<vmem>>, vector<1x8x4xbf16>
    %77 = vector.shape_cast %76 : vector<1x8x4xbf16> to vector<8x4xbf16>
    %cst_62 = arith.constant dense<0.000000e+00> : vector<8x512xf32>
    %78 = tpu.matmul %77, %75, %cst_62 {dimension_numbers = #tpu.dot_dimension_numbers<[1], [0], [0], [1], [0, 0, 1, 1], [], []>} : vector<8x4xbf16>, vector<4x512xbf16>, vector<8x512xf32> -> vector<8x512xf32>
    %79 = arith.addf %70, %78 : vector<8x512xf32>
    %c0_63 = arith.constant 0 : index
    %c72 = arith.constant 72 : index
    %80 = vector.load %arg7[%c0_63, %c72] : memref<4x768xbf16, #tpu.memory_space<vmem>>, vector<4x512xbf16>
    %c7 = arith.constant 7 : index
    %c0_64 = arith.constant 0 : index
    %c0_65 = arith.constant 0 : index
    %81 = vector.load %arg5[%c7, %c0_64, %c0_65] : memref<27x1x512xbf16, #tpu.memory_space<vmem>>, vector<1x1x512xbf16>
    %82 = vector.shape_cast %81 : vector<1x1x512xbf16> to vector<1x512xbf16>
    %83 = vector.broadcast %82 : vector<1x512xbf16> to vector<4x512xbf16>
    %84 = arith.mulf %80, %83 : vector<4x512xbf16>
    %c7_66 = arith.constant 7 : index
    %c0_67 = arith.constant 0 : index
    %c0_68 = arith.constant 0 : index
    %85 = vector.load %arg4[%c7_66, %c0_67, %c0_68] : memref<27x8x4xbf16, #tpu.memory_space<vmem>>, vector<1x8x4xbf16>
    %86 = vector.shape_cast %85 : vector<1x8x4xbf16> to vector<8x4xbf16>
    %cst_69 = arith.constant dense<0.000000e+00> : vector<8x512xf32>
    %87 = tpu.matmul %86, %84, %cst_69 {dimension_numbers = #tpu.dot_dimension_numbers<[1], [0], [0], [1], [0, 0, 1, 1], [], []>} : vector<8x4xbf16>, vector<4x512xbf16>, vector<8x512xf32> -> vector<8x512xf32>
    %88 = arith.addf %79, %87 : vector<8x512xf32>
    %c0_70 = arith.constant 0 : index
    %c73 = arith.constant 73 : index
    %89 = vector.load %arg7[%c0_70, %c73] : memref<4x768xbf16, #tpu.memory_space<vmem>>, vector<4x512xbf16>
    %c8 = arith.constant 8 : index
    %c0_71 = arith.constant 0 : index
    %c0_72 = arith.constant 0 : index
    %90 = vector.load %arg5[%c8, %c0_71, %c0_72] : memref<27x1x512xbf16, #tpu.memory_space<vmem>>, vector<1x1x512xbf16>
    %91 = vector.shape_cast %90 : vector<1x1x512xbf16> to vector<1x512xbf16>
    %92 = vector.broadcast %91 : vector<1x512xbf16> to vector<4x512xbf16>
    %93 = arith.mulf %89, %92 : vector<4x512xbf16>
    %c8_73 = arith.constant 8 : index
    %c0_74 = arith.constant 0 : index
    %c0_75 = arith.constant 0 : index
    %94 = vector.load %arg4[%c8_73, %c0_74, %c0_75] : memref<27x8x4xbf16, #tpu.memory_space<vmem>>, vector<1x8x4xbf16>
    %95 = vector.shape_cast %94 : vector<1x8x4xbf16> to vector<8x4xbf16>
    %cst_76 = arith.constant dense<0.000000e+00> : vector<8x512xf32>
    %96 = tpu.matmul %95, %93, %cst_76 {dimension_numbers = #tpu.dot_dimension_numbers<[1], [0], [0], [1], [0, 0, 1, 1], [], []>} : vector<8x4xbf16>, vector<4x512xbf16>, vector<8x512xf32> -> vector<8x512xf32>
    %97 = arith.addf %88, %96 : vector<8x512xf32>
    %c0_77 = arith.constant 0 : index
    %c119 = arith.constant 119 : index
    %98 = vector.load %arg7[%c0_77, %c119] : memref<4x768xbf16, #tpu.memory_space<vmem>>, vector<4x512xbf16>
    %c9 = arith.constant 9 : index
    %c0_78 = arith.constant 0 : index
    %c0_79 = arith.constant 0 : index
    %99 = vector.load %arg5[%c9, %c0_78, %c0_79] : memref<27x1x512xbf16, #tpu.memory_space<vmem>>, vector<1x1x512xbf16>
    %100 = vector.shape_cast %99 : vector<1x1x512xbf16> to vector<1x512xbf16>
    %101 = vector.broadcast %100 : vector<1x512xbf16> to vector<4x512xbf16>
    %102 = arith.mulf %98, %101 : vector<4x512xbf16>
    %c9_80 = arith.constant 9 : index
    %c0_81 = arith.constant 0 : index
    %c0_82 = arith.constant 0 : index
    %103 = vector.load %arg4[%c9_80, %c0_81, %c0_82] : memref<27x8x4xbf16, #tpu.memory_space<vmem>>, vector<1x8x4xbf16>
    %104 = vector.shape_cast %103 : vector<1x8x4xbf16> to vector<8x4xbf16>
    %cst_83 = arith.constant dense<0.000000e+00> : vector<8x512xf32>
    %105 = tpu.matmul %104, %102, %cst_83 {dimension_numbers = #tpu.dot_dimension_numbers<[1], [0], [0], [1], [0, 0, 1, 1], [], []>} : vector<8x4xbf16>, vector<4x512xbf16>, vector<8x512xf32> -> vector<8x512xf32>
    %106 = arith.addf %97, %105 : vector<8x512xf32>
    %c0_84 = arith.constant 0 : index
    %c120 = arith.constant 120 : index
    %107 = vector.load %arg7[%c0_84, %c120] : memref<4x768xbf16, #tpu.memory_space<vmem>>, vector<4x512xbf16>
    %c10 = arith.constant 10 : index
    %c0_85 = arith.constant 0 : index
    %c0_86 = arith.constant 0 : index
    %108 = vector.load %arg5[%c10, %c0_85, %c0_86] : memref<27x1x512xbf16, #tpu.memory_space<vmem>>, vector<1x1x512xbf16>
    %109 = vector.shape_cast %108 : vector<1x1x512xbf16> to vector<1x512xbf16>
    %110 = vector.broadcast %109 : vector<1x512xbf16> to vector<4x512xbf16>
    %111 = arith.mulf %107, %110 : vector<4x512xbf16>
    %c10_87 = arith.constant 10 : index
    %c0_88 = arith.constant 0 : index
    %c0_89 = arith.constant 0 : index
    %112 = vector.load %arg4[%c10_87, %c0_88, %c0_89] : memref<27x8x4xbf16, #tpu.memory_space<vmem>>, vector<1x8x4xbf16>
    %113 = vector.shape_cast %112 : vector<1x8x4xbf16> to vector<8x4xbf16>
    %cst_90 = arith.constant dense<0.000000e+00> : vector<8x512xf32>
    %114 = tpu.matmul %113, %111, %cst_90 {dimension_numbers = #tpu.dot_dimension_numbers<[1], [0], [0], [1], [0, 0, 1, 1], [], []>} : vector<8x4xbf16>, vector<4x512xbf16>, vector<8x512xf32> -> vector<8x512xf32>
    %115 = arith.addf %106, %114 : vector<8x512xf32>
    %c0_91 = arith.constant 0 : index
    %c121 = arith.constant 121 : index
    %116 = vector.load %arg7[%c0_91, %c121] : memref<4x768xbf16, #tpu.memory_space<vmem>>, vector<4x512xbf16>
    %c11 = arith.constant 11 : index
    %c0_92 = arith.constant 0 : index
    %c0_93 = arith.constant 0 : index
    %117 = vector.load %arg5[%c11, %c0_92, %c0_93] : memref<27x1x512xbf16, #tpu.memory_space<vmem>>, vector<1x1x512xbf16>
    %118 = vector.shape_cast %117 : vector<1x1x512xbf16> to vector<1x512xbf16>
    %119 = vector.broadcast %118 : vector<1x512xbf16> to vector<4x512xbf16>
    %120 = arith.mulf %116, %119 : vector<4x512xbf16>
    %c11_94 = arith.constant 11 : index
    %c0_95 = arith.constant 0 : index
    %c0_96 = arith.constant 0 : index
    %121 = vector.load %arg4[%c11_94, %c0_95, %c0_96] : memref<27x8x4xbf16, #tpu.memory_space<vmem>>, vector<1x8x4xbf16>
    %122 = vector.shape_cast %121 : vector<1x8x4xbf16> to vector<8x4xbf16>
    %cst_97 = arith.constant dense<0.000000e+00> : vector<8x512xf32>
    %123 = tpu.matmul %122, %120, %cst_97 {dimension_numbers = #tpu.dot_dimension_numbers<[1], [0], [0], [1], [0, 0, 1, 1], [], []>} : vector<8x4xbf16>, vector<4x512xbf16>, vector<8x512xf32> -> vector<8x512xf32>
    %124 = arith.addf %115, %123 : vector<8x512xf32>
    %c0_98 = arith.constant 0 : index
    %c127 = arith.constant 127 : index
    %125 = vector.load %arg7[%c0_98, %c127] : memref<4x768xbf16, #tpu.memory_space<vmem>>, vector<4x512xbf16>
    %c12 = arith.constant 12 : index
    %c0_99 = arith.constant 0 : index
    %c0_100 = arith.constant 0 : index
    %126 = vector.load %arg5[%c12, %c0_99, %c0_100] : memref<27x1x512xbf16, #tpu.memory_space<vmem>>, vector<1x1x512xbf16>
    %127 = vector.shape_cast %126 : vector<1x1x512xbf16> to vector<1x512xbf16>
    %128 = vector.broadcast %127 : vector<1x512xbf16> to vector<4x512xbf16>
    %129 = arith.mulf %125, %128 : vector<4x512xbf16>
    %c12_101 = arith.constant 12 : index
    %c0_102 = arith.constant 0 : index
    %c0_103 = arith.constant 0 : index
    %130 = vector.load %arg4[%c12_101, %c0_102, %c0_103] : memref<27x8x4xbf16, #tpu.memory_space<vmem>>, vector<1x8x4xbf16>
    %131 = vector.shape_cast %130 : vector<1x8x4xbf16> to vector<8x4xbf16>
    %cst_104 = arith.constant dense<0.000000e+00> : vector<8x512xf32>
    %132 = tpu.matmul %131, %129, %cst_104 {dimension_numbers = #tpu.dot_dimension_numbers<[1], [0], [0], [1], [0, 0, 1, 1], [], []>} : vector<8x4xbf16>, vector<4x512xbf16>, vector<8x512xf32> -> vector<8x512xf32>
    %133 = arith.addf %124, %132 : vector<8x512xf32>
    %c0_105 = arith.constant 0 : index
    %c128_106 = arith.constant 128 : index
    %134 = vector.load %arg7[%c0_105, %c128_106] : memref<4x768xbf16, #tpu.memory_space<vmem>>, vector<4x512xbf16>
    %c13 = arith.constant 13 : index
    %c0_107 = arith.constant 0 : index
    %c0_108 = arith.constant 0 : index
    %135 = vector.load %arg5[%c13, %c0_107, %c0_108] : memref<27x1x512xbf16, #tpu.memory_space<vmem>>, vector<1x1x512xbf16>
    %136 = vector.shape_cast %135 : vector<1x1x512xbf16> to vector<1x512xbf16>
    %137 = vector.broadcast %136 : vector<1x512xbf16> to vector<4x512xbf16>
    %138 = arith.mulf %134, %137 : vector<4x512xbf16>
    %c13_109 = arith.constant 13 : index
    %c0_110 = arith.constant 0 : index
    %c0_111 = arith.constant 0 : index
    %139 = vector.load %arg4[%c13_109, %c0_110, %c0_111] : memref<27x8x4xbf16, #tpu.memory_space<vmem>>, vector<1x8x4xbf16>
    %140 = vector.shape_cast %139 : vector<1x8x4xbf16> to vector<8x4xbf16>
    %cst_112 = arith.constant dense<0.000000e+00> : vector<8x512xf32>
    %141 = tpu.matmul %140, %138, %cst_112 {dimension_numbers = #tpu.dot_dimension_numbers<[1], [0], [0], [1], [0, 0, 1, 1], [], []>} : vector<8x4xbf16>, vector<4x512xbf16>, vector<8x512xf32> -> vector<8x512xf32>
    %142 = arith.addf %133, %141 : vector<8x512xf32>
    %c0_113 = arith.constant 0 : index
    %c129 = arith.constant 129 : index
    %143 = vector.load %arg7[%c0_113, %c129] : memref<4x768xbf16, #tpu.memory_space<vmem>>, vector<4x512xbf16>
    %c14 = arith.constant 14 : index
    %c0_114 = arith.constant 0 : index
    %c0_115 = arith.constant 0 : index
    %144 = vector.load %arg5[%c14, %c0_114, %c0_115] : memref<27x1x512xbf16, #tpu.memory_space<vmem>>, vector<1x1x512xbf16>
    %145 = vector.shape_cast %144 : vector<1x1x512xbf16> to vector<1x512xbf16>
    %146 = vector.broadcast %145 : vector<1x512xbf16> to vector<4x512xbf16>
    %147 = arith.mulf %143, %146 : vector<4x512xbf16>
    %c14_116 = arith.constant 14 : index
    %c0_117 = arith.constant 0 : index
    %c0_118 = arith.constant 0 : index
    %148 = vector.load %arg4[%c14_116, %c0_117, %c0_118] : memref<27x8x4xbf16, #tpu.memory_space<vmem>>, vector<1x8x4xbf16>
    %149 = vector.shape_cast %148 : vector<1x8x4xbf16> to vector<8x4xbf16>
    %cst_119 = arith.constant dense<0.000000e+00> : vector<8x512xf32>
    %150 = tpu.matmul %149, %147, %cst_119 {dimension_numbers = #tpu.dot_dimension_numbers<[1], [0], [0], [1], [0, 0, 1, 1], [], []>} : vector<8x4xbf16>, vector<4x512xbf16>, vector<8x512xf32> -> vector<8x512xf32>
    %151 = arith.addf %142, %150 : vector<8x512xf32>
    %c0_120 = arith.constant 0 : index
    %c135 = arith.constant 135 : index
    %152 = vector.load %arg7[%c0_120, %c135] : memref<4x768xbf16, #tpu.memory_space<vmem>>, vector<4x512xbf16>
    %c15 = arith.constant 15 : index
    %c0_121 = arith.constant 0 : index
    %c0_122 = arith.constant 0 : index
    %153 = vector.load %arg5[%c15, %c0_121, %c0_122] : memref<27x1x512xbf16, #tpu.memory_space<vmem>>, vector<1x1x512xbf16>
    %154 = vector.shape_cast %153 : vector<1x1x512xbf16> to vector<1x512xbf16>
    %155 = vector.broadcast %154 : vector<1x512xbf16> to vector<4x512xbf16>
    %156 = arith.mulf %152, %155 : vector<4x512xbf16>
    %c15_123 = arith.constant 15 : index
    %c0_124 = arith.constant 0 : index
    %c0_125 = arith.constant 0 : index
    %157 = vector.load %arg4[%c15_123, %c0_124, %c0_125] : memref<27x8x4xbf16, #tpu.memory_space<vmem>>, vector<1x8x4xbf16>
    %158 = vector.shape_cast %157 : vector<1x8x4xbf16> to vector<8x4xbf16>
    %cst_126 = arith.constant dense<0.000000e+00> : vector<8x512xf32>
    %159 = tpu.matmul %158, %156, %cst_126 {dimension_numbers = #tpu.dot_dimension_numbers<[1], [0], [0], [1], [0, 0, 1, 1], [], []>} : vector<8x4xbf16>, vector<4x512xbf16>, vector<8x512xf32> -> vector<8x512xf32>
    %160 = arith.addf %151, %159 : vector<8x512xf32>
    %c0_127 = arith.constant 0 : index
    %c136 = arith.constant 136 : index
    %161 = vector.load %arg7[%c0_127, %c136] : memref<4x768xbf16, #tpu.memory_space<vmem>>, vector<4x512xbf16>
    %c16 = arith.constant 16 : index
    %c0_128 = arith.constant 0 : index
    %c0_129 = arith.constant 0 : index
    %162 = vector.load %arg5[%c16, %c0_128, %c0_129] : memref<27x1x512xbf16, #tpu.memory_space<vmem>>, vector<1x1x512xbf16>
    %163 = vector.shape_cast %162 : vector<1x1x512xbf16> to vector<1x512xbf16>
    %164 = vector.broadcast %163 : vector<1x512xbf16> to vector<4x512xbf16>
    %165 = arith.mulf %161, %164 : vector<4x512xbf16>
    %c16_130 = arith.constant 16 : index
    %c0_131 = arith.constant 0 : index
    %c0_132 = arith.constant 0 : index
    %166 = vector.load %arg4[%c16_130, %c0_131, %c0_132] : memref<27x8x4xbf16, #tpu.memory_space<vmem>>, vector<1x8x4xbf16>
    %167 = vector.shape_cast %166 : vector<1x8x4xbf16> to vector<8x4xbf16>
    %cst_133 = arith.constant dense<0.000000e+00> : vector<8x512xf32>
    %168 = tpu.matmul %167, %165, %cst_133 {dimension_numbers = #tpu.dot_dimension_numbers<[1], [0], [0], [1], [0, 0, 1, 1], [], []>} : vector<8x4xbf16>, vector<4x512xbf16>, vector<8x512xf32> -> vector<8x512xf32>
    %169 = arith.addf %160, %168 : vector<8x512xf32>
    %c0_134 = arith.constant 0 : index
    %c137 = arith.constant 137 : index
    %170 = vector.load %arg7[%c0_134, %c137] : memref<4x768xbf16, #tpu.memory_space<vmem>>, vector<4x512xbf16>
    %c17 = arith.constant 17 : index
    %c0_135 = arith.constant 0 : index
    %c0_136 = arith.constant 0 : index
    %171 = vector.load %arg5[%c17, %c0_135, %c0_136] : memref<27x1x512xbf16, #tpu.memory_space<vmem>>, vector<1x1x512xbf16>
    %172 = vector.shape_cast %171 : vector<1x1x512xbf16> to vector<1x512xbf16>
    %173 = vector.broadcast %172 : vector<1x512xbf16> to vector<4x512xbf16>
    %174 = arith.mulf %170, %173 : vector<4x512xbf16>
    %c17_137 = arith.constant 17 : index
    %c0_138 = arith.constant 0 : index
    %c0_139 = arith.constant 0 : index
    %175 = vector.load %arg4[%c17_137, %c0_138, %c0_139] : memref<27x8x4xbf16, #tpu.memory_space<vmem>>, vector<1x8x4xbf16>
    %176 = vector.shape_cast %175 : vector<1x8x4xbf16> to vector<8x4xbf16>
    %cst_140 = arith.constant dense<0.000000e+00> : vector<8x512xf32>
    %177 = tpu.matmul %176, %174, %cst_140 {dimension_numbers = #tpu.dot_dimension_numbers<[1], [0], [0], [1], [0, 0, 1, 1], [], []>} : vector<8x4xbf16>, vector<4x512xbf16>, vector<8x512xf32> -> vector<8x512xf32>
    %178 = arith.addf %169, %177 : vector<8x512xf32>
    %c0_141 = arith.constant 0 : index
    %c183 = arith.constant 183 : index
    %179 = vector.load %arg7[%c0_141, %c183] : memref<4x768xbf16, #tpu.memory_space<vmem>>, vector<4x512xbf16>
    %c18 = arith.constant 18 : index
    %c0_142 = arith.constant 0 : index
    %c0_143 = arith.constant 0 : index
    %180 = vector.load %arg5[%c18, %c0_142, %c0_143] : memref<27x1x512xbf16, #tpu.memory_space<vmem>>, vector<1x1x512xbf16>
    %181 = vector.shape_cast %180 : vector<1x1x512xbf16> to vector<1x512xbf16>
    %182 = vector.broadcast %181 : vector<1x512xbf16> to vector<4x512xbf16>
    %183 = arith.mulf %179, %182 : vector<4x512xbf16>
    %c18_144 = arith.constant 18 : index
    %c0_145 = arith.constant 0 : index
    %c0_146 = arith.constant 0 : index
    %184 = vector.load %arg4[%c18_144, %c0_145, %c0_146] : memref<27x8x4xbf16, #tpu.memory_space<vmem>>, vector<1x8x4xbf16>
    %185 = vector.shape_cast %184 : vector<1x8x4xbf16> to vector<8x4xbf16>
    %cst_147 = arith.constant dense<0.000000e+00> : vector<8x512xf32>
    %186 = tpu.matmul %185, %183, %cst_147 {dimension_numbers = #tpu.dot_dimension_numbers<[1], [0], [0], [1], [0, 0, 1, 1], [], []>} : vector<8x4xbf16>, vector<4x512xbf16>, vector<8x512xf32> -> vector<8x512xf32>
    %187 = arith.addf %178, %186 : vector<8x512xf32>
    %c0_148 = arith.constant 0 : index
    %c184 = arith.constant 184 : index
    %188 = vector.load %arg7[%c0_148, %c184] : memref<4x768xbf16, #tpu.memory_space<vmem>>, vector<4x512xbf16>
    %c19 = arith.constant 19 : index
    %c0_149 = arith.constant 0 : index
    %c0_150 = arith.constant 0 : index
    %189 = vector.load %arg5[%c19, %c0_149, %c0_150] : memref<27x1x512xbf16, #tpu.memory_space<vmem>>, vector<1x1x512xbf16>
    %190 = vector.shape_cast %189 : vector<1x1x512xbf16> to vector<1x512xbf16>
    %191 = vector.broadcast %190 : vector<1x512xbf16> to vector<4x512xbf16>
    %192 = arith.mulf %188, %191 : vector<4x512xbf16>
    %c19_151 = arith.constant 19 : index
    %c0_152 = arith.constant 0 : index
    %c0_153 = arith.constant 0 : index
    %193 = vector.load %arg4[%c19_151, %c0_152, %c0_153] : memref<27x8x4xbf16, #tpu.memory_space<vmem>>, vector<1x8x4xbf16>
    %194 = vector.shape_cast %193 : vector<1x8x4xbf16> to vector<8x4xbf16>
    %cst_154 = arith.constant dense<0.000000e+00> : vector<8x512xf32>
    %195 = tpu.matmul %194, %192, %cst_154 {dimension_numbers = #tpu.dot_dimension_numbers<[1], [0], [0], [1], [0, 0, 1, 1], [], []>} : vector<8x4xbf16>, vector<4x512xbf16>, vector<8x512xf32> -> vector<8x512xf32>
    %196 = arith.addf %187, %195 : vector<8x512xf32>
    %c0_155 = arith.constant 0 : index
    %c185 = arith.constant 185 : index
    %197 = vector.load %arg7[%c0_155, %c185] : memref<4x768xbf16, #tpu.memory_space<vmem>>, vector<4x512xbf16>
    %c20 = arith.constant 20 : index
    %c0_156 = arith.constant 0 : index
    %c0_157 = arith.constant 0 : index
    %198 = vector.load %arg5[%c20, %c0_156, %c0_157] : memref<27x1x512xbf16, #tpu.memory_space<vmem>>, vector<1x1x512xbf16>
    %199 = vector.shape_cast %198 : vector<1x1x512xbf16> to vector<1x512xbf16>
    %200 = vector.broadcast %199 : vector<1x512xbf16> to vector<4x512xbf16>
    %201 = arith.mulf %197, %200 : vector<4x512xbf16>
    %c20_158 = arith.constant 20 : index
    %c0_159 = arith.constant 0 : index
    %c0_160 = arith.constant 0 : index
    %202 = vector.load %arg4[%c20_158, %c0_159, %c0_160] : memref<27x8x4xbf16, #tpu.memory_space<vmem>>, vector<1x8x4xbf16>
    %203 = vector.shape_cast %202 : vector<1x8x4xbf16> to vector<8x4xbf16>
    %cst_161 = arith.constant dense<0.000000e+00> : vector<8x512xf32>
    %204 = tpu.matmul %203, %201, %cst_161 {dimension_numbers = #tpu.dot_dimension_numbers<[1], [0], [0], [1], [0, 0, 1, 1], [], []>} : vector<8x4xbf16>, vector<4x512xbf16>, vector<8x512xf32> -> vector<8x512xf32>
    %205 = arith.addf %196, %204 : vector<8x512xf32>
    %c0_162 = arith.constant 0 : index
    %c191 = arith.constant 191 : index
    %206 = vector.load %arg7[%c0_162, %c191] : memref<4x768xbf16, #tpu.memory_space<vmem>>, vector<4x512xbf16>
    %c21 = arith.constant 21 : index
    %c0_163 = arith.constant 0 : index
    %c0_164 = arith.constant 0 : index
    %207 = vector.load %arg5[%c21, %c0_163, %c0_164] : memref<27x1x512xbf16, #tpu.memory_space<vmem>>, vector<1x1x512xbf16>
    %208 = vector.shape_cast %207 : vector<1x1x512xbf16> to vector<1x512xbf16>
    %209 = vector.broadcast %208 : vector<1x512xbf16> to vector<4x512xbf16>
    %210 = arith.mulf %206, %209 : vector<4x512xbf16>
    %c21_165 = arith.constant 21 : index
    %c0_166 = arith.constant 0 : index
    %c0_167 = arith.constant 0 : index
    %211 = vector.load %arg4[%c21_165, %c0_166, %c0_167] : memref<27x8x4xbf16, #tpu.memory_space<vmem>>, vector<1x8x4xbf16>
    %212 = vector.shape_cast %211 : vector<1x8x4xbf16> to vector<8x4xbf16>
    %cst_168 = arith.constant dense<0.000000e+00> : vector<8x512xf32>
    %213 = tpu.matmul %212, %210, %cst_168 {dimension_numbers = #tpu.dot_dimension_numbers<[1], [0], [0], [1], [0, 0, 1, 1], [], []>} : vector<8x4xbf16>, vector<4x512xbf16>, vector<8x512xf32> -> vector<8x512xf32>
    %214 = arith.addf %205, %213 : vector<8x512xf32>
    %c0_169 = arith.constant 0 : index
    %c192 = arith.constant 192 : index
    %215 = vector.load %arg7[%c0_169, %c192] : memref<4x768xbf16, #tpu.memory_space<vmem>>, vector<4x512xbf16>
    %c22 = arith.constant 22 : index
    %c0_170 = arith.constant 0 : index
    %c0_171 = arith.constant 0 : index
    %216 = vector.load %arg5[%c22, %c0_170, %c0_171] : memref<27x1x512xbf16, #tpu.memory_space<vmem>>, vector<1x1x512xbf16>
    %217 = vector.shape_cast %216 : vector<1x1x512xbf16> to vector<1x512xbf16>
    %218 = vector.broadcast %217 : vector<1x512xbf16> to vector<4x512xbf16>
    %219 = arith.mulf %215, %218 : vector<4x512xbf16>
    %c22_172 = arith.constant 22 : index
    %c0_173 = arith.constant 0 : index
    %c0_174 = arith.constant 0 : index
    %220 = vector.load %arg4[%c22_172, %c0_173, %c0_174] : memref<27x8x4xbf16, #tpu.memory_space<vmem>>, vector<1x8x4xbf16>
    %221 = vector.shape_cast %220 : vector<1x8x4xbf16> to vector<8x4xbf16>
    %cst_175 = arith.constant dense<0.000000e+00> : vector<8x512xf32>
    %222 = tpu.matmul %221, %219, %cst_175 {dimension_numbers = #tpu.dot_dimension_numbers<[1], [0], [0], [1], [0, 0, 1, 1], [], []>} : vector<8x4xbf16>, vector<4x512xbf16>, vector<8x512xf32> -> vector<8x512xf32>
    %223 = arith.addf %214, %222 : vector<8x512xf32>
    %c0_176 = arith.constant 0 : index
    %c193 = arith.constant 193 : index
    %224 = vector.load %arg7[%c0_176, %c193] : memref<4x768xbf16, #tpu.memory_space<vmem>>, vector<4x512xbf16>
    %c23 = arith.constant 23 : index
    %c0_177 = arith.constant 0 : index
    %c0_178 = arith.constant 0 : index
    %225 = vector.load %arg5[%c23, %c0_177, %c0_178] : memref<27x1x512xbf16, #tpu.memory_space<vmem>>, vector<1x1x512xbf16>
    %226 = vector.shape_cast %225 : vector<1x1x512xbf16> to vector<1x512xbf16>
    %227 = vector.broadcast %226 : vector<1x512xbf16> to vector<4x512xbf16>
    %228 = arith.mulf %224, %227 : vector<4x512xbf16>
    %c23_179 = arith.constant 23 : index
    %c0_180 = arith.constant 0 : index
    %c0_181 = arith.constant 0 : index
    %229 = vector.load %arg4[%c23_179, %c0_180, %c0_181] : memref<27x8x4xbf16, #tpu.memory_space<vmem>>, vector<1x8x4xbf16>
    %230 = vector.shape_cast %229 : vector<1x8x4xbf16> to vector<8x4xbf16>
    %cst_182 = arith.constant dense<0.000000e+00> : vector<8x512xf32>
    %231 = tpu.matmul %230, %228, %cst_182 {dimension_numbers = #tpu.dot_dimension_numbers<[1], [0], [0], [1], [0, 0, 1, 1], [], []>} : vector<8x4xbf16>, vector<4x512xbf16>, vector<8x512xf32> -> vector<8x512xf32>
    %232 = arith.addf %223, %231 : vector<8x512xf32>
    %c0_183 = arith.constant 0 : index
    %c199 = arith.constant 199 : index
    %233 = vector.load %arg7[%c0_183, %c199] : memref<4x768xbf16, #tpu.memory_space<vmem>>, vector<4x512xbf16>
    %c24 = arith.constant 24 : index
    %c0_184 = arith.constant 0 : index
    %c0_185 = arith.constant 0 : index
    %234 = vector.load %arg5[%c24, %c0_184, %c0_185] : memref<27x1x512xbf16, #tpu.memory_space<vmem>>, vector<1x1x512xbf16>
    %235 = vector.shape_cast %234 : vector<1x1x512xbf16> to vector<1x512xbf16>
    %236 = vector.broadcast %235 : vector<1x512xbf16> to vector<4x512xbf16>
    %237 = arith.mulf %233, %236 : vector<4x512xbf16>
    %c24_186 = arith.constant 24 : index
    %c0_187 = arith.constant 0 : index
    %c0_188 = arith.constant 0 : index
    %238 = vector.load %arg4[%c24_186, %c0_187, %c0_188] : memref<27x8x4xbf16, #tpu.memory_space<vmem>>, vector<1x8x4xbf16>
    %239 = vector.shape_cast %238 : vector<1x8x4xbf16> to vector<8x4xbf16>
    %cst_189 = arith.constant dense<0.000000e+00> : vector<8x512xf32>
    %240 = tpu.matmul %239, %237, %cst_189 {dimension_numbers = #tpu.dot_dimension_numbers<[1], [0], [0], [1], [0, 0, 1, 1], [], []>} : vector<8x4xbf16>, vector<4x512xbf16>, vector<8x512xf32> -> vector<8x512xf32>
    %241 = arith.addf %232, %240 : vector<8x512xf32>
    %c0_190 = arith.constant 0 : index
    %c200 = arith.constant 200 : index
    %242 = vector.load %arg7[%c0_190, %c200] : memref<4x768xbf16, #tpu.memory_space<vmem>>, vector<4x512xbf16>
    %c25 = arith.constant 25 : index
    %c0_191 = arith.constant 0 : index
    %c0_192 = arith.constant 0 : index
    %243 = vector.load %arg5[%c25, %c0_191, %c0_192] : memref<27x1x512xbf16, #tpu.memory_space<vmem>>, vector<1x1x512xbf16>
    %244 = vector.shape_cast %243 : vector<1x1x512xbf16> to vector<1x512xbf16>
    %245 = vector.broadcast %244 : vector<1x512xbf16> to vector<4x512xbf16>
    %246 = arith.mulf %242, %245 : vector<4x512xbf16>
    %c25_193 = arith.constant 25 : index
    %c0_194 = arith.constant 0 : index
    %c0_195 = arith.constant 0 : index
    %247 = vector.load %arg4[%c25_193, %c0_194, %c0_195] : memref<27x8x4xbf16, #tpu.memory_space<vmem>>, vector<1x8x4xbf16>
    %248 = vector.shape_cast %247 : vector<1x8x4xbf16> to vector<8x4xbf16>
    %cst_196 = arith.constant dense<0.000000e+00> : vector<8x512xf32>
    %249 = tpu.matmul %248, %246, %cst_196 {dimension_numbers = #tpu.dot_dimension_numbers<[1], [0], [0], [1], [0, 0, 1, 1], [], []>} : vector<8x4xbf16>, vector<4x512xbf16>, vector<8x512xf32> -> vector<8x512xf32>
    %250 = arith.addf %241, %249 : vector<8x512xf32>
    %c0_197 = arith.constant 0 : index
    %c201 = arith.constant 201 : index
    %251 = vector.load %arg7[%c0_197, %c201] : memref<4x768xbf16, #tpu.memory_space<vmem>>, vector<4x512xbf16>
    %c26 = arith.constant 26 : index
    %c0_198 = arith.constant 0 : index
    %c0_199 = arith.constant 0 : index
    %252 = vector.load %arg5[%c26, %c0_198, %c0_199] : memref<27x1x512xbf16, #tpu.memory_space<vmem>>, vector<1x1x512xbf16>
    %253 = vector.shape_cast %252 : vector<1x1x512xbf16> to vector<1x512xbf16>
    %254 = vector.broadcast %253 : vector<1x512xbf16> to vector<4x512xbf16>
    %255 = arith.mulf %251, %254 : vector<4x512xbf16>
    %c26_200 = arith.constant 26 : index
    %c0_201 = arith.constant 0 : index
    %c0_202 = arith.constant 0 : index
    %256 = vector.load %arg4[%c26_200, %c0_201, %c0_202] : memref<27x8x4xbf16, #tpu.memory_space<vmem>>, vector<1x8x4xbf16>
    %257 = vector.shape_cast %256 : vector<1x8x4xbf16> to vector<8x4xbf16>
    %cst_203 = arith.constant dense<0.000000e+00> : vector<8x512xf32>
    %258 = tpu.matmul %257, %255, %cst_203 {dimension_numbers = #tpu.dot_dimension_numbers<[1], [0], [0], [1], [0, 0, 1, 1], [], []>} : vector<8x4xbf16>, vector<4x512xbf16>, vector<8x512xf32> -> vector<8x512xf32>
    %259 = arith.addf %250, %258 : vector<8x512xf32>
    %c0_204 = arith.constant 0 : index
    %c0_205 = arith.constant 0 : index
    %c0_206 = arith.constant 0 : index
    %260 = vector.load %arg6[%c0_204, %c0_205, %c0_206] : memref<1x12x512xf32, #tpu.memory_space<vmem>>, vector<1x4x512xf32>
    %261 = vector.shape_cast %260 : vector<1x4x512xf32> to vector<4x512xf32>
    %262 = vector.shape_cast %1 : vector<4x512xf32> to vector<1x4x512xf32>
    tpu.vector_store %arg6[%c0_204, %c0_205, %c0_206], %262 {strides = array<i32>} : memref<1x12x512xf32, #tpu.memory_space<vmem>>, vector<1x4x512xf32>,
    %c0_207 = arith.constant 0 : index
    %c4_208 = arith.constant 4 : index
    %c0_209 = arith.constant 0 : index
    %263 = vector.load %arg6[%c0_207, %c4_208, %c0_209] : memref<1x12x512xf32, #tpu.memory_space<vmem>>, vector<1x8x512xf32>
    %264 = vector.shape_cast %263 : vector<1x8x512xf32> to vector<8x512xf32>
    %265 = vector.shape_cast %259 : vector<8x512xf32> to vector<1x8x512xf32>
    tpu.vector_store %arg6[%c0_207, %c4_208, %c0_209], %265 {strides = array<i32>} : memref<1x12x512xf32, #tpu.memory_space<vmem>>, vector<1x8x512xf32>,
    return
  }
  func.func @transform_0(%arg0: i32) -> (i32, i32, i32) {
    %c0_i32 = arith.constant 0 : i32
    %c0_i32_0 = arith.constant 0 : i32
    %c0_i32_1 = arith.constant 0 : i32
    return %arg0, %c0_i32, %c0_i32_0 : i32, i32, i32
  }
  func.func @transform_1(%arg0: i32) -> (i32, i32) {
    %c0_i32 = arith.constant 0 : i32
    %c0_i32_0 = arith.constant 0 : i32
    %c0_i32_1 = arith.constant 0 : i32
    return %c0_i32, %c0_i32_0 : i32, i32
  }
  func.func @transform_2(%arg0: i32) -> (i32, i32) {
    %c0_i32 = arith.constant 0 : i32
    %c0_i32_0 = arith.constant 0 : i32
    %c0_i32_1 = arith.constant 0 : i32
    return %c0_i32, %c0_i32_0 : i32, i32
  }
  func.func @transform_3(%arg0: i32) -> (i32, i32, i32) {
    %c0_i32 = arith.constant 0 : i32
    %c0_i32_0 = arith.constant 0 : i32
    %c0_i32_1 = arith.constant 0 : i32
    %c0_i32_2 = arith.constant 0 : i32
    return %c0_i32, %c0_i32_0, %c0_i32_1 : i32, i32, i32
  }
  func.func @transform_4(%arg0: i32) -> (i32, i32, i32) {
    %c0_i32 = arith.constant 0 : i32
    %c0_i32_0 = arith.constant 0 : i32
    %c0_i32_1 = arith.constant 0 : i32
    %c0_i32_2 = arith.constant 0 : i32
    return %c0_i32, %c0_i32_0, %c0_i32_1 : i32, i32, i32
  }
  func.func @transform_5(%arg0: i32) -> (i32, i32, i32) {
    %c0_i32 = arith.constant 0 : i32
    %c0_i32_0 = arith.constant 0 : i32
    %c0_i32_1 = arith.constant 0 : i32
    return %arg0, %c0_i32, %c0_i32_0 : i32, i32, i32
  }
}

module attributes {stable_mosaic.version = 11 : i64} {
  func.func @_dense_layer_kernel(%arg0: i32, %arg1: memref<1x12x512xf32, #tpu.memory_space<vmem>>, %arg2: memref<12x1xf32, #tpu.memory_space<vmem>>, %arg3: memref<12x1xf32, #tpu.memory_space<vmem>>, %arg4: memref<27x8x12xbf16, #tpu.memory_space<vmem>>, %arg5: memref<27x1x512xbf16, #tpu.memory_space<vmem>>, %arg6: memref<1x20x512xf32, #tpu.memory_space<vmem>>, %arg7: memref<12x768xbf16, #tpu.memory_space<vmem>>) attributes {dimension_semantics = [#tpu.dimension_semantics<parallel>], iteration_bounds = array<i64: 2>, scalar_prefetch = 0 : i64, scratch_operands = 1 : i64, tpu.core_type = #tpu.core_type<tc>, window_params = [{transform_indices = @transform_0, window_bounds = array<i64: 1, 12, 512>}, {pipeline_mode = #tpu.pipeline_mode<synchronous>, transform_indices = @transform_1, window_bounds = array<i64: 12, 1>}, {pipeline_mode = #tpu.pipeline_mode<synchronous>, transform_indices = @transform_2, window_bounds = array<i64: 12, 1>}, {pipeline_mode = #tpu.pipeline_mode<synchronous>, transform_indices = @transform_3, window_bounds = array<i64: 27, 8, 12>}, {pipeline_mode = #tpu.pipeline_mode<synchronous>, transform_indices = @transform_4, window_bounds = array<i64: 27, 1, 512>}, {transform_indices = @transform_5, window_bounds = array<i64: 1, 20, 512>}]} {
    %c0 = arith.constant 0 : index
    %c0_0 = arith.constant 0 : index
    %c0_1 = arith.constant 0 : index
    %0 = vector.load %arg1[%c0, %c0_0, %c0_1] : memref<1x12x512xf32, #tpu.memory_space<vmem>>, vector<1x12x512xf32>
    %1 = vector.shape_cast %0 : vector<1x12x512xf32> to vector<12x512xf32>
    %c0_2 = arith.constant 0 : index
    %c0_3 = arith.constant 0 : index
    %2 = vector.load %arg2[%c0_2, %c0_3] : memref<12x1xf32, #tpu.memory_space<vmem>>, vector<12x1xf32>
    %3 = vector.broadcast %2 : vector<12x1xf32> to vector<12x512xf32>
    %4 = arith.mulf %1, %3 : vector<12x512xf32>
    %c0_4 = arith.constant 0 : index
    %c0_5 = arith.constant 0 : index
    %5 = vector.load %arg3[%c0_4, %c0_5] : memref<12x1xf32, #tpu.memory_space<vmem>>, vector<12x1xf32>
    %6 = vector.broadcast %5 : vector<12x1xf32> to vector<12x512xf32>
    %7 = arith.addf %4, %6 : vector<12x512xf32>
    %cst = arith.constant 0.000000e+00 : f32
    %8 = vector.broadcast %cst : f32 to vector<12x512xf32>
    %9 = arith.maximumf %7, %8 : vector<12x512xf32>
    %cst_6 = arith.constant 0.000000e+00 : bf16
    %10 = vector.broadcast %cst_6 : bf16 to vector<12x128xbf16>
    %c0_7 = arith.constant 0 : index
    %c0_8 = arith.constant 0 : index
    %11 = vector.load %arg7[%c0_7, %c0_8] : memref<12x768xbf16, #tpu.memory_space<vmem>>, vector<12x128xbf16>
    tpu.vector_store %arg7[%c0_7, %c0_8], %10 {strides = array<i32>} : memref<12x768xbf16, #tpu.memory_space<vmem>>, vector<12x128xbf16>,
    %cst_9 = arith.constant 0.000000e+00 : bf16
    %12 = vector.broadcast %cst_9 : bf16 to vector<12x128xbf16>
    %c0_10 = arith.constant 0 : index
    %c640 = arith.constant 640 : index
    %13 = vector.load %arg7[%c0_10, %c640] : memref<12x768xbf16, #tpu.memory_space<vmem>>, vector<12x128xbf16>
    tpu.vector_store %arg7[%c0_10, %c640], %12 {strides = array<i32>} : memref<12x768xbf16, #tpu.memory_space<vmem>>, vector<12x128xbf16>,
    %14 = arith.truncf %9 : vector<12x512xf32> to vector<12x512xbf16>
    %c0_11 = arith.constant 0 : index
    %c128 = arith.constant 128 : index
    %15 = vector.load %arg7[%c0_11, %c128] : memref<12x768xbf16, #tpu.memory_space<vmem>>, vector<12x512xbf16>
    tpu.vector_store %arg7[%c0_11, %c128], %14 {strides = array<i32>} : memref<12x768xbf16, #tpu.memory_space<vmem>>, vector<12x512xbf16>,
    %cst_12 = arith.constant 0.000000e+00 : f32
    %16 = vector.broadcast %cst_12 : f32 to vector<8x512xf32>
    %c0_13 = arith.constant 0 : index
    %c55 = arith.constant 55 : index
    %17 = vector.load %arg7[%c0_13, %c55] : memref<12x768xbf16, #tpu.memory_space<vmem>>, vector<12x512xbf16>
    %c0_14 = arith.constant 0 : index
    %c0_15 = arith.constant 0 : index
    %c0_16 = arith.constant 0 : index
    %18 = vector.load %arg5[%c0_14, %c0_15, %c0_16] : memref<27x1x512xbf16, #tpu.memory_space<vmem>>, vector<1x1x512xbf16>
    %19 = vector.shape_cast %18 : vector<1x1x512xbf16> to vector<1x512xbf16>
    %20 = vector.broadcast %19 : vector<1x512xbf16> to vector<12x512xbf16>
    %21 = arith.mulf %17, %20 : vector<12x512xbf16>
    %c0_17 = arith.constant 0 : index
    %c0_18 = arith.constant 0 : index
    %c0_19 = arith.constant 0 : index
    %22 = vector.load %arg4[%c0_17, %c0_18, %c0_19] : memref<27x8x12xbf16, #tpu.memory_space<vmem>>, vector<1x8x12xbf16>
    %23 = vector.shape_cast %22 : vector<1x8x12xbf16> to vector<8x12xbf16>
    %cst_20 = arith.constant dense<0.000000e+00> : vector<8x512xf32>
    %24 = tpu.matmul %23, %21, %cst_20 {dimension_numbers = #tpu.dot_dimension_numbers<[1], [0], [0], [1], [0, 0, 1, 1], [], []>} : vector<8x12xbf16>, vector<12x512xbf16>, vector<8x512xf32> -> vector<8x512xf32>
    %25 = arith.addf %16, %24 : vector<8x512xf32>
    %c0_21 = arith.constant 0 : index
    %c56 = arith.constant 56 : index
    %26 = vector.load %arg7[%c0_21, %c56] : memref<12x768xbf16, #tpu.memory_space<vmem>>, vector<12x512xbf16>
    %c1 = arith.constant 1 : index
    %c0_22 = arith.constant 0 : index
    %c0_23 = arith.constant 0 : index
    %27 = vector.load %arg5[%c1, %c0_22, %c0_23] : memref<27x1x512xbf16, #tpu.memory_space<vmem>>, vector<1x1x512xbf16>
    %28 = vector.shape_cast %27 : vector<1x1x512xbf16> to vector<1x512xbf16>
    %29 = vector.broadcast %28 : vector<1x512xbf16> to vector<12x512xbf16>
    %30 = arith.mulf %26, %29 : vector<12x512xbf16>
    %c1_24 = arith.constant 1 : index
    %c0_25 = arith.constant 0 : index
    %c0_26 = arith.constant 0 : index
    %31 = vector.load %arg4[%c1_24, %c0_25, %c0_26] : memref<27x8x12xbf16, #tpu.memory_space<vmem>>, vector<1x8x12xbf16>
    %32 = vector.shape_cast %31 : vector<1x8x12xbf16> to vector<8x12xbf16>
    %cst_27 = arith.constant dense<0.000000e+00> : vector<8x512xf32>
    %33 = tpu.matmul %32, %30, %cst_27 {dimension_numbers = #tpu.dot_dimension_numbers<[1], [0], [0], [1], [0, 0, 1, 1], [], []>} : vector<8x12xbf16>, vector<12x512xbf16>, vector<8x512xf32> -> vector<8x512xf32>
    %34 = arith.addf %25, %33 : vector<8x512xf32>
    %c0_28 = arith.constant 0 : index
    %c57 = arith.constant 57 : index
    %35 = vector.load %arg7[%c0_28, %c57] : memref<12x768xbf16, #tpu.memory_space<vmem>>, vector<12x512xbf16>
    %c2 = arith.constant 2 : index
    %c0_29 = arith.constant 0 : index
    %c0_30 = arith.constant 0 : index
    %36 = vector.load %arg5[%c2, %c0_29, %c0_30] : memref<27x1x512xbf16, #tpu.memory_space<vmem>>, vector<1x1x512xbf16>
    %37 = vector.shape_cast %36 : vector<1x1x512xbf16> to vector<1x512xbf16>
    %38 = vector.broadcast %37 : vector<1x512xbf16> to vector<12x512xbf16>
    %39 = arith.mulf %35, %38 : vector<12x512xbf16>
    %c2_31 = arith.constant 2 : index
    %c0_32 = arith.constant 0 : index
    %c0_33 = arith.constant 0 : index
    %40 = vector.load %arg4[%c2_31, %c0_32, %c0_33] : memref<27x8x12xbf16, #tpu.memory_space<vmem>>, vector<1x8x12xbf16>
    %41 = vector.shape_cast %40 : vector<1x8x12xbf16> to vector<8x12xbf16>
    %cst_34 = arith.constant dense<0.000000e+00> : vector<8x512xf32>
    %42 = tpu.matmul %41, %39, %cst_34 {dimension_numbers = #tpu.dot_dimension_numbers<[1], [0], [0], [1], [0, 0, 1, 1], [], []>} : vector<8x12xbf16>, vector<12x512xbf16>, vector<8x512xf32> -> vector<8x512xf32>
    %43 = arith.addf %34, %42 : vector<8x512xf32>
    %c0_35 = arith.constant 0 : index
    %c63 = arith.constant 63 : index
    %44 = vector.load %arg7[%c0_35, %c63] : memref<12x768xbf16, #tpu.memory_space<vmem>>, vector<12x512xbf16>
    %c3 = arith.constant 3 : index
    %c0_36 = arith.constant 0 : index
    %c0_37 = arith.constant 0 : index
    %45 = vector.load %arg5[%c3, %c0_36, %c0_37] : memref<27x1x512xbf16, #tpu.memory_space<vmem>>, vector<1x1x512xbf16>
    %46 = vector.shape_cast %45 : vector<1x1x512xbf16> to vector<1x512xbf16>
    %47 = vector.broadcast %46 : vector<1x512xbf16> to vector<12x512xbf16>
    %48 = arith.mulf %44, %47 : vector<12x512xbf16>
    %c3_38 = arith.constant 3 : index
    %c0_39 = arith.constant 0 : index
    %c0_40 = arith.constant 0 : index
    %49 = vector.load %arg4[%c3_38, %c0_39, %c0_40] : memref<27x8x12xbf16, #tpu.memory_space<vmem>>, vector<1x8x12xbf16>
    %50 = vector.shape_cast %49 : vector<1x8x12xbf16> to vector<8x12xbf16>
    %cst_41 = arith.constant dense<0.000000e+00> : vector<8x512xf32>
    %51 = tpu.matmul %50, %48, %cst_41 {dimension_numbers = #tpu.dot_dimension_numbers<[1], [0], [0], [1], [0, 0, 1, 1], [], []>} : vector<8x12xbf16>, vector<12x512xbf16>, vector<8x512xf32> -> vector<8x512xf32>
    %52 = arith.addf %43, %51 : vector<8x512xf32>
    %c0_42 = arith.constant 0 : index
    %c64 = arith.constant 64 : index
    %53 = vector.load %arg7[%c0_42, %c64] : memref<12x768xbf16, #tpu.memory_space<vmem>>, vector<12x512xbf16>
    %c4 = arith.constant 4 : index
    %c0_43 = arith.constant 0 : index
    %c0_44 = arith.constant 0 : index
    %54 = vector.load %arg5[%c4, %c0_43, %c0_44] : memref<27x1x512xbf16, #tpu.memory_space<vmem>>, vector<1x1x512xbf16>
    %55 = vector.shape_cast %54 : vector<1x1x512xbf16> to vector<1x512xbf16>
    %56 = vector.broadcast %55 : vector<1x512xbf16> to vector<12x512xbf16>
    %57 = arith.mulf %53, %56 : vector<12x512xbf16>
    %c4_45 = arith.constant 4 : index
    %c0_46 = arith.constant 0 : index
    %c0_47 = arith.constant 0 : index
    %58 = vector.load %arg4[%c4_45, %c0_46, %c0_47] : memref<27x8x12xbf16, #tpu.memory_space<vmem>>, vector<1x8x12xbf16>
    %59 = vector.shape_cast %58 : vector<1x8x12xbf16> to vector<8x12xbf16>
    %cst_48 = arith.constant dense<0.000000e+00> : vector<8x512xf32>
    %60 = tpu.matmul %59, %57, %cst_48 {dimension_numbers = #tpu.dot_dimension_numbers<[1], [0], [0], [1], [0, 0, 1, 1], [], []>} : vector<8x12xbf16>, vector<12x512xbf16>, vector<8x512xf32> -> vector<8x512xf32>
    %61 = arith.addf %52, %60 : vector<8x512xf32>
    %c0_49 = arith.constant 0 : index
    %c65 = arith.constant 65 : index
    %62 = vector.load %arg7[%c0_49, %c65] : memref<12x768xbf16, #tpu.memory_space<vmem>>, vector<12x512xbf16>
    %c5 = arith.constant 5 : index
    %c0_50 = arith.constant 0 : index
    %c0_51 = arith.constant 0 : index
    %63 = vector.load %arg5[%c5, %c0_50, %c0_51] : memref<27x1x512xbf16, #tpu.memory_space<vmem>>, vector<1x1x512xbf16>
    %64 = vector.shape_cast %63 : vector<1x1x512xbf16> to vector<1x512xbf16>
    %65 = vector.broadcast %64 : vector<1x512xbf16> to vector<12x512xbf16>
    %66 = arith.mulf %62, %65 : vector<12x512xbf16>
    %c5_52 = arith.constant 5 : index
    %c0_53 = arith.constant 0 : index
    %c0_54 = arith.constant 0 : index
    %67 = vector.load %arg4[%c5_52, %c0_53, %c0_54] : memref<27x8x12xbf16, #tpu.memory_space<vmem>>, vector<1x8x12xbf16>
    %68 = vector.shape_cast %67 : vector<1x8x12xbf16> to vector<8x12xbf16>
    %cst_55 = arith.constant dense<0.000000e+00> : vector<8x512xf32>
    %69 = tpu.matmul %68, %66, %cst_55 {dimension_numbers = #tpu.dot_dimension_numbers<[1], [0], [0], [1], [0, 0, 1, 1], [], []>} : vector<8x12xbf16>, vector<12x512xbf16>, vector<8x512xf32> -> vector<8x512xf32>
    %70 = arith.addf %61, %69 : vector<8x512xf32>
    %c0_56 = arith.constant 0 : index
    %c71 = arith.constant 71 : index
    %71 = vector.load %arg7[%c0_56, %c71] : memref<12x768xbf16, #tpu.memory_space<vmem>>, vector<12x512xbf16>
    %c6 = arith.constant 6 : index
    %c0_57 = arith.constant 0 : index
    %c0_58 = arith.constant 0 : index
    %72 = vector.load %arg5[%c6, %c0_57, %c0_58] : memref<27x1x512xbf16, #tpu.memory_space<vmem>>, vector<1x1x512xbf16>
    %73 = vector.shape_cast %72 : vector<1x1x512xbf16> to vector<1x512xbf16>
    %74 = vector.broadcast %73 : vector<1x512xbf16> to vector<12x512xbf16>
    %75 = arith.mulf %71, %74 : vector<12x512xbf16>
    %c6_59 = arith.constant 6 : index
    %c0_60 = arith.constant 0 : index
    %c0_61 = arith.constant 0 : index
    %76 = vector.load %arg4[%c6_59, %c0_60, %c0_61] : memref<27x8x12xbf16, #tpu.memory_space<vmem>>, vector<1x8x12xbf16>
    %77 = vector.shape_cast %76 : vector<1x8x12xbf16> to vector<8x12xbf16>
    %cst_62 = arith.constant dense<0.000000e+00> : vector<8x512xf32>
    %78 = tpu.matmul %77, %75, %cst_62 {dimension_numbers = #tpu.dot_dimension_numbers<[1], [0], [0], [1], [0, 0, 1, 1], [], []>} : vector<8x12xbf16>, vector<12x512xbf16>, vector<8x512xf32> -> vector<8x512xf32>
    %79 = arith.addf %70, %78 : vector<8x512xf32>
    %c0_63 = arith.constant 0 : index
    %c72 = arith.constant 72 : index
    %80 = vector.load %arg7[%c0_63, %c72] : memref<12x768xbf16, #tpu.memory_space<vmem>>, vector<12x512xbf16>
    %c7 = arith.constant 7 : index
    %c0_64 = arith.constant 0 : index
    %c0_65 = arith.constant 0 : index
    %81 = vector.load %arg5[%c7, %c0_64, %c0_65] : memref<27x1x512xbf16, #tpu.memory_space<vmem>>, vector<1x1x512xbf16>
    %82 = vector.shape_cast %81 : vector<1x1x512xbf16> to vector<1x512xbf16>
    %83 = vector.broadcast %82 : vector<1x512xbf16> to vector<12x512xbf16>
    %84 = arith.mulf %80, %83 : vector<12x512xbf16>
    %c7_66 = arith.constant 7 : index
    %c0_67 = arith.constant 0 : index
    %c0_68 = arith.constant 0 : index
    %85 = vector.load %arg4[%c7_66, %c0_67, %c0_68] : memref<27x8x12xbf16, #tpu.memory_space<vmem>>, vector<1x8x12xbf16>
    %86 = vector.shape_cast %85 : vector<1x8x12xbf16> to vector<8x12xbf16>
    %cst_69 = arith.constant dense<0.000000e+00> : vector<8x512xf32>
    %87 = tpu.matmul %86, %84, %cst_69 {dimension_numbers = #tpu.dot_dimension_numbers<[1], [0], [0], [1], [0, 0, 1, 1], [], []>} : vector<8x12xbf16>, vector<12x512xbf16>, vector<8x512xf32> -> vector<8x512xf32>
    %88 = arith.addf %79, %87 : vector<8x512xf32>
    %c0_70 = arith.constant 0 : index
    %c73 = arith.constant 73 : index
    %89 = vector.load %arg7[%c0_70, %c73] : memref<12x768xbf16, #tpu.memory_space<vmem>>, vector<12x512xbf16>
    %c8 = arith.constant 8 : index
    %c0_71 = arith.constant 0 : index
    %c0_72 = arith.constant 0 : index
    %90 = vector.load %arg5[%c8, %c0_71, %c0_72] : memref<27x1x512xbf16, #tpu.memory_space<vmem>>, vector<1x1x512xbf16>
    %91 = vector.shape_cast %90 : vector<1x1x512xbf16> to vector<1x512xbf16>
    %92 = vector.broadcast %91 : vector<1x512xbf16> to vector<12x512xbf16>
    %93 = arith.mulf %89, %92 : vector<12x512xbf16>
    %c8_73 = arith.constant 8 : index
    %c0_74 = arith.constant 0 : index
    %c0_75 = arith.constant 0 : index
    %94 = vector.load %arg4[%c8_73, %c0_74, %c0_75] : memref<27x8x12xbf16, #tpu.memory_space<vmem>>, vector<1x8x12xbf16>
    %95 = vector.shape_cast %94 : vector<1x8x12xbf16> to vector<8x12xbf16>
    %cst_76 = arith.constant dense<0.000000e+00> : vector<8x512xf32>
    %96 = tpu.matmul %95, %93, %cst_76 {dimension_numbers = #tpu.dot_dimension_numbers<[1], [0], [0], [1], [0, 0, 1, 1], [], []>} : vector<8x12xbf16>, vector<12x512xbf16>, vector<8x512xf32> -> vector<8x512xf32>
    %97 = arith.addf %88, %96 : vector<8x512xf32>
    %c0_77 = arith.constant 0 : index
    %c119 = arith.constant 119 : index
    %98 = vector.load %arg7[%c0_77, %c119] : memref<12x768xbf16, #tpu.memory_space<vmem>>, vector<12x512xbf16>
    %c9 = arith.constant 9 : index
    %c0_78 = arith.constant 0 : index
    %c0_79 = arith.constant 0 : index
    %99 = vector.load %arg5[%c9, %c0_78, %c0_79] : memref<27x1x512xbf16, #tpu.memory_space<vmem>>, vector<1x1x512xbf16>
    %100 = vector.shape_cast %99 : vector<1x1x512xbf16> to vector<1x512xbf16>
    %101 = vector.broadcast %100 : vector<1x512xbf16> to vector<12x512xbf16>
    %102 = arith.mulf %98, %101 : vector<12x512xbf16>
    %c9_80 = arith.constant 9 : index
    %c0_81 = arith.constant 0 : index
    %c0_82 = arith.constant 0 : index
    %103 = vector.load %arg4[%c9_80, %c0_81, %c0_82] : memref<27x8x12xbf16, #tpu.memory_space<vmem>>, vector<1x8x12xbf16>
    %104 = vector.shape_cast %103 : vector<1x8x12xbf16> to vector<8x12xbf16>
    %cst_83 = arith.constant dense<0.000000e+00> : vector<8x512xf32>
    %105 = tpu.matmul %104, %102, %cst_83 {dimension_numbers = #tpu.dot_dimension_numbers<[1], [0], [0], [1], [0, 0, 1, 1], [], []>} : vector<8x12xbf16>, vector<12x512xbf16>, vector<8x512xf32> -> vector<8x512xf32>
    %106 = arith.addf %97, %105 : vector<8x512xf32>
    %c0_84 = arith.constant 0 : index
    %c120 = arith.constant 120 : index
    %107 = vector.load %arg7[%c0_84, %c120] : memref<12x768xbf16, #tpu.memory_space<vmem>>, vector<12x512xbf16>
    %c10 = arith.constant 10 : index
    %c0_85 = arith.constant 0 : index
    %c0_86 = arith.constant 0 : index
    %108 = vector.load %arg5[%c10, %c0_85, %c0_86] : memref<27x1x512xbf16, #tpu.memory_space<vmem>>, vector<1x1x512xbf16>
    %109 = vector.shape_cast %108 : vector<1x1x512xbf16> to vector<1x512xbf16>
    %110 = vector.broadcast %109 : vector<1x512xbf16> to vector<12x512xbf16>
    %111 = arith.mulf %107, %110 : vector<12x512xbf16>
    %c10_87 = arith.constant 10 : index
    %c0_88 = arith.constant 0 : index
    %c0_89 = arith.constant 0 : index
    %112 = vector.load %arg4[%c10_87, %c0_88, %c0_89] : memref<27x8x12xbf16, #tpu.memory_space<vmem>>, vector<1x8x12xbf16>
    %113 = vector.shape_cast %112 : vector<1x8x12xbf16> to vector<8x12xbf16>
    %cst_90 = arith.constant dense<0.000000e+00> : vector<8x512xf32>
    %114 = tpu.matmul %113, %111, %cst_90 {dimension_numbers = #tpu.dot_dimension_numbers<[1], [0], [0], [1], [0, 0, 1, 1], [], []>} : vector<8x12xbf16>, vector<12x512xbf16>, vector<8x512xf32> -> vector<8x512xf32>
    %115 = arith.addf %106, %114 : vector<8x512xf32>
    %c0_91 = arith.constant 0 : index
    %c121 = arith.constant 121 : index
    %116 = vector.load %arg7[%c0_91, %c121] : memref<12x768xbf16, #tpu.memory_space<vmem>>, vector<12x512xbf16>
    %c11 = arith.constant 11 : index
    %c0_92 = arith.constant 0 : index
    %c0_93 = arith.constant 0 : index
    %117 = vector.load %arg5[%c11, %c0_92, %c0_93] : memref<27x1x512xbf16, #tpu.memory_space<vmem>>, vector<1x1x512xbf16>
    %118 = vector.shape_cast %117 : vector<1x1x512xbf16> to vector<1x512xbf16>
    %119 = vector.broadcast %118 : vector<1x512xbf16> to vector<12x512xbf16>
    %120 = arith.mulf %116, %119 : vector<12x512xbf16>
    %c11_94 = arith.constant 11 : index
    %c0_95 = arith.constant 0 : index
    %c0_96 = arith.constant 0 : index
    %121 = vector.load %arg4[%c11_94, %c0_95, %c0_96] : memref<27x8x12xbf16, #tpu.memory_space<vmem>>, vector<1x8x12xbf16>
    %122 = vector.shape_cast %121 : vector<1x8x12xbf16> to vector<8x12xbf16>
    %cst_97 = arith.constant dense<0.000000e+00> : vector<8x512xf32>
    %123 = tpu.matmul %122, %120, %cst_97 {dimension_numbers = #tpu.dot_dimension_numbers<[1], [0], [0], [1], [0, 0, 1, 1], [], []>} : vector<8x12xbf16>, vector<12x512xbf16>, vector<8x512xf32> -> vector<8x512xf32>
    %124 = arith.addf %115, %123 : vector<8x512xf32>
    %c0_98 = arith.constant 0 : index
    %c127 = arith.constant 127 : index
    %125 = vector.load %arg7[%c0_98, %c127] : memref<12x768xbf16, #tpu.memory_space<vmem>>, vector<12x512xbf16>
    %c12 = arith.constant 12 : index
    %c0_99 = arith.constant 0 : index
    %c0_100 = arith.constant 0 : index
    %126 = vector.load %arg5[%c12, %c0_99, %c0_100] : memref<27x1x512xbf16, #tpu.memory_space<vmem>>, vector<1x1x512xbf16>
    %127 = vector.shape_cast %126 : vector<1x1x512xbf16> to vector<1x512xbf16>
    %128 = vector.broadcast %127 : vector<1x512xbf16> to vector<12x512xbf16>
    %129 = arith.mulf %125, %128 : vector<12x512xbf16>
    %c12_101 = arith.constant 12 : index
    %c0_102 = arith.constant 0 : index
    %c0_103 = arith.constant 0 : index
    %130 = vector.load %arg4[%c12_101, %c0_102, %c0_103] : memref<27x8x12xbf16, #tpu.memory_space<vmem>>, vector<1x8x12xbf16>
    %131 = vector.shape_cast %130 : vector<1x8x12xbf16> to vector<8x12xbf16>
    %cst_104 = arith.constant dense<0.000000e+00> : vector<8x512xf32>
    %132 = tpu.matmul %131, %129, %cst_104 {dimension_numbers = #tpu.dot_dimension_numbers<[1], [0], [0], [1], [0, 0, 1, 1], [], []>} : vector<8x12xbf16>, vector<12x512xbf16>, vector<8x512xf32> -> vector<8x512xf32>
    %133 = arith.addf %124, %132 : vector<8x512xf32>
    %c0_105 = arith.constant 0 : index
    %c128_106 = arith.constant 128 : index
    %134 = vector.load %arg7[%c0_105, %c128_106] : memref<12x768xbf16, #tpu.memory_space<vmem>>, vector<12x512xbf16>
    %c13 = arith.constant 13 : index
    %c0_107 = arith.constant 0 : index
    %c0_108 = arith.constant 0 : index
    %135 = vector.load %arg5[%c13, %c0_107, %c0_108] : memref<27x1x512xbf16, #tpu.memory_space<vmem>>, vector<1x1x512xbf16>
    %136 = vector.shape_cast %135 : vector<1x1x512xbf16> to vector<1x512xbf16>
    %137 = vector.broadcast %136 : vector<1x512xbf16> to vector<12x512xbf16>
    %138 = arith.mulf %134, %137 : vector<12x512xbf16>
    %c13_109 = arith.constant 13 : index
    %c0_110 = arith.constant 0 : index
    %c0_111 = arith.constant 0 : index
    %139 = vector.load %arg4[%c13_109, %c0_110, %c0_111] : memref<27x8x12xbf16, #tpu.memory_space<vmem>>, vector<1x8x12xbf16>
    %140 = vector.shape_cast %139 : vector<1x8x12xbf16> to vector<8x12xbf16>
    %cst_112 = arith.constant dense<0.000000e+00> : vector<8x512xf32>
    %141 = tpu.matmul %140, %138, %cst_112 {dimension_numbers = #tpu.dot_dimension_numbers<[1], [0], [0], [1], [0, 0, 1, 1], [], []>} : vector<8x12xbf16>, vector<12x512xbf16>, vector<8x512xf32> -> vector<8x512xf32>
    %142 = arith.addf %133, %141 : vector<8x512xf32>
    %c0_113 = arith.constant 0 : index
    %c129 = arith.constant 129 : index
    %143 = vector.load %arg7[%c0_113, %c129] : memref<12x768xbf16, #tpu.memory_space<vmem>>, vector<12x512xbf16>
    %c14 = arith.constant 14 : index
    %c0_114 = arith.constant 0 : index
    %c0_115 = arith.constant 0 : index
    %144 = vector.load %arg5[%c14, %c0_114, %c0_115] : memref<27x1x512xbf16, #tpu.memory_space<vmem>>, vector<1x1x512xbf16>
    %145 = vector.shape_cast %144 : vector<1x1x512xbf16> to vector<1x512xbf16>
    %146 = vector.broadcast %145 : vector<1x512xbf16> to vector<12x512xbf16>
    %147 = arith.mulf %143, %146 : vector<12x512xbf16>
    %c14_116 = arith.constant 14 : index
    %c0_117 = arith.constant 0 : index
    %c0_118 = arith.constant 0 : index
    %148 = vector.load %arg4[%c14_116, %c0_117, %c0_118] : memref<27x8x12xbf16, #tpu.memory_space<vmem>>, vector<1x8x12xbf16>
    %149 = vector.shape_cast %148 : vector<1x8x12xbf16> to vector<8x12xbf16>
    %cst_119 = arith.constant dense<0.000000e+00> : vector<8x512xf32>
    %150 = tpu.matmul %149, %147, %cst_119 {dimension_numbers = #tpu.dot_dimension_numbers<[1], [0], [0], [1], [0, 0, 1, 1], [], []>} : vector<8x12xbf16>, vector<12x512xbf16>, vector<8x512xf32> -> vector<8x512xf32>
    %151 = arith.addf %142, %150 : vector<8x512xf32>
    %c0_120 = arith.constant 0 : index
    %c135 = arith.constant 135 : index
    %152 = vector.load %arg7[%c0_120, %c135] : memref<12x768xbf16, #tpu.memory_space<vmem>>, vector<12x512xbf16>
    %c15 = arith.constant 15 : index
    %c0_121 = arith.constant 0 : index
    %c0_122 = arith.constant 0 : index
    %153 = vector.load %arg5[%c15, %c0_121, %c0_122] : memref<27x1x512xbf16, #tpu.memory_space<vmem>>, vector<1x1x512xbf16>
    %154 = vector.shape_cast %153 : vector<1x1x512xbf16> to vector<1x512xbf16>
    %155 = vector.broadcast %154 : vector<1x512xbf16> to vector<12x512xbf16>
    %156 = arith.mulf %152, %155 : vector<12x512xbf16>
    %c15_123 = arith.constant 15 : index
    %c0_124 = arith.constant 0 : index
    %c0_125 = arith.constant 0 : index
    %157 = vector.load %arg4[%c15_123, %c0_124, %c0_125] : memref<27x8x12xbf16, #tpu.memory_space<vmem>>, vector<1x8x12xbf16>
    %158 = vector.shape_cast %157 : vector<1x8x12xbf16> to vector<8x12xbf16>
    %cst_126 = arith.constant dense<0.000000e+00> : vector<8x512xf32>
    %159 = tpu.matmul %158, %156, %cst_126 {dimension_numbers = #tpu.dot_dimension_numbers<[1], [0], [0], [1], [0, 0, 1, 1], [], []>} : vector<8x12xbf16>, vector<12x512xbf16>, vector<8x512xf32> -> vector<8x512xf32>
    %160 = arith.addf %151, %159 : vector<8x512xf32>
    %c0_127 = arith.constant 0 : index
    %c136 = arith.constant 136 : index
    %161 = vector.load %arg7[%c0_127, %c136] : memref<12x768xbf16, #tpu.memory_space<vmem>>, vector<12x512xbf16>
    %c16 = arith.constant 16 : index
    %c0_128 = arith.constant 0 : index
    %c0_129 = arith.constant 0 : index
    %162 = vector.load %arg5[%c16, %c0_128, %c0_129] : memref<27x1x512xbf16, #tpu.memory_space<vmem>>, vector<1x1x512xbf16>
    %163 = vector.shape_cast %162 : vector<1x1x512xbf16> to vector<1x512xbf16>
    %164 = vector.broadcast %163 : vector<1x512xbf16> to vector<12x512xbf16>
    %165 = arith.mulf %161, %164 : vector<12x512xbf16>
    %c16_130 = arith.constant 16 : index
    %c0_131 = arith.constant 0 : index
    %c0_132 = arith.constant 0 : index
    %166 = vector.load %arg4[%c16_130, %c0_131, %c0_132] : memref<27x8x12xbf16, #tpu.memory_space<vmem>>, vector<1x8x12xbf16>
    %167 = vector.shape_cast %166 : vector<1x8x12xbf16> to vector<8x12xbf16>
    %cst_133 = arith.constant dense<0.000000e+00> : vector<8x512xf32>
    %168 = tpu.matmul %167, %165, %cst_133 {dimension_numbers = #tpu.dot_dimension_numbers<[1], [0], [0], [1], [0, 0, 1, 1], [], []>} : vector<8x12xbf16>, vector<12x512xbf16>, vector<8x512xf32> -> vector<8x512xf32>
    %169 = arith.addf %160, %168 : vector<8x512xf32>
    %c0_134 = arith.constant 0 : index
    %c137 = arith.constant 137 : index
    %170 = vector.load %arg7[%c0_134, %c137] : memref<12x768xbf16, #tpu.memory_space<vmem>>, vector<12x512xbf16>
    %c17 = arith.constant 17 : index
    %c0_135 = arith.constant 0 : index
    %c0_136 = arith.constant 0 : index
    %171 = vector.load %arg5[%c17, %c0_135, %c0_136] : memref<27x1x512xbf16, #tpu.memory_space<vmem>>, vector<1x1x512xbf16>
    %172 = vector.shape_cast %171 : vector<1x1x512xbf16> to vector<1x512xbf16>
    %173 = vector.broadcast %172 : vector<1x512xbf16> to vector<12x512xbf16>
    %174 = arith.mulf %170, %173 : vector<12x512xbf16>
    %c17_137 = arith.constant 17 : index
    %c0_138 = arith.constant 0 : index
    %c0_139 = arith.constant 0 : index
    %175 = vector.load %arg4[%c17_137, %c0_138, %c0_139] : memref<27x8x12xbf16, #tpu.memory_space<vmem>>, vector<1x8x12xbf16>
    %176 = vector.shape_cast %175 : vector<1x8x12xbf16> to vector<8x12xbf16>
    %cst_140 = arith.constant dense<0.000000e+00> : vector<8x512xf32>
    %177 = tpu.matmul %176, %174, %cst_140 {dimension_numbers = #tpu.dot_dimension_numbers<[1], [0], [0], [1], [0, 0, 1, 1], [], []>} : vector<8x12xbf16>, vector<12x512xbf16>, vector<8x512xf32> -> vector<8x512xf32>
    %178 = arith.addf %169, %177 : vector<8x512xf32>
    %c0_141 = arith.constant 0 : index
    %c183 = arith.constant 183 : index
    %179 = vector.load %arg7[%c0_141, %c183] : memref<12x768xbf16, #tpu.memory_space<vmem>>, vector<12x512xbf16>
    %c18 = arith.constant 18 : index
    %c0_142 = arith.constant 0 : index
    %c0_143 = arith.constant 0 : index
    %180 = vector.load %arg5[%c18, %c0_142, %c0_143] : memref<27x1x512xbf16, #tpu.memory_space<vmem>>, vector<1x1x512xbf16>
    %181 = vector.shape_cast %180 : vector<1x1x512xbf16> to vector<1x512xbf16>
    %182 = vector.broadcast %181 : vector<1x512xbf16> to vector<12x512xbf16>
    %183 = arith.mulf %179, %182 : vector<12x512xbf16>
    %c18_144 = arith.constant 18 : index
    %c0_145 = arith.constant 0 : index
    %c0_146 = arith.constant 0 : index
    %184 = vector.load %arg4[%c18_144, %c0_145, %c0_146] : memref<27x8x12xbf16, #tpu.memory_space<vmem>>, vector<1x8x12xbf16>
    %185 = vector.shape_cast %184 : vector<1x8x12xbf16> to vector<8x12xbf16>
    %cst_147 = arith.constant dense<0.000000e+00> : vector<8x512xf32>
    %186 = tpu.matmul %185, %183, %cst_147 {dimension_numbers = #tpu.dot_dimension_numbers<[1], [0], [0], [1], [0, 0, 1, 1], [], []>} : vector<8x12xbf16>, vector<12x512xbf16>, vector<8x512xf32> -> vector<8x512xf32>
    %187 = arith.addf %178, %186 : vector<8x512xf32>
    %c0_148 = arith.constant 0 : index
    %c184 = arith.constant 184 : index
    %188 = vector.load %arg7[%c0_148, %c184] : memref<12x768xbf16, #tpu.memory_space<vmem>>, vector<12x512xbf16>
    %c19 = arith.constant 19 : index
    %c0_149 = arith.constant 0 : index
    %c0_150 = arith.constant 0 : index
    %189 = vector.load %arg5[%c19, %c0_149, %c0_150] : memref<27x1x512xbf16, #tpu.memory_space<vmem>>, vector<1x1x512xbf16>
    %190 = vector.shape_cast %189 : vector<1x1x512xbf16> to vector<1x512xbf16>
    %191 = vector.broadcast %190 : vector<1x512xbf16> to vector<12x512xbf16>
    %192 = arith.mulf %188, %191 : vector<12x512xbf16>
    %c19_151 = arith.constant 19 : index
    %c0_152 = arith.constant 0 : index
    %c0_153 = arith.constant 0 : index
    %193 = vector.load %arg4[%c19_151, %c0_152, %c0_153] : memref<27x8x12xbf16, #tpu.memory_space<vmem>>, vector<1x8x12xbf16>
    %194 = vector.shape_cast %193 : vector<1x8x12xbf16> to vector<8x12xbf16>
    %cst_154 = arith.constant dense<0.000000e+00> : vector<8x512xf32>
    %195 = tpu.matmul %194, %192, %cst_154 {dimension_numbers = #tpu.dot_dimension_numbers<[1], [0], [0], [1], [0, 0, 1, 1], [], []>} : vector<8x12xbf16>, vector<12x512xbf16>, vector<8x512xf32> -> vector<8x512xf32>
    %196 = arith.addf %187, %195 : vector<8x512xf32>
    %c0_155 = arith.constant 0 : index
    %c185 = arith.constant 185 : index
    %197 = vector.load %arg7[%c0_155, %c185] : memref<12x768xbf16, #tpu.memory_space<vmem>>, vector<12x512xbf16>
    %c20 = arith.constant 20 : index
    %c0_156 = arith.constant 0 : index
    %c0_157 = arith.constant 0 : index
    %198 = vector.load %arg5[%c20, %c0_156, %c0_157] : memref<27x1x512xbf16, #tpu.memory_space<vmem>>, vector<1x1x512xbf16>
    %199 = vector.shape_cast %198 : vector<1x1x512xbf16> to vector<1x512xbf16>
    %200 = vector.broadcast %199 : vector<1x512xbf16> to vector<12x512xbf16>
    %201 = arith.mulf %197, %200 : vector<12x512xbf16>
    %c20_158 = arith.constant 20 : index
    %c0_159 = arith.constant 0 : index
    %c0_160 = arith.constant 0 : index
    %202 = vector.load %arg4[%c20_158, %c0_159, %c0_160] : memref<27x8x12xbf16, #tpu.memory_space<vmem>>, vector<1x8x12xbf16>
    %203 = vector.shape_cast %202 : vector<1x8x12xbf16> to vector<8x12xbf16>
    %cst_161 = arith.constant dense<0.000000e+00> : vector<8x512xf32>
    %204 = tpu.matmul %203, %201, %cst_161 {dimension_numbers = #tpu.dot_dimension_numbers<[1], [0], [0], [1], [0, 0, 1, 1], [], []>} : vector<8x12xbf16>, vector<12x512xbf16>, vector<8x512xf32> -> vector<8x512xf32>
    %205 = arith.addf %196, %204 : vector<8x512xf32>
    %c0_162 = arith.constant 0 : index
    %c191 = arith.constant 191 : index
    %206 = vector.load %arg7[%c0_162, %c191] : memref<12x768xbf16, #tpu.memory_space<vmem>>, vector<12x512xbf16>
    %c21 = arith.constant 21 : index
    %c0_163 = arith.constant 0 : index
    %c0_164 = arith.constant 0 : index
    %207 = vector.load %arg5[%c21, %c0_163, %c0_164] : memref<27x1x512xbf16, #tpu.memory_space<vmem>>, vector<1x1x512xbf16>
    %208 = vector.shape_cast %207 : vector<1x1x512xbf16> to vector<1x512xbf16>
    %209 = vector.broadcast %208 : vector<1x512xbf16> to vector<12x512xbf16>
    %210 = arith.mulf %206, %209 : vector<12x512xbf16>
    %c21_165 = arith.constant 21 : index
    %c0_166 = arith.constant 0 : index
    %c0_167 = arith.constant 0 : index
    %211 = vector.load %arg4[%c21_165, %c0_166, %c0_167] : memref<27x8x12xbf16, #tpu.memory_space<vmem>>, vector<1x8x12xbf16>
    %212 = vector.shape_cast %211 : vector<1x8x12xbf16> to vector<8x12xbf16>
    %cst_168 = arith.constant dense<0.000000e+00> : vector<8x512xf32>
    %213 = tpu.matmul %212, %210, %cst_168 {dimension_numbers = #tpu.dot_dimension_numbers<[1], [0], [0], [1], [0, 0, 1, 1], [], []>} : vector<8x12xbf16>, vector<12x512xbf16>, vector<8x512xf32> -> vector<8x512xf32>
    %214 = arith.addf %205, %213 : vector<8x512xf32>
    %c0_169 = arith.constant 0 : index
    %c192 = arith.constant 192 : index
    %215 = vector.load %arg7[%c0_169, %c192] : memref<12x768xbf16, #tpu.memory_space<vmem>>, vector<12x512xbf16>
    %c22 = arith.constant 22 : index
    %c0_170 = arith.constant 0 : index
    %c0_171 = arith.constant 0 : index
    %216 = vector.load %arg5[%c22, %c0_170, %c0_171] : memref<27x1x512xbf16, #tpu.memory_space<vmem>>, vector<1x1x512xbf16>
    %217 = vector.shape_cast %216 : vector<1x1x512xbf16> to vector<1x512xbf16>
    %218 = vector.broadcast %217 : vector<1x512xbf16> to vector<12x512xbf16>
    %219 = arith.mulf %215, %218 : vector<12x512xbf16>
    %c22_172 = arith.constant 22 : index
    %c0_173 = arith.constant 0 : index
    %c0_174 = arith.constant 0 : index
    %220 = vector.load %arg4[%c22_172, %c0_173, %c0_174] : memref<27x8x12xbf16, #tpu.memory_space<vmem>>, vector<1x8x12xbf16>
    %221 = vector.shape_cast %220 : vector<1x8x12xbf16> to vector<8x12xbf16>
    %cst_175 = arith.constant dense<0.000000e+00> : vector<8x512xf32>
    %222 = tpu.matmul %221, %219, %cst_175 {dimension_numbers = #tpu.dot_dimension_numbers<[1], [0], [0], [1], [0, 0, 1, 1], [], []>} : vector<8x12xbf16>, vector<12x512xbf16>, vector<8x512xf32> -> vector<8x512xf32>
    %223 = arith.addf %214, %222 : vector<8x512xf32>
    %c0_176 = arith.constant 0 : index
    %c193 = arith.constant 193 : index
    %224 = vector.load %arg7[%c0_176, %c193] : memref<12x768xbf16, #tpu.memory_space<vmem>>, vector<12x512xbf16>
    %c23 = arith.constant 23 : index
    %c0_177 = arith.constant 0 : index
    %c0_178 = arith.constant 0 : index
    %225 = vector.load %arg5[%c23, %c0_177, %c0_178] : memref<27x1x512xbf16, #tpu.memory_space<vmem>>, vector<1x1x512xbf16>
    %226 = vector.shape_cast %225 : vector<1x1x512xbf16> to vector<1x512xbf16>
    %227 = vector.broadcast %226 : vector<1x512xbf16> to vector<12x512xbf16>
    %228 = arith.mulf %224, %227 : vector<12x512xbf16>
    %c23_179 = arith.constant 23 : index
    %c0_180 = arith.constant 0 : index
    %c0_181 = arith.constant 0 : index
    %229 = vector.load %arg4[%c23_179, %c0_180, %c0_181] : memref<27x8x12xbf16, #tpu.memory_space<vmem>>, vector<1x8x12xbf16>
    %230 = vector.shape_cast %229 : vector<1x8x12xbf16> to vector<8x12xbf16>
    %cst_182 = arith.constant dense<0.000000e+00> : vector<8x512xf32>
    %231 = tpu.matmul %230, %228, %cst_182 {dimension_numbers = #tpu.dot_dimension_numbers<[1], [0], [0], [1], [0, 0, 1, 1], [], []>} : vector<8x12xbf16>, vector<12x512xbf16>, vector<8x512xf32> -> vector<8x512xf32>
    %232 = arith.addf %223, %231 : vector<8x512xf32>
    %c0_183 = arith.constant 0 : index
    %c199 = arith.constant 199 : index
    %233 = vector.load %arg7[%c0_183, %c199] : memref<12x768xbf16, #tpu.memory_space<vmem>>, vector<12x512xbf16>
    %c24 = arith.constant 24 : index
    %c0_184 = arith.constant 0 : index
    %c0_185 = arith.constant 0 : index
    %234 = vector.load %arg5[%c24, %c0_184, %c0_185] : memref<27x1x512xbf16, #tpu.memory_space<vmem>>, vector<1x1x512xbf16>
    %235 = vector.shape_cast %234 : vector<1x1x512xbf16> to vector<1x512xbf16>
    %236 = vector.broadcast %235 : vector<1x512xbf16> to vector<12x512xbf16>
    %237 = arith.mulf %233, %236 : vector<12x512xbf16>
    %c24_186 = arith.constant 24 : index
    %c0_187 = arith.constant 0 : index
    %c0_188 = arith.constant 0 : index
    %238 = vector.load %arg4[%c24_186, %c0_187, %c0_188] : memref<27x8x12xbf16, #tpu.memory_space<vmem>>, vector<1x8x12xbf16>
    %239 = vector.shape_cast %238 : vector<1x8x12xbf16> to vector<8x12xbf16>
    %cst_189 = arith.constant dense<0.000000e+00> : vector<8x512xf32>
    %240 = tpu.matmul %239, %237, %cst_189 {dimension_numbers = #tpu.dot_dimension_numbers<[1], [0], [0], [1], [0, 0, 1, 1], [], []>} : vector<8x12xbf16>, vector<12x512xbf16>, vector<8x512xf32> -> vector<8x512xf32>
    %241 = arith.addf %232, %240 : vector<8x512xf32>
    %c0_190 = arith.constant 0 : index
    %c200 = arith.constant 200 : index
    %242 = vector.load %arg7[%c0_190, %c200] : memref<12x768xbf16, #tpu.memory_space<vmem>>, vector<12x512xbf16>
    %c25 = arith.constant 25 : index
    %c0_191 = arith.constant 0 : index
    %c0_192 = arith.constant 0 : index
    %243 = vector.load %arg5[%c25, %c0_191, %c0_192] : memref<27x1x512xbf16, #tpu.memory_space<vmem>>, vector<1x1x512xbf16>
    %244 = vector.shape_cast %243 : vector<1x1x512xbf16> to vector<1x512xbf16>
    %245 = vector.broadcast %244 : vector<1x512xbf16> to vector<12x512xbf16>
    %246 = arith.mulf %242, %245 : vector<12x512xbf16>
    %c25_193 = arith.constant 25 : index
    %c0_194 = arith.constant 0 : index
    %c0_195 = arith.constant 0 : index
    %247 = vector.load %arg4[%c25_193, %c0_194, %c0_195] : memref<27x8x12xbf16, #tpu.memory_space<vmem>>, vector<1x8x12xbf16>
    %248 = vector.shape_cast %247 : vector<1x8x12xbf16> to vector<8x12xbf16>
    %cst_196 = arith.constant dense<0.000000e+00> : vector<8x512xf32>
    %249 = tpu.matmul %248, %246, %cst_196 {dimension_numbers = #tpu.dot_dimension_numbers<[1], [0], [0], [1], [0, 0, 1, 1], [], []>} : vector<8x12xbf16>, vector<12x512xbf16>, vector<8x512xf32> -> vector<8x512xf32>
    %250 = arith.addf %241, %249 : vector<8x512xf32>
    %c0_197 = arith.constant 0 : index
    %c201 = arith.constant 201 : index
    %251 = vector.load %arg7[%c0_197, %c201] : memref<12x768xbf16, #tpu.memory_space<vmem>>, vector<12x512xbf16>
    %c26 = arith.constant 26 : index
    %c0_198 = arith.constant 0 : index
    %c0_199 = arith.constant 0 : index
    %252 = vector.load %arg5[%c26, %c0_198, %c0_199] : memref<27x1x512xbf16, #tpu.memory_space<vmem>>, vector<1x1x512xbf16>
    %253 = vector.shape_cast %252 : vector<1x1x512xbf16> to vector<1x512xbf16>
    %254 = vector.broadcast %253 : vector<1x512xbf16> to vector<12x512xbf16>
    %255 = arith.mulf %251, %254 : vector<12x512xbf16>
    %c26_200 = arith.constant 26 : index
    %c0_201 = arith.constant 0 : index
    %c0_202 = arith.constant 0 : index
    %256 = vector.load %arg4[%c26_200, %c0_201, %c0_202] : memref<27x8x12xbf16, #tpu.memory_space<vmem>>, vector<1x8x12xbf16>
    %257 = vector.shape_cast %256 : vector<1x8x12xbf16> to vector<8x12xbf16>
    %cst_203 = arith.constant dense<0.000000e+00> : vector<8x512xf32>
    %258 = tpu.matmul %257, %255, %cst_203 {dimension_numbers = #tpu.dot_dimension_numbers<[1], [0], [0], [1], [0, 0, 1, 1], [], []>} : vector<8x12xbf16>, vector<12x512xbf16>, vector<8x512xf32> -> vector<8x512xf32>
    %259 = arith.addf %250, %258 : vector<8x512xf32>
    %c0_204 = arith.constant 0 : index
    %c0_205 = arith.constant 0 : index
    %c0_206 = arith.constant 0 : index
    %260 = vector.load %arg6[%c0_204, %c0_205, %c0_206] : memref<1x20x512xf32, #tpu.memory_space<vmem>>, vector<1x12x512xf32>
    %261 = vector.shape_cast %260 : vector<1x12x512xf32> to vector<12x512xf32>
    %262 = vector.shape_cast %1 : vector<12x512xf32> to vector<1x12x512xf32>
    tpu.vector_store %arg6[%c0_204, %c0_205, %c0_206], %262 {strides = array<i32>} : memref<1x20x512xf32, #tpu.memory_space<vmem>>, vector<1x12x512xf32>,
    %c0_207 = arith.constant 0 : index
    %c12_208 = arith.constant 12 : index
    %c0_209 = arith.constant 0 : index
    %263 = vector.load %arg6[%c0_207, %c12_208, %c0_209] : memref<1x20x512xf32, #tpu.memory_space<vmem>>, vector<1x8x512xf32>
    %264 = vector.shape_cast %263 : vector<1x8x512xf32> to vector<8x512xf32>
    %265 = vector.shape_cast %259 : vector<8x512xf32> to vector<1x8x512xf32>
    tpu.vector_store %arg6[%c0_207, %c12_208, %c0_209], %265 {strides = array<i32>} : memref<1x20x512xf32, #tpu.memory_space<vmem>>, vector<1x8x512xf32>,
    return
  }
  func.func @transform_0(%arg0: i32) -> (i32, i32, i32) {
    %c0_i32 = arith.constant 0 : i32
    %c0_i32_0 = arith.constant 0 : i32
    %c0_i32_1 = arith.constant 0 : i32
    return %arg0, %c0_i32, %c0_i32_0 : i32, i32, i32
  }
  func.func @transform_1(%arg0: i32) -> (i32, i32) {
    %c0_i32 = arith.constant 0 : i32
    %c0_i32_0 = arith.constant 0 : i32
    %c0_i32_1 = arith.constant 0 : i32
    return %c0_i32, %c0_i32_0 : i32, i32
  }
  func.func @transform_2(%arg0: i32) -> (i32, i32) {
    %c0_i32 = arith.constant 0 : i32
    %c0_i32_0 = arith.constant 0 : i32
    %c0_i32_1 = arith.constant 0 : i32
    return %c0_i32, %c0_i32_0 : i32, i32
  }
  func.func @transform_3(%arg0: i32) -> (i32, i32, i32) {
    %c0_i32 = arith.constant 0 : i32
    %c0_i32_0 = arith.constant 0 : i32
    %c0_i32_1 = arith.constant 0 : i32
    %c0_i32_2 = arith.constant 0 : i32
    return %c0_i32, %c0_i32_0, %c0_i32_1 : i32, i32, i32
  }
  func.func @transform_4(%arg0: i32) -> (i32, i32, i32) {
    %c0_i32 = arith.constant 0 : i32
    %c0_i32_0 = arith.constant 0 : i32
    %c0_i32_1 = arith.constant 0 : i32
    %c0_i32_2 = arith.constant 0 : i32
    return %c0_i32, %c0_i32_0, %c0_i32_1 : i32, i32, i32
  }
  func.func @transform_5(%arg0: i32) -> (i32, i32, i32) {
    %c0_i32 = arith.constant 0 : i32
    %c0_i32_0 = arith.constant 0 : i32
    %c0_i32_1 = arith.constant 0 : i32
    return %arg0, %c0_i32, %c0_i32_0 : i32, i32, i32
  }
}

</mosaic_0001>

<bundles_post_ra>
// kernel: forward.2
= control target key start
LH: loop header
LB: loop body
LE: loop exit
PB: predicated region body
PF: predicated region fallthrough
CT: control target
= control target key end

     0   :  { %s7043_s18 = smov 0   ;;  %s8120_s0 = inlined_call_operand.vmem [shape: f32[2,4,512], index: 0, kind: input, shape index: {}]   ;;  %s8121_s1 = inlined_call_operand.vmem [shape: f32[4,1], index: 1, kind: input, shape index: {}]   ;;  %s8122_s2 = inlined_call_operand.vmem [shape: f32[4,1], index: 2, kind: input, shape index: {}]   ;;  %s8123_s3 = inlined_call_operand.vmem [shape: bf16[27,8,4], index: 3, kind: input, shape index: {}]   ;;  %s8124_s4 = inlined_call_operand.vmem [shape: bf16[27,1,512], index: 4, kind: input, shape index: {}]   ;;  %s8125_s5 = inlined_call_operand.vmem [shape: f32[2,12,512], index: 5, kind: output, shape index: {}]  }
   0x1 LB: > { %s6541_s19 = sadd.s32 4294967295, %s6990_s18   ;;  %p6545_p0 = scmp.ge.s32.totalorder %s6990_s18, 1  ;;  %s6990_s18 = sphi %s7043_s18, %s15_s18  }
   0x2   : > { %p187_p1 = scmp.lt.s32.totalorder %s6990_s18, 3 }
   0x4   : > { %p188_p2 = pnand %p6545_p0, %p187_p1 }
   0x5   : > { %v228_v0 = vld [vmem:[%s8121_s1] sm:$0xf] (!%p188_p2)  ;;  %v236_v1 = vlaneseq (!%p188_p2)  ;;  %v6992_v2 = vmov (!%p188_p2), 0   ;;  %v6993_v4 = vmov (!%p188_p2), 1983009808   ;;  %p215_p3 = scmp.lt.s32.totalorder (!%p188_p2), %s6541_s19, 1 }
   0x6   : > { %191 = sbr.rel (%p188_p2) target bundleno = 1061 (0x425), region = 40  ;;  %6980 = vset.pattern.permute.xlu0 (!%p188_p2), %v6992_v2  ;;  %260 = vst [vmem:[#allocation2] sm:$0x3] (!%p188_p2), %v6992_v2  ;;  %261 = vst [vmem:[#allocation2 + $0xa] sm:$0x3] (!%p188_p2), %v6992_v2  ;;  %559 = vmatprep.mubr.bf16.mxu0 (!%p188_p2), %v6992_v2  ;;  %v279_v5 = vunpack.c.l.s4 (!%p188_p2), %v6993_v4  ;;  %s6995_s20 = smov (!%p188_p2), 56  }
   0x7   : > { %231 = vperm.xlu0 (!%p188_p2), %6980, %v228_v0   ;;  %v7058_v3 = vshrl.u32 (!%p188_p2), %v236_v1, 7  ;;  %v6994_v6 = vmov (!%p188_p2), 1966171168   ;;  %600 = vmatprep.mubr.bf16.mxu1 (!%p188_p2), %v6992_v2  ;;  %v243_v9 = vld [vmem:[%s8122_s2] sm:$0xf] (!%p188_p2)  ;;  %s6996_s21 = smov (!%p188_p2), 55  }
   0x8   : > { %v308_v7 = vunpack.c.l.s4 (!%p188_p2), %v6994_v6  ;;  %v6554_v8 = vld.sshfl [vmem:[%s8124_s4 + $0x4] sm:$0x33 pattern:$0x75316420] (!%p188_p2)  ;;  %v280_v11 = vunpack.c.0.s8 (!%p188_p2), %v279_v5  ;;  %s6997_s22 = smov (!%p188_p2), 63   ;;  %s6998_s23 = smov (!%p188_p2), 57  }
   0x9   : > { %v6552_v10 = vld.sshfl [vmem:[%s8124_s4] sm:$0x33 pattern:$0x75316420] (!%p188_p2)  ;;  %v392_v13 = vcombine.high (!%p188_p2), %v6554_v8, %v6554_v8  ;;  %v7092_v22 = vsub.s32 (!%p188_p2), 0, %v7058_v3  ;;  %s6999_s24 = smov (!%p188_p2), 65  }
   0xa   : > { %v309_v12 = vunpack.c.0.s8 (!%p188_p2), %v308_v7  ;;  %v306_v14 = vcombine.high (!%p188_p2), %v6552_v10, %v6552_v10  ;;  %v6572_v15 = vld.sshfl [vmem:[%s8124_s4 + $0xc] sm:$0x33 pattern:$0x75316420] (!%p188_p2)  ;;  %v7089_v21 = vsub.s32 (!%p188_p2), %v280_v11, %v7058_v3  ;;  %s7000_s25 = smov (!%p188_p2), 64   ;;  %vm461_vm0 = vcmask (!%p188_p2), 457728  }
   0xb   : > { %v990_v16 = vcombine.high (!%p188_p2), %v6572_v15, %v6572_v15  ;;  %v6565_v17 = vld.sshfl [vmem:[%s8124_s4 + $0x8] sm:$0x33 pattern:$0x75316420] (!%p188_p2)  ;;  %246 = vperm.xlu0 (!%p188_p2), %6980, %v243_v9   ;;  %vm375_vm1 = vcmask (!%p188_p2), 449536   ;;  %s7002_s7 = smov (!%p188_p2), 72  }
   0xc   : > { %v7079_v18 = vsub.s32 (!%p188_p2), %v309_v12, %v7058_v3  ;;  %v759_v19 = vcombine.high (!%p188_p2), %v6565_v17, %v6565_v17  ;;  %v7084_v20 = vld.sshfl [vmem:[%s8124_s4 + $0x14] sm:$0x33 pattern:$0x75316420] (!%p188_p2)  ;;  %vm828_vm2 = vcmask (!%p188_p2), 465920   ;;  %s7003_s8 = smov (!%p188_p2), 71  }
   0xd   : > { %s8145_s19 = smov (!%p215_p3, %s6541_s19), 1  ;;  %v1451_v23 = vcombine.high %v7084_v20, %v7084_v20  ;;  %s7004_s11 = smov 73   ;;  %vm1059_vm3 = vcmask 515072   ;;  %vm1290_vm4 = vcmask 523264   ;;  %vm1103_vm5 = vcmask 531456  }
   0xe   : > { %v399_v24 = vrot.slane %v6554_v8, %v7079_v18  ;;  %v406_v25 = vrot.slane %v392_v13, %v7079_v18  ;;  %v313_v26 = vrot.slane %v6552_v10, %v7079_v18  ;;  %v320_v27 = vrot.slane %v306_v14, %v7079_v18  ;;  %s6741_s9 = sshll.u32 %s8145_s19, 4  ;;  %s6742_s10 = sshll.u32 %s8145_s19, 6 }
   0xf   : > { %v997_v28 = vrot.slane %v6572_v15, %v7079_v18  ;;  %v1004_v29 = vrot.slane %v990_v16, %v7079_v18  ;;  %v766_v30 = vrot.slane %v6565_v17, %v7079_v18  ;;  %v773_v31 = vrot.slane %v759_v19, %v7079_v18  ;;  %s219_s13 = scalar_lea.vmem %s8120_s0, %s6741_s9  ;;  %s7110_s16 = scalar_lea.vmem %s8125_s5, %s6742_s10 }
  0x10   : > { %v407_v32 = vcombine.high %v399_v24, %v399_v24  ;;  %v408_v33 = vcombine.high %v406_v25, %v406_v25  ;;  %v410_v34 = vpack.i.b16 %v399_v24, %v399_v24  ;;  %v417_v35 = vpack.i.b16 %v406_v25, %v406_v25  ;;  %v7112_v36 = vld [vmem:[%s219_s13] sm:$0xff]  ;;  %v7114_v37 = vld [vmem:[%s219_s13 + $0x8] sm:$0xff]  ;;  %v6579_v25 = vld.sshfl [vmem:[%s8124_s4 + $0x10] sm:$0x33 pattern:$0x75316420] }
  0x11   : > { %v321_v38 = vcombine.high %v313_v26, %v313_v26  ;;  %v322_v39 = vcombine.high %v320_v27, %v320_v27  ;;  %v324_v40 = vpack.i.b16 %v313_v26, %v313_v26  ;;  %v331_v41 = vpack.i.b16 %v320_v27, %v320_v27  ;;  %6462 = vst [vmem:[%s7110_s16] sm:$0xf] %v7112_v36  ;;  %s7005_s17 = smov 119   ;;  %s7006_s19 = smov 120  }
  0x12   : > { %6464 = vst [vmem:[%s7110_s16 + $0x10] sm:$0xf] %v7114_v37  ;;  %v415_v42 = vrot.slane %v410_v34, %v7092_v22  ;;  %v422_v43 = vrot.slane %v417_v35, %v7092_v22  ;;  %v424_v44 = vpack.i.b16 %v407_v32, %v407_v32  ;;  %v431_v45 = vpack.i.b16 %v408_v33, %v408_v33  ;;  %s7007_s26 = smov 121   ;;  %s7008_s13 = smov 127  }
  0x13   : > { %v329_v46 = vrot.slane %v324_v40, %v7092_v22  ;;  %v336_v47 = vrot.slane %v331_v41, %v7092_v22  ;;  %v338_v48 = vpack.i.b16 %v321_v38, %v321_v38  ;;  %v345_v49 = vpack.i.b16 %v322_v39, %v322_v39  ;;  %s7009_s10 = smov 1   ;;  %s7010_s15 = smov 9  }
  0x14   : > { %v429_v50 = vrot.slane %v424_v44, %v7092_v22  ;;  %v436_v51 = vrot.slane %v431_v45, %v7092_v22  ;;  %v441_v52 = vcombine.low %v415_v42, %v422_v43  ;;  %v1005_v53 = vcombine.high %v997_v28, %v997_v28  ;;  %s7011_s29 = smov 7   ;;  %s7012_s30 = smov 8  }
  0x15   : > { %v343_v54 = vrot.slane %v338_v48, %v7092_v22  ;;  %v350_v55 = vrot.slane %v345_v49, %v7092_v22  ;;  %v355_v56 = vcombine.low %v329_v46, %v336_v47  ;;  %v1006_v57 = vcombine.high %v1004_v29, %v1004_v29 }
  0x16   : > { %v442_v58 = vcombine.low %v429_v50, %v436_v51  ;;  %v449_v59 = vrot.slane %v441_v52, %v7089_v21  ;;  %v1008_v60 = vpack.i.b16 %v997_v28, %v997_v28  ;;  %v1015_v61 = vpack.i.b16 %v1004_v29, %v1004_v29 }
  0x17   : > { %v356_v62 = vcombine.low %v343_v54, %v350_v55  ;;  %v363_v63 = vrot.slane %v355_v56, %v7089_v21  ;;  %v1022_v0 = vpack.i.b16 %v1005_v53, %v1005_v53  ;;  %v1029_v1 = vpack.i.b16 %v1006_v57, %v1006_v57 }
  0x18   : > { %v456_v4 = vrot.slane %v442_v58, %v7089_v21  ;;  %v1013_v5 = vrot.slane %v1008_v60, %v7092_v22  ;;  %v1020_v6 = vrot.slane %v1015_v61, %v7092_v22  ;;  %v774_v7 = vcombine.high %v766_v30, %v766_v30 }
  0x19   : > { %v370_v8 = vrot.slane %v356_v62, %v7089_v21  ;;  %v1027_v9 = vrot.slane %v1022_v0, %v7092_v22  ;;  %v1034_v10 = vrot.slane %v1029_v1, %v7092_v22  ;;  %v775_v11 = vcombine.high %v773_v31, %v773_v31 }
  0x1a   : > { %v457_v12 = vcombine.low %v449_v59, %v456_v4  ;;  %v1039_v13 = vcombine.low %v1013_v5, %v1020_v6  ;;  %v777_v14 = vpack.i.b16 %v766_v30, %v766_v30  ;;  %v784_v15 = vpack.i.b16 %v773_v31, %v773_v31 }
  0x1b   : > { %v371_v16 = vcombine.low %v363_v63, %v370_v8  ;;  %v1040_v17 = vcombine.low %v1027_v9, %v1034_v10  ;;  %v791_v19 = vpack.i.b16 %v774_v7, %v774_v7  ;;  %v798_v24 = vpack.i.b16 %v775_v11, %v775_v11 }
  0x1c   : > { %458 = vrot.lane.b32.xlu1 %v457_v12, %s6995_s20  ;;  %v1047_v26 = vrot.slane %v1039_v13, %v7089_v21  ;;  %v782_v27 = vrot.slane %v777_v14, %v7092_v22  ;;  %v789_v28 = vrot.slane %v784_v15, %v7092_v22  ;;  %v1458_v29 = vrot.slane %v7084_v20, %v7079_v18 }
  0x1d   : > { %v1054_v30 = vrot.slane %v1040_v17, %v7089_v21  ;;  %v796_v31 = vrot.slane %v791_v19, %v7092_v22  ;;  %v803_v32 = vrot.slane %v798_v24, %v7092_v22  ;;  %v1465_v33 = vrot.slane %v1451_v23, %v7079_v18 }
  0x1e   : > { %v808_v34 = vcombine.low %v782_v27, %v789_v28  ;;  %v1466_v35 = vcombine.high %v1458_v29, %v1458_v29  ;;  %v1469_v38 = vpack.i.b16 %v1458_v29, %v1458_v29  ;;  %v1221_v39 = vcombine.high %v6579_v25, %v6579_v25  ;;  %v6593_v28 = vld.sshfl [vmem:[%s8124_s4 + $0x18] sm:$0x33 pattern:$0x75316420] }
  0x1f   : > { %v1055_v40 = vcombine.low %v1047_v26, %v1054_v30  ;;  %v809_v41 = vcombine.low %v796_v31, %v803_v32  ;;  %v1467_v42 = vcombine.high %v1465_v33, %v1465_v33  ;;  %v1476_v43 = vpack.i.b16 %v1465_v33, %v1465_v33 }
  0x20   : > { %372 = vrot.lane.b32.xlu1 %v371_v16, %s6996_s21  ;;  %v816_v44 = vrot.slane %v808_v34, %v7089_v21  ;;  %v1474_v45 = vrot.slane %v1469_v38, %v7092_v22  ;;  %v1483_v46 = vpack.i.b16 %v1466_v35, %v1466_v35  ;;  %v1228_v47 = vrot.slane %v6579_v25, %v7079_v18 }
  0x21   : > { %v823_v20 = vrot.slane %v809_v41, %v7089_v21  ;;  %v1481_v23 = vrot.slane %v1476_v43, %v7092_v22  ;;  %v1490_v48 = vpack.i.b16 %v1467_v42, %v1467_v42  ;;  %v1235_v49 = vrot.slane %v1221_v39, %v7079_v18 }
  0x22   : > { %v1488_v50 = vrot.slane %v1483_v46, %v7092_v22  ;;  %v1236_v51 = vcombine.high %v1228_v47, %v1228_v47  ;;  %v1239_v52 = vpack.i.b16 %v1228_v47, %v1228_v47  ;;  %v6458_v63 = vcombine.high %v7112_v36, %v7112_v36 }
  0x23   : > { %v824_v53 = vcombine.low %v816_v44, %v823_v20  ;;  %v1495_v54 = vrot.slane %v1490_v48, %v7092_v22  ;;  %v1500_v55 = vcombine.low %v1474_v45, %v1481_v23  ;;  %v1237_v56 = vcombine.high %v1235_v49, %v1235_v49  ;;  %v6600_v44 = vld.sshfl [vmem:[%s8124_s4 + $0x1c] sm:$0x33 pattern:$0x75316420] }
  0x24   : > { %1056 = vrot.lane.b32.xlu1 %v1055_v40, %s6997_s22  ;;  %v1244_v57 = vrot.slane %v1239_v52, %v7092_v22  ;;  %v1246_v58 = vpack.i.b16 %v1235_v49, %v1235_v49  ;;  %v1253_v59 = vpack.i.b16 %v1236_v51, %v1236_v51  ;;  %v6459_v4 = vcombine.high %v7114_v37, %v7114_v37 }
  0x25   : > { %825 = vrot.lane.b32.xlu0 %v824_v53, %s6998_s23  ;;  %v1501_v60 = vcombine.low %v1488_v50, %v1495_v54  ;;  %v1508_v61 = vrot.slane %v1500_v55, %v7089_v21  ;;  %v1260_v62 = vpack.i.b16 %v1237_v56, %v1237_v56  ;;  %6463 = vst [vmem:[%s7110_s16 + $0x8] sm:$0xf] %v6458_v63  ;;  %v7001_v13 = vmov 839922192  }
  0x26   : > { %v1251_v0 = vrot.slane %v1246_v58, %v7092_v22  ;;  %v1258_v1 = vrot.slane %v1253_v59, %v7092_v22  ;;  %6465 = vst [vmem:[%s7110_s16 + $0x18] sm:$0xf] %v6459_v4  ;;  %v234_v14 = vunpack.c.l.s4 %v7001_v13  ;;  %v1680_v33 = vcombine.high %v6593_v28, %v6593_v28 }
  0x27   : > { %v1515_v5 = vrot.slane %v1501_v60, %v7089_v21  ;;  %v1265_v6 = vrot.slane %v1260_v62, %v7092_v22  ;;  %v1687_v39 = vrot.slane %v6593_v28, %v7079_v18  ;;  %v1909_v49 = vcombine.high %v6600_v44, %v6600_v44 }
  0x28   : > { %v1270_v7 = vcombine.low %v1244_v57, %v1251_v0  ;;  %v235_v15 = vunpack.c.0.s8 %v234_v14  ;;  %v1916_v56 = vrot.slane %v6600_v44, %v7079_v18  ;;  %vm8126_vm6 = vcmask 588800  }
  0x29   : > { %v1516_v8 = vcombine.low %v1508_v61, %v1515_v5  ;;  %v1271_v9 = vcombine.low %v1258_v1, %v1265_v6  ;;  %v1695_v42 = vcombine.high %v1687_v39, %v1687_v39  ;;  %v1698_v45 = vpack.i.b16 %v1687_v39, %v1687_v39 }
  0x2a   : > { %v1278_v10 = vrot.slane %v1270_v7, %v7089_v21  ;;  %v238_v16 = vsub.s32 %v235_v15, %v7058_v3  ;;  %v1923_v57 = vrot.slane %v1909_v49, %v7079_v18  ;;  %v1924_v5 = vcombine.high %v1916_v56, %v1916_v56  ;;  %v6607_v7 = vld.sshfl [vmem:[%s8124_s4 + $0x20] sm:$0x33 pattern:$0x75316420] }
  0x2b   : > { %1517 = vrot.lane.b32.xlu1 %v1516_v8, %s6999_s24  ;;  %v1285_v11 = vrot.slane %v1271_v9, %v7089_v21  ;;  %v1712_v20 = vpack.i.b16 %v1695_v42, %v1695_v42  ;;  %v1703_v50 = vrot.slane %v1698_v45, %v7092_v22  ;;  %v1927_v13 = vpack.i.b16 %v1916_v56, %v1916_v56 }
  0x2c   : > { %v1925_v6 = vcombine.high %v1923_v57, %v1923_v57  ;;  %v2138_v14 = vcombine.high %v6607_v7, %v6607_v7  ;;  %vm514_vm7 = vcmask 1041408   ;;  %vm8127_vm8 = vcmask 580608  }
  0x2d   : > { %v1286_v12 = vcombine.low %v1278_v10, %v1285_v11  ;;  %v1717_v52 = vrot.slane %v1712_v20, %v7092_v22  ;;  %vm8128_vm9 = vcmask 596992   ;;  %vm510_vm10 = vcmask 31744  }
  0x2e   : > { %v2152_v28 = vrot.slane %v2138_v14, %v7079_v18  ;;  %vm2436_vm11 = vcmask 973824   ;;  %vm2667_vm12 = vcmask 982016   ;;  %vm2898_vm13 = vcmask 990208  }
  0x2f   : > { %1287 = vrot.lane.b32.xlu0 %v1286_v12, %s7000_s25  ;;  %vm3129_vm14 = vcmask 1039360   ;;  %vm3173_vm15 = vcmask 7168  }
  0x30   : > { %v2154_v39 = vcombine.high %v2152_v28, %v2152_v28  ;;  %v2163_v44 = vpack.i.b16 %v2152_v28, %v2152_v28 }
  0x86   : > { %v232_v17 = vpop.permute.xlu0 %231 }
  0x87   : > { %v239_v19 = vrot.slane %v232_v17, %v238_v16  ;;  %v1941_v17 = vpack.i.b16 %v1924_v5, %v1924_v5 }
  0x89   : > { %v241_v25 = vmul.f32 %v239_v19, %v7112_v36  ;;  %v242_v26 = vmul.f32 %v239_v19, %v7114_v37  ;;  %v1694_v36 = vrot.slane %v1680_v33, %v7079_v18  ;;  %v1948_v19 = vpack.i.b16 %v1925_v6, %v1925_v6 }
  0x8a   : > { %v247_v24 = vpop.permute.xlu0 %246 }
  0x8b   : > { %v254_v27 = vrot.slane %v247_v24, %v238_v16  ;;  %v1696_v43 = vcombine.high %v1694_v36, %v1694_v36  ;;  %v1705_v46 = vpack.i.b16 %v1694_v36, %v1694_v36  ;;  %v1934_v16 = vpack.i.b16 %v1923_v57, %v1923_v57 }
  0x8d   : > { %v256_v29 = vadd.f32 %v254_v27, %v241_v25  ;;  %v257_v30 = vadd.f32 %v254_v27, %v242_v26  ;;  %v1719_v23 = vpack.i.b16 %v1696_v43, %v1696_v43  ;;  %v1710_v51 = vrot.slane %v1705_v46, %v7092_v22 }
  0x8e   : > { %v459_v47 = vpop.permute.xlu1 %458  ;;  %v2145_v27 = vrot.slane %v6607_v7, %v7079_v18  ;;  %v6621_v7 = vld.sshfl [vmem:[%s8124_s4 + $0x28] sm:$0x33 pattern:$0x75316420] }
  0x8f   : > { %v258_v31 = vmax.f32 %v256_v29, 0.0  ;;  %v259_v32 = vmax.f32 %v257_v30, 0.0  ;;  %v460_v48 = vrot.slane %v459_v47, 6  ;;  %v1724_v53 = vrot.slane %v1719_v23, %v7092_v22 }
  0x90   : > { %v1729_v61 = vcombine.low %v1703_v50, %v1710_v51  ;;  %v1932_v29 = vrot.slane %v1927_v13, %v7092_v22  ;;  %v1939_v30 = vrot.slane %v1934_v16, %v7092_v22  ;;  %v2156_v43 = vpack.i.b16 %v2145_v27, %v2145_v27 }
  0x91   : > { %v264_v34 = vcombine.high %v258_v31, %v258_v31  ;;  %v265_v35 = vcombine.high %v259_v32, %v259_v32  ;;  %v462_v55 = vsel %vm461_vm0, %v460_v48, %v459_v47  ;;  %v1730_v0 = vcombine.low %v1717_v52, %v1724_v53 }
  0x92   : > { %v373_v60 = vpop.permute.xlu1 %372  ;;  %v1737_v10 = vrot.slane %v1729_v61, %v7089_v21  ;;  %v1958_v36 = vcombine.low %v1932_v29, %v1939_v30  ;;  %v2177_v47 = vpack.i.b16 %v2154_v39, %v2154_v39  ;;  %v2161_v52 = vrot.slane %v2156_v43, %v7092_v22  ;;  %v6628_v43 = vld.sshfl [vmem:[%s8124_s4 + $0x2c] sm:$0x33 pattern:$0x75316420] }
  0x93   : > { %v6550_v3 = vpack.c.bf16 %v264_v34, %v258_v31  ;;  %v6551_v38 = vpack.c.bf16 %v265_v35, %v259_v32  ;;  %v374_v63 = vrot.slane %v373_v60, 6  ;;  %v1744_v12 = vrot.slane %v1730_v0, %v7089_v21 }
  0x94   : > { %v1946_v31 = vrot.slane %v1941_v17, %v7092_v22  ;;  %v1953_v32 = vrot.slane %v1948_v19, %v7092_v22  ;;  %v1966_v23 = vrot.slane %v1958_v36, %v7089_v21  ;;  %v2168_v53 = vrot.slane %v2163_v44, %v7092_v22 }
  0x95   : > { %v284_v37 = vrot.slane %v6550_v3, %v7089_v21  ;;  %v291_v40 = vrot.slane %v6551_v38, %v7089_v21  ;;  %v376_v11 = vsel %vm375_vm1, %v374_v63, %v373_v60  ;;  %v1745_v26 = vcombine.low %v1737_v10, %v1744_v12 }
  0x96   : > { %v2153_v38 = vcombine.high %v2145_v27, %v2145_v27  ;;  %v2182_v56 = vrot.slane %v2177_v47, %v7092_v22  ;;  %v1057_v61 = vpop.permute.xlu1 %1056  ;;  %v2187_v0 = vcombine.low %v2161_v52, %v2168_v53  ;;  %v2605_v29 = vrot.slane %v6621_v7, %v7079_v18 }
  0x97   : > { %v292_v41 = vcombine.low %v284_v37, %v291_v40  ;;  %v826_v33 = vpop.permute.xlu0 %825  ;;  %v1959_v37 = vcombine.low %v1946_v31, %v1953_v32  ;;  %v6614_v40 = vld.sshfl [vmem:[%s8124_s4 + $0x24] sm:$0x33 pattern:$0x75316420]  ;;  %v2829_v52 = vcombine.high %v6628_v43, %v6628_v43 }
  0x98   : > { %v827_v3 = vrot.slane %v826_v33, 6  ;;  %v2170_v46 = vpack.i.b16 %v2153_v38, %v2153_v38  ;;  %v2367_v49 = vcombine.high %v6614_v40, %v6614_v40  ;;  %v2613_v36 = vcombine.high %v2605_v29, %v2605_v29 }
  0x99   : > { %294 = vst [vmem:[#allocation2 + $0x2] sm:$0xff] %v292_v41 }
  0x9a   : > { %v829_v45 = vsel %vm828_vm2, %v827_v3, %v826_v33  ;;  %v2381_v60 = vrot.slane %v2367_v49, %v7079_v18 }
  0x9c   : > { %v2383_v6 = vcombine.high %v2381_v60, %v2381_v60  ;;  %v2392_v17 = vpack.i.b16 %v2381_v60, %v2381_v60 }
  0x9d   : > { %v1518_v60 = vpop.permute.xlu1 %1517 }
  0x9e   : > { %v2397_v33 = vrot.slane %v2392_v17, %v7092_v22 }
  0xa0   : > { %v7196_v54 = vld [vmem:[#allocation2] sm:$0xff]  ;;  %v296_v58 = vld [vmem:[#allocation2 + $0x8] sm:$0x3] }
  0xa1   : > { %v465_v59 = vmul.bf16 %v462_v55, %v7196_v54  ;;  %v466_v1 = vmul.bf16 %v460_v48, %v296_v58  ;;  %v379_v24 = vmul.bf16 %v376_v11, %v7196_v54  ;;  %v380_v20 = vmul.bf16 %v374_v63, %v296_v58  ;;  %v7261_v31 = vpop.permute.xlu0 %1287 }
  0xa2   : > { %v1973_v48 = vrot.slane %v1959_v37, %v7089_v21  ;;  %v832_v50 = vmul.bf16 %v829_v45, %v7196_v54  ;;  %v2175_v55 = vrot.slane %v2170_v46, %v7092_v22  ;;  %v2195_v11 = vrot.slane %v2187_v0, %v7089_v21 }
  0xa3   : > { %v471_v62 = vcombine.high %v465_v59, %v465_v59  ;;  %v478_v4 = vrot.slane %v465_v59, %v7089_v21  ;;  %v494_v15 = vrot.slane %v466_v1, %v7089_v21  ;;  %v618_v34 = vrot.slane %v379_v24, %v7089_v21 }
  0xa4   : > { %v611_v35 = vcombine.high %v379_v24, %v379_v24  ;;  %v634_v57 = vrot.slane %v380_v20, %v7089_v21  ;;  %v1974_v58 = vcombine.low %v1966_v23, %v1973_v48  ;;  %v2374_v59 = vrot.slane %v6614_v40, %v7079_v18 }
  0xa5   : > { %495 = vrot.lane.b32.xlu0 %v478_v4, %s7002_s7  ;;  %v486_v8 = vcombine.high %v478_v4, %v478_v4  ;;  %v485_v9 = vrot.slane %v471_v62, %v7089_v21  ;;  %v626_v41 = vcombine.high %v618_v34, %v618_v34  ;;  %v845_v62 = vrot.slane %v832_v50, %v7089_v21 }
  0xa6   : > { %v625_v42 = vrot.slane %v611_v35, %v7089_v21  ;;  %v838_v63 = vcombine.high %v832_v50, %v832_v50  ;;  %v1058_v1 = vrot.slane %v1057_v61, 6  ;;  %v2188_v4 = vcombine.low %v2175_v55, %v2182_v56 }
  0xa7   : > { %497 = vrot.lane.b32.xlu1 %v486_v8, %s7002_s7  ;;  %v487_v25 = vcombine.high %v485_v9, %v485_v9  ;;  %v2382_v5 = vcombine.high %v2374_v59, %v2374_v59  ;;  %v748_v8 = vld [vmem:[#allocation2 + $0x8] sm:$0x3]  ;;  %v2385_v14 = vpack.i.b16 %v2374_v59, %v2374_v59  ;;  %v2406_v24 = vpack.i.b16 %v2383_v6, %v2383_v6 }
  0xa8   : > { %v627_v51 = vcombine.high %v625_v42, %v625_v42  ;;  %v852_v10 = vrot.slane %v838_v63, %v7089_v21  ;;  %v1060_v12 = vsel %vm1059_vm3, %v1058_v1, %v1057_v61  ;;  %v2202_v13 = vrot.slane %v2188_v4, %v7089_v21 }
  0xa9   : > { %503 = vrot.lane.b32.xlu0 %v494_v15, %s7002_s7  ;;  %v2598_v15 = vcombine.high %v6621_v7, %v6621_v7  ;;  %v833_v16 = vmul.bf16 %v827_v3, %v748_v8  ;;  %v2399_v19 = vpack.i.b16 %v2382_v5, %v2382_v5  ;;  %v2390_v28 = vrot.slane %v2385_v14, %v7092_v22 }
  0xaa   : > { %v2203_v27 = vcombine.low %v2195_v11, %v2202_v13  ;;  %v2411_v35 = vrot.slane %v2406_v24, %v7092_v22  ;;  %v1289_v39 = vrot.slane %v7261_v31, 6  ;;  %v2616_v46 = vpack.i.b16 %v2605_v29, %v2605_v29 }
  0xab   : > { %501 = vrot.lane.b32.xlu1 %v487_v25, %s7002_s7  ;;  %v1063_v25 = vmul.bf16 %v1060_v12, %v7196_v54  ;;  %v2612_v30 = vrot.slane %v2598_v15, %v7079_v18  ;;  %v861_v32 = vrot.slane %v833_v16, %v7089_v21  ;;  %v2416_v40 = vcombine.low %v2390_v28, %v2397_v33 }
  0xac   : > { %v1291_v47 = vsel %vm1290_vm4, %v1289_v39, %v7261_v31  ;;  %v2630_v23 = vpack.i.b16 %v2613_v36, %v2613_v36  ;;  %v2621_v56 = vrot.slane %v2616_v46, %v7092_v22  ;;  %v2836_v63 = vrot.slane %v6628_v43, %v7079_v18  ;;  %v6635_v46 = vld.sshfl [vmem:[%s8124_s4 + $0x30] sm:$0x33 pattern:$0x75316420] }
  0xad   : > { %499 = vrot.lane.b32.xlu0 %v485_v9, %s7002_s7  ;;  %v853_v9 = vcombine.high %v845_v62, %v845_v62  ;;  %v1076_v3 = vrot.slane %v1063_v25, %v7089_v21  ;;  %v1069_v38 = vcombine.high %v1063_v25, %v1063_v25  ;;  %v2614_v37 = vcombine.high %v2612_v30, %v2612_v30 }
  0xae   : > { %v2623_v20 = vpack.i.b16 %v2612_v30, %v2612_v30  ;;  %v2424_v50 = vrot.slane %v2416_v40, %v7089_v21  ;;  %v1294_v53 = vmul.bf16 %v1291_v47, %v7196_v54  ;;  %v2843_v0 = vrot.slane %v2829_v52, %v7079_v18 }
  0xaf   : > { %1746 = vrot.lane.b32.xlu1 %v1745_v26, %s7003_s8  ;;  %v854_v26 = vcombine.high %v852_v10, %v852_v10  ;;  %v1084_v44 = vcombine.high %v1076_v3, %v1076_v3  ;;  %v1083_v45 = vrot.slane %v1069_v38, %v7089_v21  ;;  %v2637_v48 = vpack.i.b16 %v2614_v37, %v2614_v37 }
  0xb0   : > { %v1300_v4 = vcombine.high %v1294_v53, %v1294_v53  ;;  %v1519_v5 = vrot.slane %v1518_v60, 6  ;;  %v2844_v8 = vcombine.high %v2836_v63, %v2836_v63  ;;  %v2847_v16 = vpack.i.b16 %v2836_v63, %v2836_v63 }
  0xb1   : > { %635 = vrot.lane.b32.xlu0 %v618_v34, %s7004_s11  ;;  %v2404_v34 = vrot.slane %v2399_v19, %v7092_v22  ;;  %v1085_v55 = vcombine.high %v1083_v45, %v1083_v45  ;;  %v2642_v59 = vrot.slane %v2637_v48, %v7092_v22  ;;  %v2854_v19 = vpack.i.b16 %v2843_v0, %v2843_v0 }
  0xb2   : > { %v1314_v12 = vrot.slane %v1300_v4, %v7089_v21  ;;  %v1520_v13 = vsel %vm1103_vm5, %v1519_v5, %v1518_v60  ;;  %v2861_v24 = vpack.i.b16 %v2844_v8, %v2844_v8  ;;  %v2852_v29 = vrot.slane %v2847_v16, %v7092_v22 }
  0xb3   : > { %637 = vrot.lane.b32.xlu1 %v626_v41, %s7004_s11  ;;  %v2417_v41 = vcombine.low %v2404_v34, %v2411_v35  ;;  %v2859_v31 = vrot.slane %v2854_v19, %v7092_v22  ;;  %v3060_v47 = vcombine.high %v6635_v46, %v6635_v46 }
  0xb5   : > { %639 = vrot.lane.b32.xlu0 %v625_v42, %s7004_s11  ;;  %v979_v42 = vld [vmem:[#allocation2 + $0x8] sm:$0x3]  ;;  %v3074_v48 = vrot.slane %v3060_v47, %v7079_v18 }
  0xb6   : > { %v1064_v49 = vmul.bf16 %v1058_v1, %v979_v42  ;;  %v1307_v1 = vrot.slane %v1294_v53, %v7089_v21 }
  0xb7   : > { %641 = vrot.lane.b32.xlu1 %v627_v51, %s7004_s11  ;;  %v2431_v51 = vrot.slane %v2417_v41, %v7089_v21  ;;  %v3076_v52 = vcombine.high %v3074_v48, %v3074_v48 }
  0xb8   : > { %v1092_v61 = vrot.slane %v1064_v49, %v7089_v21  ;;  %v1315_v11 = vcombine.high %v1307_v1, %v1307_v1 }
  0xb9   : > { %643 = vrot.lane.b32.xlu0 %v634_v57, %s7004_s11  ;;  %v2628_v57 = vrot.slane %v2623_v20, %v7092_v22 }
  0xbb   : > { %1975 = vrot.lane.b32.xlu1 %v1974_v58, %s7002_s7  ;;  %v2635_v58 = vrot.slane %v2630_v23, %v7092_v22  ;;  %v2647_v6 = vcombine.low %v2621_v56, %v2628_v57  ;;  %v3067_v23 = vrot.slane %v6635_v46, %v7079_v18 }
  0xbd   : > { %862 = vrot.lane.b32.xlu0 %v845_v62, %s7003_s8  ;;  %v2432_v62 = vcombine.low %v2424_v50, %v2431_v51  ;;  %v2648_v7 = vcombine.low %v2635_v58, %v2642_v59  ;;  %v2655_v14 = vrot.slane %v2647_v6, %v7089_v21  ;;  %v3075_v51 = vcombine.high %v3067_v23, %v3067_v23  ;;  %v6555_v6 = vld [vmem:[%s8123_s3 + $0x4] sm:$0xf] }
  0xbe   : > { %v3078_v58 = vpack.i.b16 %v3067_v23, %v3067_v23  ;;  %v3085_v59 = vpack.i.b16 %v3074_v48, %v3074_v48 }
  0xbf   : > { %864 = vrot.lane.b32.xlu1 %v853_v9, %s7003_s8  ;;  %v2845_v9 = vcombine.high %v2843_v0, %v2843_v0  ;;  %v2662_v15 = vrot.slane %v2648_v7, %v7089_v21  ;;  %v3092_v60 = vpack.i.b16 %v3075_v51, %v3075_v51 }
  0xc0   : > { %v3083_v8 = vrot.slane %v3078_v58, %v7092_v22  ;;  %v6656_v58 = vld.sshfl [vmem:[%s8124_s4 + $0x3c] sm:$0x33 pattern:$0x75316420] }
  0xc1   : > { %866 = vrot.lane.b32.xlu0 %v852_v10, %s7003_s8  ;;  %v1210_v10 = vld [vmem:[#allocation2 + $0x8] sm:$0x3]  ;;  %v2868_v25 = vpack.i.b16 %v2845_v9, %v2845_v9  ;;  %v2663_v28 = vcombine.low %v2655_v14, %v2662_v15  ;;  %v3090_v9 = vrot.slane %v3085_v59, %v7092_v22 }
  0xc2   : > { %v1295_v17 = vmul.bf16 %v1289_v39, %v1210_v10  ;;  %v1440_v39 = vld [vmem:[#allocation2 + $0x8] sm:$0x3]  ;;  %v3097_v10 = vrot.slane %v3092_v60, %v7092_v22 }
  0xc3   : > { %868 = vrot.lane.b32.xlu1 %v854_v26, %s7003_s8  ;;  %v1523_v26 = vmul.bf16 %v1520_v13, %v7196_v54  ;;  %v2873_v33 = vrot.slane %v2868_v25, %v7092_v22  ;;  %v1524_v40 = vmul.bf16 %v1519_v5, %v1440_v39 }
  0xc4   : > { %v1323_v30 = vrot.slane %v1295_v17, %v7089_v21 }
  0xc5   : > { %870 = vrot.lane.b32.xlu0 %v861_v32, %s7003_s8  ;;  %v2866_v32 = vrot.slane %v2861_v24, %v7092_v22  ;;  %v1536_v34 = vrot.slane %v1523_v26, %v7089_v21  ;;  %v1529_v35 = vcombine.high %v1523_v26, %v1523_v26  ;;  %v3109_v24 = vcombine.low %v3083_v8, %v3090_v9  ;;  %v6649_v26 = vld.sshfl [vmem:[%s8124_s4 + $0x38] sm:$0x33 pattern:$0x75316420] }
  0xc6   : > { %v3720_v9 = vcombine.high %v6656_v58, %v6656_v58 }
  0xc7   : > { %2204 = vrot.lane.b32.xlu1 %v2203_v27, %s7004_s11  ;;  %v1316_v27 = vcombine.high %v1314_v12, %v1314_v12  ;;  %v2879_v38 = vcombine.low %v2866_v32, %v2873_v33  ;;  %v1544_v36 = vcombine.high %v1536_v34, %v1536_v34  ;;  %v1543_v37 = vrot.slane %v1529_v35, %v7089_v21  ;;  %v1669_v32 = vld [vmem:[#allocation2 + $0x8] sm:$0x3] }
  0xc9   : > { %1093 = vrot.lane.b32.xlu0 %v1076_v3, %s6999_s24  ;;  %v2878_v3 = vcombine.low %v2852_v29, %v2859_v31  ;;  %v2893_v42 = vrot.slane %v2879_v38, %v7089_v21  ;;  %v1545_v43 = vcombine.high %v1543_v37, %v1543_v37  ;;  %v3117_v38 = vrot.slane %v3109_v24, %v7089_v21 }
  0xcb   : > { %1095 = vrot.lane.b32.xlu1 %v1084_v44, %s6999_s24  ;;  %v2886_v41 = vrot.slane %v2878_v3, %v7089_v21  ;;  %v1552_v44 = vrot.slane %v1524_v40, %v7089_v21 }
  0xcd   : > { %1097 = vrot.lane.b32.xlu0 %v1083_v45, %s6999_s24  ;;  %v2894_v45 = vcombine.low %v2886_v41, %v2893_v42 }
  0xcf   : > { %1099 = vrot.lane.b32.xlu1 %v1085_v55, %s6999_s24 }
  0xd1   : > { %1101 = vrot.lane.b32.xlu0 %v1092_v61, %s6999_s24  ;;  %v3099_v61 = vpack.i.b16 %v3076_v52, %v3076_v52 }
  0xd3   : > { %2433 = vrot.lane.b32.xlu1 %v2432_v62, %s7005_s17 }
  0xd5   : > { %1324 = vrot.lane.b32.xlu0 %v1307_v1, %s7000_s25 }
  0xd7   : > { %1326 = vrot.lane.b32.xlu1 %v1315_v11, %s7000_s25  ;;  %v3104_v11 = vrot.slane %v3099_v61, %v7092_v22 }
  0xd9   : > { %1328 = vrot.lane.b32.xlu0 %v1314_v12, %s7000_s25  ;;  %v3110_v25 = vcombine.low %v3097_v10, %v3104_v11 }
  0xdb   : > { %1330 = vrot.lane.b32.xlu1 %v1316_v27, %s7000_s25  ;;  %v3124_v39 = vrot.slane %v3110_v25, %v7089_v21 }
  0xdd   : > { %1332 = vrot.lane.b32.xlu0 %v1323_v30, %s7000_s25 }
  0xdf   : > { %2664 = vrot.lane.b32.xlu1 %v2663_v28, %s7006_s19 }
  0xe1   : > { %1553 = vrot.lane.b32.xlu0 %v1536_v34, %s6997_s22  ;;  %v3491_v34 = vcombine.high %v6649_v26, %v6649_v26 }
  0xe3   : > { %1555 = vrot.lane.b32.xlu1 %v1544_v36, %s6997_s22 }
  0xe5   : > { %1557 = vrot.lane.b32.xlu0 %v1543_v37, %s6997_s22 }
  0xe7   : > { %1559 = vrot.lane.b32.xlu1 %v1545_v43, %s6997_s22  ;;  %v381_v43 = vld [vmem:[%s8123_s3] sm:$0xf] }
  0xe9   : > { %1561 = vrot.lane.b32.xlu0 %v1552_v44, %s6997_s22  ;;  %v3498_v44 = vrot.slane %v6649_v26, %v7079_v18 }
  0xeb   : > { %2895 = vrot.lane.b32.xlu1 %v2894_v45, %s7007_s26  ;;  %v3505_v45 = vrot.slane %v3491_v34, %v7079_v18  ;;  %v3506_v51 = vcombine.high %v3498_v44, %v3498_v44 }
  0xed   : > { %v3507_v52 = vcombine.high %v3505_v45, %v3505_v45 }
 0x117   : > { %v496_v20 = vpop.permute.xlu0 %495 }
 0x119   : > { %v498_v49 = vpop.permute.xlu1 %497 }
 0x11a   : > { %v506_v56 = vsel %vm8126_vm6, %v496_v20, %v498_v49  ;;  %v3125_v20 = vcombine.low %v3117_v38, %v3124_v39 }
 0x11b   : > { %v504_v50 = vpop.permute.xlu0 %503  ;;  %v516_v1 = vsel %vm514_vm7, %v506_v56, 0 }
 0x11d   : > { %v502_v53 = vpop.permute.xlu1 %501 }
 0x11e   : > { %v509_v55 = vsel %vm8126_vm6, %v502_v53, %v504_v50 }
 0x11f   : > { %v500_v57 = vpop.permute.xlu0 %499  ;;  %6558 = vmatprep.subr.msk.bf16.mxu1 %vm514_vm7, %v509_v55 }
 0x120   : > { %v507_v62 = vsel %vm8126_vm6, %v498_v49, %v500_v57  ;;  %v508_v63 = vsel %vm8126_vm6, %v500_v57, %v502_v53 }
 0x121   : > { %6556 = vmatprep.subr.msk.bf16.mxu0 %vm514_vm7, %v507_v62  ;;  %v1747_v0 = vpop.permute.xlu1 %1746  ;;  %v522_v4 = vsel %vm514_vm7, %v508_v63, 0  ;;  %v3509_v63 = vpack.i.b16 %v3498_v44, %v3498_v44 }
 0x122   : > { %v1748_v5 = vrot.slane %v1747_v0, 6  ;;  %528 = vmatpush1.bf16.msra.mxu0 %v516_v1  ;;  %569 = vmatpush1.bf16.msra.mxu1 %v522_v4  ;;  %v3516_v4 = vpack.i.b16 %v3505_v45, %v3505_v45 }
 0x123   : > { %v636_v7 = vpop.permute.xlu0 %635 }
 0x124   : > { %v1749_v12 = vsel %vm8127_vm8, %v1748_v5, %v1747_v0  ;;  %v1753_v35 = vmul.bf16 %v1748_v5, %v1669_v32  ;;  %v1898_v0 = vld [vmem:[#allocation2 + $0x8] sm:$0x3]  ;;  %v3523_v5 = vpack.i.b16 %v3506_v51, %v3506_v51 }
 0x125   : > { %v1752_v13 = vmul.bf16 %v1749_v12, %v7196_v54  ;;  %v638_v14 = vpop.permute.xlu1 %637  ;;  %6557 = vmatmul.mubr.msk.bf16.vlgmr.msra.gmra.mrb[0].mxu0 %vm510_vm10, %v6555_v6  ;;  %6559 = vmatmul.mubr.msk.bf16.vlgmr.msra.gmra.mrb[0].mxu1 %vm510_vm10, %v6555_v6  ;;  %v3530_v6 = vpack.i.b16 %v3507_v52, %v3507_v52 }
 0x126   : > { %v646_v15 = vsel %vm8128_vm9, %v636_v7, %v638_v14  ;;  %697 = vmatprep.mubr.bf16.mxu0 %v6992_v2  ;;  %738 = vmatprep.mubr.bf16.mxu1 %v6992_v2  ;;  %v1781_v47 = vrot.slane %v1753_v35, %v7089_v21 }
 0x127   : > { %v640_v16 = vpop.permute.xlu0 %639  ;;  %v1765_v17 = vrot.slane %v1752_v13, %v7089_v21  ;;  %v1758_v19 = vcombine.high %v1752_v13, %v1752_v13  ;;  %v654_v29 = vsel %vm514_vm7, %v646_v15, 0  ;;  %v3535_v24 = vrot.slane %v3530_v6, %v7092_v22 }
 0x128   : > { %v647_v27 = vsel %vm8128_vm9, %v638_v14, %v640_v16  ;;  %v3514_v14 = vrot.slane %v3509_v63, %v7092_v22 }
 0x129   : > { %1782 = vrot.lane.b32.xlu0 %v1765_v17, %s6998_s23  ;;  %6560 = vmatprep.subr.msk.bf16.mxu0 %vm514_vm7, %v647_v27  ;;  %v642_v28 = vpop.permute.xlu1 %641  ;;  %v1773_v30 = vcombine.high %v1765_v17, %v1765_v17  ;;  %v1772_v31 = vrot.slane %v1758_v19, %v7089_v21  ;;  %v3521_v17 = vrot.slane %v3516_v4, %v7092_v22 }
 0x12a   : > { %v648_v33 = vsel %vm8128_vm9, %v640_v16, %v642_v28  ;;  %666 = vmatpush1.bf16.msra.mxu0 %v654_v29  ;;  %v6566_v16 = vld [vmem:[%s8123_s3 + $0x8] sm:$0xf]  ;;  %v3528_v19 = vrot.slane %v3523_v5, %v7092_v22  ;;  %v3727_v27 = vrot.slane %v6656_v58, %v7079_v18 }
 0x12b   : > { %v644_v3 = vpop.permute.xlu0 %643  ;;  %1784 = vrot.lane.b32.xlu1 %v1773_v30, %s6998_s23  ;;  %v660_v40 = vsel %vm514_vm7, %v648_v33, 0  ;;  %v1774_v41 = vcombine.high %v1772_v31, %v1772_v31  ;;  %v3540_v33 = vcombine.low %v3514_v14, %v3521_v17 }
 0x12c   : > { %v649_v36 = vsel %vm8128_vm9, %v642_v28, %v644_v3  ;;  %v3734_v28 = vrot.slane %v3720_v9, %v7079_v18  ;;  %v3541_v34 = vcombine.low %v3528_v19, %v3535_v24  ;;  %v3735_v39 = vcombine.high %v3727_v27, %v3727_v27 }
 0x12d   : > { %1786 = vrot.lane.b32.xlu0 %v1772_v31, %s6998_s23  ;;  %6562 = vmatprep.subr.msk.bf16.mxu1 %vm514_vm7, %v649_v36  ;;  %v1976_v37 = vpop.permute.xlu1 %1975 }
 0x12e   : > { %v1977_v42 = vrot.slane %v1976_v37, 6  ;;  %707 = vmatpush1.bf16.msra.mxu1 %v660_v40  ;;  %v3736_v36 = vcombine.high %v3734_v28, %v3734_v28  ;;  %v3555_v51 = vrot.slane %v3541_v34, %v7089_v21  ;;  %v3752_v52 = vpack.i.b16 %v3735_v39, %v3735_v39 }
 0x12f   : > { %v863_v46 = vpop.permute.xlu0 %862  ;;  %1788 = vrot.lane.b32.xlu1 %v1774_v41, %s6998_s23  ;;  %v3738_v41 = vpack.i.b16 %v3727_v27, %v3727_v27 }
 0x130   : > { %v1978_v23 = vsel %vm8126_vm6, %v1977_v42, %v1976_v37  ;;  %v1982_v7 = vmul.bf16 %v1977_v42, %v1898_v0  ;;  %v6663_v37 = vld.sshfl [vmem:[%s8124_s4 + $0x40] sm:$0x33 pattern:$0x75316420]  ;;  %v3757_v6 = vrot.slane %v3752_v52, %v7092_v22  ;;  %vm2480_vm6 = vcmask 72704  }
 0x131   : > { %v1981_v48 = vmul.bf16 %v1978_v23, %v7196_v54  ;;  %1790 = vrot.lane.b32.xlu0 %v1781_v47, %s6998_s23  ;;  %v865_v49 = vpop.permute.xlu1 %864  ;;  %6561 = vmatmul.mubr.msk.bf16.vlgmr.msra.gmra.mrb[0].mxu0 %vm510_vm10, %v381_v43  ;;  %v2127_v47 = vld [vmem:[#allocation2 + $0x8] sm:$0x3]  ;;  %v3548_v23 = vrot.slane %v3540_v33, %v7089_v21  ;;  %v3956_v63 = vrot.slane %v6663_v37, %v7079_v18 }
 0x132   : > { %v873_v50 = vsel %vm8127_vm8, %v863_v46, %v865_v49  ;;  %6563 = vmatmul.mubr.msk.bf16.vlgmr.msra.gmra.mrb[0].mxu1 %vm510_vm10, %v381_v43  ;;  %924 = vmatprep.mubr.bf16.mxu0 %v6992_v2  ;;  %v2010_v26 = vrot.slane %v1982_v7, %v7089_v21  ;;  %v3745_v46 = vpack.i.b16 %v3734_v28, %v3734_v28 }
 0x133   : > { %v867_v53 = vpop.permute.xlu0 %866  ;;  %3126 = vrot.lane.b32.xlu1 %v3125_v20, %s7008_s13  ;;  %v1994_v55 = vrot.slane %v1981_v48, %v7089_v21  ;;  %v1987_v56 = vcombine.high %v1981_v48, %v1981_v48  ;;  %965 = vmatprep.mubr.bf16.mxu1 %v6992_v2  ;;  %v881_v60 = vsel %vm514_vm7, %v873_v50, 0  ;;  %v3949_v48 = vcombine.high %v6663_v37, %v6663_v37 }
 0x134   : > { %v874_v57 = vsel %vm8127_vm8, %v865_v49, %v867_v53  ;;  %v3556_v5 = vcombine.low %v3548_v23, %v3555_v51 }
 0x135   : > { %2011 = vrot.lane.b32.xlu0 %v1994_v55, %s6995_s20  ;;  %6567 = vmatprep.subr.msk.bf16.mxu0 %vm514_vm7, %v874_v57  ;;  %v869_v59 = vpop.permute.xlu1 %868  ;;  %v2002_v61 = vcombine.high %v1994_v55, %v1994_v55  ;;  %v2001_v62 = vrot.slane %v1987_v56, %v7089_v21  ;;  %v3963_v0 = vrot.slane %v3949_v48, %v7079_v18 }
 0x136   : > { %v875_v1 = vsel %vm8127_vm8, %v867_v53, %v869_v59  ;;  %893 = vmatpush1.bf16.msra.mxu0 %v881_v60  ;;  %v3759_v53 = vpack.i.b16 %v3736_v36, %v3736_v36  ;;  %v3750_v60 = vrot.slane %v3745_v46, %v7092_v22 }
 0x137   : > { %v871_v8 = vpop.permute.xlu0 %870  ;;  %2013 = vrot.lane.b32.xlu1 %v2002_v61, %s6995_s20  ;;  %v887_v12 = vsel %vm514_vm7, %v875_v1, 0  ;;  %v2003_v13 = vcombine.high %v2001_v62, %v2001_v62  ;;  %v3965_v14 = vcombine.high %v3963_v0, %v3963_v0 }
 0x138   : > { %v876_v10 = vsel %vm8127_vm8, %v869_v59, %v871_v8  ;;  %v3743_v59 = vrot.slane %v3738_v41, %v7092_v22  ;;  %v3764_v7 = vrot.slane %v3759_v53, %v7092_v22  ;;  %vm2942_vm8 = vcmask 56320  }
 0x139   : > { %2015 = vrot.lane.b32.xlu0 %v2001_v62, %s6995_s20  ;;  %6569 = vmatprep.subr.msk.bf16.mxu1 %vm514_vm7, %v876_v10  ;;  %v2205_v11 = vpop.permute.xlu1 %2204  ;;  %v6573_v62 = vld [vmem:[%s8123_s3 + $0xc] sm:$0xf] }
 0x13a   : > { %v2206_v15 = vrot.slane %v2205_v11, 6  ;;  %934 = vmatpush1.bf16.msra.mxu1 %v887_v12  ;;  %v3770_v19 = vcombine.low %v3757_v6, %v3764_v7  ;;  %v2587_v7 = vld [vmem:[#allocation2 + $0x8] sm:$0x3] }
 0x13b   : > { %v1094_v25 = vpop.permute.xlu0 %1093  ;;  %2017 = vrot.lane.b32.xlu1 %v2003_v13, %s6995_s20  ;;  %v3964_v13 = vcombine.high %v3956_v63, %v3956_v63 }
 0x13c   : > { %v2207_v29 = vsel %vm8128_vm9, %v2206_v15, %v2205_v11  ;;  %v2211_v49 = vmul.bf16 %v2206_v15, %v2127_v47  ;;  %v3769_v11 = vcombine.low %v3743_v59, %v3750_v60  ;;  %v3784_v36 = vrot.slane %v3770_v19, %v7089_v21  ;;  %v6580_v47 = vld [vmem:[%s8123_s3 + $0x10] sm:$0xf] }
 0x13d   : > { %v2210_v30 = vmul.bf16 %v2207_v29, %v7196_v54  ;;  %2019 = vrot.lane.b32.xlu0 %v2010_v26, %s6995_s20  ;;  %v1096_v31 = vpop.permute.xlu1 %1095  ;;  %6568 = vmatmul.mubr.msk.bf16.vlgmr.msra.gmra.mrb[0].mxu0 %vm510_vm10, %v6566_v16  ;;  %v6670_v26 = vld.sshfl [vmem:[%s8124_s4 + $0x44] sm:$0x33 pattern:$0x75316420]  ;;  %v3981_v34 = vpack.i.b16 %v3964_v13, %v3964_v13  ;;  %vm2711_vm9 = vcmask 64512  }
 0x13e   : > { %v1104_v32 = vsel %vm1103_vm5, %v1094_v25, %v1096_v31  ;;  %6570 = vmatmul.mubr.msk.bf16.vlgmr.msra.gmra.mrb[0].mxu1 %vm510_vm10, %v6566_v16  ;;  %1155 = vmatprep.mubr.bf16.mxu0 %v6992_v2  ;;  %v2239_v4 = vrot.slane %v2211_v49, %v7089_v21  ;;  %v3967_v25 = vpack.i.b16 %v3956_v63, %v3956_v63 }
 0x13f   : > { %v1098_v35 = vpop.permute.xlu0 %1097  ;;  %v2223_v3 = vrot.slane %v2210_v30, %v7089_v21  ;;  %v2216_v38 = vcombine.high %v2210_v30, %v2210_v30  ;;  %1196 = vmatprep.mubr.bf16.mxu1 %v6992_v2  ;;  %v1112_v43 = vsel %vm514_vm7, %v1104_v32, 0  ;;  %v2356_v32 = vld [vmem:[#allocation2 + $0x8] sm:$0x3]  ;;  %v3777_v39 = vrot.slane %v3769_v11, %v7089_v21 }
 0x140   : > { %v1105_v40 = vsel %vm1103_vm5, %v1096_v31, %v1098_v35  ;;  %v3974_v31 = vpack.i.b16 %v3963_v0, %v3963_v0  ;;  %v4178_v37 = vcombine.high %v6670_v26, %v6670_v26  ;;  %v4185_v48 = vrot.slane %v6670_v26, %v7079_v18 }
 0x141   : > { %2240 = vrot.lane.b32.xlu1 %v2223_v3, %s6996_s21  ;;  %6574 = vmatprep.subr.msk.bf16.mxu0 %vm514_vm7, %v1105_v40  ;;  %v1100_v42 = vpop.permute.xlu1 %1099  ;;  %v2231_v44 = vcombine.high %v2223_v3, %v2223_v3  ;;  %v2230_v45 = vrot.slane %v2216_v38, %v7089_v21  ;;  %v3785_v51 = vcombine.low %v3777_v39, %v3784_v36 }
 0x142   : > { %v1106_v20 = vsel %vm1103_vm5, %v1098_v35, %v1100_v42  ;;  %1124 = vmatpush1.bf16.msra.mxu0 %v1112_v43  ;;  %v3988_v35 = vpack.i.b16 %v3965_v14, %v3965_v14  ;;  %v4192_v52 = vrot.slane %v4178_v37, %v7079_v18  ;;  %v4193_v60 = vcombine.high %v4185_v48, %v4185_v48 }
 0x143   : > { %v1102_v50 = vpop.permute.xlu0 %1101  ;;  %2242 = vrot.lane.b32.xlu0 %v2231_v44, %s6996_s21  ;;  %v1118_v57 = vsel %vm514_vm7, %v1106_v20, 0  ;;  %v2232_v58 = vcombine.high %v2230_v45, %v2230_v45  ;;  %v3972_v44 = vrot.slane %v3967_v25, %v7092_v22  ;;  %v3986_v20 = vrot.slane %v3981_v34, %v7092_v22 }
 0x144   : > { %v1107_v55 = vsel %vm1103_vm5, %v1100_v42, %v1102_v50  ;;  %v3993_v23 = vrot.slane %v3988_v35, %v7092_v22  ;;  %v4194_v63 = vcombine.high %v4192_v52, %v4192_v52  ;;  %v4203_v11 = vpack.i.b16 %v4192_v52, %v4192_v52  ;;  %v6983_v35 = vld [vmem:[#allocation2] sm:$0xff] }
 0x145   : > { %2244 = vrot.lane.b32.xlu1 %v2230_v45, %s6996_s21  ;;  %6576 = vmatprep.subr.msk.bf16.mxu1 %vm514_vm7, %v1107_v55  ;;  %v2434_v56 = vpop.permute.xlu1 %2433  ;;  %v3979_v45 = vrot.slane %v3974_v31, %v7092_v22 }
 0x146   : > { %v2435_v61 = vrot.slane %v2434_v56, 6  ;;  %1165 = vmatpush1.bf16.msra.mxu1 %v1118_v57  ;;  %v3999_v59 = vcombine.low %v3986_v20, %v3993_v23  ;;  %v6677_v23 = vld.sshfl [vmem:[%s8124_s4 + $0x48] sm:$0x33 pattern:$0x75316420] }
 0x147   : > { %v1325_v1 = vpop.permute.xlu0 %1324  ;;  %2246 = vrot.lane.b32.xlu0 %v2232_v58, %s6996_s21  ;;  %v3998_v57 = vcombine.low %v3972_v44, %v3979_v45  ;;  %v4414_v52 = vrot.slane %v6677_v23, %v7079_v18 }
 0x148   : > { %v2437_v8 = vsel %vm2436_vm11, %v2435_v61, %v2434_v56  ;;  %v2441_v3 = vmul.bf16 %v2435_v61, %v2356_v32  ;;  %v4013_v14 = vrot.slane %v3999_v59, %v7089_v21 }
 0x149   : > { %v2440_v9 = vmul.bf16 %v2437_v8, %v7196_v54  ;;  %2248 = vrot.lane.b32.xlu1 %v2239_v4, %s6996_s21  ;;  %v1327_v10 = vpop.permute.xlu1 %1326  ;;  %6575 = vmatmul.mubr.msk.bf16.vlgmr.msra.gmra.mrb[0].mxu0 %vm510_vm10, %v6573_v62 }
 0x14a   : > { %v1334_v12 = vsel %vm1290_vm4, %v1325_v1, %v1327_v10  ;;  %6577 = vmatmul.mubr.msk.bf16.vlgmr.msra.gmra.mrb[0].mxu1 %vm510_vm10, %v6573_v62  ;;  %1385 = vmatprep.mubr.bf16.mxu0 %v6992_v2  ;;  %v2469_v50 = vrot.slane %v2441_v3, %v7089_v21 }
 0x14b   : > { %v1329_v15 = vpop.permute.xlu0 %1328  ;;  %3557 = vrot.lane.b32.xlu0 %v3556_v5, %s7009_s10  ;;  %v2453_v16 = vrot.slane %v2440_v9, %v7089_v21  ;;  %v2446_v17 = vcombine.high %v2440_v9, %v2440_v9  ;;  %1426 = vmatprep.mubr.bf16.mxu1 %v6992_v2  ;;  %v1342_v28 = vsel %vm514_vm7, %v1334_v12, 0  ;;  %v4006_v9 = vrot.slane %v3998_v57, %v7089_v21 }
 0x14c   : > { %v1335_v24 = vsel %vm1290_vm4, %v1327_v10, %v1329_v15  ;;  %v4196_v10 = vpack.i.b16 %v4185_v48, %v4185_v48  ;;  %v6684_v48 = vld.sshfl [vmem:[%s8124_s4 + $0x4c] sm:$0x33 pattern:$0x75316420] }
 0x14d   : > { %2470 = vrot.lane.b32.xlu1 %v2453_v16, %s7010_s15  ;;  %6581 = vmatprep.subr.msk.bf16.mxu0 %vm514_vm7, %v1335_v24  ;;  %v1331_v27 = vpop.permute.xlu1 %1330  ;;  %v2461_v29 = vcombine.high %v2453_v16, %v2453_v16  ;;  %v2460_v30 = vrot.slane %v2446_v17, %v7089_v21  ;;  %v4217_v16 = vpack.i.b16 %v4194_v63, %v4194_v63 }
 0x14e   : > { %v1336_v33 = vsel %vm1290_vm4, %v1329_v15, %v1331_v27  ;;  %1354 = vmatpush1.bf16.msra.mxu0 %v1342_v28  ;;  %v4210_v15 = vpack.i.b16 %v4193_v60, %v4193_v60  ;;  %v4208_v28 = vrot.slane %v4203_v11, %v7092_v22  ;;  %v4014_v31 = vcombine.low %v4006_v9, %v4013_v14 }
 0x14f   : > { %v1333_v38 = vpop.permute.xlu0 %1332  ;;  %2472 = vrot.lane.b32.xlu0 %v2461_v29, %s7010_s15  ;;  %v1348_v42 = vsel %vm514_vm7, %v1336_v33, 0  ;;  %v2462_v43 = vcombine.high %v2460_v30, %v2460_v30  ;;  %v6587_v29 = vld [vmem:[%s8123_s3 + $0x14] sm:$0xf]  ;;  %v4222_v33 = vrot.slane %v4217_v16, %v7092_v22  ;;  %v4422_v60 = vcombine.high %v4414_v52, %v4414_v52 }
 0x150   : > { %v1337_v40 = vsel %vm1290_vm4, %v1331_v27, %v1333_v38  ;;  %v4201_v27 = vrot.slane %v4196_v10, %v7092_v22  ;;  %v4215_v32 = vrot.slane %v4210_v15, %v7092_v22 }
 0x151   : > { %2474 = vrot.lane.b32.xlu1 %v2460_v30, %s7010_s15  ;;  %6583 = vmatprep.subr.msk.bf16.mxu1 %vm514_vm7, %v1337_v40  ;;  %v2665_v41 = vpop.permute.xlu1 %2664  ;;  %v4439_v9 = vpack.i.b16 %v4422_v60, %v4422_v60 }
 0x152   : > { %v2666_v46 = vrot.slane %v2665_v41, 6  ;;  %1395 = vmatpush1.bf16.msra.mxu1 %v1348_v42  ;;  %v4227_v38 = vcombine.low %v4201_v27, %v4208_v28  ;;  %v4228_v37 = vcombine.low %v4215_v32, %v4222_v33  ;;  %v2818_v42 = vld [vmem:[#allocation2 + $0x8] sm:$0x3] }
 0x153   : > { %v1554_v49 = vpop.permute.xlu0 %1553  ;;  %2476 = vrot.lane.b32.xlu0 %v2462_v43, %s7010_s15  ;;  %v4444_v27 = vrot.slane %v4439_v9, %v7092_v22 }
 0x154   : > { %v2668_v53 = vsel %vm2667_vm12, %v2666_v46, %v2665_v41  ;;  %v2672_v12 = vmul.bf16 %v2666_v46, %v2587_v7  ;;  %v4235_v44 = vrot.slane %v4227_v38, %v7089_v21  ;;  %v4242_v45 = vrot.slane %v4228_v37, %v7089_v21  ;;  %v6691_v38 = vld.sshfl [vmem:[%s8124_s4 + $0x50] sm:$0x33 pattern:$0x75316420] }
 0x155   : > { %v2671_v55 = vmul.bf16 %v2668_v53, %v7196_v54  ;;  %2478 = vrot.lane.b32.xlu1 %v2469_v50, %s7010_s15  ;;  %v1556_v56 = vpop.permute.xlu1 %1555  ;;  %6582 = vmatmul.mubr.msk.bf16.vlgmr.msra.gmra.mrb[0].mxu0 %vm510_vm10, %v6580_v47  ;;  %v4636_v50 = vcombine.high %v6684_v48, %v6684_v48  ;;  %v4425_v7 = vpack.i.b16 %v4414_v52, %v4414_v52 }
 0x156   : > { %v1563_v58 = vsel %vm1059_vm3, %v1554_v49, %v1556_v56  ;;  %6584 = vmatmul.mubr.msk.bf16.vlgmr.msra.gmra.mrb[0].mxu1 %vm510_vm10, %v6580_v47  ;;  %1614 = vmatprep.mubr.bf16.mxu0 %v6992_v2  ;;  %v2700_v30 = vrot.slane %v2672_v12, %v7089_v21  ;;  %v4243_v20 = vcombine.low %v4235_v44, %v4242_v45 }
 0x157   : > { %v1558_v61 = vpop.permute.xlu0 %1557  ;;  %3786 = vrot.lane.b32.xlu0 %v3785_v51, %s7011_s29  ;;  %v2684_v54 = vrot.slane %v2671_v55, %v7089_v21  ;;  %v2677_v62 = vcombine.high %v2671_v55, %v2671_v55  ;;  %1655 = vmatprep.mubr.bf16.mxu1 %v6992_v2  ;;  %v1571_v4 = vsel %vm514_vm7, %v1563_v58, 0  ;;  %v4407_v49 = vcombine.high %v6677_v23, %v6677_v23 }
 0x158   : > { %v1564_v0 = vsel %vm1059_vm3, %v1556_v56, %v1558_v61  ;;  %v4643_v56 = vrot.slane %v6684_v48, %v7079_v18  ;;  %v4650_v57 = vrot.slane %v4636_v50, %v7079_v18  ;;  %v4865_v45 = vcombine.high %v6691_v38, %v6691_v38 }
 0x159   : > { %2701 = vrot.lane.b32.xlu1 %v2684_v54, %s7012_s30  ;;  %6588 = vmatprep.subr.msk.bf16.mxu0 %vm514_vm7, %v1564_v0  ;;  %v1560_v1 = vpop.permute.xlu1 %1559  ;;  %v2692_v5 = vcombine.high %v2684_v54, %v2684_v54  ;;  %v2691_v6 = vrot.slane %v2677_v62, %v7089_v21  ;;  %v4421_v53 = vrot.slane %v4407_v49, %v7079_v18  ;;  %v3049_v49 = vld [vmem:[#allocation2 + $0x8] sm:$0x3] }
 0x15a   : > { %v1565_v8 = vsel %vm1059_vm3, %v1558_v61, %v1560_v1  ;;  %1583 = vmatpush1.bf16.msra.mxu0 %v1571_v4  ;;  %v4651_v0 = vcombine.high %v4643_v56, %v4643_v56  ;;  %v4654_v12 = vpack.i.b16 %v4643_v56, %v4643_v56  ;;  %v6601_v56 = vld [vmem:[%s8123_s3 + $0x1c] sm:$0xf] }
 0x15b   : > { %v1562_v13 = vpop.permute.xlu0 %1561  ;;  %2703 = vrot.lane.b32.xlu0 %v2692_v5, %s7012_s30  ;;  %v1577_v24 = vsel %vm514_vm7, %v1565_v8, 0  ;;  %v2693_v25 = vcombine.high %v2691_v6, %v2691_v6  ;;  %v4423_v61 = vcombine.high %v4421_v53, %v4421_v53  ;;  %v6594_v5 = vld [vmem:[%s8123_s3 + $0x18] sm:$0xf]  ;;  %v4432_v8 = vpack.i.b16 %v4421_v53, %v4421_v53 }
 0x15c   : > { %v1566_v17 = vsel %vm1059_vm3, %v1560_v1, %v1562_v13  ;;  %v4652_v1 = vcombine.high %v4650_v57, %v4650_v57  ;;  %v4661_v13 = vpack.i.b16 %v4650_v57, %v4650_v57  ;;  %v4668_v16 = vpack.i.b16 %v4651_v0, %v4651_v0 }
 0x15d   : > { %2705 = vrot.lane.b32.xlu1 %v2691_v6, %s7012_s30  ;;  %6590 = vmatprep.subr.msk.bf16.mxu1 %vm514_vm7, %v1566_v17  ;;  %v2896_v19 = vpop.permute.xlu1 %2895  ;;  %v4446_v10 = vpack.i.b16 %v4423_v61, %v4423_v61 }
 0x15e   : > { %v2897_v26 = vrot.slane %v2896_v19, 6  ;;  %1624 = vmatpush1.bf16.msra.mxu1 %v1577_v24  ;;  %v4675_v17 = vpack.i.b16 %v4652_v1, %v4652_v1  ;;  %v4666_v32 = vrot.slane %v4661_v13, %v7092_v22 }
 0x15f   : > { %2707 = vrot.lane.b32.xlu0 %v2693_v25, %s7012_s30  ;;  %v4430_v25 = vrot.slane %v4425_v7, %v7092_v22  ;;  %v4451_v28 = vrot.slane %v4446_v10, %v7092_v22 }
 0x160   : > { %v2899_v34 = vsel %vm2898_vm13, %v2897_v26, %v2896_v19  ;;  %v2903_v43 = vmul.bf16 %v2897_v26, %v2818_v42  ;;  %v4437_v26 = vrot.slane %v4432_v8, %v7092_v22 }
 0x161   : > { %v2902_v3 = vmul.bf16 %v6983_v35, %v2899_v34  ;;  %2709 = vrot.lane.b32.xlu1 %v2700_v30, %s7012_s30  ;;  %6589 = vmatmul.mubr.msk.bf16.vlgmr.msra.gmra.mrb[0].mxu0 %vm510_vm10, %v6587_v29  ;;  %v4673_v35 = vrot.slane %v4668_v16, %v7092_v22  ;;  %v4457_v42 = vcombine.low %v4444_v27, %v4451_v28 }
 0x162   : > { %6591 = vmatmul.mubr.msk.bf16.vlgmr.msra.gmra.mrb[0].mxu1 %vm510_vm10, %v6587_v29  ;;  %1843 = vmatprep.mubr.bf16.mxu0 %v6992_v2  ;;  %v2931_v47 = vrot.slane %v2903_v43, %v7089_v21  ;;  %v3048_v29 = vld [vmem:[#allocation2] sm:$0xff] }
 0x163   : > { %4015 = vrot.lane.b32.xlu0 %v4014_v31, %s7012_s30  ;;  %v2915_v39 = vrot.slane %v2902_v3, %v7089_v21  ;;  %v2908_v36 = vcombine.high %v2902_v3, %v2902_v3  ;;  %1884 = vmatprep.mubr.bf16.mxu1 %v6992_v2  ;;  %v4659_v31 = vrot.slane %v4654_v12, %v7092_v22 }
 0x164   : > { %v4680_v3 = vrot.slane %v4675_v17, %v7092_v22 }
 0x165   : > { %2932 = vrot.lane.b32.xlu1 %v2915_v39, %s7011_s29  ;;  %v2923_v40 = vcombine.high %v2915_v39, %v2915_v39  ;;  %v2922_v41 = vrot.slane %v2908_v36, %v7089_v21  ;;  %v4685_v44 = vcombine.low %v4659_v31, %v4666_v32 }
 0x166   : > { %v4686_v48 = vcombine.low %v4673_v35, %v4680_v3 }
 0x167   : > { %2934 = vrot.lane.b32.xlu0 %v2923_v40, %s7011_s29  ;;  %v2924_v46 = vcombine.high %v2922_v41, %v2922_v41 }
 0x169   : > { %2936 = vrot.lane.b32.xlu1 %v2922_v41, %s7011_s29  ;;  %v4456_v41 = vcombine.low %v4430_v25, %v4437_v26  ;;  %v6608_v25 = vld [vmem:[%s8123_s3 + $0x20] sm:$0xf] }
 0x16b   : > { %2938 = vrot.lane.b32.xlu0 %v2924_v46, %s7011_s29  ;;  %v4464_v53 = vrot.slane %v4456_v41, %v7089_v21 }
 0x16d   : > { %2940 = vrot.lane.b32.xlu1 %v2931_v47, %s7011_s29 }
 0x16f   : > { %4244 = vrot.lane.b32.xlu0 %v4243_v20, %s7010_s15 }
 0x19b   : > { %v1783_v51 = vpop.permute.xlu0 %1782 }
 0x19d   : > { %v1785_v55 = vpop.permute.xlu1 %1784 }
 0x19e   : > { %v1792_v58 = vsel %vm828_vm2, %v1783_v51, %v1785_v55 }
 0x19f   : > { %v1787_v59 = vpop.permute.xlu0 %1786  ;;  %v1800_v63 = vsel %vm514_vm7, %v1792_v58, 0  ;;  %v4872_v58 = vrot.slane %v6691_v38, %v7079_v18 }
 0x1a0   : > { %v1793_v54 = vsel %vm828_vm2, %v1785_v55, %v1787_v59  ;;  %v4471_v55 = vrot.slane %v4457_v42, %v7089_v21 }
 0x1a1   : > { %6595 = vmatprep.subr.msk.bf16.mxu0 %vm514_vm7, %v1793_v54  ;;  %v1789_v62 = vpop.permute.xlu1 %1788  ;;  %v4693_v54 = vrot.slane %v4685_v44, %v7089_v21  ;;  %v4883_v10 = vpack.i.b16 %v4872_v58, %v4872_v58 }
 0x1a2   : > { %v1794_v4 = vsel %vm828_vm2, %v1787_v59, %v1789_v62  ;;  %1812 = vmatpush1.bf16.msra.mxu0 %v1800_v63  ;;  %v4879_v59 = vrot.slane %v4865_v45, %v7079_v18  ;;  %v4472_v1 = vcombine.low %v4464_v53, %v4471_v55 }
 0x1a3   : > { %v1791_v6 = vpop.permute.xlu0 %1790  ;;  %v1806_v15 = vsel %vm514_vm7, %v1794_v4, 0  ;;  %v4880_v4 = vcombine.high %v4872_v58, %v4872_v58  ;;  %v4888_v26 = vrot.slane %v4883_v10, %v7092_v22 }
 0x1a4   : > { %v1795_v11 = vsel %vm828_vm2, %v1789_v62, %v1791_v6  ;;  %v4700_v62 = vrot.slane %v4686_v48, %v7089_v21  ;;  %v4890_v12 = vpack.i.b16 %v4879_v59, %v4879_v59  ;;  %v3480_v48 = vld [vmem:[#allocation2 + $0xa] sm:$0x3] }
 0x1a5   : > { %6597 = vmatprep.subr.msk.bf16.mxu1 %vm514_vm7, %v1795_v11  ;;  %v3127_v14 = vpop.permute.xlu1 %3126  ;;  %6596 = vmatmul.mubr.msk.bf16.vlgmr.msra.gmra.mrb[0].mxu0 %vm510_vm10, %v6594_v5  ;;  %v4897_v13 = vpack.i.b16 %v4880_v4, %v4880_v4 }
 0x1a6   : > { %v3128_v19 = vrot.slane %v3127_v14, 6  ;;  %1853 = vmatpush1.bf16.msra.mxu1 %v1806_v15  ;;  %2072 = vmatprep.mubr.bf16.mxu0 %v6992_v2  ;;  %v4701_v7 = vcombine.low %v4693_v54, %v4700_v62  ;;  %v6698_v15 = vld.sshfl [vmem:[%s8124_s4 + $0x54] sm:$0x33 pattern:$0x75316420] }
 0x1a7   : > { %v2012_v24 = vpop.permute.xlu0 %2011  ;;  %v5094_v27 = vcombine.high %v6698_v15, %v6698_v15  ;;  %v5101_v3 = vrot.slane %v6698_v15, %v7079_v18  ;;  %v6615_v62 = vld [vmem:[%s8123_s3 + $0x24] sm:$0xf] }
 0x1a8   : > { %v3130_v30 = vsel %vm3129_vm14, %v3128_v19, %v3127_v14  ;;  %v3134_v51 = vmul.bf16 %v3128_v19, %v3049_v49 }
 0x1a9   : > { %v3133_v33 = vmul.bf16 %v3130_v30, %v3048_v29  ;;  %v2014_v34 = vpop.permute.xlu1 %2013  ;;  %6598 = vmatmul.mubr.msk.bf16.vlgmr.msra.gmra.mrb[0].mxu1 %vm510_vm10, %v6594_v5  ;;  %v4881_v5 = vcombine.high %v4879_v59, %v4879_v59  ;;  %v4895_v29 = vrot.slane %v4890_v12, %v7092_v22  ;;  %v4902_v30 = vrot.slane %v4897_v13, %v7092_v22 }
 0x1aa   : > { %v2021_v39 = vsel %vm461_vm0, %v2012_v24, %v2014_v34  ;;  %2113 = vmatprep.mubr.bf16.mxu1 %v6992_v2  ;;  %v3162_v0 = vrot.slane %v3134_v51, %v7089_v21  ;;  %v5108_v38 = vrot.slane %v5094_v27, %v7079_v18 }
 0x1ab   : > { %v2016_v36 = vpop.permute.xlu0 %2015  ;;  %v3146_v37 = vrot.slane %v3133_v33, %v7089_v21  ;;  %v3139_v40 = vcombine.high %v3133_v33, %v3133_v33  ;;  %v2029_v47 = vsel %vm514_vm7, %v2021_v39, 0  ;;  %v4904_v14 = vpack.i.b16 %v4881_v5, %v4881_v5  ;;  %v7621_v39 = vld [vmem:[#allocation2 + $0x2] sm:$0xff] }
 0x1ac   : > { %v2022_v43 = vsel %vm461_vm0, %v2014_v34, %v2016_v36  ;;  %v5119_v59 = vpack.i.b16 %v5108_v38, %v5108_v38 }
 0x1ad   : > { %3163 = vrot.lane.b32.xlu1 %v3146_v37, %s7009_s10  ;;  %6602 = vmatprep.subr.msk.bf16.mxu0 %vm514_vm7, %v2022_v43  ;;  %v2018_v46 = vpop.permute.xlu1 %2017  ;;  %v3154_v20 = vcombine.high %v3146_v37, %v3146_v37  ;;  %v3153_v23 = vrot.slane %v3139_v40, %v7089_v21  ;;  %v4909_v31 = vrot.slane %v4904_v14, %v7092_v22 }
 0x1ae   : > { %v2023_v50 = vsel %vm461_vm0, %v2016_v36, %v2018_v46  ;;  %2041 = vmatpush1.bf16.msra.mxu0 %v2029_v47  ;;  %v4914_v37 = vcombine.low %v4888_v26, %v4895_v29  ;;  %v5109_v47 = vcombine.high %v5101_v3, %v5101_v3  ;;  %v5124_v10 = vrot.slane %v5119_v59, %v7092_v22 }
 0x1af   : > { %v2020_v52 = vpop.permute.xlu0 %2019  ;;  %3165 = vrot.lane.b32.xlu0 %v3154_v20, %s7009_s10  ;;  %v2035_v60 = vsel %vm514_vm7, %v2023_v50, 0  ;;  %v3155_v61 = vcombine.high %v3153_v23, %v3153_v23  ;;  %v4915_v40 = vcombine.low %v4902_v30, %v4909_v31  ;;  %v5110_v20 = vcombine.high %v5108_v38, %v5108_v38 }
 0x1b0   : > { %v2024_v57 = vsel %vm461_vm0, %v2018_v46, %v2020_v52  ;;  %v4922_v50 = vrot.slane %v4914_v37, %v7089_v21 }
 0x1b1   : > { %3167 = vrot.lane.b32.xlu1 %v3153_v23, %s7009_s10  ;;  %6604 = vmatprep.subr.msk.bf16.mxu1 %vm514_vm7, %v2024_v57  ;;  %v6705_v23 = vld.sshfl [vmem:[%s8124_s4 + $0x58] sm:$0x33 pattern:$0x75316420]  ;;  %v4929_v51 = vrot.slane %v4915_v40, %v7089_v21  ;;  %v5112_v57 = vpack.i.b16 %v5101_v3, %v5101_v3 }
 0x1b2   : > { %2082 = vmatpush1.bf16.msra.mxu1 %v2035_v60  ;;  %6603 = vmatmul.mubr.msk.bf16.vlgmr.msra.gmra.mrb[0].mxu0 %vm510_vm10, %v6601_v56  ;;  %v5323_v60 = vcombine.high %v6705_v23, %v6705_v23  ;;  %v6712_v3 = vld.sshfl [vmem:[%s8124_s4 + $0x5c] sm:$0x33 pattern:$0x75316420] }
 0x1b3   : > { %3169 = vrot.lane.b32.xlu0 %v3155_v61, %s7009_s10  ;;  %v2241_v63 = vpop.permute.xlu1 %2240  ;;  %2301 = vmatprep.mubr.bf16.mxu0 %v6992_v2 }
 0x1b4   : > { %v5337_v12 = vrot.slane %v5323_v60, %v7079_v18 }
 0x1b5   : > { %v2243_v6 = vpop.permute.xlu0 %2242  ;;  %3171 = vrot.lane.b32.xlu1 %v3162_v0, %s7009_s10  ;;  %6605 = vmatmul.mubr.msk.bf16.vlgmr.msra.gmra.mrb[0].mxu1 %vm510_vm10, %v6601_v56  ;;  %v5133_v0 = vpack.i.b16 %v5110_v20, %v5110_v20 }
 0x1b6   : > { %v2250_v8 = vsel %vm375_vm1, %v2241_v63, %v2243_v6  ;;  %2342 = vmatprep.mubr.bf16.mxu1 %v6992_v2  ;;  %v5126_v63 = vpack.i.b16 %v5109_v47, %v5109_v47 }
 0x1b7   : > { %4473 = vrot.lane.b32.xlu0 %v4472_v1, %s6996_s21  ;;  %v2245_v9 = vpop.permute.xlu1 %2244  ;;  %v2258_v17 = vsel %vm514_vm7, %v2250_v8, 0  ;;  %v5117_v8 = vrot.slane %v5112_v57, %v7092_v22 }
 0x1b8   : > { %v2251_v11 = vsel %vm375_vm1, %v2243_v6, %v2245_v9  ;;  %v5131_v15 = vrot.slane %v5126_v63, %v7092_v22 }
 0x1b9   : > { %v2247_v16 = vpop.permute.xlu0 %2246  ;;  %4702 = vrot.lane.b32.xlu1 %v4701_v7, %s6995_s20  ;;  %6609 = vmatprep.subr.msk.bf16.mxu0 %vm514_vm7, %v2251_v11  ;;  %v4930_v7 = vcombine.low %v4922_v50, %v4929_v51  ;;  %v5330_v11 = vrot.slane %v6705_v23, %v7079_v18  ;;  %v6622_v23 = vld [vmem:[%s8123_s3 + $0x28] sm:$0xf] }
 0x1ba   : > { %v2252_v19 = vsel %vm375_vm1, %v2245_v9, %v2247_v16  ;;  %2270 = vmatpush1.bf16.msra.mxu0 %v2258_v17 }
 0x1bb   : > { %v2249_v24 = vpop.permute.xlu1 %2248  ;;  %v2264_v33 = vsel %vm514_vm7, %v2252_v19, 0  ;;  %v5338_v27 = vcombine.high %v5330_v11, %v5330_v11 }
 0x1bc   : > { %v2253_v28 = vsel %vm375_vm1, %v2247_v16, %v2249_v24  ;;  %v5138_v16 = vrot.slane %v5133_v0, %v7092_v22 }
 0x1bd   : > { %v3558_v32 = vpop.permute.xlu0 %3557  ;;  %6611 = vmatprep.subr.msk.bf16.mxu1 %vm514_vm7, %v2253_v28  ;;  %v5339_v28 = vcombine.high %v5337_v12, %v5337_v12 }
 0x1be   : > { %v3559_v34 = vrot.slane %v3558_v32, 6  ;;  %2311 = vmatpush1.bf16.msra.mxu1 %v2264_v33  ;;  %6610 = vmatmul.mubr.msk.bf16.vlgmr.msra.gmra.mrb[0].mxu0 %vm510_vm10, %v6608_v25  ;;  %v5144_v33 = vcombine.low %v5131_v15, %v5138_v16 }
 0x1bf   : > { %v2471_v35 = vpop.permute.xlu1 %2470  ;;  %2532 = vmatprep.mubr.bf16.mxu0 %v6992_v2 }
 0x1c0   : > { %v3560_v36 = vsel %vm3173_vm15, %v3559_v34, %v3558_v32  ;;  %v3564_v61 = vmul.bf16 %v3559_v34, %v3480_v48  ;;  %v5143_v32 = vcombine.low %v5117_v8, %v5124_v10  ;;  %v5158_v20 = vrot.slane %v5144_v33, %v7089_v21 }
 0x1c1   : > { %v3563_v41 = vmul.bf16 %v3560_v36, %v7621_v39  ;;  %v2473_v42 = vpop.permute.xlu0 %2472  ;;  %6612 = vmatmul.mubr.msk.bf16.vlgmr.msra.gmra.mrb[0].mxu1 %vm510_vm10, %v6608_v25  ;;  %v3709_v25 = vld [vmem:[#allocation2 + $0xa] sm:$0x3]  ;;  %v5552_v48 = vcombine.high %v6712_v3, %v6712_v3 }
 0x1c2   : > { %v2481_v43 = vsel %vm2480_vm6, %v2471_v35, %v2473_v42  ;;  %2573 = vmatprep.mubr.bf16.mxu1 %v6992_v2  ;;  %v3592_v14 = vrot.slane %v3564_v61, %v7089_v21  ;;  %v5341_v35 = vpack.i.b16 %v5330_v11, %v5330_v11  ;;  %v5151_v47 = vrot.slane %v5143_v32, %v7089_v21  ;;  %v6629_v32 = vld [vmem:[%s8123_s3 + $0x2c] sm:$0xf] }
 0x1c3   : > { %v3569_v44 = vcombine.high %v3563_v41, %v3563_v41  ;;  %v2475_v45 = vpop.permute.xlu1 %2474  ;;  %v3576_v46 = vrot.slane %v3563_v41, %v7089_v21  ;;  %v2489_v52 = vsel %vm514_vm7, %v2481_v43, 0  ;;  %v5348_v43 = vpack.i.b16 %v5337_v12, %v5337_v12 }
 0x1c4   : > { %v2482_v49 = vsel %vm2480_vm6, %v2473_v42, %v2475_v45  ;;  %v5159_v61 = vcombine.low %v5151_v47, %v5158_v20 }
 0x1c5   : > { %v2477_v53 = vpop.permute.xlu0 %2476  ;;  %3593 = vrot.lane.b32.xlu0 %v3576_v46, %s7008_s13  ;;  %6616 = vmatprep.subr.msk.bf16.mxu0 %vm514_vm7, %v2482_v49  ;;  %v3584_v55 = vcombine.high %v3576_v46, %v3576_v46  ;;  %v3583_v56 = vrot.slane %v3569_v44, %v7089_v21  ;;  %v5355_v44 = vpack.i.b16 %v5338_v27, %v5338_v27 }
 0x1c6   : > { %v2483_v58 = vsel %vm2480_vm6, %v2475_v45, %v2477_v53  ;;  %2501 = vmatpush1.bf16.msra.mxu0 %v2489_v52  ;;  %v5362_v45 = vpack.i.b16 %v5339_v28, %v5339_v28  ;;  %v5353_v57 = vrot.slane %v5348_v43, %v7092_v22 }
 0x1c7   : > { %3595 = vrot.lane.b32.xlu1 %v3584_v55, %s7008_s13  ;;  %v2479_v54 = vpop.permute.xlu1 %2478  ;;  %v2495_v4 = vsel %vm514_vm7, %v2483_v58, 0  ;;  %v3585_v6 = vcombine.high %v3583_v56, %v3583_v56  ;;  %v5346_v55 = vrot.slane %v5341_v35, %v7092_v22  ;;  %v5360_v58 = vrot.slane %v5355_v44, %v7092_v22 }
 0x1c8   : > { %v2484_v1 = vsel %vm2480_vm6, %v2477_v53, %v2479_v54  ;;  %v5367_v59 = vrot.slane %v5362_v45, %v7092_v22  ;;  %v5559_v54 = vrot.slane %v6712_v3, %v7079_v18 }
 0x1c9   : > { %v3787_v5 = vpop.permute.xlu0 %3786  ;;  %3597 = vrot.lane.b32.xlu0 %v3583_v56, %s7008_s13  ;;  %6618 = vmatprep.subr.msk.bf16.mxu1 %vm514_vm7, %v2484_v1 }
 0x1ca   : > { %v3788_v9 = vrot.slane %v3787_v5, 6  ;;  %2542 = vmatpush1.bf16.msra.mxu1 %v2495_v4  ;;  %6617 = vmatmul.mubr.msk.bf16.vlgmr.msra.gmra.mrb[0].mxu0 %vm510_vm10, %v6615_v62  ;;  %v3938_v4 = vld [vmem:[#allocation2 + $0xa] sm:$0x3]  ;;  %v5567_v11 = vcombine.high %v5559_v54, %v5559_v54  ;;  %v5570_v27 = vpack.i.b16 %v5559_v54, %v5559_v54 }
 0x1cb   : > { %3599 = vrot.lane.b32.xlu1 %v3585_v6, %s7008_s13  ;;  %v2702_v13 = vpop.permute.xlu1 %2701  ;;  %2763 = vmatprep.mubr.bf16.mxu0 %v6992_v2  ;;  %v5372_v6 = vcombine.low %v5346_v55, %v5353_v57 }
 0x1cc   : > { %v3789_v17 = vsel %vm2942_vm8, %v3788_v9, %v3787_v5  ;;  %v3793_v38 = vmul.bf16 %v3788_v9, %v3709_v25 }
 0x1cd   : > { %v3792_v19 = vmul.bf16 %v3789_v17, %v7621_v39  ;;  %v2704_v24 = vpop.permute.xlu0 %2703  ;;  %3601 = vrot.lane.b32.xlu0 %v3592_v14, %s7008_s13  ;;  %6619 = vmatmul.mubr.msk.bf16.vlgmr.msra.gmra.mrb[0].mxu1 %vm510_vm10, %v6615_v62  ;;  %v5566_v62 = vrot.slane %v5552_v48, %v7079_v18  ;;  %v5380_v25 = vrot.slane %v5372_v6, %v7089_v21 }
 0x1ce   : > { %v2712_v26 = vsel %vm2711_vm9, %v2702_v13, %v2704_v24  ;;  %2804 = vmatprep.mubr.bf16.mxu1 %v6992_v2  ;;  %v3821_v53 = vrot.slane %v3793_v38, %v7089_v21 }
 0x1cf   : > { %v3798_v29 = vcombine.high %v3792_v19, %v3792_v19  ;;  %4931 = vrot.lane.b32.xlu1 %v4930_v7, %s6998_s23  ;;  %v2706_v30 = vpop.permute.xlu1 %2705  ;;  %v3805_v31 = vrot.slane %v3792_v19, %v7089_v21  ;;  %v2720_v36 = vsel %vm514_vm7, %v2712_v26, 0  ;;  %v5373_v7 = vcombine.low %v5360_v58, %v5367_v59  ;;  %v6642_v58 = vld.sshfl [vmem:[%s8124_s4 + $0x34] sm:$0x33 pattern:$0x75316420] }
 0x1d0   : > { %v2713_v34 = vsel %vm2711_vm9, %v2704_v24, %v2706_v30  ;;  %v5568_v12 = vcombine.high %v5566_v62, %v5566_v62  ;;  %v3290_v59 = vcombine.high %v6642_v58, %v6642_v58 }
 0x1d1   : > { %v2708_v37 = vpop.permute.xlu0 %2707  ;;  %3822 = vrot.lane.b32.xlu0 %v3805_v31, %s7007_s26  ;;  %6623 = vmatprep.subr.msk.bf16.mxu0 %vm514_vm7, %v2713_v34  ;;  %v3813_v40 = vcombine.high %v3805_v31, %v3805_v31  ;;  %v3812_v41 = vrot.slane %v3798_v29, %v7089_v21  ;;  %v5387_v26 = vrot.slane %v5373_v7, %v7089_v21 }
 0x1d2   : > { %v2714_v42 = vsel %vm2711_vm9, %v2706_v30, %v2708_v37  ;;  %2732 = vmatpush1.bf16.msra.mxu0 %v2720_v36  ;;  %v5577_v29 = vpack.i.b16 %v5566_v62, %v5566_v62  ;;  %v5584_v30 = vpack.i.b16 %v5567_v11, %v5567_v11  ;;  %v5591_v31 = vpack.i.b16 %v5568_v12, %v5568_v12 }
 0x1d3   : > { %3824 = vrot.lane.b32.xlu1 %v3813_v40, %s7007_s26  ;;  %v2710_v46 = vpop.permute.xlu1 %2709  ;;  %v2726_v50 = vsel %vm514_vm7, %v2714_v42, 0  ;;  %v3814_v52 = vcombine.high %v3812_v41, %v3812_v41  ;;  %v5575_v40 = vrot.slane %v5570_v27, %v7092_v22 }
 0x1d4   : > { %v2715_v49 = vsel %vm2711_vm9, %v2708_v37, %v2710_v46  ;;  %v5388_v37 = vcombine.low %v5380_v25, %v5387_v26  ;;  %v5589_v42 = vrot.slane %v5584_v30, %v7092_v22  ;;  %v5596_v43 = vrot.slane %v5591_v31, %v7092_v22  ;;  %v4167_v46 = vld [vmem:[#allocation2 + $0xa] sm:$0x3] }
 0x1d5   : > { %v4016_v51 = vpop.permute.xlu0 %4015  ;;  %3826 = vrot.lane.b32.xlu0 %v3812_v41, %s7007_s26  ;;  %6625 = vmatprep.subr.msk.bf16.mxu1 %vm514_vm7, %v2715_v49  ;;  %v5582_v41 = vrot.slane %v5577_v29, %v7092_v22 }
 0x1d6   : > { %v4017_v56 = vrot.slane %v4016_v51, 6  ;;  %2773 = vmatpush1.bf16.msra.mxu1 %v2726_v50  ;;  %6624 = vmatmul.mubr.msk.bf16.vlgmr.msra.gmra.mrb[0].mxu0 %vm510_vm10, %v6622_v23  ;;  %v5602_v48 = vcombine.low %v5589_v42, %v5596_v43 }
 0x1d7   : > { %3828 = vrot.lane.b32.xlu1 %v3814_v52, %s7007_s26  ;;  %v2933_v60 = vpop.permute.xlu1 %2932  ;;  %2994 = vmatprep.mubr.bf16.mxu0 %v6992_v2 }
 0x1d8   : > { %v4018_v63 = vsel %vm2711_vm9, %v4017_v56, %v4016_v51  ;;  %v4022_v14 = vmul.bf16 %v4017_v56, %v3938_v4 }
 0x1d9   : > { %v4021_v0 = vmul.bf16 %v4018_v63, %v7621_v39  ;;  %v2935_v1 = vpop.permute.xlu0 %2934  ;;  %3830 = vrot.lane.b32.xlu0 %v3821_v53, %s7007_s26  ;;  %6626 = vmatmul.mubr.msk.bf16.vlgmr.msra.gmra.mrb[0].mxu1 %vm510_vm10, %v6622_v23  ;;  %v5601_v23 = vcombine.low %v5575_v40, %v5582_v41  ;;  %v5616_v53 = vrot.slane %v5602_v48, %v7089_v21 }
 0x1da   : > { %v2943_v5 = vsel %vm2942_vm8, %v2933_v60, %v2935_v1  ;;  %3035 = vmatprep.mubr.bf16.mxu1 %v6992_v2  ;;  %v4050_v34 = vrot.slane %v4022_v14, %v7089_v21  ;;  %v3297_v60 = vrot.slane %v6642_v58, %v7079_v18 }
 0x1db   : > { %v4027_v8 = vcombine.high %v4021_v0, %v4021_v0  ;;  %v4034_v9 = vrot.slane %v4021_v0, %v7089_v21  ;;  %5160 = vrot.lane.b32.xlu1 %v5159_v61, %s6997_s22  ;;  %v2937_v10 = vpop.permute.xlu1 %2936  ;;  %v2951_v17 = vsel %vm514_vm7, %v2943_v5, 0  ;;  %v5609_v52 = vrot.slane %v5601_v23, %v7089_v21 }
 0x1dc   : > { %v2944_v13 = vsel %vm2942_vm8, %v2935_v1, %v2937_v10  ;;  %v3304_v61 = vrot.slane %v3290_v59, %v7079_v18  ;;  %v3305_v54 = vcombine.high %v3297_v60, %v3297_v60  ;;  %v3308_v63 = vpack.i.b16 %v3297_v60, %v3297_v60 }
 0x1dd   : > { %v4041_v15 = vrot.slane %v4027_v8, %v7089_v21  ;;  %v4042_v16 = vcombine.high %v4034_v9, %v4034_v9  ;;  %v2939_v19 = vpop.permute.xlu0 %2938  ;;  %4051 = vrot.lane.b32.xlu0 %v4034_v9, %s7006_s19  ;;  %6630 = vmatprep.subr.msk.bf16.mxu0 %vm514_vm7, %v2944_v13  ;;  %v5617_v57 = vcombine.low %v5609_v52, %v5616_v53  ;;  %v6719_v13 = vld.sshfl [vmem:[%s8124_s4 + $0x60] sm:$0x33 pattern:$0x75316420] }
 0x1de   : > { %v2945_v24 = vsel %vm2942_vm8, %v2937_v10, %v2939_v19  ;;  %2963 = vmatpush1.bf16.msra.mxu0 %v2951_v17  ;;  %v3306_v62 = vcombine.high %v3304_v61, %v3304_v61  ;;  %v3315_v0 = vpack.i.b16 %v3304_v61, %v3304_v61  ;;  %v3322_v1 = vpack.i.b16 %v3305_v54, %v3305_v54 }
 0x1df   : > { %4053 = vrot.lane.b32.xlu1 %v4042_v16, %s7006_s19  ;;  %v2941_v28 = vpop.permute.xlu1 %2940  ;;  %v2957_v35 = vsel %vm514_vm7, %v2945_v24, 0  ;;  %v4043_v38 = vcombine.high %v4041_v15, %v4041_v15  ;;  %v3313_v5 = vrot.slane %v3308_v63, %v7092_v22 }
 0x1e0   : > { %v2946_v33 = vsel %vm2942_vm8, %v2939_v19, %v2941_v28  ;;  %v3329_v4 = vpack.i.b16 %v3306_v62, %v3306_v62  ;;  %v3320_v6 = vrot.slane %v3315_v0, %v7092_v22  ;;  %v3327_v7 = vrot.slane %v3322_v1, %v7092_v22 }
 0x1e1   : > { %v4245_v3 = vpop.permute.xlu0 %4244  ;;  %4055 = vrot.lane.b32.xlu0 %v4041_v15, %s7006_s19  ;;  %6632 = vmatprep.subr.msk.bf16.mxu1 %vm514_vm7, %v2946_v33  ;;  %v5781_v15 = vcombine.high %v6719_v13, %v6719_v13  ;;  %v5788_v19 = vrot.slane %v6719_v13, %v7079_v18 }
 0x1e2   : > { %v4246_v36 = vrot.slane %v4245_v3, 6  ;;  %3004 = vmatpush1.bf16.msra.mxu1 %v2957_v35  ;;  %6631 = vmatmul.mubr.msk.bf16.vlgmr.msra.gmra.mrb[0].mxu0 %vm510_vm10, %v6629_v32  ;;  %v3334_v8 = vrot.slane %v3329_v4, %v7092_v22  ;;  %v3339_v9 = vcombine.low %v3313_v5, %v3320_v6  ;;  %v4396_v5 = vld [vmem:[#allocation2 + $0xa] sm:$0x3] }
 0x1e3   : > { %4057 = vrot.lane.b32.xlu1 %v4043_v38, %s7006_s19  ;;  %3225 = vmatprep.mubr.bf16.mxu0 %v6992_v2  ;;  %v5795_v24 = vrot.slane %v5781_v15, %v7079_v18  ;;  %v5796_v30 = vcombine.high %v5788_v19, %v5788_v19  ;;  %v5799_v40 = vpack.i.b16 %v5788_v19, %v5788_v19 }
 0x1e4   : > { %v4247_v44 = vsel %vm2480_vm6, %v4246_v36, %v4245_v3  ;;  %v4251_v49 = vmul.bf16 %v4246_v36, %v4167_v46  ;;  %v3340_v10 = vcombine.low %v3327_v7, %v3334_v8  ;;  %v3347_v11 = vrot.slane %v3339_v9, %v7089_v21  ;;  %v6733_v7 = vld.sshfl [vmem:[%s8124_s4 + $0x68] sm:$0x33 pattern:$0x75316420] }
 0x1e5   : > { %v4250_v45 = vmul.bf16 %v4247_v44, %v7621_v39  ;;  %4059 = vrot.lane.b32.xlu0 %v4050_v34, %s7006_s19  ;;  %6633 = vmatmul.mubr.msk.bf16.vlgmr.msra.gmra.mrb[0].mxu1 %vm510_vm10, %v6629_v32  ;;  %v5797_v31 = vcombine.high %v5795_v24, %v5795_v24  ;;  %v6726_v32 = vld.sshfl [vmem:[%s8124_s4 + $0x64] sm:$0x33 pattern:$0x75316420]  ;;  %v5806_v43 = vpack.i.b16 %v5795_v24, %v5795_v24  ;;  %vm8129_vm6 = vcmask 596992  }
 0x1e6   : > { %3266 = vmatprep.mubr.bf16.mxu1 %v6992_v2  ;;  %v4279_v55 = vrot.slane %v4251_v49, %v7089_v21  ;;  %v3354_v12 = vrot.slane %v3340_v10, %v7089_v21  ;;  %v6010_v41 = vcombine.high %v6726_v32, %v6726_v32  ;;  %v5813_v44 = vpack.i.b16 %v5796_v30, %v5796_v30  ;;  %vm8130_vm8 = vmmov %vm8129_vm6 }
 0x1e7   : > { %v4256_v47 = vcombine.high %v4250_v45, %v4250_v45  ;;  %v4263_v20 = vrot.slane %v4250_v45, %v7089_v21  ;;  %5389 = vrot.lane.b32.xlu1 %v5388_v37, %s7000_s25  ;;  %v6636_v37 = vld [vmem:[%s8123_s3 + $0x30] sm:$0xf]  ;;  %v5820_v45 = vpack.i.b16 %v5797_v31, %v5797_v31  ;;  %v6239_v19 = vcombine.high %v6733_v7, %v6733_v7  ;;  %vm8131_vm9 = vmmov %vm8129_vm6 }
 0x1e8   : > { %v3355_v14 = vcombine.low %v3347_v11, %v3354_v12  ;;  %v6024_v52 = vrot.slane %v6010_v41, %v7079_v18  ;;  %v6643_v12 = vld [vmem:[%s8123_s3 + $0x34] sm:$0xf] }
 0x1e9   : > { %v4270_v50 = vrot.slane %v4256_v47, %v7089_v21  ;;  %v4271_v51 = vcombine.high %v4263_v20, %v4263_v20  ;;  %4280 = vrot.lane.b32.xlu0 %v4263_v20, %s7005_s17 }
 0x1ea   : > { %v3357_v16 = vmul.bf16 %v7621_v39, %v3355_v14  ;;  %v6026_v62 = vcombine.high %v6024_v52, %v6024_v52  ;;  %v6035_v10 = vpack.i.b16 %v6024_v52, %v6024_v52 }
 0x1eb   : > { %4282 = vrot.lane.b32.xlu1 %v4271_v51, %s7005_s17  ;;  %v4272_v56 = vcombine.high %v4270_v50, %v4270_v50  ;;  %v6017_v51 = vrot.slane %v6726_v32, %v7079_v18 }
 0x1ec   : > { %v3368_v26 = vrot.slane %v3357_v16, %v7089_v21  ;;  %v3361_v27 = vcombine.high %v3357_v16, %v3357_v16  ;;  %v6049_v14 = vpack.i.b16 %v6026_v62, %v6026_v62 }
 0x1ed   : > { %4284 = vrot.lane.b32.xlu0 %v4270_v50, %s7005_s17  ;;  %v5804_v50 = vrot.slane %v5799_v40, %v7092_v22  ;;  %v6025_v54 = vcombine.high %v6017_v51, %v6017_v51  ;;  %v6028_v6 = vpack.i.b16 %v6017_v51, %v6017_v51 }
 0x1ee   : > { %v3376_v3 = vcombine.high %v3368_v26, %v3368_v26  ;;  %v3375_v38 = vrot.slane %v3361_v27, %v7089_v21  ;;  %v3382_v23 = vsel %vm514_vm7, %v3368_v26, 0  ;;  %v6040_v27 = vrot.slane %v6035_v10, %v7092_v22 }
 0x1ef   : > { %4286 = vrot.lane.b32.xlu1 %v4272_v56, %s7005_s17  ;;  %v5818_v56 = vrot.slane %v5813_v44, %v7092_v22  ;;  %v6042_v13 = vpack.i.b16 %v6025_v54, %v6025_v54  ;;  %v6033_v24 = vrot.slane %v6028_v6, %v7092_v22 }
 0x1f0   : > { %v3377_v48 = vcombine.high %v3375_v38, %v3375_v38  ;;  %v3388_v60 = vsel %vm514_vm7, %v3375_v38, 0 }
 0x1f1   : > { %4288 = vrot.lane.b32.xlu0 %v4279_v55, %s7005_s17  ;;  %v5811_v55 = vrot.slane %v5806_v43, %v7092_v22 }
 0x1f3   : > { %5618 = vrot.lane.b32.xlu1 %v5617_v57, %s6999_s24  ;;  %v5825_v57 = vrot.slane %v5820_v45, %v7092_v22  ;;  %v5830_v1 = vcombine.low %v5804_v50, %v5811_v55 }
 0x1f5   : > { %v5831_v4 = vcombine.low %v5818_v56, %v5825_v57  ;;  %v5838_v16 = vrot.slane %v5830_v1, %v7089_v21  ;;  %v6650_v56 = vld [vmem:[%s8123_s3 + $0x38] sm:$0xf] }
 0x21f   : > { %v3164_v17 = vpop.permute.xlu1 %3163 }
 0x221   : > { %v3166_v25 = vpop.permute.xlu0 %3165 }
 0x222   : > { %v3174_v28 = vsel %vm3173_vm15, %v3164_v17, %v3166_v25  ;;  %v5845_v17 = vrot.slane %v5831_v4, %v7089_v21 }
 0x223   : > { %v3168_v29 = vpop.permute.xlu1 %3167  ;;  %v3182_v34 = vsel %vm514_vm7, %v3174_v28, 0  ;;  %v6047_v28 = vrot.slane %v6042_v13, %v7092_v22 }
 0x224   : > { %v3175_v33 = vsel %vm3173_vm15, %v3166_v25, %v3168_v29  ;;  %v5846_v32 = vcombine.low %v5838_v16, %v5845_v17 }
 0x225   : > { %v3170_v35 = vpop.permute.xlu0 %3169  ;;  %6637 = vmatprep.subr.msk.bf16.mxu0 %vm514_vm7, %v3175_v33  ;;  %v6246_v33 = vrot.slane %v6733_v7, %v7079_v18 }
 0x226   : > { %v3176_v36 = vsel %vm3173_vm15, %v3168_v29, %v3170_v35  ;;  %3194 = vmatpush1.bf16.msra.mxu0 %v3182_v34  ;;  %v6054_v29 = vrot.slane %v6049_v14, %v7092_v22  ;;  %v6253_v34 = vrot.slane %v6239_v19, %v7079_v18  ;;  %v4625_v18 = vld [vmem:[#allocation2 + $0xa] sm:$0x3] }
 0x227   : > { %6644 = vmatprep.subr.msk.bf16.mxu0 %vm514_vm7, %v3376_v3  ;;  %v3172_v42 = vpop.permute.xlu1 %3171  ;;  %v3188_v47 = vsel %vm514_vm7, %v3176_v36, 0  ;;  %v6059_v36 = vcombine.low %v6033_v24, %v6040_v27  ;;  %v6257_v50 = vpack.i.b16 %v6246_v33, %v6246_v33 }
 0x228   : > { %v3177_v46 = vsel %vm3173_vm15, %v3170_v35, %v3172_v42  ;;  %v6060_v40 = vcombine.low %v6047_v28, %v6054_v29  ;;  %v6254_v42 = vcombine.high %v6246_v33, %v6246_v33  ;;  %v6255_v43 = vcombine.high %v6253_v34, %v6253_v34 }
 0x229   : > { %v4474_v20 = vpop.permute.xlu0 %4473  ;;  %6639 = vmatprep.subr.msk.bf16.mxu1 %vm514_vm7, %v3177_v46  ;;  %6638 = vmatmul.mubr.msk.bf16.vlgmr.msra.gmra.mrb[0].mxu0 %vm510_vm10, %v6636_v37  ;;  %v6264_v51 = vpack.i.b16 %v6253_v34, %v6253_v34 }
 0x22a   : > { %v4475_v49 = vrot.slane %v4474_v20, 6  ;;  %3235 = vmatpush1.bf16.msra.mxu1 %v3188_v47  ;;  %3394 = vmatpush1.bf16.msra.mxu0 %v3382_v23  ;;  %v6067_v23 = vrot.slane %v6059_v36, %v7089_v21  ;;  %v6271_v57 = vpack.i.b16 %v6254_v42, %v6254_v42 }
 0x22b   : > { %6646 = vmatprep.subr.msk.bf16.mxu1 %vm514_vm7, %v3377_v48  ;;  %v7784_v53 = vpop.permute.xlu1 %4702  ;;  %3425 = vmatprep.mubr.bf16.mxu0 %v6992_v2 }
 0x22c   : > { %v4476_v58 = vsel %vm375_vm1, %v4475_v49, %v4474_v20  ;;  %v4704_v61 = vrot.slane %v7784_v53, 6  ;;  %v4480_v15 = vmul.bf16 %v4475_v49, %v4396_v5  ;;  %v6074_v49 = vrot.slane %v6060_v40, %v7089_v21 }
 0x22d   : > { %v4479_v59 = vmul.bf16 %v4476_v58, %v7621_v39  ;;  %6640 = vmatmul.mubr.msk.bf16.vlgmr.msra.gmra.mrb[0].mxu1 %vm510_vm10, %v6636_v37  ;;  %v6278_v58 = vpack.i.b16 %v6255_v43, %v6255_v43  ;;  %v6276_v5 = vrot.slane %v6271_v57, %v7092_v22  ;;  %v5083_v43 = vld [vmem:[#allocation2 + $0xa] sm:$0x3] }
 0x22e   : > { %3435 = vmatpush1.bf16.msra.mxu1 %v3388_v60  ;;  %3466 = vmatprep.mubr.bf16.mxu1 %v6992_v2  ;;  %v4705_v11 = vsel %vm461_vm0, %v4704_v61, %v7784_v53  ;;  %v4508_v30 = vrot.slane %v4480_v15, %v7089_v21  ;;  %v4709_v52 = vmul.bf16 %v4704_v61, %v4625_v18  ;;  %v4854_v15 = vld [vmem:[#allocation2 + $0xa] sm:$0x3] }
 0x22f   : > { %v4485_v63 = vcombine.high %v4479_v59, %v4479_v59  ;;  %v4492_v0 = vrot.slane %v4479_v59, %v7089_v21  ;;  %v4708_v25 = vmul.bf16 %v4705_v11, %v7621_v39  ;;  %v6075_v62 = vcombine.low %v6067_v23, %v6074_v49 }
 0x230   : > { %v4737_v1 = vrot.slane %v4709_v52, %v7089_v21  ;;  %v6283_v6 = vrot.slane %v6278_v58, %v7092_v22 }
 0x231   : > { %v4499_v8 = vrot.slane %v4485_v63, %v7089_v21  ;;  %v4500_v9 = vcombine.high %v4492_v0, %v4492_v0  ;;  %4509 = vrot.lane.b32.xlu0 %v4492_v0, %s7004_s11  ;;  %v4714_v35 = vcombine.high %v4708_v25, %v4708_v25  ;;  %v4721_v3 = vrot.slane %v4708_v25, %v7089_v21 }
 0x232   : > { %v6262_v63 = vrot.slane %v6257_v50, %v7092_v22  ;;  %v6269_v0 = vrot.slane %v6264_v51, %v7092_v22  ;;  %v6289_v14 = vcombine.low %v6276_v5, %v6283_v6 }
 0x233   : > { %4511 = vrot.lane.b32.xlu1 %v4500_v9, %s7004_s11  ;;  %v4501_v26 = vcombine.high %v4499_v8, %v4499_v8  ;;  %v4728_v45 = vrot.slane %v4714_v35, %v7089_v21  ;;  %v4729_v46 = vcombine.high %v4721_v3, %v4721_v3 }
 0x234   : > { %v6288_v22 = vcombine.low %v6262_v63, %v6269_v0  ;;  %v5312_v0 = vld [vmem:[#allocation2 + $0xa] sm:$0x3] }
 0x235   : > { %4513 = vrot.lane.b32.xlu0 %v4499_v8, %s7004_s11  ;;  %6645 = vmatmul.mubr.msk.bf16.vlgmr.msra.gmra.mrb[0].mxu0 %vm510_vm10, %v6643_v12  ;;  %v4730_v53 = vcombine.high %v4728_v45, %v4728_v45 }
 0x236   : > { %3654 = vmatprep.mubr.bf16.mxu0 %v6992_v2  ;;  %v6296_v29 = vrot.slane %v6288_v22, %v7089_v21 }
 0x237   : > { %4515 = vrot.lane.b32.xlu1 %v4501_v26, %s7004_s11  ;;  %v3594_v31 = vpop.permute.xlu0 %3593 }
 0x239   : > { %4517 = vrot.lane.b32.xlu0 %v4508_v30, %s7004_s11  ;;  %v3596_v38 = vpop.permute.xlu1 %3595  ;;  %6647 = vmatmul.mubr.msk.bf16.vlgmr.msra.gmra.mrb[0].mxu1 %vm510_vm10, %v6643_v12  ;;  %v6303_v30 = vrot.slane %v6289_v14, %v7089_v21  ;;  %v6671_v14 = vld [vmem:[%s8123_s3 + $0x44] sm:$0xf] }
 0x23a   : > { %v3603_v37 = vsel %vm3129_vm14, %v3594_v31, %v3596_v38  ;;  %3695 = vmatprep.mubr.bf16.mxu1 %v6992_v2  ;;  %v6657_v31 = vld [vmem:[%s8123_s3 + $0x3c] sm:$0xf] }
 0x23b   : > { %5847 = vrot.lane.b32.xlu1 %v5846_v32, %s7003_s8  ;;  %v3598_v41 = vpop.permute.xlu0 %3597  ;;  %v3611_v47 = vsel %vm514_vm7, %v3603_v37, 0  ;;  %v6304_v37 = vcombine.low %v6296_v29, %v6303_v30 }
 0x23c   : > { %v3604_v44 = vsel %vm3129_vm14, %v3596_v38, %v3598_v41 }
 0x23d   : > { %4738 = vrot.lane.b32.xlu0 %v4721_v3, %s7002_s7  ;;  %6651 = vmatprep.subr.msk.bf16.mxu0 %vm514_vm7, %v3604_v44  ;;  %v3600_v20 = vpop.permute.xlu1 %3599 }
 0x23e   : > { %v3605_v48 = vsel %vm3129_vm14, %v3598_v41, %v3600_v20  ;;  %3623 = vmatpush1.bf16.msra.mxu0 %v3611_v47 }
 0x23f   : > { %v3602_v55 = vpop.permute.xlu0 %3601  ;;  %4740 = vrot.lane.b32.xlu1 %v4729_v46, %s7002_s7  ;;  %v3617_v60 = vsel %vm514_vm7, %v3605_v48, 0 }
 0x240   : > { %v3606_v59 = vsel %vm3129_vm14, %v3600_v20, %v3602_v55  ;;  %v6664_v55 = vld [vmem:[%s8123_s3 + $0x40] sm:$0xf] }
 0x241   : > { %4742 = vrot.lane.b32.xlu0 %v4728_v45, %s7002_s7  ;;  %6653 = vmatprep.subr.msk.bf16.mxu1 %vm514_vm7, %v3606_v59  ;;  %v4932_v54 = vpop.permute.xlu1 %4931 }
 0x242   : > { %v4933_v61 = vrot.slane %v4932_v54, 6  ;;  %3664 = vmatpush1.bf16.msra.mxu1 %v3617_v60  ;;  %6652 = vmatmul.mubr.msk.bf16.vlgmr.msra.gmra.mrb[0].mxu0 %vm510_vm10, %v6650_v56 }
 0x243   : > { %v3823_v4 = vpop.permute.xlu0 %3822  ;;  %4744 = vrot.lane.b32.xlu1 %v4730_v53, %s7002_s7  ;;  %3883 = vmatprep.mubr.bf16.mxu0 %v6992_v2 }
 0x244   : > { %v4934_v7 = vsel %vm828_vm2, %v4933_v61, %v4932_v54  ;;  %v4938_v27 = vmul.bf16 %v4933_v61, %v4854_v15 }
 0x245   : > { %v4937_v8 = vmul.bf16 %v4934_v7, %v7621_v39  ;;  %4746 = vrot.lane.b32.xlu0 %v4737_v1, %s7002_s7  ;;  %v3825_v9 = vpop.permute.xlu1 %3824  ;;  %6654 = vmatmul.mubr.msk.bf16.vlgmr.msra.gmra.mrb[0].mxu1 %vm510_vm10, %v6650_v56 }
 0x246   : > { %v3832_v10 = vsel %vm2898_vm13, %v3823_v4, %v3825_v9  ;;  %3924 = vmatprep.mubr.bf16.mxu1 %v6992_v2  ;;  %v4966_v38 = vrot.slane %v4938_v27, %v7089_v21 }
 0x247   : > { %v4943_v11 = vcombine.high %v4937_v8, %v4937_v8  ;;  %v4950_v12 = vrot.slane %v4937_v8, %v7089_v21  ;;  %v3827_v13 = vpop.permute.xlu0 %3826  ;;  %6076 = vrot.lane.b32.xlu1 %v6075_v62, %s7002_s7  ;;  %v3840_v24 = vsel %vm514_vm7, %v3832_v10, 0 }
 0x248   : > { %v3833_v16 = vsel %vm2898_vm13, %v3825_v9, %v3827_v13 }
 0x249   : > { %v4957_v17 = vrot.slane %v4943_v11, %v7089_v21  ;;  %v4958_v19 = vcombine.high %v4950_v12, %v4950_v12  ;;  %4967 = vrot.lane.b32.xlu0 %v4950_v12, %s7003_s8  ;;  %6658 = vmatprep.subr.msk.bf16.mxu0 %vm514_vm7, %v3833_v16  ;;  %v3829_v25 = vpop.permute.xlu1 %3828 }
 0x24a   : > { %v3834_v26 = vsel %vm2898_vm13, %v3827_v13, %v3829_v25  ;;  %3852 = vmatpush1.bf16.msra.mxu0 %v3840_v24 }
 0x24b   : > { %v3831_v28 = vpop.permute.xlu0 %3830  ;;  %4969 = vrot.lane.b32.xlu1 %v4958_v19, %s7003_s8  ;;  %v3846_v33 = vsel %vm514_vm7, %v3834_v26, 0  ;;  %v4959_v35 = vcombine.high %v4957_v17, %v4957_v17 }
 0x24c   : > { %v3835_v32 = vsel %vm2898_vm13, %v3829_v25, %v3831_v28  ;;  %v5541_v28 = vld [vmem:[#allocation2 + $0xa] sm:$0x3]  ;;  %vm8134_vm13 = vcmask 588800  }
 0x24d   : > { %4971 = vrot.lane.b32.xlu0 %v4957_v17, %s7003_s8  ;;  %6660 = vmatprep.subr.msk.bf16.mxu1 %vm514_vm7, %v3835_v32  ;;  %v5161_v34 = vpop.permute.xlu1 %5160  ;;  %vm8135_vm14 = vmmov %vm8134_vm13 }
 0x24e   : > { %v5162_v3 = vrot.slane %v5161_v34, 6  ;;  %3893 = vmatpush1.bf16.msra.mxu1 %v3846_v33  ;;  %6659 = vmatmul.mubr.msk.bf16.vlgmr.msra.gmra.mrb[0].mxu0 %vm510_vm10, %v6657_v31  ;;  %vm8136_vm15 = vmmov %vm8134_vm13 }
 0x24f   : > { %v4052_v36 = vpop.permute.xlu0 %4051  ;;  %4973 = vrot.lane.b32.xlu1 %v4959_v35, %s7003_s8  ;;  %4112 = vmatprep.mubr.bf16.mxu0 %v6992_v2 }
 0x250   : > { %v5163_v40 = vsel %vm1059_vm3, %v5162_v3, %v5161_v34  ;;  %v5167_v20 = vmul.bf16 %v5162_v3, %v5083_v43  ;;  %v6678_v43 = vld [vmem:[%s8123_s3 + $0x48] sm:$0xf] }
 0x251   : > { %v5166_v41 = vmul.bf16 %v5163_v40, %v7621_v39  ;;  %4975 = vrot.lane.b32.xlu0 %v4966_v38, %s7003_s8  ;;  %v4054_v42 = vpop.permute.xlu1 %4053  ;;  %6661 = vmatmul.mubr.msk.bf16.vlgmr.msra.gmra.mrb[0].mxu1 %vm510_vm10, %v6657_v31 }
 0x252   : > { %v4061_v18 = vsel %vm2667_vm12, %v4052_v36, %v4054_v42  ;;  %4153 = vmatprep.mubr.bf16.mxu1 %v6992_v2  ;;  %v5195_v57 = vrot.slane %v5167_v20, %v7089_v21 }
 0x253   : > { %v5172_v44 = vcombine.high %v5166_v41, %v5166_v41  ;;  %v5179_v45 = vrot.slane %v5166_v41, %v7089_v21  ;;  %v4056_v46 = vpop.permute.xlu0 %4055  ;;  %6305 = vrot.lane.b32.xlu1 %v6304_v37, %s7004_s11  ;;  %v4069_v49 = vsel %vm514_vm7, %v4061_v18, 0 }
 0x254   : > { %v4062_v47 = vsel %vm2667_vm12, %v4054_v42, %v4056_v46 }
 0x255   : > { %v5186_v23 = vrot.slane %v5172_v44, %v7089_v21  ;;  %v5187_v48 = vcombine.high %v5179_v45, %v5179_v45  ;;  %5196 = vrot.lane.b32.xlu0 %v5179_v45, %s6999_s24  ;;  %6665 = vmatprep.subr.msk.bf16.mxu0 %vm514_vm7, %v4062_v47  ;;  %v4058_v50 = vpop.permute.xlu1 %4057 }
 0x256   : > { %v4063_v51 = vsel %vm2667_vm12, %v4056_v46, %v4058_v50  ;;  %4081 = vmatpush1.bf16.msra.mxu0 %v4069_v49 }
 0x257   : > { %v4060_v52 = vpop.permute.xlu0 %4059  ;;  %5198 = vrot.lane.b32.xlu1 %v5187_v48, %s6999_s24  ;;  %v4075_v58 = vsel %vm514_vm7, %v4063_v51, 0  ;;  %v5188_v60 = vcombine.high %v5186_v23, %v5186_v23 }
 0x258   : > { %v4064_v56 = vsel %vm2667_vm12, %v4058_v50, %v4060_v52  ;;  %vm8133_vm12 = vcmask 580608  }
 0x259   : > { %5200 = vrot.lane.b32.xlu0 %v5186_v23, %s6999_s24  ;;  %6667 = vmatprep.subr.msk.bf16.mxu1 %vm514_vm7, %v4064_v56  ;;  %v5390_v59 = vpop.permute.xlu1 %5389  ;;  %v7961_v23 = vld [vmem:[#allocation2 + $0x2] sm:$0xff] }
 0x25a   : > { %v5391_v54 = vrot.slane %v5390_v59, 6  ;;  %4122 = vmatpush1.bf16.msra.mxu1 %v4075_v58  ;;  %6666 = vmatmul.mubr.msk.bf16.vlgmr.msra.gmra.mrb[0].mxu0 %vm510_vm10, %v6664_v55 }
 0x25b   : > { %v4281_v53 = vpop.permute.xlu0 %4280  ;;  %5202 = vrot.lane.b32.xlu1 %v5188_v60, %s6999_s24  ;;  %4341 = vmatprep.mubr.bf16.mxu0 %v6992_v2 }
 0x25c   : > { %v5392_v61 = vsel %vm1290_vm4, %v5391_v54, %v5390_v59  ;;  %v5396_v8 = vmul.bf16 %v5391_v54, %v5312_v0  ;;  %v6685_v0 = vld [vmem:[%s8123_s3 + $0x4c] sm:$0xf] }
 0x25d   : > { %v5395_v62 = vmul.bf16 %v5392_v61, %v7621_v39  ;;  %5204 = vrot.lane.b32.xlu0 %v5195_v57, %s6999_s24  ;;  %v4283_v63 = vpop.permute.xlu1 %4282  ;;  %6668 = vmatmul.mubr.msk.bf16.vlgmr.msra.gmra.mrb[0].mxu1 %vm510_vm10, %v6664_v55  ;;  %v5770_v57 = vld [vmem:[#allocation2 + $0xa] sm:$0x3] }
 0x25e   : > { %v4290_v1 = vsel %vm2436_vm11, %v4281_v53, %v4283_v63  ;;  %4382 = vmatprep.mubr.bf16.mxu1 %v6992_v2  ;;  %v5424_v16 = vrot.slane %v5396_v8, %v7089_v21 }
 0x25f   : > { %v5401_v4 = vcombine.high %v5395_v62, %v5395_v62  ;;  %v5408_v5 = vrot.slane %v5395_v62, %v7089_v21  ;;  %v4285_v6 = vpop.permute.xlu0 %4284  ;;  %v4298_v11 = vsel %vm514_vm7, %v4290_v1, 0 }
 0x260   : > { %v4291_v7 = vsel %vm2436_vm11, %v4283_v63, %v4285_v6 }
 0x261   : > { %v5415_v9 = vrot.slane %v5401_v4, %v7089_v21  ;;  %v5416_v10 = vcombine.high %v5408_v5, %v5408_v5  ;;  %5425 = vrot.lane.b32.xlu1 %v5408_v5, %s7000_s25  ;;  %6672 = vmatprep.subr.msk.bf16.mxu0 %vm514_vm7, %v4291_v7  ;;  %v4287_v12 = vpop.permute.xlu1 %4286 }
 0x262   : > { %v4292_v13 = vsel %vm2436_vm11, %v4285_v6, %v4287_v12  ;;  %4310 = vmatpush1.bf16.msra.mxu0 %v4298_v11 }
 0x263   : > { %v4289_v22 = vpop.permute.xlu0 %4288  ;;  %5427 = vrot.lane.b32.xlu0 %v5416_v10, %s7000_s25  ;;  %v4304_v17 = vsel %vm514_vm7, %v4292_v13, 0  ;;  %v5417_v24 = vcombine.high %v5415_v9, %v5415_v9 }
 0x264   : > { %v4293_v15 = vsel %vm2436_vm11, %v4287_v12, %v4289_v22  ;;  %vm8132_vm11 = vmmov %vm8129_vm6 }
 0x265   : > { %5429 = vrot.lane.b32.xlu1 %v5415_v9, %s7000_s25  ;;  %6674 = vmatprep.subr.msk.bf16.mxu1 %vm514_vm7, %v4293_v15  ;;  %v5619_v19 = vpop.permute.xlu1 %5618 }
 0x266   : > { %v5620_v25 = vrot.slane %v5619_v19, 6  ;;  %4351 = vmatpush1.bf16.msra.mxu1 %v4304_v17  ;;  %6673 = vmatmul.mubr.msk.bf16.vlgmr.msra.gmra.mrb[0].mxu0 %vm510_vm10, %v6671_v14 }
 0x267   : > { %5431 = vrot.lane.b32.xlu0 %v5417_v24, %s7000_s25  ;;  %4570 = vmatprep.mubr.bf16.mxu0 %v6992_v2 }
 0x268   : > { %v5621_v26 = vsel %vm1103_vm5, %v5620_v25, %v5619_v19  ;;  %v5625_v31 = vmul.bf16 %v5620_v25, %v5541_v28 }
 0x269   : > { %v5624_v27 = vmul.bf16 %v5621_v26, %v7621_v39  ;;  %5433 = vrot.lane.b32.xlu1 %v5424_v16, %s7000_s25  ;;  %6675 = vmatmul.mubr.msk.bf16.vlgmr.msra.gmra.mrb[0].mxu1 %vm510_vm10, %v6671_v14  ;;  %v5999_v16 = vld [vmem:[#allocation2 + $0xa] sm:$0x3] }
 0x26a   : > { %4611 = vmatprep.mubr.bf16.mxu1 %v6992_v2  ;;  %v5653_v39 = vrot.slane %v5625_v31, %v7089_v21 }
 0x26b   : > { %v5630_v29 = vcombine.high %v5624_v27, %v5624_v27  ;;  %v5637_v30 = vrot.slane %v5624_v27, %v7089_v21 }
 0x26d   : > { %v5644_v32 = vrot.slane %v5630_v29, %v7089_v21  ;;  %v5645_v33 = vcombine.high %v5637_v30, %v5637_v30  ;;  %5654 = vrot.lane.b32.xlu0 %v5637_v30, %s6997_s22  ;;  %v6692_v30 = vld [vmem:[%s8123_s3 + $0x50] sm:$0xf] }
 0x26f   : > { %5656 = vrot.lane.b32.xlu1 %v5645_v33, %s6997_s22  ;;  %v5646_v34 = vcombine.high %v5644_v32, %v5644_v32 }
 0x271   : > { %5658 = vrot.lane.b32.xlu0 %v5644_v32, %s6997_s22 }
 0x273   : > { %5660 = vrot.lane.b32.xlu1 %v5646_v34, %s6997_s22 }
 0x275   : > { %5662 = vrot.lane.b32.xlu0 %v5653_v39, %s6997_s22 }
 0x2a3   : > { %v4510_v35 = vpop.permute.xlu0 %4509 }
 0x2a5   : > { %v4512_v3 = vpop.permute.xlu1 %4511 }
 0x2a6   : > { %v4519_v38 = vsel %vm8129_vm6, %v4510_v35, %v4512_v3  ;;  %vm8137_vm6 = vmmov %vm8134_vm13 }
 0x2a7   : > { %v4514_v36 = vpop.permute.xlu0 %4513  ;;  %v4527_v40 = vsel %vm514_vm7, %v4519_v38, 0 }
 0x2a8   : > { %v4520_v37 = vsel %vm8130_vm8, %v4512_v3, %v4514_v36  ;;  %vm8138_vm8 = vmmov %vm8137_vm6 }
 0x2a9   : > { %6679 = vmatprep.subr.msk.bf16.mxu0 %vm514_vm7, %v4520_v37  ;;  %v4516_v41 = vpop.permute.xlu1 %4515 }
 0x2aa   : > { %v4521_v42 = vsel %vm8131_vm9, %v4514_v36, %v4516_v41  ;;  %4539 = vmatpush1.bf16.msra.mxu0 %v4527_v40  ;;  %vm8139_vm9 = vmmov %vm8133_vm12 }
 0x2ab   : > { %v4518_v18 = vpop.permute.xlu0 %4517  ;;  %v4533_v45 = vsel %vm514_vm7, %v4521_v42, 0 }
 0x2ac   : > { %v4522_v44 = vsel %vm8132_vm11, %v4516_v41, %v4518_v18  ;;  %vm8140_vm11 = vmmov %vm8139_vm9  ;;  %v6228_v18 = vld [vmem:[#allocation2 + $0xa] sm:$0x3] }
 0x2ad   : > { %6681 = vmatprep.subr.msk.bf16.mxu1 %vm514_vm7, %v4522_v44  ;;  %v5848_v46 = vpop.permute.xlu1 %5847  ;;  %6680 = vmatmul.mubr.msk.bf16.vlgmr.msra.gmra.mrb[0].mxu0 %vm510_vm10, %v6678_v43 }
 0x2ae   : > { %v5849_v47 = vrot.slane %v5848_v46, 6  ;;  %4580 = vmatpush1.bf16.msra.mxu1 %v4533_v45  ;;  %4799 = vmatprep.mubr.bf16.mxu0 %v6992_v2 }
 0x2af   : > { %v4739_v20 = vpop.permute.xlu0 %4738 }
 0x2b0   : > { %v5850_v48 = vsel %vm8133_vm12, %v5849_v47, %v5848_v46  ;;  %v5854_v62 = vmul.bf16 %v5849_v47, %v5770_v57  ;;  %vm8141_vm12 = vmmov %vm8139_vm9 }
 0x2b1   : > { %v5853_v49 = vmul.bf16 %v5850_v48, %v7961_v23  ;;  %v4741_v50 = vpop.permute.xlu1 %4740  ;;  %6682 = vmatmul.mubr.msk.bf16.vlgmr.msra.gmra.mrb[0].mxu1 %vm510_vm10, %v6678_v43 }
 0x2b2   : > { %v4748_v51 = vsel %vm8134_vm13, %v4739_v20, %v4741_v50  ;;  %4840 = vmatprep.mubr.bf16.mxu1 %v6992_v2  ;;  %v5882_v8 = vrot.slane %v5854_v62, %v7089_v21  ;;  %vm8142_vm13 = vmmov %vm8139_vm9 }
 0x2b3   : > { %v5859_v52 = vcombine.high %v5853_v49, %v5853_v49  ;;  %v5866_v55 = vrot.slane %v5853_v49, %v7089_v21  ;;  %v4743_v56 = vpop.permute.xlu0 %4742  ;;  %v4756_v54 = vsel %vm514_vm7, %v4748_v51, 0 }
 0x2b4   : > { %v4749_v58 = vsel %vm8135_vm14, %v4741_v50, %v4743_v56  ;;  %vm8143_vm14 = vcmask 596992   ;;  %v6699_v50 = vld [vmem:[%s8123_s3 + $0x54] sm:$0xf] }
 0x2b5   : > { %v5873_v59 = vrot.slane %v5859_v52, %v7089_v21  ;;  %v5874_v60 = vcombine.high %v5866_v55, %v5866_v55  ;;  %5883 = vrot.lane.b32.xlu1 %v5866_v55, %s6998_s23  ;;  %6686 = vmatprep.subr.msk.bf16.mxu0 %vm514_vm7, %v4749_v58  ;;  %v4745_v53 = vpop.permute.xlu1 %4744 }
 0x2b6   : > { %v4750_v61 = vsel %vm8136_vm15, %v4743_v56, %v4745_v53  ;;  %4768 = vmatpush1.bf16.msra.mxu0 %v4756_v54 }
 0x2b7   : > { %v4747_v63 = vpop.permute.xlu0 %4746  ;;  %5885 = vrot.lane.b32.xlu0 %v5874_v60, %s6998_s23  ;;  %v4762_v4 = vsel %vm514_vm7, %v4750_v61, 0  ;;  %v5875_v6 = vcombine.high %v5873_v59, %v5873_v59 }
 0x2b8   : > { %v4751_v1 = vsel %vm8137_vm6, %v4745_v53, %v4747_v63  ;;  %v6706_v63 = vld [vmem:[%s8123_s3 + $0x58] sm:$0xf] }
 0x2b9   : > { %5887 = vrot.lane.b32.xlu1 %v5873_v59, %s6998_s23  ;;  %6688 = vmatprep.subr.msk.bf16.mxu1 %vm514_vm7, %v4751_v1  ;;  %v6077_v5 = vpop.permute.xlu1 %6076 }
 0x2ba   : > { %v6078_v7 = vrot.slane %v6077_v5, 6  ;;  %4809 = vmatpush1.bf16.msra.mxu1 %v4762_v4  ;;  %6687 = vmatmul.mubr.msk.bf16.vlgmr.msra.gmra.mrb[0].mxu0 %vm510_vm10, %v6685_v0 }
 0x2bb   : > { %v4968_v9 = vpop.permute.xlu0 %4967  ;;  %5889 = vrot.lane.b32.xlu0 %v5875_v6, %s6998_s23  ;;  %5028 = vmatprep.mubr.bf16.mxu0 %v6992_v2 }
 0x2bc   : > { %v6079_v10 = vsel %vm8138_vm8, %v6078_v7, %v6077_v5  ;;  %v6083_v28 = vmul.bf16 %v6078_v7, %v5999_v16 }
 0x2bd   : > { %v6082_v11 = vmul.bf16 %v6079_v10, %v7961_v23  ;;  %5891 = vrot.lane.b32.xlu1 %v5882_v8, %s6998_s23  ;;  %v4970_v12 = vpop.permute.xlu1 %4969  ;;  %6689 = vmatmul.mubr.msk.bf16.vlgmr.msra.gmra.mrb[0].mxu1 %vm510_vm10, %v6685_v0 }
 0x2be   : > { %v4977_v13 = vsel %vm8139_vm9, %v4968_v9, %v4970_v12  ;;  %5069 = vmatprep.mubr.bf16.mxu1 %v6992_v2  ;;  %v6111_v35 = vrot.slane %v6083_v28, %v7089_v21  ;;  %v6720_v28 = vld [vmem:[%s8123_s3 + $0x60] sm:$0xf] }
 0x2bf   : > { %v6088_v22 = vcombine.high %v6082_v11, %v6082_v11  ;;  %v6095_v14 = vrot.slane %v6082_v11, %v7089_v21  ;;  %v4972_v15 = vpop.permute.xlu0 %4971  ;;  %v4985_v25 = vsel %vm514_vm7, %v4977_v13, 0  ;;  %v6713_v13 = vld [vmem:[%s8123_s3 + $0x5c] sm:$0xf] }
 0x2c0   : > { %v4978_v17 = vsel %vm8140_vm11, %v4970_v12, %v4972_v15 }
 0x2c1   : > { %v6102_v19 = vrot.slane %v6088_v22, %v7089_v21  ;;  %v6103_v24 = vcombine.high %v6095_v14, %v6095_v14  ;;  %6112 = vrot.lane.b32.xlu0 %v6095_v14, %s6995_s20  ;;  %6693 = vmatprep.subr.msk.bf16.mxu0 %vm514_vm7, %v4978_v17  ;;  %v4974_v26 = vpop.permute.xlu1 %4973 }
 0x2c2   : > { %v4979_v27 = vsel %vm8141_vm12, %v4972_v15, %v4974_v26  ;;  %4997 = vmatpush1.bf16.msra.mxu0 %v4985_v25 }
 0x2c3   : > { %v4976_v29 = vpop.permute.xlu0 %4975  ;;  %6114 = vrot.lane.b32.xlu1 %v6103_v24, %s6995_s20  ;;  %v4991_v32 = vsel %vm514_vm7, %v4979_v27, 0  ;;  %v6104_v39 = vcombine.high %v6102_v19, %v6102_v19 }
 0x2c4   : > { %v4980_v31 = vsel %vm8142_vm13, %v4974_v26, %v4976_v29 }
 0x2c5   : > { %6116 = vrot.lane.b32.xlu0 %v6102_v19, %s6995_s20  ;;  %6695 = vmatprep.subr.msk.bf16.mxu1 %vm514_vm7, %v4980_v31  ;;  %v6306_v33 = vpop.permute.xlu1 %6305 }
 0x2c6   : > { %v6307_v34 = vrot.slane %v6306_v33, 6  ;;  %5038 = vmatpush1.bf16.msra.mxu1 %v4991_v32  ;;  %6694 = vmatmul.mubr.msk.bf16.vlgmr.msra.gmra.mrb[0].mxu0 %vm510_vm10, %v6692_v30 }
 0x2c7   : > { %v5197_v3 = vpop.permute.xlu0 %5196  ;;  %6118 = vrot.lane.b32.xlu1 %v6104_v39, %s6995_s20  ;;  %5257 = vmatprep.mubr.bf16.mxu0 %v6992_v2 }
 0x2c8   : > { %v6308_v38 = vsel %vm8143_vm14, %v6307_v34, %v6306_v33  ;;  %v6312_v48 = vmul.bf16 %v6307_v34, %v6228_v18 }
 0x2c9   : > { %v6311_v36 = vmul.bf16 %v6308_v38, %v7961_v23  ;;  %6120 = vrot.lane.b32.xlu0 %v6111_v35, %s6995_s20  ;;  %v5199_v37 = vpop.permute.xlu1 %5198  ;;  %6696 = vmatmul.mubr.msk.bf16.vlgmr.msra.gmra.mrb[0].mxu1 %vm510_vm10, %v6692_v30 }
 0x2ca   : > { %v5206_v40 = vsel %vm1103_vm5, %v5197_v3, %v5199_v37  ;;  %5298 = vmatprep.mubr.bf16.mxu1 %v6992_v2  ;;  %v6340_v56 = vrot.slane %v6312_v48, %v7089_v21  ;;  %v6734_v48 = vld [vmem:[%s8123_s3 + $0x68] sm:$0xf] }
 0x2cb   : > { %v6317_v41 = vcombine.high %v6311_v36, %v6311_v36  ;;  %v6324_v42 = vrot.slane %v6311_v36, %v7089_v21  ;;  %v5201_v43 = vpop.permute.xlu0 %5200  ;;  %v5214_v47 = vsel %vm514_vm7, %v5206_v40, 0 }
 0x2cc   : > { %v5207_v44 = vsel %vm1103_vm5, %v5199_v37, %v5201_v43  ;;  %v6727_v37 = vld [vmem:[%s8123_s3 + $0x64] sm:$0xf] }
 0x2cd   : > { %v6331_v45 = vrot.slane %v6317_v41, %v7089_v21  ;;  %v6332_v46 = vcombine.high %v6324_v42, %v6324_v42  ;;  %6341 = vrot.lane.b32.xlu1 %v6324_v42, %s6996_s21  ;;  %6700 = vmatprep.subr.msk.bf16.mxu0 %vm514_vm7, %v5207_v44  ;;  %v5203_v20 = vpop.permute.xlu1 %5202 }
 0x2ce   : > { %v5208_v23 = vsel %vm1103_vm5, %v5201_v43, %v5203_v20  ;;  %5226 = vmatpush1.bf16.msra.mxu0 %v5214_v47 }
 0x2cf   : > { %v5205_v49 = vpop.permute.xlu0 %5204  ;;  %6343 = vrot.lane.b32.xlu0 %v6332_v46, %s6996_s21  ;;  %v5220_v52 = vsel %vm514_vm7, %v5208_v23, 0  ;;  %v6333_v55 = vcombine.high %v6331_v45, %v6331_v45 }
 0x2d0   : > { %v5209_v51 = vsel %vm1103_vm5, %v5203_v20, %v5205_v49 }
 0x2d1   : > { %6345 = vrot.lane.b32.xlu1 %v6331_v45, %s6996_s21  ;;  %6702 = vmatprep.subr.msk.bf16.mxu1 %vm514_vm7, %v5209_v51 }
 0x2d2   : > { %5267 = vmatpush1.bf16.msra.mxu1 %v5220_v52  ;;  %6701 = vmatmul.mubr.msk.bf16.vlgmr.msra.gmra.mrb[0].mxu0 %vm510_vm10, %v6699_v50 }
 0x2d3   : > { %6347 = vrot.lane.b32.xlu0 %v6333_v55, %s6996_s21  ;;  %v5426_v57 = vpop.permute.xlu1 %5425  ;;  %5486 = vmatprep.mubr.bf16.mxu0 %v6992_v2 }
 0x2d5   : > { %v5428_v58 = vpop.permute.xlu0 %5427  ;;  %6349 = vrot.lane.b32.xlu1 %v6340_v56, %s6996_s21  ;;  %6703 = vmatmul.mubr.msk.bf16.vlgmr.msra.gmra.mrb[0].mxu1 %vm510_vm10, %v6699_v50 }
 0x2d6   : > { %v5435_v59 = vsel %vm1290_vm4, %v5426_v57, %v5428_v58  ;;  %5527 = vmatprep.mubr.bf16.mxu1 %v6992_v2 }
 0x2d7   : > { %v5430_v60 = vpop.permute.xlu1 %5429  ;;  %v5443_v53 = vsel %vm514_vm7, %v5435_v59, 0 }
 0x2d8   : > { %v5436_v54 = vsel %vm1290_vm4, %v5428_v58, %v5430_v60 }
 0x2d9   : > { %v5432_v21 = vpop.permute.xlu0 %5431  ;;  %6707 = vmatprep.subr.msk.bf16.mxu0 %vm514_vm7, %v5436_v54 }
 0x2da   : > { %v5437_v61 = vsel %vm1290_vm4, %v5430_v60, %v5432_v21  ;;  %5455 = vmatpush1.bf16.msra.mxu0 %v5443_v53 }
 0x2db   : > { %v5434_v62 = vpop.permute.xlu1 %5433  ;;  %v5449_v1 = vsel %vm514_vm7, %v5437_v61, 0 }
 0x2dc   : > { %v5438_v0 = vsel %vm1290_vm4, %v5432_v21, %v5434_v62 }
 0x2dd   : > { %6709 = vmatprep.subr.msk.bf16.mxu1 %vm514_vm7, %v5438_v0 }
 0x2de   : > { %5496 = vmatpush1.bf16.msra.mxu1 %v5449_v1  ;;  %6708 = vmatmul.mubr.msk.bf16.vlgmr.msra.gmra.mrb[0].mxu0 %vm510_vm10, %v6706_v63 }
 0x2df   : > { %v5655_v4 = vpop.permute.xlu0 %5654  ;;  %5715 = vmatprep.mubr.bf16.mxu0 %v6992_v2 }
 0x2e1   : > { %v5657_v5 = vpop.permute.xlu1 %5656  ;;  %6710 = vmatmul.mubr.msk.bf16.vlgmr.msra.gmra.mrb[0].mxu1 %vm510_vm10, %v6706_v63 }
 0x2e2   : > { %v5664_v6 = vsel %vm1059_vm3, %v5655_v4, %v5657_v5  ;;  %5756 = vmatprep.mubr.bf16.mxu1 %v6992_v2 }
 0x2e3   : > { %v5659_v7 = vpop.permute.xlu0 %5658  ;;  %v5672_v9 = vsel %vm514_vm7, %v5664_v6, 0 }
 0x2e4   : > { %v5665_v8 = vsel %vm1059_vm3, %v5657_v5, %v5659_v7 }
 0x2e5   : > { %6714 = vmatprep.subr.msk.bf16.mxu0 %vm514_vm7, %v5665_v8  ;;  %v5661_v10 = vpop.permute.xlu1 %5660 }
 0x2e6   : > { %v5666_v11 = vsel %vm1059_vm3, %v5659_v7, %v5661_v10  ;;  %5684 = vmatpush1.bf16.msra.mxu0 %v5672_v9 }
 0x2e7   : > { %v5663_v12 = vpop.permute.xlu0 %5662  ;;  %v5678_v14 = vsel %vm514_vm7, %v5666_v11, 0 }
 0x2e8   : > { %v5667_v22 = vsel %vm1059_vm3, %v5661_v10, %v5663_v12 }
 0x2e9   : > { %6716 = vmatprep.subr.msk.bf16.mxu1 %vm514_vm7, %v5667_v22 }
 0x2ea   : > { %5725 = vmatpush1.bf16.msra.mxu1 %v5678_v14  ;;  %6715 = vmatmul.mubr.msk.bf16.vlgmr.msra.gmra.mrb[0].mxu0 %vm510_vm10, %v6713_v13 }
 0x2eb   : > { %5944 = vmatprep.mubr.bf16.mxu0 %v6992_v2 }
 0x2ed   : > { %6717 = vmatmul.mubr.msk.bf16.vlgmr.msra.gmra.mrb[0].mxu1 %vm510_vm10, %v6713_v13 }
 0x2ee   : > { %5985 = vmatprep.mubr.bf16.mxu1 %v6992_v2 }
 0x327   : > { %v5884_v15 = vpop.permute.xlu1 %5883 }
 0x329   : > { %v5886_v16 = vpop.permute.xlu0 %5885 }
 0x32a   : > { %v5893_v17 = vsel %vm828_vm2, %v5884_v15, %v5886_v16 }
 0x32b   : > { %v5888_v19 = vpop.permute.xlu1 %5887  ;;  %v5901_v25 = vsel %vm514_vm7, %v5893_v17, 0 }
 0x32c   : > { %v5894_v24 = vsel %vm828_vm2, %v5886_v16, %v5888_v19 }
 0x32d   : > { %v5890_v26 = vpop.permute.xlu0 %5889  ;;  %6721 = vmatprep.subr.msk.bf16.mxu0 %vm514_vm7, %v5894_v24 }
 0x32e   : > { %v5895_v27 = vsel %vm828_vm2, %v5888_v19, %v5890_v26  ;;  %5913 = vmatpush1.bf16.msra.mxu0 %v5901_v25 }
 0x32f   : > { %v5892_v29 = vpop.permute.xlu1 %5891  ;;  %v5907_v31 = vsel %vm514_vm7, %v5895_v27, 0 }
 0x330   : > { %v5896_v30 = vsel %vm828_vm2, %v5890_v26, %v5892_v29 }
 0x331   : > { %6722 = vmatmul.mubr.msk.bf16.vlgmr.msra.gmra.mrb[0].mxu0 %vm510_vm10, %v6720_v28  ;;  %6723 = vmatprep.subr.msk.bf16.mxu1 %vm514_vm7, %v5896_v30 }
 0x332   : > { %5954 = vmatpush1.bf16.msra.mxu1 %v5907_v31  ;;  %6173 = vmatprep.mubr.bf16.mxu0 %v6992_v2 }
 0x333   : > { %v6113_v32 = vpop.permute.xlu0 %6112 }
 0x335   : > { %6724 = vmatmul.mubr.msk.bf16.vlgmr.msra.gmra.mrb[0].mxu1 %vm510_vm10, %v6720_v28  ;;  %v6115_v33 = vpop.permute.xlu1 %6114 }
 0x336   : > { %v6122_v39 = vsel %vm461_vm0, %v6113_v32, %v6115_v33  ;;  %6214 = vmatprep.mubr.bf16.mxu1 %v6992_v2 }
 0x337   : > { %v6117_v34 = vpop.permute.xlu0 %6116  ;;  %v6130_v3 = vsel %vm514_vm7, %v6122_v39, 0 }
 0x338   : > { %v6123_v35 = vsel %vm461_vm0, %v6115_v33, %v6117_v34 }
 0x339   : > { %6728 = vmatprep.subr.msk.bf16.mxu0 %vm514_vm7, %v6123_v35  ;;  %v6119_v38 = vpop.permute.xlu1 %6118 }
 0x33a   : > { %v6124_v36 = vsel %vm461_vm0, %v6117_v34, %v6119_v38  ;;  %6142 = vmatpush1.bf16.msra.mxu0 %v6130_v3 }
 0x33b   : > { %v6121_v40 = vpop.permute.xlu0 %6120  ;;  %v6136_v42 = vsel %vm514_vm7, %v6124_v36, 0 }
 0x33c   : > { %v6125_v41 = vsel %vm461_vm0, %v6119_v38, %v6121_v40 }
 0x33d   : > { %6729 = vmatmul.mubr.msk.bf16.vlgmr.msra.gmra.mrb[0].mxu0 %vm510_vm10, %v6727_v37  ;;  %6730 = vmatprep.subr.msk.bf16.mxu1 %vm514_vm7, %v6125_v41 }
 0x33e   : > { %6183 = vmatpush1.bf16.msra.mxu1 %v6136_v42  ;;  %6402 = vmatprep.mubr.bf16.mxu0 %v6992_v2 }
 0x33f   : > { %v6342_v43 = vpop.permute.xlu1 %6341 }
 0x341   : > { %v6344_v18 = vpop.permute.xlu0 %6343  ;;  %6731 = vmatmul.mubr.msk.bf16.vlgmr.msra.gmra.mrb[0].mxu1 %vm510_vm10, %v6727_v37 }
 0x342   : > { %v6351_v44 = vsel %vm375_vm1, %v6342_v43, %v6344_v18  ;;  %6443 = vmatprep.mubr.bf16.mxu1 %v6992_v2 }
 0x343   : > { %v6346_v45 = vpop.permute.xlu1 %6345  ;;  %v6359_v47 = vsel %vm514_vm7, %v6351_v44, 0 }
 0x344   : > { %v6352_v46 = vsel %vm375_vm1, %v6344_v18, %v6346_v45 }
 0x345   : > { %v6348_v20 = vpop.permute.xlu0 %6347  ;;  %6735 = vmatprep.subr.msk.bf16.mxu0 %vm514_vm7, %v6352_v46 }
 0x346   : > { %v6353_v23 = vsel %vm375_vm1, %v6346_v45, %v6348_v20  ;;  %6371 = vmatpush1.bf16.msra.mxu0 %v6359_v47 }
 0x347   : > { %v6350_v49 = vpop.permute.xlu1 %6349  ;;  %v6365_v50 = vsel %vm514_vm7, %v6353_v23, 0 }
 0x348   : > { %v6354_v2 = vsel %vm375_vm1, %v6348_v20, %v6350_v49 }
 0x349   : > { %6736 = vmatmul.mubr.msk.bf16.vlgmr.msra.gmra.mrb[0].mxu0 %vm510_vm10, %v6734_v48  ;;  %6737 = vmatprep.subr.msk.bf16.mxu1 %vm514_vm7, %v6354_v2 }
 0x34a   : > { %6412 = vmatpush1.bf16.msra.mxu1 %v6365_v50 }
 0x34d   : > { %6738 = vmatmul.mubr.msk.bf16.vlgmr.msra.gmra.mrb[0].mxu1 %vm510_vm10, %v6734_v48 }
 0x41c   : > { %v6404_v51 = vpop.f32.mrb[0].mxu0 }
 0x41d   : > { %v6470_v52 = vrot.slane %v6404_v51, 4  ;;  %v6406_v55 = vpop.f32.mrb[1].mxu0 }
 0x41e   : > { %v6471_v56 = vrot.slane %v6406_v55, 4  ;;  %v6408_v57 = vpop.f32.mrb[2].mxu0 }
 0x41f   : > { %6478 = vst [vmem:[%s7110_s16 + $0x20] ss:$-28 sps:$4 sm:$0xff] %v6470_v52   ;;  %v6409_v58 = vpop.f32.mrb[3].mxu0 }
 0x420   : > { %6479 = vst [vmem:[%s7110_s16 + $0x28] ss:$-28 sps:$4 sm:$0xff] %v6471_v56   ;;  %v6445_v59 = vpop.f32.mrb[0].mxu1 }
 0x421   : > { %v6472_v60 = vrot.slane %v6445_v59, 4  ;;  %v6447_v54 = vpop.f32.mrb[1].mxu1 }
 0x422   : > { %v6473_v53 = vrot.slane %v6447_v54, 4  ;;  %v6449_v21 = vpop.f32.mrb[2].mxu1 }
 0x423   : > { %6480 = vst [vmem:[%s7110_s16 + $0x30] ss:$-28 sps:$4 sm:$0xff] %v6472_v60   ;;  %v6450_v61 = vpop.f32.mrb[3].mxu1 }
 0x424   : > { %6481 = vst [vmem:[%s7110_s16 + $0x38] ss:$-28 sps:$4 sm:$0xff] %v6473_v53  }
 0x425 PF: > { %s15_s18 = sadd.s32 1, %s6990_s18  }
 0x426   : > { %p12_p4 = scmp.ge.s32.totalorder %s15_s18, 4  }
 0x428   :  { %14 = sbr.rel (!%p12_p4) target bundleno = 1 (0x1), region = 122 }

// kernel: forward.3
= control target key start
LH: loop header
LB: loop body
LE: loop exit
PB: predicated region body
PF: predicated region fallthrough
CT: control target
= control target key end

     0   :  { %s7186_s18 = smov 0   ;;  %s8362_s0 = inlined_call_operand.vmem [shape: f32[2,12,512], index: 0, kind: input, shape index: {}]   ;;  %s8363_s1 = inlined_call_operand.vmem [shape: f32[12,1], index: 1, kind: input, shape index: {}]   ;;  %s8364_s2 = inlined_call_operand.vmem [shape: f32[12,1], index: 2, kind: input, shape index: {}]   ;;  %s8365_s3 = inlined_call_operand.vmem [shape: bf16[27,8,12], index: 3, kind: input, shape index: {}]   ;;  %s8366_s4 = inlined_call_operand.vmem [shape: bf16[27,1,512], index: 4, kind: input, shape index: {}]   ;;  %s8367_s5 = inlined_call_operand.vmem [shape: f32[2,20,512], index: 5, kind: output, shape index: {}]  }
   0x1 LB: > { %s6497_s19 = sadd.s32 4294967295, %s7135_s18   ;;  %p6501_p0 = scmp.ge.s32.totalorder %s7135_s18, 1  ;;  %s7135_s18 = sphi %s7186_s18, %s15_s18  }
   0x2   : > { %p187_p1 = scmp.lt.s32.totalorder %s7135_s18, 3 }
   0x4   : > { %p188_p2 = pnand %p6501_p0, %p187_p1 }
   0x5   : > { %v254_v0 = vld [vmem:[%s8364_s2] sm:$0xff] (!%p188_p2)  ;;  %v333_v2 = vlaneseq (!%p188_p2)  ;;  %v7137_v3 = vmov (!%p188_p2), 0   ;;  %v255_v4 = vld [vmem:[%s8364_s2 + $0x8] sm:$0xf] (!%p188_p2)  ;;  %v7138_v5 = vmov (!%p188_p2), 1966171168  }
   0x6   : > { %191 = sbr.rel (%p188_p2) target bundleno = 977 (0x3d1), region = 40  ;;  %v234_v1 = vld [vmem:[%s8363_s1] sm:$0xff] (!%p188_p2)  ;;  %7128 = vset.pattern.permute.xlu1 (!%p188_p2), %v7137_v3  ;;  %282 = vst [vmem:[#allocation2] sm:$0xf] (!%p188_p2), %v7137_v3  ;;  %283 = vst [vmem:[#allocation2 + $0x18] sm:$0x3] (!%p188_p2), %v7137_v3  ;;  %7127 = vset.pattern.permute.xlu0 (!%p188_p2), %v7137_v3  ;;  %v331_v6 = vunpack.c.l.s4 (!%p188_p2), %v7138_v5 }
   0x7   : > { %284 = vst [vmem:[#allocation2 + $0x14] sm:$0xf] (!%p188_p2), %v7137_v3  ;;  %285 = vst [vmem:[#allocation2 + $0x2c] sm:$0x3] (!%p188_p2), %v7137_v3  ;;  %258 = vperm.xlu1 (!%p188_p2), %7128, %v254_v0   ;;  %238 = vperm.xlu0 (!%p188_p2), %7127, %v234_v1   ;;  %v334_v7 = vshrl.u32 (!%p188_p2), %v333_v2, 7  ;;  %p215_p3 = scmp.lt.s32.totalorder (!%p188_p2), %s6497_s19, 1 }
   0x8   : > { %v6513_v8 = vld.sshfl [vmem:[%s8366_s4 + $0x4] sm:$0x33 pattern:$0x75316420] (!%p188_p2)  ;;  %v235_v9 = vld [vmem:[%s8363_s1 + $0x8] sm:$0xf] (!%p188_p2)  ;;  %576 = vmatprep.mubr.bf16.mxu0 (!%p188_p2), %v7137_v3  ;;  %617 = vmatprep.mubr.bf16.mxu1 (!%p188_p2), %v7137_v3  ;;  %v332_v11 = vunpack.c.0.s8 (!%p188_p2), %v331_v6 }
   0x9   : > { %v6509_v10 = vld.sshfl [vmem:[%s8366_s4] sm:$0x33 pattern:$0x75316420] (!%p188_p2)  ;;  %v415_v12 = vcombine.high (!%p188_p2), %v6513_v8, %v6513_v8  ;;  %v7233_v20 = vsub.s32 (!%p188_p2), 0, %v334_v7  ;;  %s7139_s22 = smov (!%p188_p2), 56  }
   0xa   : > { %v329_v13 = vcombine.high (!%p188_p2), %v6509_v10, %v6509_v10  ;;  %v6536_v14 = vld.sshfl [vmem:[%s8366_s4 + $0x8] sm:$0x33 pattern:$0x75316420] (!%p188_p2)  ;;  %v7226_v17 = vsub.s32 (!%p188_p2), %v332_v11, %v334_v7  ;;  %s7140_s23 = smov (!%p188_p2), 55   ;;  %s7141_s28 = smov (!%p188_p2), 57  }
   0xb   : > { %v775_v15 = vcombine.high (!%p188_p2), %v6536_v14, %v6536_v14  ;;  %v6550_v16 = vld.sshfl [vmem:[%s8366_s4 + $0xc] sm:$0x33 pattern:$0x75316420] (!%p188_p2)  ;;  %263 = vperm.xlu1 (!%p188_p2), %7128, %v255_v4   ;;  %243 = vperm.xlu0 (!%p188_p2), %7127, %v235_v9   ;;  %s7142_s6 = smov (!%p188_p2), 63   ;;  %s7143_s9 = smov (!%p188_p2), 64  }
   0xc   : > { %v1004_v18 = vcombine.high (!%p188_p2), %v6550_v16, %v6550_v16  ;;  %v7231_v19 = vld.sshfl [vmem:[%s8366_s4 + $0x10] sm:$0x33 pattern:$0x75316420] (!%p188_p2)  ;;  %v422_v22 = vrot.slane (!%p188_p2), %v6513_v8, %v7226_v17  ;;  %v429_v23 = vrot.slane (!%p188_p2), %v415_v12, %v7226_v17  ;;  %v336_v24 = vrot.slane (!%p188_p2), %v6509_v10, %v7226_v17  ;;  %s7144_s12 = smov (!%p188_p2), 65   ;;  %s7145_s15 = smov (!%p188_p2), 71  }
   0xd   : > { %v1233_v21 = vcombine.high %v7231_v19, %v7231_v19  ;;  %v343_v25 = vrot.slane %v329_v13, %v7226_v17  ;;  %v782_v26 = vrot.slane %v6536_v14, %v7226_v17  ;;  %v789_v27 = vrot.slane %v775_v15, %v7226_v17  ;;  %s8396_s19 = smov (!%p215_p3, %s6497_s19), 1  ;;  %s7146_s20 = smov 72  }
   0xe   : > { %v7246_v28 = vrot.slane %v6550_v16, %v7226_v17  ;;  %v7249_v29 = vrot.slane %v1004_v18, %v7226_v17  ;;  %v430_v30 = vcombine.high %v422_v22, %v422_v22  ;;  %v431_v31 = vcombine.high %v429_v23, %v429_v23  ;;  %s6886_s13 = sshll.u32 %s8396_s19, 6  ;;  %s7099_s14 = smul.u32 96, %s8396_s19 }
   0xf   : > { %v433_v32 = vpack.i.b16 %v422_v22, %v422_v22  ;;  %v440_v33 = vpack.i.b16 %v429_v23, %v429_v23  ;;  %v344_v34 = vcombine.high %v336_v24, %v336_v24  ;;  %v345_v35 = vcombine.high %v343_v25, %v343_v25  ;;  %s219_s17 = scalar_lea.vmem %s8362_s0, %s6886_s13  ;;  %v6578_v23 = vld.sshfl [vmem:[%s8366_s4 + $0x14] sm:$0x33 pattern:$0x75316420]  ;;  %s7147_s25 = smov 73  }
  0x10   : > { %v347_v36 = vpack.i.b16 %v336_v24, %v336_v24  ;;  %v354_v37 = vpack.i.b16 %v343_v25, %v343_v25  ;;  %v447_v38 = vpack.i.b16 %v430_v30, %v430_v30  ;;  %v454_v39 = vpack.i.b16 %v431_v31, %v431_v31  ;;  %s7265_s19 = scalar_lea.vmem %s8367_s5, %s7099_s14  ;;  %v7267_v50 = vld [vmem:[%s219_s17] sm:$0xff]  ;;  %v7269_v51 = vld [vmem:[%s219_s17 + $0x8] sm:$0xff]  ;;  %v7273_v56 = vld [vmem:[%s219_s17 + $0x10] sm:$0xff]  ;;  %s7148_s26 = smov 119  }
  0x11   : > { %v438_v40 = vrot.slane %v433_v32, %v7233_v20  ;;  %v445_v41 = vrot.slane %v440_v33, %v7233_v20  ;;  %v361_v42 = vpack.i.b16 %v344_v34, %v344_v34  ;;  %v368_v43 = vpack.i.b16 %v345_v35, %v345_v35  ;;  %v7275_v57 = vld [vmem:[%s219_s17 + $0x18] sm:$0xff]  ;;  %6414 = vst [vmem:[%s7265_s19] sm:$0xff] %v7267_v50  ;;  %v7281_v58 = vld [vmem:[%s219_s17 + $0x20] sm:$0xf]  ;;  %v7288_v63 = vld [vmem:[%s219_s17 + $0x28] sm:$0xf]  ;;  %s7149_s27 = smov 120  }
  0x12   : > { %v352_v44 = vrot.slane %v347_v36, %v7233_v20  ;;  %v359_v45 = vrot.slane %v354_v37, %v7233_v20  ;;  %v452_v46 = vrot.slane %v447_v38, %v7233_v20  ;;  %v459_v47 = vrot.slane %v454_v39, %v7233_v20  ;;  %6415 = vst [vmem:[%s7265_s19 + $0x8] sm:$0xff] %v7269_v51  ;;  %v7290_v0 = vld [vmem:[%s219_s17 + $0x30] sm:$0xf]  ;;  %v7292_v1 = vld [vmem:[%s219_s17 + $0x38] sm:$0xf]  ;;  %s7150_s29 = smov 121  }
  0x13   : > { %v6514_v48 = vcombine.low %v438_v40, %v445_v41  ;;  %v790_v49 = vcombine.high %v782_v26, %v782_v26  ;;  %v366_v52 = vrot.slane %v361_v42, %v7233_v20  ;;  %v373_v53 = vrot.slane %v368_v43, %v7233_v20  ;;  %6416 = vst [vmem:[%s7265_s19 + $0x10] sm:$0xff] %v7273_v56  ;;  %s7151_s30 = smov 127   ;;  %s7152_s10 = smov 1  }
  0x14   : > { %v6510_v54 = vcombine.low %v352_v44, %v359_v45  ;;  %v791_v55 = vcombine.high %v789_v27, %v789_v27  ;;  %v6515_v59 = vcombine.low %v452_v46, %v459_v47  ;;  %v793_v61 = vpack.i.b16 %v782_v26, %v782_v26  ;;  %6417 = vst [vmem:[%s7265_s19 + $0x18] sm:$0xff] %v7275_v57  ;;  %v6606_v46 = vld.sshfl [vmem:[%s8366_s4 + $0x1c] sm:$0x33 pattern:$0x75316420]  ;;  %s7153_s14 = smov 9  }
  0x15   : > { %470 = vrot.lane.b32.xlu0 %v6514_v48, %s7139_s22  ;;  %v807_v60 = vpack.i.b16 %v790_v49, %v790_v49  ;;  %v800_v62 = vpack.i.b16 %v789_v27, %v789_v27  ;;  %6418 = vst [vmem:[%s7265_s19 + $0x20] sm:$0xf] %v7281_v58  ;;  %v6511_v2 = vcombine.low %v366_v52, %v373_v53  ;;  %6419 = vst [vmem:[%s7265_s19 + $0x28] sm:$0xf] %v7288_v63  ;;  %vm476_vm0 = vcmask 457728   ;;  %s7154_s21 = smov 7  }
  0x16   : > { %v814_v4 = vpack.i.b16 %v791_v55, %v791_v55  ;;  %v1019_v5 = vcombine.high %v7246_v28, %v7246_v28  ;;  %v1020_v6 = vcombine.high %v7249_v29, %v7249_v29  ;;  %6420 = vst [vmem:[%s7265_s19 + $0x30] sm:$0xf] %v7290_v0  ;;  %6421 = vst [vmem:[%s7265_s19 + $0x38] sm:$0xf] %v7292_v1  ;;  %472 = vrot.lane.b32.xlu1 %v6515_v59, %s7139_s22  ;;  %vm392_vm1 = vcmask 1043456   ;;  %s7155_s8 = smov 8  }
  0x17   : > { %v812_v7 = vrot.slane %v807_v60, %v7233_v20  ;;  %v798_v8 = vrot.slane %v793_v61, %v7233_v20  ;;  %v805_v9 = vrot.slane %v800_v62, %v7233_v20  ;;  %v1022_v10 = vpack.i.b16 %v7246_v28, %v7246_v28 }
  0x18   : > { %v819_v11 = vrot.slane %v814_v4, %v7233_v20  ;;  %v1036_v12 = vpack.i.b16 %v1019_v5, %v1019_v5  ;;  %v1043_v13 = vpack.i.b16 %v1020_v6, %v1020_v6  ;;  %v1029_v14 = vpack.i.b16 %v7249_v29, %v7249_v29  ;;  %v6620_v4 = vld.sshfl [vmem:[%s8366_s4 + $0x20] sm:$0x33 pattern:$0x75316420] }
  0x19   : > { %384 = vrot.lane.b32.xlu0 %v6510_v54, %s7140_s23  ;;  %v6537_v15 = vcombine.low %v798_v8, %v805_v9  ;;  %v1027_v16 = vrot.slane %v1022_v10, %v7233_v20  ;;  %v1240_v18 = vrot.slane %v7231_v19, %v7226_v17  ;;  %v1247_v22 = vrot.slane %v1233_v21, %v7226_v17  ;;  %v6592_v19 = vld.sshfl [vmem:[%s8366_s4 + $0x18] sm:$0x33 pattern:$0x75316420] }
  0x1a   : > { %v6538_v24 = vcombine.low %v812_v7, %v819_v11  ;;  %v1041_v25 = vrot.slane %v1036_v12, %v7233_v20  ;;  %v1048_v26 = vrot.slane %v1043_v13, %v7233_v20  ;;  %v1034_v27 = vrot.slane %v1029_v14, %v7233_v20  ;;  %386 = vrot.lane.b32.xlu1 %v6511_v2, %s7140_s23 }
  0x1b   : > { %v1248_v28 = vcombine.high %v1240_v18, %v1240_v18  ;;  %v1249_v29 = vcombine.high %v1247_v22, %v1247_v22  ;;  %v1251_v30 = vpack.i.b16 %v1240_v18, %v1240_v18  ;;  %v1258_v31 = vpack.i.b16 %v1247_v22, %v1247_v22 }
  0x1c   : > { %v6551_v21 = vcombine.low %v1027_v16, %v1034_v27  ;;  %v1461_v32 = vcombine.high %v6578_v23, %v6578_v23  ;;  %v1468_v33 = vrot.slane %v6578_v23, %v7226_v17  ;;  %v1688_v41 = vcombine.high %v6592_v19, %v6592_v19 }
  0x1d   : > { %830 = vrot.lane.b32.xlu0 %v6537_v15, %s7141_s28  ;;  %v1265_v34 = vpack.i.b16 %v1248_v28, %v1248_v28  ;;  %v1272_v35 = vpack.i.b16 %v1249_v29, %v1249_v29  ;;  %v1256_v36 = vrot.slane %v1251_v30, %v7233_v20  ;;  %v1263_v37 = vrot.slane %v1258_v31, %v7233_v20 }
  0x1e   : > { %v1475_v38 = vrot.slane %v1461_v32, %v7226_v17  ;;  %v1476_v39 = vcombine.high %v1468_v33, %v1468_v33  ;;  %v1479_v40 = vpack.i.b16 %v1468_v33, %v1468_v33  ;;  %832 = vrot.lane.b32.xlu1 %v6538_v24, %s7141_s28  ;;  %v6552_v42 = vcombine.low %v1041_v25, %v1048_v26 }
  0x1f   : > { %v1270_v43 = vrot.slane %v1265_v34, %v7233_v20  ;;  %v1277_v44 = vrot.slane %v1272_v35, %v7233_v20  ;;  %v1695_v45 = vrot.slane %v6592_v19, %v7226_v17  ;;  %v6565_v47 = vcombine.low %v1256_v36, %v1263_v37 }
  0x20   : > { %v1477_v48 = vcombine.high %v1475_v38, %v1475_v38  ;;  %v1493_v49 = vpack.i.b16 %v1476_v39, %v1476_v39  ;;  %v1486_v52 = vpack.i.b16 %v1475_v38, %v1475_v38  ;;  %v1484_v53 = vrot.slane %v1479_v40, %v7233_v20  ;;  %v6648_v40 = vld.sshfl [vmem:[%s8366_s4 + $0x28] sm:$0x33 pattern:$0x75316420] }
  0x21   : > { %1059 = vrot.lane.b32.xlu0 %v6551_v21, %s7142_s6  ;;  %v1702_v54 = vrot.slane %v1688_v41, %v7226_v17  ;;  %v1706_v55 = vpack.i.b16 %v1695_v45, %v1695_v45  ;;  %v1703_v59 = vcombine.high %v1695_v45, %v1695_v45  ;;  %v6566_v60 = vcombine.low %v1270_v43, %v1277_v44  ;;  %v6634_v21 = vld.sshfl [vmem:[%s8366_s4 + $0x24] sm:$0x33 pattern:$0x75316420] }
  0x22   : > { %v1500_v61 = vpack.i.b16 %v1477_v48, %v1477_v48  ;;  %v1491_v62 = vrot.slane %v1486_v52, %v7233_v20  ;;  %v1915_v2 = vcombine.high %v6606_v46, %v6606_v46  ;;  %1061 = vrot.lane.b32.xlu1 %v6552_v42, %s7142_s6  ;;  %v1498_v5 = vrot.slane %v1493_v49, %v7233_v20 }
  0x23   : > { %v1713_v6 = vpack.i.b16 %v1702_v54, %v1702_v54  ;;  %v1704_v7 = vcombine.high %v1702_v54, %v1702_v54  ;;  %v1720_v8 = vpack.i.b16 %v1703_v59, %v1703_v59  ;;  %v1711_v10 = vrot.slane %v1706_v55, %v7233_v20 }
  0x24   : > { %v1505_v9 = vrot.slane %v1500_v61, %v7233_v20  ;;  %v1922_v11 = vrot.slane %v6606_v46, %v7226_v17  ;;  %v1929_v12 = vrot.slane %v1915_v2, %v7226_v17  ;;  %v6579_v13 = vcombine.low %v1484_v53, %v1491_v62 }
  0x25   : > { %1288 = vrot.lane.b32.xlu0 %v6565_v47, %s7143_s9  ;;  %v1725_v14 = vrot.slane %v1720_v8, %v7233_v20  ;;  %v1727_v15 = vpack.i.b16 %v1704_v7, %v1704_v7  ;;  %v2142_v16 = vcombine.high %v6620_v4, %v6620_v4  ;;  %v1718_v18 = vrot.slane %v1713_v6, %v7233_v20  ;;  %v6662_v6 = vld.sshfl [vmem:[%s8366_s4 + $0x2c] sm:$0x33 pattern:$0x75316420] }
  0x26   : > { %v1930_v22 = vcombine.high %v1922_v11, %v1922_v11  ;;  %v1931_v23 = vcombine.high %v1929_v12, %v1929_v12  ;;  %v1933_v24 = vpack.i.b16 %v1922_v11, %v1922_v11  ;;  %1290 = vrot.lane.b32.xlu1 %v6566_v60, %s7143_s9  ;;  %v6580_v25 = vcombine.low %v1498_v5, %v1505_v9 }
  0x27   : > { %v1732_v26 = vrot.slane %v1727_v15, %v7233_v20  ;;  %v1940_v27 = vpack.i.b16 %v1929_v12, %v1929_v12  ;;  %v2149_v28 = vrot.slane %v6620_v4, %v7226_v17  ;;  %v2156_v19 = vrot.slane %v2142_v16, %v7226_v17 }
  0x28   : > { %v1947_v29 = vpack.i.b16 %v1930_v22, %v1930_v22  ;;  %v1954_v30 = vpack.i.b16 %v1931_v23, %v1931_v23  ;;  %v1938_v31 = vrot.slane %v1933_v24, %v7233_v20  ;;  %v6593_v41 = vcombine.low %v1711_v10, %v1718_v18 }
  0x29   : > { %1516 = vrot.lane.b32.xlu0 %v6579_v13, %s7144_s12  ;;  %v6594_v32 = vcombine.low %v1725_v14, %v1732_v26  ;;  %v1945_v33 = vrot.slane %v1940_v27, %v7233_v20  ;;  %v2160_v34 = vpack.i.b16 %v2149_v28, %v2149_v28  ;;  %v2157_v35 = vcombine.high %v2149_v28, %v2149_v28  ;;  %v6676_v14 = vld.sshfl [vmem:[%s8366_s4 + $0x30] sm:$0x33 pattern:$0x75316420] }
  0x2a   : > { %v1952_v36 = vrot.slane %v1947_v29, %v7233_v20  ;;  %v1959_v37 = vrot.slane %v1954_v30, %v7233_v20  ;;  %v2167_v38 = vpack.i.b16 %v2156_v19, %v2156_v19  ;;  %v2158_v39 = vcombine.high %v2156_v19, %v2156_v19  ;;  %1518 = vrot.lane.b32.xlu1 %v6580_v25, %s7144_s12 }
  0x2b   : > { %v6607_v42 = vcombine.low %v1938_v31, %v1945_v33  ;;  %v2174_v43 = vpack.i.b16 %v2157_v35, %v2157_v35  ;;  %v2369_v44 = vcombine.high %v6634_v21, %v6634_v21  ;;  %v2165_v46 = vrot.slane %v2160_v34, %v7233_v20 }
  0x2c   : > { %v6608_v45 = vcombine.low %v1952_v36, %v1959_v37  ;;  %v2181_v47 = vpack.i.b16 %v2158_v39, %v2158_v39  ;;  %v2376_v48 = vrot.slane %v6634_v21, %v7226_v17  ;;  %v2598_v53 = vcombine.high %v6648_v40, %v6648_v40 }
  0x2d   : > { %1745 = vrot.lane.b32.xlu0 %v6594_v32, %s7145_s15  ;;  %v2179_v49 = vrot.slane %v2174_v43, %v7233_v20  ;;  %v2383_v52 = vrot.slane %v2369_v44, %v7226_v17  ;;  %v2605_v54 = vrot.slane %v6648_v40, %v7226_v17  ;;  %v2172_v55 = vrot.slane %v2167_v38, %v7233_v20 }
  0x2e   : > { %v2186_v59 = vrot.slane %v2181_v47, %v7233_v20  ;;  %v2384_v60 = vcombine.high %v2376_v48, %v2376_v48  ;;  %v2387_v61 = vpack.i.b16 %v2376_v48, %v2376_v48  ;;  %1743 = vrot.lane.b32.xlu1 %v6593_v41, %s7145_s15  ;;  %v2612_v4 = vrot.slane %v2598_v53, %v7226_v17 }
  0x2f   : > { %v2385_v62 = vcombine.high %v2383_v52, %v2383_v52  ;;  %v2394_v2 = vpack.i.b16 %v2383_v52, %v2383_v52  ;;  %v2616_v5 = vpack.i.b16 %v2605_v54, %v2605_v54  ;;  %v2613_v9 = vcombine.high %v2605_v54, %v2605_v54 }
  0x30   : > { %v2401_v7 = vpack.i.b16 %v2384_v60, %v2384_v60  ;;  %v2392_v8 = vrot.slane %v2387_v61, %v7233_v20  ;;  %v6622_v10 = vcombine.low %v2179_v49, %v2186_v59  ;;  %v2623_v13 = vpack.i.b16 %v2612_v4, %v2612_v4 }
  0x31   : > { %1970 = vrot.lane.b32.xlu0 %v6607_v42, %s7146_s20  ;;  %v2408_v11 = vpack.i.b16 %v2385_v62, %v2385_v62  ;;  %v2399_v12 = vrot.slane %v2394_v2, %v7233_v20  ;;  %v6621_v15 = vcombine.low %v2165_v46, %v2172_v55  ;;  %v2614_v16 = vcombine.high %v2612_v4, %v2612_v4 }
  0x32   : > { %v2630_v18 = vpack.i.b16 %v2613_v9, %v2613_v9  ;;  %v2827_v22 = vcombine.high %v6662_v6, %v6662_v6  ;;  %1972 = vrot.lane.b32.xlu1 %v6608_v45, %s7146_s20  ;;  %v2406_v23 = vrot.slane %v2401_v7, %v7233_v20  ;;  %v2621_v25 = vrot.slane %v2616_v5, %v7233_v20 }
  0x33   : > { %v2413_v24 = vrot.slane %v2408_v11, %v7233_v20  ;;  %v2834_v26 = vrot.slane %v6662_v6, %v7226_v17  ;;  %v6635_v27 = vcombine.low %v2392_v8, %v2399_v12  ;;  %v2637_v28 = vpack.i.b16 %v2614_v16, %v2614_v16  ;;  %v6703_v6 = vld.sshfl [vmem:[%s8366_s4 + $0x38] sm:$0x33 pattern:$0x75316420] }
  0x34   : > { %v2841_v29 = vrot.slane %v2827_v22, %v7226_v17  ;;  %v3056_v30 = vcombine.high %v6676_v14, %v6676_v14  ;;  %v2628_v31 = vrot.slane %v2623_v13, %v7233_v20  ;;  %v2635_v19 = vrot.slane %v2630_v18, %v7233_v20 }
  0x35   : > { %2199 = vrot.lane.b32.xlu0 %v6622_v10, %s7147_s25  ;;  %v2842_v21 = vcombine.high %v2834_v26, %v2834_v26  ;;  %v2845_v32 = vpack.i.b16 %v2834_v26, %v2834_v26  ;;  %v2642_v33 = vrot.slane %v2637_v28, %v7233_v20  ;;  %v3063_v36 = vrot.slane %v6676_v14, %v7226_v17 }
  0x36   : > { %v2843_v34 = vcombine.high %v2841_v29, %v2841_v29  ;;  %v2852_v35 = vpack.i.b16 %v2841_v29, %v2841_v29  ;;  %2197 = vrot.lane.b32.xlu1 %v6621_v15, %s7147_s25  ;;  %v6636_v37 = vcombine.low %v2406_v23, %v2413_v24  ;;  %v3070_v39 = vrot.slane %v3056_v30, %v7226_v17 }
  0x37   : > { %v2859_v38 = vpack.i.b16 %v2842_v21, %v2842_v21  ;;  %v2850_v41 = vrot.slane %v2845_v32, %v7233_v20  ;;  %v6650_v42 = vcombine.low %v2635_v19, %v2642_v33  ;;  %v3071_v44 = vcombine.high %v3063_v36, %v3063_v36 }
  0x38   : > { %v2866_v40 = vpack.i.b16 %v2843_v34, %v2843_v34  ;;  %v2857_v43 = vrot.slane %v2852_v35, %v7233_v20  ;;  %v3072_v45 = vcombine.high %v3070_v39, %v3070_v39  ;;  %v6649_v46 = vcombine.low %v2621_v25, %v2628_v31 }
  0x39   : > { %2424 = vrot.lane.b32.xlu0 %v6635_v27, %s7148_s26  ;;  %v2864_v47 = vrot.slane %v2859_v38, %v7233_v20  ;;  %v3074_v48 = vpack.i.b16 %v3063_v36, %v3063_v36  ;;  %v3081_v52 = vpack.i.b16 %v3070_v39, %v3070_v39  ;;  %v3088_v53 = vpack.i.b16 %v3071_v44, %v3071_v44 }
  0x3a   : > { %2426 = vrot.lane.b32.xlu1 %v6636_v37, %s7148_s26  ;;  %v2871_v49 = vrot.slane %v2866_v40, %v7233_v20  ;;  %v3095_v54 = vpack.i.b16 %v3072_v45, %v3072_v45  ;;  %v6663_v55 = vcombine.low %v2850_v41, %v2857_v43  ;;  %v3479_v7 = vcombine.high %v6703_v6, %v6703_v6 }
  0x3b   : > { %v3093_v59 = vrot.slane %v3088_v53, %v7233_v20  ;;  %v3079_v62 = vrot.slane %v3074_v48, %v7233_v20  ;;  %v3086_v2 = vrot.slane %v3081_v52, %v7233_v20  ;;  %v7429_v8 = vrot.slane %v6703_v6, %v7226_v17 }
  0x3c   : > { %v3100_v60 = vrot.slane %v3095_v54, %v7233_v20  ;;  %v6664_v61 = vcombine.low %v2864_v47, %v2871_v49  ;;  %v7432_v9 = vrot.slane %v3479_v7, %v7226_v17  ;;  %vm390_vm2 = vcmask 449536  }
  0x3d   : > { %2655 = vrot.lane.b32.xlu0 %v6650_v42, %s7149_s27  ;;  %v6677_v5 = vcombine.low %v3079_v62, %v3086_v2  ;;  %v3494_v10 = vcombine.high %v7429_v8, %v7429_v8  ;;  %vm836_vm3 = vcmask 465920   ;;  %vm1065_vm4 = vcmask 515072  }
  0x3e   : > { %2653 = vrot.lane.b32.xlu1 %v6649_v46, %s7149_s27  ;;  %v6678_v4 = vcombine.low %v3093_v59, %v3100_v60  ;;  %v3495_v11 = vcombine.high %v7432_v9, %v7432_v9  ;;  %vm1294_vm5 = vcmask 523264   ;;  %vm8371_vm6 = vcmask 531456  }
  0x3f   : > { %v3511_v12 = vpack.i.b16 %v3494_v10, %v3494_v10  ;;  %vm8369_vm7 = vcmask 580608   ;;  %vm8368_vm8 = vcmask 588800   ;;  %vm8370_vm9 = vcmask 596992  }
  0x40   : > { %v3518_v13 = vpack.i.b16 %v3495_v11, %v3495_v11  ;;  %vm2430_vm10 = vcmask 973824   ;;  %vm2659_vm11 = vcmask 982016   ;;  %vm2888_vm12 = vcmask 990208  }
  0x41   : > { %2882 = vrot.lane.b32.xlu0 %v6663_v55, %s7150_s29  ;;  %v7439_v14 = vrot.slane %v3511_v12, %v7233_v20  ;;  %vm531_vm13 = vcmask 1045504   ;;  %vm527_vm14 = vcmask 97280   ;;  %vm3117_vm15 = vcmask 1039360  }
  0x42   : > { %2884 = vrot.lane.b32.xlu1 %v6664_v61, %s7150_s29  ;;  %v7442_v15 = vrot.slane %v3518_v13, %v7233_v20 }
  0x44   : > { %v6705_v16 = vcombine.low %v7439_v14, %v7442_v15 }
  0x45   : > { %3113 = vrot.lane.b32.xlu0 %v6678_v4, %s7151_s30 }
  0x46   : > { %3111 = vrot.lane.b32.xlu1 %v6677_v5, %s7151_s30 }
  0x86   : > { %v239_v18 = vpop.permute.xlu0 %238  ;;  %v259_v22 = vpop.permute.xlu1 %258 }
  0x87   : > { %v246_v23 = vmul.f32 %v239_v18, %v7267_v50  ;;  %v247_v24 = vmul.f32 %v239_v18, %v7269_v51  ;;  %v248_v25 = vmul.f32 %v239_v18, %v7273_v56  ;;  %v249_v26 = vmul.f32 %v239_v18, %v7275_v57 }
  0x89   : > { %v266_v27 = vadd.f32 %v259_v22, %v246_v23  ;;  %v267_v28 = vadd.f32 %v259_v22, %v247_v24  ;;  %v268_v29 = vadd.f32 %v259_v22, %v248_v25  ;;  %v269_v30 = vadd.f32 %v259_v22, %v249_v26 }
  0x8a   : > { %v244_v31 = vpop.permute.xlu0 %243  ;;  %v264_v57 = vpop.permute.xlu1 %263 }
  0x8b   : > { %v274_v19 = vmax.f32 %v266_v27, 0.0  ;;  %v275_v21 = vmax.f32 %v267_v28, 0.0  ;;  %v276_v32 = vmax.f32 %v268_v29, 0.0  ;;  %v277_v33 = vmax.f32 %v269_v30, 0.0 }
  0x8c   : > { %v250_v34 = vmul.f32 %v244_v31, %v7281_v58  ;;  %v251_v35 = vmul.f32 %v244_v31, %v7288_v63  ;;  %v252_v50 = vmul.f32 %v244_v31, %v7290_v0  ;;  %v253_v51 = vmul.f32 %v244_v31, %v7292_v1 }
  0x8d   : > { %v6887_v56 = vpack.c.bf16 %v275_v21, %v274_v19  ;;  %v6888_v36 = vpack.c.bf16 %v277_v33, %v276_v32  ;;  %v3497_v33 = vpack.i.b16 %v7429_v8, %v7429_v8 }
  0x8e   : > { %v270_v37 = vadd.f32 %v264_v57, %v250_v34  ;;  %v271_v38 = vadd.f32 %v264_v57, %v251_v35  ;;  %v272_v39 = vadd.f32 %v264_v57, %v252_v50  ;;  %v273_v40 = vadd.f32 %v264_v57, %v253_v51  ;;  %v473_v63 = vpop.permute.xlu1 %472  ;;  %v471_v0 = vpop.permute.xlu0 %470 }
  0x8f   : > { %310 = vst [vmem:[#allocation2 + $0x4] sm:$0xff] %v6887_v56  ;;  %311 = vst [vmem:[#allocation2 + $0xc] sm:$0xff] %v6888_v36  ;;  %v474_v1 = vrot.slane %v471_v0, 4  ;;  %v475_v46 = vrot.slane %v473_v63, 4  ;;  %v3504_v50 = vpack.i.b16 %v7432_v9, %v7432_v9 }
  0x90   : > { %v278_v41 = vmax.f32 %v270_v37, 0.0  ;;  %v279_v42 = vmax.f32 %v271_v38, 0.0  ;;  %v280_v43 = vmax.f32 %v272_v39, 0.0  ;;  %v281_v44 = vmax.f32 %v273_v40, 0.0 }
  0x91   : > { %v477_v48 = vsel %vm476_vm0, %v474_v1, %v471_v0  ;;  %v478_v49 = vsel %vm392_vm1, %v474_v1, %v475_v46  ;;  %v3502_v38 = vrot.slane %v3497_v33, %v7233_v20  ;;  %v3509_v40 = vrot.slane %v3504_v50, %v7233_v20 }
  0x92   : > { %v6889_v58 = vpack.c.bf16 %v279_v42, %v278_v41  ;;  %v6890_v45 = vpack.c.bf16 %v281_v44, %v280_v43  ;;  %v387_v52 = vpop.permute.xlu1 %386  ;;  %v385_v53 = vpop.permute.xlu0 %384  ;;  %v479_v4 = vsel %vm476_vm0, %v478_v49, %v473_v63 }
  0x93   : > { %v389_v60 = vrot.slane %v387_v52, 4  ;;  %v388_v61 = vrot.slane %v385_v53, 4  ;;  %v6704_v63 = vcombine.low %v3502_v38, %v3509_v40 }
  0x94   : > { %312 = vst [vmem:[#allocation2 + $0x1c] sm:$0x33] %v6889_v58  ;;  %313 = vst [vmem:[#allocation2 + $0x24] sm:$0x33] %v6890_v45 }
  0x95   : > { %v391_v12 = vsel %vm390_vm2, %v388_v61, %v385_v53  ;;  %v393_v13 = vsel %vm392_vm1, %v388_v61, %v389_v60 }
  0x96   : > { %v7454_v47 = vld [vmem:[#allocation2] sm:$0xff]  ;;  %v7459_v62 = vld [vmem:[#allocation2 + $0x8] sm:$0xff]  ;;  %v316_v18 = vld [vmem:[#allocation2 + $0x10] sm:$0xf]  ;;  %v831_v27 = vpop.permute.xlu0 %830  ;;  %v833_v29 = vpop.permute.xlu1 %832  ;;  %v394_v30 = vsel %vm390_vm2, %v393_v13, %v387_v52 }
  0x97   : > { %v483_v55 = vmul.bf16 %v477_v48, %v7454_v47  ;;  %v484_v11 = vmul.bf16 %v479_v4, %v7459_v62  ;;  %v398_v26 = vmul.bf16 %v391_v12, %v7454_v47  ;;  %v485_v28 = vmul.bf16 %v475_v46, %v316_v18 }
  0x98   : > { %v834_v32 = vrot.slane %v831_v27, 4  ;;  %v835_v34 = vrot.slane %v833_v29, 4  ;;  %v399_v35 = vmul.bf16 %v394_v30, %v7459_v62  ;;  %v400_v39 = vmul.bf16 %v389_v60, %v316_v18 }
  0x9a   : > { %v837_v37 = vsel %vm836_vm3, %v834_v32, %v831_v27  ;;  %v838_v8 = vsel %vm392_vm1, %v834_v32, %v835_v34  ;;  %v1060_v45 = vpop.permute.xlu0 %1059  ;;  %v1062_v0 = vpop.permute.xlu1 %1061 }
  0x9b   : > { %v317_v54 = vld [vmem:[#allocation2 + $0x18] sm:$0x33]  ;;  %v318_v2 = vld [vmem:[#allocation2 + $0x20] sm:$0x33]  ;;  %v319_v10 = vld [vmem:[#allocation2 + $0x28] sm:$0x3]  ;;  %v843_v41 = vmul.bf16 %v837_v37, %v7454_v47  ;;  %v839_v58 = vsel %vm836_vm3, %v838_v8, %v833_v29 }
  0x9c   : > { %v486_v59 = vmul.bf16 %v477_v48, %v317_v54  ;;  %v487_v7 = vmul.bf16 %v479_v4, %v318_v2  ;;  %v401_v22 = vmul.bf16 %v391_v12, %v317_v54  ;;  %v488_v25 = vmul.bf16 %v475_v46, %v319_v10  ;;  %v762_v57 = vld [vmem:[#allocation2 + $0x18] sm:$0x33]  ;;  %v763_v44 = vld [vmem:[#allocation2 + $0x20] sm:$0x33]  ;;  %v764_v52 = vld [vmem:[#allocation2 + $0x28] sm:$0x3] }
  0x9d   : > { %v402_v21 = vmul.bf16 %v394_v30, %v318_v2  ;;  %v403_v36 = vmul.bf16 %v389_v60, %v319_v10  ;;  %v846_v9 = vmul.bf16 %v837_v37, %v762_v57  ;;  %v844_v46 = vmul.bf16 %v839_v58, %v7459_v62  ;;  %v761_v2 = vld [vmem:[#allocation2 + $0x10] sm:$0xf]  ;;  %v993_v32 = vld [vmem:[#allocation2 + $0x28] sm:$0x3]  ;;  %v1221_v37 = vld [vmem:[#allocation2 + $0x20] sm:$0x33] }
  0x9e   : > { %v6518_v5 = vcombine.high %v483_v55, %v486_v59  ;;  %v6517_v6 = vcombine.low %v483_v55, %v486_v59  ;;  %v6520_v23 = vcombine.high %v484_v11, %v487_v7  ;;  %v6519_v24 = vcombine.low %v484_v11, %v487_v7  ;;  %v1289_v54 = vpop.permute.xlu0 %1288  ;;  %v1291_v7 = vpop.permute.xlu1 %1290 }
  0x9f   : > { %v6521_v31 = vcombine.low %v485_v28, %v488_v25  ;;  %v6526_v19 = vcombine.low %v398_v26, %v401_v22  ;;  %v6527_v51 = vcombine.high %v398_v26, %v401_v22  ;;  %v6528_v56 = vcombine.low %v399_v35, %v402_v21  ;;  %v992_v25 = vld [vmem:[#allocation2 + $0x20] sm:$0x33] }
  0xa0   : > { %514 = vrot.lane.b32.xlu1 %v6518_v5, %s7146_s20  ;;  %512 = vrot.lane.b32.xlu0 %v6517_v6, %s7146_s20  ;;  %v6529_v42 = vcombine.high %v399_v35, %v402_v21  ;;  %v6530_v43 = vcombine.low %v400_v39, %v403_v36  ;;  %v6540_v1 = vcombine.low %v843_v41, %v846_v9  ;;  %v1063_v49 = vrot.slane %v1060_v45, 4  ;;  %v991_v6 = vld [vmem:[#allocation2 + $0x18] sm:$0x33] }
  0xa1   : > { %v847_v48 = vmul.bf16 %v839_v58, %v763_v44  ;;  %v1064_v53 = vrot.slane %v1062_v0, 4  ;;  %v6541_v59 = vcombine.high %v843_v41, %v846_v9  ;;  %v848_v60 = vmul.bf16 %v835_v34, %v764_v52 }
  0xa2   : > { %v1066_v61 = vsel %vm1065_vm4, %v1063_v49, %v1060_v45  ;;  %v845_v5 = vmul.bf16 %v835_v34, %v761_v2  ;;  %v1292_v10 = vrot.slane %v1289_v54, 4  ;;  %v1519_v36 = vpop.permute.xlu1 %1518  ;;  %v1517_v57 = vpop.permute.xlu0 %1516 }
  0xa3   : > { %v6542_v55 = vcombine.low %v844_v46, %v847_v48  ;;  %v1067_v4 = vsel %vm392_vm1, %v1063_v49, %v1064_v53  ;;  %v1072_v11 = vmul.bf16 %v1066_v61, %v7454_v47  ;;  %v1075_v12 = vmul.bf16 %v1066_v61, %v991_v6 }
  0xa4   : > { %518 = vrot.lane.b32.xlu1 %v6520_v23, %s7146_s20  ;;  %516 = vrot.lane.b32.xlu0 %v6519_v24, %s7146_s20  ;;  %v6544_v13 = vcombine.low %v845_v5, %v848_v60  ;;  %v6543_v18 = vcombine.high %v844_v46, %v847_v48  ;;  %v1068_v22 = vsel %vm1065_vm4, %v1067_v4, %v1062_v0  ;;  %v1293_v23 = vrot.slane %v1291_v7, 4  ;;  %v1448_v48 = vld [vmem:[#allocation2 + $0x18] sm:$0x33]  ;;  %v1449_v4 = vld [vmem:[#allocation2 + $0x20] sm:$0x33] }
  0xa5   : > { %v1295_v24 = vsel %vm1294_vm5, %v1292_v10, %v1289_v54  ;;  %v6555_v26 = vcombine.high %v1072_v11, %v1075_v12  ;;  %v6554_v27 = vcombine.low %v1072_v11, %v1075_v12  ;;  %v1073_v28 = vmul.bf16 %v1068_v22, %v7459_v62  ;;  %v1675_v11 = vld [vmem:[#allocation2 + $0x18] sm:$0x33] }
  0xa6   : > { %v1076_v29 = vmul.bf16 %v1068_v22, %v992_v25  ;;  %v1296_v30 = vsel %vm392_vm1, %v1292_v10, %v1293_v23  ;;  %v1301_v21 = vmul.bf16 %v1295_v24, %v7454_v47  ;;  %v1520_v41 = vrot.slane %v1517_v57, 4  ;;  %v1744_v44 = vpop.permute.xlu1 %1743  ;;  %v1746_v52 = vpop.permute.xlu0 %1745  ;;  %v1447_v22 = vld [vmem:[#allocation2 + $0x10] sm:$0xf] }
  0xa7   : > { %v1521_v9 = vrot.slane %v1519_v36, 4  ;;  %v1747_v49 = vrot.slane %v1744_v44, 4  ;;  %v1748_v61 = vrot.slane %v1746_v52, 4 }
  0xa8   : > { %520 = vrot.lane.b32.xlu0 %v6521_v31, %s7146_s20  ;;  %647 = vrot.lane.b32.xlu1 %v6526_v19, %s7147_s25  ;;  %v990_v31 = vld [vmem:[#allocation2 + $0x10] sm:$0xf]  ;;  %v1220_v19 = vld [vmem:[#allocation2 + $0x18] sm:$0x33]  ;;  %v6557_v35 = vcombine.high %v1073_v28, %v1076_v29  ;;  %v6556_v50 = vcombine.low %v1073_v28, %v1076_v29 }
  0xa9   : > { %v1074_v33 = vmul.bf16 %v1064_v53, %v990_v31  ;;  %v1304_v34 = vmul.bf16 %v1295_v24, %v1220_v19  ;;  %v1523_v46 = vsel %vm392_vm1, %v1520_v41, %v1521_v9  ;;  %v1749_v2 = vsel %vm8369_vm7, %v1747_v49, %v1744_v44  ;;  %v1676_v31 = vld [vmem:[#allocation2 + $0x20] sm:$0x33] }
  0xaa   : > { %v1524_v60 = vsel %vm8371_vm6, %v1523_v46, %v1519_v36  ;;  %v1750_v12 = vsel %vm392_vm1, %v1747_v49, %v1748_v61  ;;  %v1973_v29 = vpop.permute.xlu1 %1972 }
  0xab   : > { %v6568_v38 = vcombine.low %v1301_v21, %v1304_v34  ;;  %v6569_v45 = vcombine.high %v1301_v21, %v1304_v34  ;;  %v1532_v10 = vmul.bf16 %v1524_v60, %v1449_v4  ;;  %v1751_v28 = vsel %vm8369_vm7, %v1750_v12, %v1746_v52 }
  0xac   : > { %649 = vrot.lane.b32.xlu0 %v6527_v51, %s7147_s25  ;;  %651 = vrot.lane.b32.xlu1 %v6528_v56, %s7147_s25  ;;  %v1077_v51 = vmul.bf16 %v1064_v53, %v993_v32  ;;  %v1297_v56 = vsel %vm1294_vm5, %v1296_v30, %v1291_v7  ;;  %v1529_v7 = vmul.bf16 %v1524_v60, %v7459_v62  ;;  %v1971_v30 = vpop.permute.xlu0 %1970  ;;  %v1901_v60 = vld [vmem:[#allocation2 + $0x10] sm:$0xf] }
  0xad   : > { %v1302_v39 = vmul.bf16 %v1297_v56, %v7459_v62  ;;  %v1305_v40 = vmul.bf16 %v1297_v56, %v1221_v37  ;;  %v1756_v19 = vmul.bf16 %v1751_v28, %v7459_v62  ;;  %v1759_v21 = vmul.bf16 %v1751_v28, %v1676_v31  ;;  %v2128_v28 = vld [vmem:[#allocation2 + $0x10] sm:$0xf] }
  0xae   : > { %v6558_v8 = vcombine.low %v1074_v33, %v1077_v51  ;;  %v6585_v24 = vcombine.high %v1529_v7, %v1532_v10  ;;  %v6584_v25 = vcombine.low %v1529_v7, %v1532_v10  ;;  %v1974_v34 = vrot.slane %v1971_v30, 4  ;;  %v1677_v51 = vld [vmem:[#allocation2 + $0x28] sm:$0x3]  ;;  %v2198_v56 = vpop.permute.xlu1 %2197 }
  0xaf   : > { %v6570_v58 = vcombine.low %v1302_v39, %v1305_v40  ;;  %v6598_v36 = vcombine.low %v1756_v19, %v1759_v21 }
  0xb0   : > { %653 = vrot.lane.b32.xlu0 %v6529_v42, %s7147_s25  ;;  %655 = vrot.lane.b32.xlu1 %v6530_v43, %s7147_s25  ;;  %v1219_v42 = vld [vmem:[#allocation2 + $0x10] sm:$0xf]  ;;  %v1222_v43 = vld [vmem:[#allocation2 + $0x28] sm:$0x3] }
  0xb1   : > { %v1306_v0 = vmul.bf16 %v1293_v23, %v1222_v43 }
  0xb2   : > { %v2427_v12 = vpop.permute.xlu1 %2426 }
  0xb4   : > { %872 = vrot.lane.b32.xlu0 %v6540_v1, %s7145_s15  ;;  %3534 = vrot.lane.b32.xlu1 %v6704_v63, %s7152_s10  ;;  %v1303_v63 = vmul.bf16 %v1293_v23, %v1219_v42  ;;  %v1522_v1 = vsel %vm8371_vm6, %v1520_v41, %v1517_v57  ;;  %v1450_v23 = vld [vmem:[#allocation2 + $0x28] sm:$0x3]  ;;  %v2201_v41 = vrot.slane %v2198_v56, 4 }
  0xb5   : > { %v1528_v53 = vmul.bf16 %v1522_v1, %v7454_v47  ;;  %v1531_v54 = vmul.bf16 %v1522_v1, %v1448_v48  ;;  %v1903_v1 = vld [vmem:[#allocation2 + $0x20] sm:$0x33] }
  0xb7   : > { %v6583_v5 = vcombine.high %v1528_v53, %v1531_v54  ;;  %v6582_v6 = vcombine.low %v1528_v53, %v1531_v54  ;;  %v2129_v53 = vld [vmem:[#allocation2 + $0x18] sm:$0x33] }
  0xb8   : > { %876 = vrot.lane.b32.xlu0 %v6542_v55, %s7145_s15  ;;  %874 = vrot.lane.b32.xlu1 %v6541_v59, %s7145_s15  ;;  %v6572_v55 = vcombine.low %v1303_v63, %v1306_v0  ;;  %v6571_v59 = vcombine.high %v1302_v39, %v1305_v40  ;;  %v1902_v40 = vld [vmem:[#allocation2 + $0x18] sm:$0x33]  ;;  %v2203_v0 = vsel %vm8370_vm9, %v2201_v41, %v2198_v56 }
  0xbc   : > { %880 = vrot.lane.b32.xlu0 %v6544_v13, %s7145_s15  ;;  %878 = vrot.lane.b32.xlu1 %v6543_v18, %s7145_s15  ;;  %v1755_v13 = vmul.bf16 %v1749_v2, %v7454_v47  ;;  %v1758_v18 = vmul.bf16 %v1749_v2, %v1675_v11  ;;  %v2130_v11 = vld [vmem:[#allocation2 + $0x20] sm:$0x33] }
  0xbe   : > { %v6596_v32 = vcombine.low %v1755_v13, %v1758_v18  ;;  %v6597_v57 = vcombine.high %v1755_v13, %v1758_v18  ;;  %v6717_v13 = vld.sshfl [vmem:[%s8366_s4 + $0x3c] sm:$0x33 pattern:$0x75316420] }
  0xc0   : > { %1103 = vrot.lane.b32.xlu0 %v6555_v26, %s7144_s12  ;;  %1101 = vrot.lane.b32.xlu1 %v6554_v27, %s7144_s12  ;;  %v1530_v26 = vmul.bf16 %v1521_v9, %v1447_v22  ;;  %v1533_v27 = vmul.bf16 %v1521_v9, %v1450_v23  ;;  %v2200_v9 = vpop.permute.xlu0 %2199 }
  0xc1   : > { %v2202_v63 = vrot.slane %v2200_v9, 4 }
  0xc2   : > { %v6586_v33 = vcombine.low %v1530_v26, %v1533_v27  ;;  %v2429_v26 = vrot.slane %v2427_v12, 4  ;;  %v3706_v27 = vcombine.high %v6717_v13, %v6717_v13 }
  0xc3   : > { %v2204_v54 = vsel %vm392_vm1, %v2201_v41, %v2202_v63 }
  0xc4   : > { %1107 = vrot.lane.b32.xlu0 %v6557_v35, %s7144_s12  ;;  %1105 = vrot.lane.b32.xlu1 %v6556_v50, %s7144_s12  ;;  %v1975_v35 = vrot.slane %v1973_v29, 4  ;;  %v1674_v50 = vld [vmem:[#allocation2 + $0x10] sm:$0xf]  ;;  %v2205_v7 = vsel %vm8370_vm9, %v2204_v54, %v2200_v9  ;;  %v2425_v10 = vpop.permute.xlu0 %2424 }
  0xc5   : > { %v1757_v37 = vmul.bf16 %v1748_v61, %v1674_v50  ;;  %v2210_v18 = vmul.bf16 %v2205_v7, %v7459_v62  ;;  %v2213_v22 = vmul.bf16 %v2205_v7, %v2130_v11  ;;  %v2356_v50 = vld [vmem:[#allocation2 + $0x18] sm:$0x33] }
  0xc6   : > { %v1977_v39 = vsel %vm392_vm1, %v1974_v34, %v1975_v35 }
  0xc8   : > { %1330 = vrot.lane.b32.xlu0 %v6568_v38, %s7143_s9  ;;  %1109 = vrot.lane.b32.xlu1 %v6558_v8, %s7144_s12  ;;  %v1760_v38 = vmul.bf16 %v1748_v61, %v1677_v51  ;;  %v1976_v8 = vsel %vm8368_vm8, %v1974_v34, %v1971_v30  ;;  %v1904_v61 = vld [vmem:[#allocation2 + $0x28] sm:$0x3]  ;;  %v6626_v30 = vcombine.low %v2210_v18, %v2213_v22 }
  0xc9   : > { %v1982_v42 = vmul.bf16 %v1976_v8, %v7454_v47  ;;  %v1985_v43 = vmul.bf16 %v1976_v8, %v1902_v40  ;;  %v3713_v34 = vrot.slane %v6717_v13, %v7226_v17 }
  0xca   : > { %v6600_v44 = vcombine.low %v1757_v37, %v1760_v38 }
  0xcb   : > { %v6611_v46 = vcombine.high %v1982_v42, %v1985_v43  ;;  %v6610_v48 = vcombine.low %v1982_v42, %v1985_v43  ;;  %v3721_v38 = vcombine.high %v3713_v34, %v3713_v34  ;;  %v3724_v42 = vpack.i.b16 %v3713_v34, %v3713_v34  ;;  %v6745_v34 = vld.sshfl [vmem:[%s8366_s4 + $0x44] sm:$0x33 pattern:$0x75316420] }
  0xcc   : > { %1334 = vrot.lane.b32.xlu0 %v6570_v58, %s7143_s9  ;;  %1332 = vrot.lane.b32.xlu1 %v6569_v45, %s7143_s9  ;;  %v6599_v58 = vcombine.high %v1756_v19, %v1759_v21  ;;  %v1978_v45 = vsel %vm8368_vm8, %v1977_v39, %v1973_v29  ;;  %v2131_v29 = vld [vmem:[#allocation2 + $0x28] sm:$0x3]  ;;  %v2211_v19 = vmul.bf16 %v2202_v63, %v2128_v28  ;;  %v2357_v39 = vld [vmem:[#allocation2 + $0x20] sm:$0x33] }
  0xcd   : > { %v1983_v49 = vmul.bf16 %v1978_v45, %v7459_v62  ;;  %v1986_v52 = vmul.bf16 %v1978_v45, %v1903_v1  ;;  %v2214_v21 = vmul.bf16 %v2202_v63, %v2131_v29  ;;  %v3738_v45 = vpack.i.b16 %v3721_v38, %v3721_v38  ;;  %v2355_v1 = vld [vmem:[#allocation2 + $0x10] sm:$0xf] }
  0xce   : > { %v3729_v14 = vrot.slane %v3724_v42, %v7233_v20 }
  0xcf   : > { %v6613_v2 = vcombine.high %v1983_v49, %v1986_v52  ;;  %v6612_v4 = vcombine.low %v1983_v49, %v1986_v52  ;;  %v2439_v52 = vmul.bf16 %v2429_v26, %v2355_v1 }
  0xd0   : > { %1338 = vrot.lane.b32.xlu0 %v6572_v55, %s7143_s9  ;;  %1336 = vrot.lane.b32.xlu1 %v6571_v59, %s7143_s9  ;;  %v2209_v55 = vmul.bf16 %v2203_v0, %v7454_v47  ;;  %v2212_v59 = vmul.bf16 %v2203_v0, %v2129_v53  ;;  %v6731_v0 = vld.sshfl [vmem:[%s8366_s4 + $0x40] sm:$0x33 pattern:$0x75316420] }
  0xd2   : > { %v6624_v23 = vcombine.low %v2209_v55, %v2212_v59  ;;  %v6625_v31 = vcombine.high %v2209_v55, %v2212_v59 }
  0xd4   : > { %1559 = vrot.lane.b32.xlu0 %v6583_v5, %s7142_s6  ;;  %1557 = vrot.lane.b32.xlu1 %v6582_v6, %s7142_s6  ;;  %v1984_v5 = vmul.bf16 %v1975_v35, %v1901_v60  ;;  %v1987_v6 = vmul.bf16 %v1975_v35, %v1904_v61  ;;  %v3720_v35 = vrot.slane %v3706_v27, %v7226_v17 }
  0xd5   : > { %v3933_v60 = vcombine.high %v6731_v0, %v6731_v0 }
  0xd6   : > { %v3722_v8 = vcombine.high %v3720_v35, %v3720_v35  ;;  %v3731_v43 = vpack.i.b16 %v3720_v35, %v3720_v35 }
  0xd7   : > { %v3947_v11 = vrot.slane %v3933_v60, %v7226_v17 }
  0xd8   : > { %1563 = vrot.lane.b32.xlu0 %v6585_v24, %s7142_s6  ;;  %1561 = vrot.lane.b32.xlu1 %v6584_v25, %s7142_s6  ;;  %v6614_v24 = vcombine.low %v1984_v5, %v1987_v6  ;;  %v2428_v25 = vrot.slane %v2425_v10, 4  ;;  %v3745_v63 = vpack.i.b16 %v3722_v8, %v3722_v8  ;;  %v3736_v15 = vrot.slane %v3731_v43, %v7233_v20 }
  0xd9   : > { %v3940_v6 = vrot.slane %v6731_v0, %v7226_v17  ;;  %v3958_v27 = vpack.i.b16 %v3947_v11, %v3947_v11  ;;  %v3949_v29 = vcombine.high %v3947_v11, %v3947_v11 }
  0xda   : > { %v3750_v59 = vrot.slane %v3745_v63, %v7233_v20  ;;  %v6718_v7 = vcombine.low %v3729_v14, %v3736_v15  ;;  %v2814_v63 = vld [vmem:[#allocation2 + $0x18] sm:$0x33] }
  0xdb   : > { %v3948_v28 = vcombine.high %v3940_v6, %v3940_v6  ;;  %v3963_v35 = vrot.slane %v3958_v27, %v7233_v20 }
  0xdc   : > { %1784 = vrot.lane.b32.xlu0 %v6596_v32, %s7141_s28  ;;  %1565 = vrot.lane.b32.xlu1 %v6586_v33, %s7142_s6  ;;  %v2431_v32 = vsel %vm2430_vm10, %v2428_v25, %v2425_v10  ;;  %v2432_v33 = vsel %vm392_vm1, %v2428_v25, %v2429_v26 }
  0xdd   : > { %v2437_v51 = vmul.bf16 %v2431_v32, %v7454_v47  ;;  %v2440_v56 = vmul.bf16 %v2431_v32, %v2356_v50  ;;  %v2433_v37 = vsel %vm2430_vm10, %v2432_v33, %v2427_v12  ;;  %v2585_v12 = vld [vmem:[#allocation2 + $0x18] sm:$0x33]  ;;  %v3965_v50 = vpack.i.b16 %v3948_v28, %v3948_v28 }
  0xde   : > { %v2438_v41 = vmul.bf16 %v2433_v37, %v7459_v62  ;;  %v2441_v9 = vmul.bf16 %v2433_v37, %v2357_v39  ;;  %v2587_v37 = vld [vmem:[#allocation2 + $0x28] sm:$0x3] }
  0xdf   : > { %v6638_v40 = vcombine.low %v2437_v51, %v2440_v56 }
  0xe0   : > { %1788 = vrot.lane.b32.xlu0 %v6598_v36, %s7141_s28  ;;  %1786 = vrot.lane.b32.xlu1 %v6597_v57, %s7141_s28  ;;  %v6628_v36 = vcombine.low %v2211_v19, %v2214_v21  ;;  %v6627_v57 = vcombine.high %v2210_v18, %v2213_v22  ;;  %v6640_v49 = vcombine.low %v2438_v41, %v2441_v9 }
  0xe1   : > { %v6641_v61 = vcombine.high %v2438_v41, %v2441_v9  ;;  %v4160_v9 = vcombine.high %v6745_v34, %v6745_v34 }
  0xe4   : > { %1792 = vrot.lane.b32.xlu0 %v6600_v44, %s7141_s28  ;;  %1790 = vrot.lane.b32.xlu1 %v6599_v58, %s7141_s28  ;;  %v2654_v44 = vpop.permute.xlu1 %2653  ;;  %v2656_v58 = vpop.permute.xlu0 %2655 }
  0xe5   : > { %v2657_v54 = vrot.slane %v2654_v44, 4  ;;  %v7573_v55 = vrot.slane %v2656_v58, 4 }
  0xe7   : > { %v2661_v5 = vsel %vm392_vm1, %v2657_v54, %v7573_v55  ;;  %v2671_v41 = vmul.bf16 %v7573_v55, %v2587_v37 }
  0xe8   : > { %2013 = vrot.lane.b32.xlu0 %v6611_v46, %s7139_s22  ;;  %2011 = vrot.lane.b32.xlu1 %v6610_v48, %s7139_s22  ;;  %v2358_v46 = vld [vmem:[#allocation2 + $0x28] sm:$0x3]  ;;  %v6639_v48 = vcombine.high %v2437_v51, %v2440_v56  ;;  %v2662_v22 = vsel %vm2659_vm11, %v2661_v5, %v2656_v58  ;;  %v2885_v25 = vpop.permute.xlu1 %2884  ;;  %v3972_v51 = vpack.i.b16 %v3949_v29, %v3949_v29 }
  0xe9   : > { %v2442_v53 = vmul.bf16 %v2429_v26, %v2358_v46  ;;  %v2883_v26 = vpop.permute.xlu0 %2882  ;;  %v7600_v56 = vrot.slane %v2885_v25, 4  ;;  %v2816_v29 = vld [vmem:[#allocation2 + $0x28] sm:$0x3] }
  0xea   : > { %v2886_v32 = vrot.slane %v2883_v26, 4  ;;  %v3977_v58 = vrot.slane %v3972_v51, %v7233_v20 }
  0xec   : > { %2017 = vrot.lane.b32.xlu0 %v6613_v2, %s7139_s22  ;;  %2015 = vrot.lane.b32.xlu1 %v6612_v4, %s7139_s22  ;;  %v6642_v2 = vcombine.low %v2439_v52, %v2442_v53  ;;  %v2660_v4 = vsel %vm2659_vm11, %v2657_v54, %v2654_v44  ;;  %v7602_v38 = vpop.permute.xlu1 %3111  ;;  %v2889_v42 = vsel %vm2888_vm12, %v2886_v32, %v2883_v26 }
  0xed   : > { %v2666_v13 = vmul.bf16 %v2660_v4, %v7454_v47  ;;  %v2669_v18 = vmul.bf16 %v2660_v4, %v2585_v12  ;;  %v7604_v8 = vpop.permute.xlu0 %3113  ;;  %v3970_v44 = vrot.slane %v3965_v50, %v7233_v20  ;;  %v2895_v52 = vmul.bf16 %v2889_v42, %v7454_v47 }
  0xee   : > { %v2898_v53 = vmul.bf16 %v2889_v42, %v2814_v63  ;;  %v3043_v63 = vld [vmem:[#allocation2 + $0x18] sm:$0x33] }
  0xef   : > { %v6652_v19 = vcombine.low %v2666_v13, %v2669_v18  ;;  %v6653_v21 = vcombine.high %v2666_v13, %v2669_v18  ;;  %v6733_v54 = vcombine.low %v3970_v44, %v3977_v58 }
  0xf0   : > { %2238 = vrot.lane.b32.xlu0 %v6624_v23, %s7140_s23  ;;  %2019 = vrot.lane.b32.xlu1 %v6614_v24, %s7139_s22  ;;  %v3951_v23 = vpack.i.b16 %v3940_v6, %v3940_v6  ;;  %v2586_v24 = vld [vmem:[#allocation2 + $0x20] sm:$0x33]  ;;  %v6666_v4 = vcombine.low %v2895_v52, %v2898_v53  ;;  %v6667_v27 = vcombine.high %v2895_v52, %v2898_v53 }
  0xf2   : > { %v3956_v33 = vrot.slane %v3951_v23, %v7233_v20  ;;  %v2813_v23 = vld [vmem:[#allocation2 + $0x10] sm:$0xf] }
  0xf4   : > { %2242 = vrot.lane.b32.xlu0 %v6626_v30, %s7140_s23  ;;  %2240 = vrot.lane.b32.xlu1 %v6625_v31, %s7140_s23  ;;  %v2667_v30 = vmul.bf16 %v2662_v22, %v7459_v62  ;;  %v2670_v31 = vmul.bf16 %v2662_v22, %v2586_v24  ;;  %v6732_v43 = vcombine.low %v3956_v33, %v3963_v35 }
  0xf6   : > { %v6655_v39 = vcombine.high %v2667_v30, %v2670_v31 }
  0xf8   : > { %2246 = vrot.lane.b32.xlu0 %v6628_v36, %s7140_s23  ;;  %2244 = vrot.lane.b32.xlu1 %v6627_v57, %s7140_s23  ;;  %v6654_v36 = vcombine.low %v2667_v30, %v2670_v31  ;;  %v2584_v57 = vld [vmem:[#allocation2 + $0x10] sm:$0xf]  ;;  %v6759_v30 = vld.sshfl [vmem:[%s8366_s4 + $0x48] sm:$0x33 pattern:$0x75316420] }
  0xf9   : > { %v3115_v31 = vrot.slane %v7602_v38, 4 }
  0xfc   : > { %3536 = vrot.lane.b32.xlu0 %v6705_v16, %s7152_s10  ;;  %2466 = vrot.lane.b32.xlu1 %v6638_v40, %s7153_s14  ;;  %v3743_v16 = vrot.slane %v3738_v45, %v7233_v20  ;;  %v2668_v40 = vmul.bf16 %v7573_v55, %v2584_v57  ;;  %v2890_v45 = vsel %vm392_vm1, %v2886_v32, %v7600_v56  ;;  %v7642_v32 = vrot.slane %v7604_v8, 4 }
  0xfd   : > { %v2891_v55 = vsel %vm2888_vm12, %v2890_v45, %v2885_v25  ;;  %v4387_v57 = vcombine.high %v6759_v30, %v6759_v30  ;;  %v4394_v45 = vrot.slane %v6759_v30, %v7226_v17 }
  0xfe   : > { %v6719_v10 = vcombine.low %v3743_v16, %v3750_v59  ;;  %v6656_v46 = vcombine.low %v2668_v40, %v2671_v41  ;;  %v2815_v59 = vld [vmem:[#allocation2 + $0x20] sm:$0x33]  ;;  %v2896_v5 = vmul.bf16 %v2891_v55, %v7459_v62  ;;  %v6773_v41 = vld.sshfl [vmem:[%s8366_s4 + $0x4c] sm:$0x33 pattern:$0x75316420]  ;;  %v3119_v44 = vsel %vm392_vm1, %v3115_v31, %v7642_v32 }
  0xff   : > { %v2899_v6 = vmul.bf16 %v2891_v55, %v2815_v59  ;;  %v3120_v55 = vsel %vm3117_vm15, %v3119_v44, %v7604_v8  ;;  %v3044_v59 = vld [vmem:[#allocation2 + $0x20] sm:$0x33]  ;;  %v4405_v8 = vpack.i.b16 %v4394_v45, %v4394_v45 }
 0x100   : > { %2468 = vrot.lane.b32.xlu0 %v6639_v48, %s7153_s14  ;;  %2470 = vrot.lane.b32.xlu1 %v6640_v49, %s7153_s14  ;;  %v4167_v48 = vrot.slane %v6745_v34, %v7226_v17  ;;  %v4174_v49 = vrot.slane %v4160_v9, %v7226_v17  ;;  %v3118_v9 = vsel %vm3117_vm15, %v3115_v31, %v7602_v38 }
 0x101   : > { %v6668_v28 = vcombine.low %v2896_v5, %v2899_v6  ;;  %v3127_v52 = vmul.bf16 %v3118_v9, %v3043_v63  ;;  %v6539_v63 = vld [vmem:[%s8365_s3 + $0x8] sm:$0xf] }
 0x102   : > { %v4175_v60 = vcombine.high %v4167_v48, %v4167_v48  ;;  %v4178_v11 = vpack.i.b16 %v4167_v48, %v4167_v48  ;;  %v4185_v12 = vpack.i.b16 %v4174_v49, %v4174_v49  ;;  %v4614_v48 = vcombine.high %v6773_v41, %v6773_v41 }
 0x104   : > { %2472 = vrot.lane.b32.xlu0 %v6641_v61, %s7153_s14  ;;  %2474 = vrot.lane.b32.xlu1 %v6642_v2, %s7153_s14  ;;  %v4176_v61 = vcombine.high %v4174_v49, %v4174_v49  ;;  %v4192_v24 = vpack.i.b16 %v4175_v60, %v4175_v60  ;;  %v4183_v34 = vrot.slane %v4178_v11, %v7233_v20 }
 0x105   : > { %v4190_v35 = vrot.slane %v4185_v12, %v7233_v20  ;;  %v3124_v49 = vmul.bf16 %v3118_v9, %v7454_v47  ;;  %v404_v47 = vld [vmem:[%s8365_s3] sm:$0xf]  ;;  %v3042_v12 = vld [vmem:[#allocation2 + $0x10] sm:$0xf] }
 0x106   : > { %v4199_v25 = vpack.i.b16 %v4176_v61, %v4176_v61 }
 0x107   : > { %v6746_v58 = vcombine.low %v4183_v34, %v4190_v35  ;;  %v6681_v11 = vcombine.high %v3124_v49, %v3127_v52 }
 0x108   : > { %3761 = vrot.lane.b32.xlu0 %v6718_v7, %s7154_s21  ;;  %3763 = vrot.lane.b32.xlu1 %v6719_v10, %s7154_s21  ;;  %v6516_v10 = vld [vmem:[%s8365_s3 + $0x4] sm:$0xf] }
 0x10c   : > { %2695 = vrot.lane.b32.xlu0 %v6652_v19, %s7155_s8  ;;  %2697 = vrot.lane.b32.xlu1 %v6653_v21, %s7155_s8  ;;  %v2897_v19 = vmul.bf16 %v7600_v56, %v2813_v23  ;;  %v2900_v21 = vmul.bf16 %v7600_v56, %v2816_v29  ;;  %v4204_v56 = vrot.slane %v4199_v25, %v7233_v20  ;;  %v3045_v25 = vld [vmem:[#allocation2 + $0x28] sm:$0x3] }
 0x10d   : > { %v3129_v31 = vmul.bf16 %v7642_v32, %v3045_v25 }
 0x10e   : > { %v6670_v42 = vcombine.low %v2897_v19, %v2900_v21 }
 0x110   : > { %2699 = vrot.lane.b32.xlu0 %v6654_v36, %s7155_s8  ;;  %2701 = vrot.lane.b32.xlu1 %v6655_v39, %s7155_s8  ;;  %v4197_v36 = vrot.slane %v4192_v24, %v7233_v20  ;;  %v6669_v39 = vcombine.high %v2896_v5, %v2899_v6  ;;  %v4628_v5 = vrot.slane %v4614_v48, %v7226_v17 }
 0x111   : > { %v6680_v6 = vcombine.low %v3124_v49, %v3127_v52  ;;  %v7722_v49 = vld [vmem:[#allocation2 + $0x4] sm:$0xff]  ;;  %v3466_v52 = vld [vmem:[#allocation2 + $0x1c] sm:$0x33] }
 0x112   : > { %v515_v0 = vpop.permute.xlu1 %514  ;;  %v513_v1 = vpop.permute.xlu0 %512  ;;  %v4630_v24 = vcombine.high %v4628_v5, %v4628_v5  ;;  %v4639_v30 = vpack.i.b16 %v4628_v5, %v4628_v5 }
 0x113   : > { %v523_v14 = vsel %vm8368_vm8, %v513_v1, %v515_v0  ;;  %v6747_v1 = vcombine.low %v4197_v36, %v4204_v56 }
 0x114   : > { %2703 = vrot.lane.b32.xlu0 %v6656_v46, %s7155_s8  ;;  %3988 = vrot.lane.b32.xlu1 %v6732_v43, %s7155_s8  ;;  %v533_v7 = vsel %vm531_vm13, %v523_v14, 0  ;;  %v4401_v46 = vrot.slane %v4387_v57, %v7226_v17  ;;  %v4653_v56 = vpack.i.b16 %v4630_v24, %v4630_v24 }
 0x116   : > { %v519_v15 = vpop.permute.xlu1 %518  ;;  %v517_v16 = vpop.permute.xlu0 %516 }
 0x117   : > { %v524_v2 = vsel %vm8368_vm8, %v515_v0, %v517_v16  ;;  %v525_v22 = vsel %vm8368_vm8, %v517_v16, %v519_v15  ;;  %v4403_v16 = vcombine.high %v4401_v46, %v4401_v46 }
 0x118   : > { %6522 = vmatprep.subr.msk.bf16.mxu0 %vm531_vm13, %v524_v2  ;;  %3990 = vrot.lane.b32.xlu0 %v6733_v54, %s7155_s8  ;;  %v539_v33 = vsel %vm531_vm13, %v525_v22, 0  ;;  %v4412_v2 = vpack.i.b16 %v4401_v46, %v4401_v46  ;;  %v3126_v22 = vmul.bf16 %v7642_v32, %v3042_v12 }
 0x119   : > { %2924 = vrot.lane.b32.xlu1 %v6666_v4, %s7154_s21  ;;  %545 = vmatpush1.bf16.msra.mxu0 %v533_v7  ;;  %v4621_v4 = vrot.slane %v6773_v41, %v7226_v17  ;;  %v3125_v7 = vmul.bf16 %v3120_v55, %v7459_v62  ;;  %v4644_v41 = vrot.slane %v4639_v30, %v7233_v20  ;;  %v6567_v30 = vld [vmem:[%s8365_s3 + $0x10] sm:$0xf] }
 0x11a   : > { %v521_v13 = vpop.permute.xlu0 %520  ;;  %v648_v18 = vpop.permute.xlu1 %647 }
 0x11b   : > { %v526_v26 = vsel %vm8368_vm8, %v519_v15, %v521_v13  ;;  %v4402_v15 = vcombine.high %v4394_v45, %v4394_v45  ;;  %v4629_v23 = vcombine.high %v4621_v4, %v4621_v4  ;;  %v4632_v29 = vpack.i.b16 %v4621_v4, %v4621_v4 }
 0x11c   : > { %6523 = vmatmul.mubr.msk.bf16.vlgmr.msra.gmra.mrb[0].mxu0 %vm527_vm14, %v6516_v10  ;;  %6524 = vmatprep.subr.msk.bf16.mxu1 %vm531_vm13, %v526_v26  ;;  %vm3163_vm8 = vcmask 7168  }
 0x11d   : > { %2926 = vrot.lane.b32.xlu0 %v6667_v27, %s7154_s21  ;;  %2928 = vrot.lane.b32.xlu1 %v6668_v28, %s7154_s21  ;;  %v4419_v13 = vpack.i.b16 %v4402_v15, %v4402_v15  ;;  %v4410_v27 = vrot.slane %v4405_v8, %v7233_v20  ;;  %v4417_v28 = vrot.slane %v4412_v2, %v7233_v20 }
 0x11e   : > { %586 = vmatpush1.bf16.msra.mxu1 %v539_v33  ;;  %v650_v50 = vpop.permute.xlu0 %649  ;;  %v652_v51 = vpop.permute.xlu1 %651  ;;  %709 = vmatprep.mubr.bf16.mxu0 %v7137_v3  ;;  %v4646_v32 = vpack.i.b16 %v4629_v23, %v4629_v23 }
 0x11f   : > { %v658_v37 = vsel %vm8370_vm9, %v648_v18, %v650_v50  ;;  %v659_v40 = vsel %vm8370_vm9, %v650_v50, %v652_v51  ;;  %v4426_v18 = vpack.i.b16 %v4403_v16, %v4403_v16  ;;  %v4424_v50 = vrot.slane %v4419_v13, %v7233_v20 }
 0x120   : > { %6531 = vmatprep.subr.msk.bf16.mxu0 %vm531_vm13, %v659_v40  ;;  %v666_v43 = vsel %vm531_vm13, %v658_v37, 0  ;;  %v4637_v40 = vrot.slane %v4632_v29, %v7233_v20 }
 0x121   : > { %6525 = vmatmul.mubr.msk.bf16.vlgmr.msra.gmra.mrb[0].mxu1 %vm527_vm14, %v6516_v10  ;;  %2930 = vrot.lane.b32.xlu0 %v6669_v39, %s7154_s21  ;;  %v3128_v10 = vmul.bf16 %v3120_v55, %v3044_v59  ;;  %v6760_v39 = vcombine.low %v4410_v27, %v4417_v28 }
 0x122   : > { %2932 = vrot.lane.b32.xlu1 %v6670_v42, %s7154_s21  ;;  %678 = vmatpush1.bf16.msra.mxu0 %v666_v43  ;;  %v654_v38 = vpop.permute.xlu0 %653  ;;  %v656_v0 = vpop.permute.xlu1 %655  ;;  %v6684_v42 = vcombine.low %v3126_v22, %v3129_v31  ;;  %v6774_v48 = vcombine.low %v4637_v40, %v4644_v41  ;;  %v6581_v40 = vld [vmem:[%s8365_s3 + $0x14] sm:$0xf] }
 0x123   : > { %v660_v53 = vsel %vm8370_vm9, %v652_v51, %v654_v38  ;;  %v661_v54 = vsel %vm8370_vm9, %v654_v38, %v656_v0  ;;  %750 = vmatprep.mubr.bf16.mxu1 %v7137_v3  ;;  %v6682_v19 = vcombine.low %v3125_v7, %v3128_v10  ;;  %v6683_v34 = vcombine.high %v3125_v7, %v3128_v10  ;;  %v6553_v10 = vld [vmem:[%s8365_s3 + $0xc] sm:$0xf] }
 0x124   : > { %6533 = vmatprep.subr.msk.bf16.mxu1 %vm531_vm13, %v661_v54  ;;  %v672_v14 = vsel %vm531_vm13, %v660_v53, 0  ;;  %v4431_v51 = vrot.slane %v4426_v18, %v7233_v20  ;;  %v4651_v38 = vrot.slane %v4646_v32, %v7233_v20  ;;  %v4658_v0 = vrot.slane %v4653_v56, %v7233_v20 }
 0x125   : > { %4215 = vrot.lane.b32.xlu0 %v6746_v58, %s7153_s14  ;;  %719 = vmatpush1.bf16.msra.mxu1 %v672_v14  ;;  %vm2934_vm9 = vcmask 56320  }
 0x126   : > { %4217 = vrot.lane.b32.xlu1 %v6747_v1, %s7153_s14  ;;  %v873_v60 = vpop.permute.xlu0 %872  ;;  %v7681_v61 = vpop.permute.xlu1 %3534  ;;  %v6761_v58 = vcombine.low %v4424_v50, %v4431_v51  ;;  %v6775_v55 = vcombine.low %v4651_v38, %v4658_v0 }
 0x127   : > { %v3538_v36 = vrot.slane %v7681_v61, 4 }
 0x128   : > { %6532 = vmatmul.mubr.msk.bf16.vlgmr.msra.gmra.mrb[0].mxu0 %vm527_vm14, %v404_v47 }
 0x129   : > { %3153 = vrot.lane.b32.xlu0 %v6680_v6, %s7152_s10  ;;  %934 = vmatprep.mubr.bf16.mxu0 %v7137_v3  ;;  %v3540_v45 = vsel %vm3163_vm8, %v3538_v36, %v7681_v61 }
 0x12a   : > { %3155 = vrot.lane.b32.xlu1 %v6681_v11, %s7152_s10  ;;  %v877_v26 = vpop.permute.xlu0 %876  ;;  %v875_v62 = vpop.permute.xlu1 %874  ;;  %v3546_v53 = vmul.bf16 %v3540_v45, %v7722_v49  ;;  %v3549_v54 = vmul.bf16 %v3540_v45, %v3466_v52 }
 0x12b   : > { %v883_v21 = vsel %vm8369_vm7, %v873_v60, %v875_v62  ;;  %v884_v33 = vsel %vm8369_vm7, %v875_v62, %v877_v26 }
 0x12c   : > { %6545 = vmatprep.subr.msk.bf16.mxu0 %vm531_vm13, %v884_v33  ;;  %v891_v35 = vsel %vm531_vm13, %v883_v21, 0  ;;  %v6707_v59 = vcombine.low %v3546_v53, %v3549_v54  ;;  %v6708_v5 = vcombine.high %v3546_v53, %v3549_v54 }
 0x12d   : > { %3157 = vrot.lane.b32.xlu0 %v6682_v19, %s7152_s10  ;;  %6534 = vmatmul.mubr.msk.bf16.vlgmr.msra.gmra.mrb[0].mxu1 %vm527_vm14, %v404_v47 }
 0x12e   : > { %3159 = vrot.lane.b32.xlu1 %v6683_v34, %s7152_s10  ;;  %903 = vmatpush1.bf16.msra.mxu0 %v891_v35  ;;  %v881_v57 = vpop.permute.xlu0 %880  ;;  %v879_v37 = vpop.permute.xlu1 %878 }
 0x12f   : > { %v885_v9 = vsel %vm8369_vm7, %v877_v26, %v879_v37  ;;  %v886_v43 = vsel %vm8369_vm7, %v879_v37, %v881_v57  ;;  %975 = vmatprep.mubr.bf16.mxu1 %v7137_v3  ;;  %vm2476_vm7 = vcmask 72704  }
 0x130   : > { %6547 = vmatprep.subr.msk.bf16.mxu1 %vm531_vm13, %v886_v43  ;;  %v897_v44 = vsel %vm531_vm13, %v885_v9, 0 }
 0x131   : > { %3161 = vrot.lane.b32.xlu0 %v6684_v42, %s7152_s10  ;;  %944 = vmatpush1.bf16.msra.mxu1 %v897_v44 }
 0x132   : > { %4442 = vrot.lane.b32.xlu1 %v6760_v39, %s7140_s23  ;;  %v1104_v1 = vpop.permute.xlu0 %1103  ;;  %v1102_v46 = vpop.permute.xlu1 %1101 }
 0x133   : > { %v1112_v14 = vsel %vm8371_vm6, %v1102_v46, %v1104_v1 }
 0x134   : > { %6546 = vmatmul.mubr.msk.bf16.vlgmr.msra.gmra.mrb[0].mxu0 %vm527_vm14, %v6539_v63  ;;  %v1120_v60 = vsel %vm531_vm13, %v1112_v14, 0 }
 0x135   : > { %4444 = vrot.lane.b32.xlu0 %v6761_v58, %s7140_s23  ;;  %1163 = vmatprep.mubr.bf16.mxu0 %v7137_v3 }
 0x136   : > { %4669 = vrot.lane.b32.xlu1 %v6774_v48, %s7139_s22  ;;  %v1108_v15 = vpop.permute.xlu0 %1107  ;;  %v1106_v16 = vpop.permute.xlu1 %1105  ;;  %v6595_v48 = vld [vmem:[%s8365_s3 + $0x18] sm:$0xf] }
 0x137   : > { %v1113_v47 = vsel %vm8371_vm6, %v1104_v1, %v1106_v16  ;;  %v1114_v8 = vsel %vm8371_vm6, %v1106_v16, %v1108_v15 }
 0x138   : > { %6559 = vmatprep.subr.msk.bf16.mxu0 %vm531_vm13, %v1113_v47  ;;  %v1126_v7 = vsel %vm531_vm13, %v1114_v8, 0 }
 0x139   : > { %4671 = vrot.lane.b32.xlu0 %v6775_v55, %s7139_s22  ;;  %6548 = vmatmul.mubr.msk.bf16.vlgmr.msra.gmra.mrb[0].mxu1 %vm527_vm14, %v6539_v63  ;;  %v6787_v55 = vld.sshfl [vmem:[%s8366_s4 + $0x50] sm:$0x33 pattern:$0x75316420] }
 0x13a   : > { %3575 = vrot.lane.b32.xlu1 %v6707_v59, %s7151_s30  ;;  %1132 = vmatpush1.bf16.msra.mxu0 %v1120_v60  ;;  %v1331_v2 = vpop.permute.xlu0 %1330  ;;  %v1110_v4 = vpop.permute.xlu1 %1109  ;;  %v4841_v59 = vcombine.high %v6787_v55, %v6787_v55 }
 0x13b   : > { %v1115_v6 = vsel %vm8371_vm6, %v1108_v15, %v1110_v4  ;;  %1204 = vmatprep.mubr.bf16.mxu1 %v7137_v3  ;;  %vm2705_vm6 = vcmask 64512  }
 0x13c   : > { %6561 = vmatprep.subr.msk.bf16.mxu1 %vm531_vm13, %v1115_v6  ;;  %v4855_v6 = vrot.slane %v4841_v59, %v7226_v17 }
 0x13d   : > { %3577 = vrot.lane.b32.xlu0 %v6708_v5, %s7151_s30  ;;  %1173 = vmatpush1.bf16.msra.mxu1 %v1126_v7  ;;  %v4848_v5 = vrot.slane %v6787_v55, %v7226_v17 }
 0x13e   : > { %v1335_v11 = vpop.permute.xlu0 %1334  ;;  %v1333_v12 = vpop.permute.xlu1 %1332 }
 0x13f   : > { %v1340_v13 = vsel %vm1294_vm5, %v1331_v2, %v1333_v12  ;;  %v1341_v18 = vsel %vm1294_vm5, %v1333_v12, %v1335_v11 }
 0x140   : > { %6560 = vmatmul.mubr.msk.bf16.vlgmr.msra.gmra.mrb[0].mxu0 %vm527_vm14, %v6553_v10  ;;  %6573 = vmatprep.subr.msk.bf16.mxu0 %vm531_vm13, %v1341_v18  ;;  %v1348_v22 = vsel %vm531_vm13, %v1340_v13, 0  ;;  %v4859_v18 = vpack.i.b16 %v4848_v5, %v4848_v5 }
 0x141   : > { %1360 = vmatpush1.bf16.msra.mxu0 %v1348_v22  ;;  %1391 = vmatprep.mubr.bf16.mxu0 %v7137_v3  ;;  %v4866_v22 = vpack.i.b16 %v4855_v6, %v4855_v6 }
 0x142   : > { %v1339_v23 = vpop.permute.xlu0 %1338  ;;  %v1337_v24 = vpop.permute.xlu1 %1336 }
 0x143   : > { %v1342_v25 = vsel %vm1294_vm5, %v1335_v11, %v1337_v24  ;;  %v1343_v26 = vsel %vm1294_vm5, %v1337_v24, %v1339_v23  ;;  %v6609_v11 = vld [vmem:[%s8365_s3 + $0x1c] sm:$0xf]  ;;  %v4856_v23 = vcombine.high %v4848_v5, %v4848_v5  ;;  %v4871_v61 = vrot.slane %v4866_v22, %v7233_v20 }
 0x144   : > { %6575 = vmatprep.subr.msk.bf16.mxu1 %vm531_vm13, %v1343_v26  ;;  %v1354_v62 = vsel %vm531_vm13, %v1342_v25, 0  ;;  %v4857_v25 = vcombine.high %v4855_v6, %v4855_v6  ;;  %v3692_v6 = vld [vmem:[#allocation2 + $0x14] sm:$0xf] }
 0x145   : > { %6562 = vmatmul.mubr.msk.bf16.vlgmr.msra.gmra.mrb[0].mxu1 %vm527_vm14, %v6553_v10 }
 0x146   : > { %1401 = vmatpush1.bf16.msra.mxu1 %v1354_v62  ;;  %v1560_v27 = vpop.permute.xlu0 %1559  ;;  %v1558_v28 = vpop.permute.xlu1 %1557  ;;  %1432 = vmatprep.mubr.bf16.mxu1 %v7137_v3 }
 0x147   : > { %v1567_v29 = vsel %vm1065_vm4, %v1558_v28, %v1560_v27 }
 0x148   : > { %v1575_v33 = vsel %vm531_vm13, %v1567_v29, 0  ;;  %v6801_v29 = vld.sshfl [vmem:[%s8366_s4 + $0x54] sm:$0x33 pattern:$0x75316420] }
 0x14a   : > { %v1564_v31 = vpop.permute.xlu0 %1563  ;;  %v1562_v19 = vpop.permute.xlu1 %1561 }
 0x14b   : > { %v1568_v21 = vsel %vm1065_vm4, %v1560_v27, %v1562_v19  ;;  %v1569_v34 = vsel %vm1065_vm4, %v1562_v19, %v1564_v31  ;;  %v7818_v27 = vld [vmem:[#allocation2 + $0xc] sm:$0xff] }
 0x14c   : > { %6574 = vmatmul.mubr.msk.bf16.vlgmr.msra.gmra.mrb[0].mxu0 %vm527_vm14, %v6567_v30  ;;  %6587 = vmatprep.subr.msk.bf16.mxu0 %vm531_vm13, %v1568_v21  ;;  %v1581_v32 = vsel %vm531_vm13, %v1569_v34, 0  ;;  %v3468_v19 = vld [vmem:[#allocation2 + $0x2c] sm:$0x3] }
 0x14d   : > { %1587 = vmatpush1.bf16.msra.mxu0 %v1575_v33  ;;  %1618 = vmatprep.mubr.bf16.mxu0 %v7137_v3 }
 0x14e   : > { %v1785_v35 = vpop.permute.xlu0 %1784  ;;  %v1566_v50 = vpop.permute.xlu1 %1565 }
 0x14f   : > { %v1570_v51 = vsel %vm1065_vm4, %v1564_v31, %v1566_v50  ;;  %v3467_v31 = vld [vmem:[#allocation2 + $0x24] sm:$0x33]  ;;  %v4873_v50 = vpack.i.b16 %v4856_v23, %v4856_v23 }
 0x150   : > { %6589 = vmatprep.subr.msk.bf16.mxu1 %vm531_vm13, %v1570_v51 }
 0x151   : > { %6576 = vmatmul.mubr.msk.bf16.vlgmr.msra.gmra.mrb[0].mxu1 %vm527_vm14, %v6567_v30  ;;  %v3465_v30 = vld [vmem:[#allocation2 + $0x14] sm:$0xf] }
 0x152   : > { %1628 = vmatpush1.bf16.msra.mxu1 %v1581_v32  ;;  %v1789_v56 = vpop.permute.xlu0 %1788  ;;  %v1787_v57 = vpop.permute.xlu1 %1786  ;;  %1659 = vmatprep.mubr.bf16.mxu1 %v7137_v3 }
 0x153   : > { %v1795_v37 = vsel %vm836_vm3, %v1787_v57, %v1789_v56  ;;  %v1794_v39 = vsel %vm836_vm3, %v1785_v35, %v1787_v57  ;;  %v4864_v35 = vrot.slane %v4859_v18, %v7233_v20 }
 0x154   : > { %6601 = vmatprep.subr.msk.bf16.mxu0 %vm531_vm13, %v1795_v37  ;;  %v1802_v43 = vsel %vm531_vm13, %v1794_v39, 0  ;;  %v5068_v37 = vcombine.high %v6801_v29, %v6801_v29 }
 0x156   : > { %v1793_v41 = vpop.permute.xlu0 %1792  ;;  %v1791_v9 = vpop.permute.xlu1 %1790 }
 0x157   : > { %v1797_v42 = vsel %vm836_vm3, %v1791_v9, %v1793_v41  ;;  %v1796_v44 = vsel %vm836_vm3, %v1789_v56, %v1791_v9  ;;  %v4880_v56 = vpack.i.b16 %v4857_v25, %v4857_v25 }
 0x158   : > { %6588 = vmatmul.mubr.msk.bf16.vlgmr.msra.gmra.mrb[0].mxu0 %vm527_vm14, %v6581_v40  ;;  %6603 = vmatprep.subr.msk.bf16.mxu1 %vm531_vm13, %v1797_v42  ;;  %v1808_v63 = vsel %vm531_vm13, %v1796_v44, 0  ;;  %v6788_v44 = vcombine.low %v4864_v35, %v4871_v61 }
 0x159   : > { %1814 = vmatpush1.bf16.msra.mxu0 %v1802_v43  ;;  %1845 = vmatprep.mubr.bf16.mxu0 %v7137_v3 }
 0x15a   : > { %v2014_v58 = vpop.permute.xlu0 %2013  ;;  %v2012_v45 = vpop.permute.xlu1 %2011 }
 0x15b   : > { %v2021_v46 = vsel %vm476_vm0, %v2012_v45, %v2014_v58 }
 0x15c   : > { %v2029_v14 = vsel %vm531_vm13, %v2021_v46, 0  ;;  %v6623_v46 = vld [vmem:[%s8365_s3 + $0x20] sm:$0xf] }
 0x15d   : > { %6590 = vmatmul.mubr.msk.bf16.vlgmr.msra.gmra.mrb[0].mxu1 %vm527_vm14, %v6581_v40 }
 0x15e   : > { %1855 = vmatpush1.bf16.msra.mxu1 %v1808_v63  ;;  %v2018_v38 = vpop.permute.xlu0 %2017  ;;  %v2016_v0 = vpop.permute.xlu1 %2015  ;;  %1886 = vmatprep.mubr.bf16.mxu1 %v7137_v3  ;;  %v4885_v63 = vrot.slane %v4880_v56, %v7233_v20 }
 0x15f   : > { %v2022_v1 = vsel %vm476_vm0, %v2014_v58, %v2016_v0  ;;  %v2023_v15 = vsel %vm476_vm0, %v2016_v0, %v2018_v38  ;;  %v4878_v58 = vrot.slane %v4873_v50, %v7233_v20 }
 0x160   : > { %6615 = vmatprep.subr.msk.bf16.mxu0 %vm531_vm13, %v2022_v1  ;;  %v2035_v8 = vsel %vm531_vm13, %v2023_v15, 0 }
 0x162   : > { %v2239_v52 = vpop.permute.xlu0 %2238  ;;  %v2020_v53 = vpop.permute.xlu1 %2019 }
 0x163   : > { %v2024_v54 = vsel %vm476_vm0, %v2018_v38, %v2020_v53  ;;  %v5075_v38 = vrot.slane %v6801_v29, %v7226_v17 }
 0x164   : > { %6602 = vmatmul.mubr.msk.bf16.vlgmr.msra.gmra.mrb[0].mxu0 %vm527_vm14, %v6595_v48  ;;  %6617 = vmatprep.subr.msk.bf16.mxu1 %vm531_vm13, %v2024_v54 }
 0x165   : > { %2041 = vmatpush1.bf16.msra.mxu0 %v2029_v14  ;;  %2072 = vmatprep.mubr.bf16.mxu0 %v7137_v3  ;;  %v6789_v14 = vcombine.low %v4878_v58, %v4885_v63  ;;  %v5083_v15 = vcombine.high %v5075_v38, %v5075_v38  ;;  %v5086_v18 = vpack.i.b16 %v5075_v38, %v5075_v38 }
 0x166   : > { %v2243_v16 = vpop.permute.xlu0 %2242  ;;  %v2241_v47 = vpop.permute.xlu1 %2240 }
 0x167   : > { %v2249_v60 = vsel %vm390_vm2, %v2241_v47, %v2243_v16  ;;  %v2248_v10 = vsel %vm390_vm2, %v2239_v52, %v2241_v47  ;;  %v3693_v47 = vld [vmem:[#allocation2 + $0x1c] sm:$0x33]  ;;  %v5100_v23 = vpack.i.b16 %v5083_v15, %v5083_v15  ;;  %v5091_v50 = vrot.slane %v5086_v18, %v7233_v20 }
 0x168   : > { %6629 = vmatprep.subr.msk.bf16.mxu0 %vm531_vm13, %v2249_v60  ;;  %v2256_v26 = vsel %vm531_vm13, %v2248_v10, 0 }
 0x169   : > { %6604 = vmatmul.mubr.msk.bf16.vlgmr.msra.gmra.mrb[0].mxu1 %vm527_vm14, %v6595_v48  ;;  %v5082_v48 = vrot.slane %v5068_v37, %v7226_v17 }
 0x16a   : > { %2082 = vmatpush1.bf16.msra.mxu1 %v2035_v8  ;;  %v2247_v2 = vpop.permute.xlu0 %2246  ;;  %v2245_v4 = vpop.permute.xlu1 %2244  ;;  %2113 = vmatprep.mubr.bf16.mxu1 %v7137_v3 }
 0x16b   : > { %v2251_v7 = vsel %vm390_vm2, %v2245_v4, %v2247_v2  ;;  %v2250_v62 = vsel %vm390_vm2, %v2243_v16, %v2245_v4  ;;  %v5084_v8 = vcombine.high %v5082_v48, %v5082_v48  ;;  %v5093_v22 = vpack.i.b16 %v5082_v48, %v5082_v48 }
 0x16c   : > { %6631 = vmatprep.subr.msk.bf16.mxu1 %vm531_vm13, %v2251_v7  ;;  %v2262_v57 = vsel %vm531_vm13, %v2250_v62, 0  ;;  %v3694_v7 = vld [vmem:[#allocation2 + $0x24] sm:$0x33] }
 0x16e   : > { %v3537_v12 = vpop.permute.xlu0 %3536  ;;  %v2467_v13 = vpop.permute.xlu1 %2466 }
 0x16f   : > { %v3539_v24 = vrot.slane %v3537_v12, 4 }
 0x170   : > { %6616 = vmatmul.mubr.msk.bf16.vlgmr.msra.gmra.mrb[0].mxu0 %vm527_vm14, %v6609_v11 }
 0x171   : > { %v3541_v28 = vsel %vm392_vm1, %v3538_v36, %v3539_v24  ;;  %2268 = vmatpush1.bf16.msra.mxu0 %v2256_v26  ;;  %2299 = vmatprep.mubr.bf16.mxu0 %v7137_v3  ;;  %v3548_v39 = vmul.bf16 %v3539_v24, %v3465_v30  ;;  %v3551_v40 = vmul.bf16 %v3539_v24, %v3468_v19  ;;  %v6815_v24 = vld.sshfl [vmem:[%s8366_s4 + $0x58] sm:$0x33 pattern:$0x75316420] }
 0x172   : > { %v3542_v21 = vsel %vm3163_vm8, %v3541_v28, %v3537_v12  ;;  %v2469_v33 = vpop.permute.xlu0 %2468  ;;  %v2471_v34 = vpop.permute.xlu1 %2470  ;;  %v5107_v30 = vpack.i.b16 %v5084_v8, %v5084_v8  ;;  %v5295_v35 = vcombine.high %v6815_v24, %v6815_v24 }
 0x173   : > { %v3547_v36 = vmul.bf16 %v3542_v21, %v7818_v27  ;;  %v3550_v51 = vmul.bf16 %v3542_v21, %v3467_v31  ;;  %v2478_v32 = vsel %vm2476_vm7, %v2469_v33, %v2471_v34  ;;  %v2477_v0 = vsel %vm2476_vm7, %v2467_v13, %v2469_v33  ;;  %v3695_v13 = vld [vmem:[#allocation2 + $0x2c] sm:$0x3]  ;;  %v6690_v31 = vld.sshfl [vmem:[%s8366_s4 + $0x34] sm:$0x33 pattern:$0x75316420] }
 0x174   : > { %6643 = vmatprep.subr.msk.bf16.mxu0 %vm531_vm13, %v2478_v32  ;;  %v6711_v1 = vcombine.low %v3548_v39, %v3551_v40  ;;  %v2485_v16 = vsel %vm531_vm13, %v2477_v0, 0  ;;  %v5105_v32 = vrot.slane %v5100_v23, %v7233_v20  ;;  %v3283_v56 = vcombine.high %v6690_v31, %v6690_v31  ;;  %v6637_v39 = vld [vmem:[%s8365_s3 + $0x24] sm:$0xf] }
 0x175   : > { %v6709_v41 = vcombine.low %v3547_v36, %v3550_v51  ;;  %v6710_v9 = vcombine.high %v3547_v36, %v3550_v51  ;;  %6618 = vmatmul.mubr.msk.bf16.vlgmr.msra.gmra.mrb[0].mxu1 %vm527_vm14, %v6609_v11  ;;  %v5098_v36 = vrot.slane %v5093_v22, %v7233_v20  ;;  %v5112_v40 = vrot.slane %v5107_v30, %v7233_v20 }
 0x176   : > { %2309 = vmatpush1.bf16.msra.mxu1 %v2262_v57  ;;  %v2473_v42 = vpop.permute.xlu0 %2472  ;;  %v2475_v43 = vpop.permute.xlu1 %2474  ;;  %2340 = vmatprep.mubr.bf16.mxu1 %v7137_v3  ;;  %v7894_v0 = vrot.slane %v6690_v31, %v7226_v17 }
 0x177   : > { %v2480_v45 = vsel %vm2476_vm7, %v2473_v42, %v2475_v43  ;;  %3581 = vrot.lane.b32.xlu0 %v6710_v9, %s7151_s30  ;;  %3579 = vrot.lane.b32.xlu1 %v6709_v41, %s7151_s30  ;;  %v2479_v2 = vsel %vm2476_vm7, %v2471_v34, %v2473_v42  ;;  %v7882_v41 = vrot.slane %v6815_v24, %v7226_v17 }
 0x178   : > { %6645 = vmatprep.subr.msk.bf16.mxu1 %vm531_vm13, %v2480_v45  ;;  %v2491_v29 = vsel %vm531_vm13, %v2479_v2, 0  ;;  %v6802_v63 = vcombine.low %v5091_v50, %v5098_v36  ;;  %v3922_v2 = vld [vmem:[#allocation2 + $0x2c] sm:$0x3]  ;;  %v3301_v31 = vpack.i.b16 %v7894_v0, %v7894_v0 }
 0x17a   : > { %v3762_v52 = vpop.permute.xlu0 %3761  ;;  %v3764_v53 = vpop.permute.xlu1 %3763 }
 0x17b   : > { %v3765_v54 = vrot.slane %v3762_v52, 4  ;;  %v3766_v55 = vrot.slane %v3764_v53, 4  ;;  %4896 = vrot.lane.b32.xlu0 %v6788_v44, %s7141_s28  ;;  %3583 = vrot.lane.b32.xlu1 %v6711_v1, %s7151_s30  ;;  %v7886_v44 = vrot.slane %v5295_v35, %v7226_v17  ;;  %v7897_v1 = vrot.slane %v3283_v56, %v7226_v17  ;;  %v6651_v35 = vld [vmem:[%s8365_s3 + $0x28] sm:$0xf] }
 0x17c   : > { %6630 = vmatmul.mubr.msk.bf16.vlgmr.msra.gmra.mrb[0].mxu0 %vm527_vm14, %v6623_v46 }
 0x17d   : > { %v3767_v59 = vsel %vm2934_vm9, %v3765_v54, %v3762_v52  ;;  %v3768_v60 = vsel %vm392_vm1, %v3765_v54, %v3766_v55  ;;  %2497 = vmatpush1.bf16.msra.mxu0 %v2485_v16  ;;  %2528 = vmatprep.mubr.bf16.mxu0 %v7137_v3  ;;  %v3775_v19 = vmul.bf16 %v3766_v55, %v3692_v6 }
 0x17e   : > { %v3773_v4 = vmul.bf16 %v3767_v59, %v7722_v49  ;;  %v3776_v5 = vmul.bf16 %v3767_v59, %v3693_v47  ;;  %v3769_v10 = vsel %vm2934_vm9, %v3768_v60, %v3764_v53  ;;  %v2696_v11 = vpop.permute.xlu0 %2695  ;;  %v2698_v12 = vpop.permute.xlu1 %2697  ;;  %v3778_v21 = vmul.bf16 %v3766_v55, %v3695_v13  ;;  %v3919_v47 = vld [vmem:[#allocation2 + $0x14] sm:$0xf]  ;;  %v3921_v13 = vld [vmem:[#allocation2 + $0x24] sm:$0x33] }
 0x17f   : > { %4898 = vrot.lane.b32.xlu1 %v6789_v14, %s7141_s28  ;;  %v3774_v62 = vmul.bf16 %v3769_v10, %v7818_v27  ;;  %v3777_v28 = vmul.bf16 %v3769_v10, %v3694_v7  ;;  %v2706_v37 = vsel %vm2705_vm6, %v2696_v11, %v2698_v12  ;;  %v6803_v52 = vcombine.low %v5105_v32, %v5112_v40 }
 0x180   : > { %v6721_v25 = vcombine.low %v3773_v4, %v3776_v5  ;;  %v6722_v26 = vcombine.high %v3773_v4, %v3776_v5  ;;  %v6725_v43 = vcombine.low %v3775_v19, %v3778_v21  ;;  %v2714_v38 = vsel %vm531_vm13, %v2706_v37, 0  ;;  %v6829_v21 = vld.sshfl [vmem:[%s8366_s4 + $0x5c] sm:$0x33 pattern:$0x75316420] }
 0x181   : > { %6632 = vmatmul.mubr.msk.bf16.vlgmr.msra.gmra.mrb[0].mxu1 %vm527_vm14, %v6623_v46  ;;  %v6723_v51 = vcombine.low %v3774_v62, %v3777_v28  ;;  %v6724_v57 = vcombine.high %v3774_v62, %v3777_v28  ;;  %v3920_v46 = vld [vmem:[#allocation2 + $0x1c] sm:$0x33]  ;;  %v5310_v53 = vcombine.high %v7882_v41, %v7882_v41  ;;  %v5311_v16 = vcombine.high %v7886_v44, %v7886_v44 }
 0x182   : > { %2538 = vmatpush1.bf16.msra.mxu1 %v2491_v29  ;;  %v2700_v33 = vpop.permute.xlu0 %2699  ;;  %3802 = vrot.lane.b32.xlu0 %v6721_v25, %s7150_s29  ;;  %v2702_v34 = vpop.permute.xlu1 %2701  ;;  %v5313_v4 = vpack.i.b16 %v7882_v41, %v7882_v41  ;;  %v3298_v5 = vcombine.high %v7894_v0, %v7894_v0  ;;  %v3299_v6 = vcombine.high %v7897_v1, %v7897_v1 }
 0x183   : > { %3804 = vrot.lane.b32.xlu1 %v6722_v26, %s7150_s29  ;;  %v2707_v61 = vsel %vm2705_vm6, %v2698_v12, %v2700_v33  ;;  %2569 = vmatprep.mubr.bf16.mxu1 %v7137_v3  ;;  %v2708_v54 = vsel %vm2705_vm6, %v2700_v33, %v2702_v34  ;;  %v5320_v11 = vpack.i.b16 %v7886_v44, %v7886_v44 }
 0x184   : > { %6657 = vmatprep.subr.msk.bf16.mxu0 %vm531_vm13, %v2707_v61  ;;  %v2720_v10 = vsel %vm531_vm13, %v2708_v54, 0  ;;  %v5327_v12 = vpack.i.b16 %v5310_v53, %v5310_v53  ;;  %v5334_v23 = vpack.i.b16 %v5311_v16, %v5311_v16  ;;  %v3308_v19 = vpack.i.b16 %v7897_v1, %v7897_v1  ;;  %v4147_v16 = vld [vmem:[#allocation2 + $0x1c] sm:$0x33] }
 0x185   : > { %v3315_v61 = vpack.i.b16 %v3298_v5, %v3298_v5  ;;  %v3322_v50 = vpack.i.b16 %v3299_v6, %v3299_v6  ;;  %v5318_v36 = vrot.slane %v5313_v4, %v7233_v20  ;;  %v5529_v0 = vrot.slane %v6829_v21, %v7226_v17 }
 0x186   : > { %v2704_v9 = vpop.permute.xlu0 %2703  ;;  %3806 = vrot.lane.b32.xlu0 %v6723_v51, %s7150_s29  ;;  %v3989_v42 = vpop.permute.xlu1 %3988  ;;  %v5325_v51 = vrot.slane %v5320_v11, %v7233_v20  ;;  %v5339_v37 = vrot.slane %v5334_v23, %v7233_v20  ;;  %v4148_v11 = vld [vmem:[#allocation2 + $0x24] sm:$0x33] }
 0x187   : > { %v2709_v58 = vsel %vm2705_vm6, %v2702_v34, %v2704_v9  ;;  %v3992_v45 = vrot.slane %v3989_v42, 4  ;;  %3808 = vrot.lane.b32.xlu1 %v6724_v57, %s7150_s29  ;;  %v5332_v57 = vrot.slane %v5327_v12, %v7233_v20  ;;  %v4149_v12 = vld [vmem:[#allocation2 + $0x2c] sm:$0x3]  ;;  %v5540_v23 = vpack.i.b16 %v5529_v0, %v5529_v0 }
 0x188   : > { %6644 = vmatmul.mubr.msk.bf16.vlgmr.msra.gmra.mrb[0].mxu0 %vm527_vm14, %v6637_v39  ;;  %6659 = vmatprep.subr.msk.bf16.mxu1 %vm531_vm13, %v2709_v58  ;;  %v3320_v58 = vrot.slane %v3315_v61, %v7233_v20 }
 0x189   : > { %v3994_v48 = vsel %vm2705_vm6, %v3992_v45, %v3989_v42  ;;  %2726 = vmatpush1.bf16.msra.mxu0 %v2714_v38  ;;  %2757 = vmatprep.mubr.bf16.mxu0 %v7137_v3  ;;  %v3306_v42 = vrot.slane %v3301_v31, %v7233_v20  ;;  %v6816_v38 = vcombine.low %v5318_v36, %v5325_v51 }
 0x18a   : > { %v4000_v55 = vmul.bf16 %v3994_v48, %v7722_v49  ;;  %v4003_v14 = vmul.bf16 %v3994_v48, %v3920_v46  ;;  %v3991_v15 = vpop.permute.xlu0 %3990  ;;  %3810 = vrot.lane.b32.xlu0 %v6725_v43, %s7150_s29  ;;  %v3313_v43 = vrot.slane %v3308_v19, %v7233_v20  ;;  %v6817_v46 = vcombine.low %v5332_v57, %v5339_v37  ;;  %v3272_v19 = vld [vmem:[#allocation2 + $0x24] sm:$0x33] }
 0x18b   : > { %v3993_v59 = vrot.slane %v3991_v15, 4  ;;  %v2925_v60 = vpop.permute.xlu1 %2924  ;;  %5123 = vrot.lane.b32.xlu1 %v6802_v63, %s7142_s6 }
 0x18c   : > { %v6735_v8 = vcombine.low %v4000_v55, %v4003_v14  ;;  %v6736_v29 = vcombine.high %v4000_v55, %v4003_v14  ;;  %v3271_v14 = vld [vmem:[#allocation2 + $0x1c] sm:$0x33] }
 0x18d   : > { %v3995_v7 = vsel %vm392_vm1, %v3992_v45, %v3993_v59  ;;  %6646 = vmatmul.mubr.msk.bf16.vlgmr.msra.gmra.mrb[0].mxu1 %vm527_vm14, %v6637_v39  ;;  %v4002_v22 = vmul.bf16 %v3993_v59, %v3919_v47  ;;  %v4005_v26 = vmul.bf16 %v3993_v59, %v3922_v2  ;;  %v5522_v39 = vcombine.high %v6829_v21, %v6829_v21 }
 0x18e   : > { %v3996_v18 = vsel %vm2705_vm6, %v3995_v7, %v3991_v15  ;;  %2767 = vmatpush1.bf16.msra.mxu1 %v2720_v10  ;;  %5125 = vrot.lane.b32.xlu0 %v6803_v52, %s7142_s6  ;;  %v3327_v45 = vrot.slane %v3322_v50, %v7233_v20  ;;  %v6691_v15 = vcombine.low %v3306_v42, %v3313_v43  ;;  %v6843_v7 = vld.sshfl [vmem:[%s8366_s4 + $0x60] sm:$0x33 pattern:$0x75316420]  ;;  %v4146_v10 = vld [vmem:[#allocation2 + $0x14] sm:$0xf] }
 0x18f   : > { %v4001_v24 = vmul.bf16 %v3996_v18, %v7818_v27  ;;  %v4004_v25 = vmul.bf16 %v3996_v18, %v3921_v13  ;;  %v2927_v62 = vpop.permute.xlu0 %2926  ;;  %v2929_v28 = vpop.permute.xlu1 %2928  ;;  %4029 = vrot.lane.b32.xlu1 %v6735_v8, %s7149_s27  ;;  %2798 = vmatprep.mubr.bf16.mxu1 %v7137_v3  ;;  %v6739_v56 = vcombine.low %v4002_v22, %v4005_v26  ;;  %vm8372_vm6 = vcmask 531456  }
 0x190   : > { %v2936_v30 = vsel %vm2934_vm9, %v2927_v62, %v2929_v28  ;;  %v2935_v34 = vsel %vm2934_vm9, %v2925_v60, %v2927_v62  ;;  %v5536_v48 = vrot.slane %v5522_v39, %v7226_v17  ;;  %v6692_v59 = vcombine.low %v3320_v58, %v3327_v45 }
 0x191   : > { %v6737_v33 = vcombine.low %v4001_v24, %v4004_v25  ;;  %6671 = vmatprep.subr.msk.bf16.mxu0 %vm531_vm13, %v2936_v30  ;;  %v6738_v40 = vcombine.high %v4001_v24, %v4004_v25  ;;  %v2943_v41 = vsel %vm531_vm13, %v2935_v34, 0  ;;  %v5537_v60 = vcombine.high %v5529_v0, %v5529_v0 }
 0x192   : > { %4031 = vrot.lane.b32.xlu0 %v6736_v29, %s7149_s27  ;;  %v5538_v6 = vcombine.high %v5536_v48, %v5536_v48  ;;  %v7972_v22 = vmul.bf16 %v6691_v15, %v3271_v14  ;;  %v5547_v24 = vpack.i.b16 %v5536_v48, %v5536_v48  ;;  %v6665_v29 = vld [vmem:[%s8365_s3 + $0x2c] sm:$0xf]  ;;  %v7981_v31 = vmul.bf16 %v6691_v15, %v7722_v49 }
 0x193   : > { %v2931_v32 = vpop.permute.xlu0 %2930  ;;  %4033 = vrot.lane.b32.xlu1 %v6737_v33, %s7149_s27  ;;  %v5554_v21 = vpack.i.b16 %v5537_v60, %v5537_v60  ;;  %v5749_v33 = vcombine.high %v6843_v7, %v6843_v7 }
 0x194   : > { %v2933_v9 = vpop.permute.xlu1 %2932  ;;  %6658 = vmatmul.mubr.msk.bf16.vlgmr.msra.gmra.mrb[0].mxu0 %vm527_vm14, %v6651_v35  ;;  %v2937_v63 = vsel %vm2934_vm9, %v2929_v28, %v2931_v32  ;;  %v5561_v50 = vpack.i.b16 %v5538_v6, %v5538_v6  ;;  %v5552_v57 = vrot.slane %v5547_v24, %v7233_v20 }
 0x195   : > { %v2938_v44 = vsel %vm2934_vm9, %v2931_v32, %v2933_v9  ;;  %2955 = vmatpush1.bf16.msra.mxu0 %v2943_v41  ;;  %2986 = vmatprep.mubr.bf16.mxu0 %v7137_v3  ;;  %v2949_v54 = vsel %vm531_vm13, %v2937_v63, 0  ;;  %v7990_v32 = vmul.bf16 %v6692_v59, %v7818_v27  ;;  %v7998_v41 = vmul.bf16 %v6692_v59, %v3272_v19 }
 0x196   : > { %6673 = vmatprep.subr.msk.bf16.mxu1 %vm531_vm13, %v2938_v44  ;;  %4035 = vrot.lane.b32.xlu0 %v6738_v40, %s7149_s27  ;;  %v6695_v40 = vcombine.high %v7981_v31, %v7972_v22  ;;  %v5559_v43 = vrot.slane %v5554_v21, %v7233_v20  ;;  %v5756_v44 = vrot.slane %v6843_v7, %v7226_v17 }
 0x197   : > { %v4216_v1 = vpop.permute.xlu0 %4215  ;;  %4037 = vrot.lane.b32.xlu1 %v6739_v56, %s7149_s27  ;;  %v5545_v56 = vrot.slane %v5540_v23, %v7233_v20  ;;  %v5566_v63 = vrot.slane %v5561_v50, %v7233_v20  ;;  %v6696_v21 = vcombine.low %v7990_v32, %v7998_v41 }
 0x198   : > { %v4219_v52 = vrot.slane %v4216_v1, 4  ;;  %v4218_v53 = vpop.permute.xlu1 %4217 }
 0x199   : > { %v7959_v55 = vrot.slane %v4218_v53, 4  ;;  %6660 = vmatmul.mubr.msk.bf16.vlgmr.msra.gmra.mrb[0].mxu1 %vm527_vm14, %v6651_v35 }
 0x19a   : > { %v4221_v47 = vsel %vm2476_vm7, %v4219_v52, %v4216_v1  ;;  %2996 = vmatpush1.bf16.msra.mxu1 %v2949_v54  ;;  %5350 = vrot.lane.b32.xlu0 %v6816_v38, %s7143_s9  ;;  %v5763_v38 = vrot.slane %v5749_v33, %v7226_v17  ;;  %v5764_v54 = vcombine.high %v5756_v44, %v5756_v44 }
 0x19b   : > { %v4227_v8 = vmul.bf16 %v4221_v47, %v7722_v49  ;;  %v4230_v2 = vmul.bf16 %v4221_v47, %v4147_v16  ;;  %v4222_v4 = vsel %vm392_vm1, %v4219_v52, %v7959_v55  ;;  %v3154_v5 = vpop.permute.xlu0 %3153  ;;  %5352 = vrot.lane.b32.xlu1 %v6817_v46, %s7143_s9  ;;  %3027 = vmatprep.mubr.bf16.mxu1 %v7137_v3 }
 0x19c   : > { %v4223_v13 = vsel %vm2476_vm7, %v4222_v4, %v4218_v53  ;;  %v3156_v18 = vpop.permute.xlu1 %3155  ;;  %v4229_v34 = vmul.bf16 %v7959_v55, %v4146_v10  ;;  %v4232_v35 = vmul.bf16 %v7959_v55, %v4149_v12  ;;  %v6830_v46 = vcombine.low %v5545_v56, %v5552_v57  ;;  %v4374_v55 = vld [vmem:[#allocation2 + $0x1c] sm:$0x33]  ;;  %v4376_v4 = vld [vmem:[#allocation2 + $0x2c] sm:$0x3]  ;;  %v6679_v10 = vld [vmem:[%s8365_s3 + $0x30] sm:$0xf] }
 0x19d   : > { %v6749_v25 = vcombine.low %v4227_v8, %v4230_v2  ;;  %v6750_v26 = vcombine.high %v4227_v8, %v4230_v2  ;;  %v4228_v62 = vmul.bf16 %v4223_v13, %v7818_v27  ;;  %v4231_v28 = vmul.bf16 %v4223_v13, %v4148_v11  ;;  %v4373_v2 = vld [vmem:[#allocation2 + $0x14] sm:$0xf]  ;;  %v4375_v12 = vld [vmem:[#allocation2 + $0x24] sm:$0x33]  ;;  %vm8373_vm7 = vmmov %vm8372_vm6 }
 0x19e   : > { %v3164_v30 = vsel %vm3163_vm8, %v3154_v5, %v3156_v18  ;;  %v6753_v45 = vcombine.low %v4229_v34, %v4232_v35  ;;  %v6697_v53 = vcombine.high %v7990_v32, %v7998_v41  ;;  %v6831_v16 = vcombine.low %v5559_v43, %v5566_v63  ;;  %v4601_v43 = vld [vmem:[#allocation2 + $0x1c] sm:$0x33] }
 0x19f   : > { %v3158_v61 = vpop.permute.xlu0 %3157  ;;  %4256 = vrot.lane.b32.xlu0 %v6749_v25, %s7148_s26  ;;  %4258 = vrot.lane.b32.xlu1 %v6750_v26, %s7148_s26  ;;  %v6751_v37 = vcombine.low %v4228_v62, %v4231_v28  ;;  %v3172_v39 = vsel %vm531_vm13, %v3164_v30, 0  ;;  %v6752_v9 = vcombine.high %v4228_v62, %v4231_v28  ;;  %v5765_v47 = vcombine.high %v5763_v38, %v5763_v38  ;;  %v6857_v30 = vld.sshfl [vmem:[%s8366_s4 + $0x64] sm:$0x33 pattern:$0x75316420] }
 0x1a0   : > { %v3165_v36 = vsel %vm3163_vm8, %v3156_v18, %v3158_v61  ;;  %v3160_v51 = vpop.permute.xlu1 %3159  ;;  %6672 = vmatmul.mubr.msk.bf16.vlgmr.msra.gmra.mrb[0].mxu0 %vm527_vm14, %v6665_v29  ;;  %v6694_v5 = vcombine.low %v7981_v31, %v7972_v22  ;;  %v5767_v11 = vpack.i.b16 %v5756_v44, %v5756_v44  ;;  %v5774_v23 = vpack.i.b16 %v5763_v38, %v5763_v38  ;;  %v6693_v38 = vld [vmem:[%s8365_s3 + $0x34] sm:$0xf] }
 0x1a1   : > { %6685 = vmatprep.subr.msk.bf16.mxu0 %vm531_vm13, %v3165_v36  ;;  %3215 = vmatprep.mubr.bf16.mxu0 %v7137_v3  ;;  %v3166_v42 = vsel %vm3163_vm8, %v3158_v61, %v3160_v51  ;;  %v5781_v24 = vpack.i.b16 %v5764_v54, %v5764_v54  ;;  %v5788_v25 = vpack.i.b16 %v5765_v47, %v5765_v47 }
 0x1a2   : > { %3184 = vmatpush1.bf16.msra.mxu0 %v3172_v39  ;;  %v3178_v48 = vsel %vm531_vm13, %v3166_v42, 0  ;;  %v3366_v19 = vsel %vm531_vm13, %v6694_v5, 0  ;;  %v5772_v61 = vrot.slane %v5767_v11, %v7233_v20  ;;  %v5779_v50 = vrot.slane %v5774_v23, %v7233_v20  ;;  %v6871_v23 = vld.sshfl [vmem:[%s8366_s4 + $0x68] sm:$0x33 pattern:$0x75316420] }
 0x1a3   : > { %v3162_v58 = vpop.permute.xlu0 %3161  ;;  %4260 = vrot.lane.b32.xlu0 %v6751_v37, %s7148_s26  ;;  %6698 = vmatprep.subr.msk.bf16.mxu0 %vm531_vm13, %v6695_v40  ;;  %v5976_v36 = vcombine.high %v6857_v30, %v6857_v30  ;;  %v5786_v56 = vrot.slane %v5781_v24, %v7233_v20  ;;  %v5793_v32 = vrot.slane %v5788_v25, %v7233_v20  ;;  %v3372_v37 = vsel %vm531_vm13, %v6696_v21, 0 }
 0x1a4   : > { %v3167_v0 = vsel %vm3163_vm8, %v3160_v51, %v3162_v58  ;;  %v4443_v1 = vpop.permute.xlu1 %4442  ;;  %4262 = vrot.lane.b32.xlu1 %v6752_v9, %s7148_s26  ;;  %v6844_v41 = vcombine.low %v5772_v61, %v5779_v50  ;;  %v5983_v9 = vrot.slane %v6857_v30, %v7226_v17  ;;  %v6706_v30 = vld [vmem:[%s8365_s3 + $0x38] sm:$0xf]  ;;  %v6210_v21 = vrot.slane %v6871_v23, %v7226_v17  ;;  %v8094_v50 = vld [vmem:[#allocation2 + $0x4] sm:$0xff] }
 0x1a5   : > { %v4446_v52 = vrot.slane %v4443_v1, 4  ;;  %6674 = vmatmul.mubr.msk.bf16.vlgmr.msra.gmra.mrb[0].mxu1 %vm527_vm14, %v6665_v29  ;;  %6687 = vmatprep.subr.msk.bf16.mxu1 %vm531_vm13, %v3167_v0  ;;  %v5990_v42 = vrot.slane %v5976_v36, %v7226_v17  ;;  %v6845_v44 = vcombine.low %v5786_v56, %v5793_v32  ;;  %v4828_v36 = vld [vmem:[#allocation2 + $0x1c] sm:$0x33]  ;;  %vm8374_vm8 = vcmask 596992  }
 0x1a6   : > { %3225 = vmatpush1.bf16.msra.mxu1 %v3178_v48  ;;  %3256 = vmatprep.mubr.bf16.mxu1 %v7137_v3  ;;  %v5991_v0 = vcombine.high %v5983_v9, %v5983_v9  ;;  %v4602_v48 = vld [vmem:[#allocation2 + $0x24] sm:$0x33]  ;;  %vm8375_vm9 = vmmov %vm8374_vm8 }
 0x1a7   : > { %v4448_v14 = vsel %vm390_vm2, %v4446_v52, %v4443_v1  ;;  %v4445_v15 = vpop.permute.xlu0 %4444  ;;  %4264 = vrot.lane.b32.xlu0 %v6753_v45, %s7148_s26  ;;  %6700 = vmatprep.subr.msk.bf16.mxu1 %vm531_vm13, %v6697_v53  ;;  %v5992_v1 = vcombine.high %v5990_v42, %v5990_v42  ;;  %v5994_v53 = vpack.i.b16 %v5983_v9, %v5983_v9 }
 0x1a8   : > { %v4454_v59 = vmul.bf16 %v4448_v14, %v7722_v49  ;;  %v4457_v60 = vmul.bf16 %v4448_v14, %v4374_v55  ;;  %v4447_v8 = vrot.slane %v4445_v15, 4  ;;  %5577 = vrot.lane.b32.xlu1 %v6830_v46, %s7144_s12  ;;  %v4670_v18 = vpop.permute.xlu1 %4669  ;;  %v4600_v46 = vld [vmem:[#allocation2 + $0x14] sm:$0xf]  ;;  %v6001_v54 = vpack.i.b16 %v5990_v42, %v5990_v42 }
 0x1a9   : > { %v4673_v34 = vrot.slane %v4670_v18, 4 }
 0x1aa   : > { %v6763_v6 = vcombine.low %v4454_v59, %v4457_v60  ;;  %v4449_v7 = vsel %vm392_vm1, %v4446_v52, %v4447_v8  ;;  %v4456_v22 = vmul.bf16 %v4447_v8, %v4373_v2  ;;  %v4459_v28 = vmul.bf16 %v4447_v8, %v4376_v4  ;;  %v4603_v52 = vld [vmem:[#allocation2 + $0x2c] sm:$0x3] }
 0x1ab   : > { %v4450_v13 = vsel %vm390_vm2, %v4449_v7, %v4445_v15  ;;  %5579 = vrot.lane.b32.xlu0 %v6831_v16, %s7144_s12  ;;  %v4672_v29 = vpop.permute.xlu0 %4671  ;;  %v6764_v31 = vcombine.high %v4454_v59, %v4457_v60  ;;  %v4675_v39 = vsel %vm476_vm0, %v4673_v34, %v4670_v18  ;;  %v6008_v59 = vpack.i.b16 %v5991_v0, %v5991_v0 }
 0x1ac   : > { %v4455_v26 = vmul.bf16 %v4450_v13, %v7818_v27  ;;  %v4458_v62 = vmul.bf16 %v4450_v13, %v4375_v12  ;;  %4483 = vrot.lane.b32.xlu1 %v6763_v6, %s7147_s25  ;;  %6686 = vmatmul.mubr.msk.bf16.vlgmr.msra.gmra.mrb[0].mxu0 %vm527_vm14, %v6679_v10  ;;  %v4674_v35 = vrot.slane %v4672_v29, 4  ;;  %v6767_v51 = vcombine.low %v4456_v22, %v4459_v28  ;;  %v3576_v13 = vpop.permute.xlu1 %3575 }
 0x1ad   : > { %3378 = vmatpush1.bf16.msra.mxu0 %v3366_v19  ;;  %3409 = vmatprep.mubr.bf16.mxu0 %v7137_v3  ;;  %v4681_v58 = vmul.bf16 %v4675_v39, %v7722_v49  ;;  %v4684_v45 = vmul.bf16 %v4675_v39, %v4601_v43  ;;  %v6015_v60 = vpack.i.b16 %v5992_v1, %v5992_v1  ;;  %v4827_v43 = vld [vmem:[#allocation2 + $0x14] sm:$0xf] }
 0x1ae   : > { %v6765_v33 = vcombine.low %v4455_v26, %v4458_v62  ;;  %v6766_v57 = vcombine.high %v4455_v26, %v4458_v62  ;;  %v4676_v40 = vsel %vm392_vm1, %v4673_v34, %v4674_v35  ;;  %v4683_v16 = vmul.bf16 %v4674_v35, %v4600_v46 }
 0x1af   : > { %4485 = vrot.lane.b32.xlu0 %v6764_v31, %s7147_s25  ;;  %v4677_v63 = vsel %vm476_vm0, %v4676_v40, %v4672_v29  ;;  %v6777_v55 = vcombine.low %v4681_v58, %v4684_v45  ;;  %v6778_v15 = vcombine.high %v4681_v58, %v4684_v45  ;;  %v4686_v47 = vmul.bf16 %v4674_v35, %v4603_v52  ;;  %v3578_v18 = vpop.permute.xlu0 %3577  ;;  %v4829_v45 = vld [vmem:[#allocation2 + $0x24] sm:$0x33] }
 0x1b0   : > { %4487 = vrot.lane.b32.xlu1 %v6765_v33, %s7147_s25  ;;  %v4682_v49 = vmul.bf16 %v4677_v63, %v7818_v27  ;;  %v4685_v14 = vmul.bf16 %v4677_v63, %v4602_v48  ;;  %v5999_v8 = vrot.slane %v5994_v53, %v7233_v20  ;;  %v6006_v2 = vrot.slane %v6001_v54, %v7233_v20  ;;  %v4830_v63 = vld [vmem:[#allocation2 + $0x2c] sm:$0x3] }
 0x1b1   : > { %6688 = vmatmul.mubr.msk.bf16.vlgmr.msra.gmra.mrb[0].mxu1 %vm527_vm14, %v6679_v10  ;;  %v6781_v6 = vcombine.low %v4683_v16, %v4686_v47  ;;  %v6013_v7 = vrot.slane %v6008_v59, %v7233_v20  ;;  %v6020_v10 = vrot.slane %v6015_v60, %v7233_v20  ;;  %v3585_v24 = vsel %vm3117_vm15, %v3576_v13, %v3578_v18 }
 0x1b2   : > { %3419 = vmatpush1.bf16.msra.mxu1 %v3372_v37  ;;  %3450 = vmatprep.mubr.bf16.mxu1 %v7137_v3  ;;  %v6779_v4 = vcombine.low %v4682_v49, %v4685_v14  ;;  %v6780_v5 = vcombine.high %v4682_v49, %v4685_v14  ;;  %v6858_v11 = vcombine.low %v5999_v8, %v6006_v2  ;;  %v3593_v28 = vsel %vm531_vm13, %v3585_v24, 0  ;;  %v5055_v24 = vld [vmem:[#allocation2 + $0x1c] sm:$0x33] }
 0x1b3   : > { %4489 = vrot.lane.b32.xlu0 %v6766_v57, %s7147_s25  ;;  %v6859_v12 = vcombine.low %v6013_v7, %v6020_v10  ;;  %v6203_v62 = vcombine.high %v6871_v23, %v6871_v23  ;;  %v6221_v37 = vpack.i.b16 %v6210_v21, %v6210_v21 }
 0x1b4   : > { %4491 = vrot.lane.b32.xlu1 %v6767_v51, %s7147_s25 }
 0x1b5   : > { %v6217_v35 = vrot.slane %v6203_v62, %v7226_v17  ;;  %v6218_v17 = vcombine.high %v6210_v21, %v6210_v21  ;;  %v6226_v1 = vrot.slane %v6221_v37, %v7233_v20 }
 0x1b7   : > { %5804 = vrot.lane.b32.xlu0 %v6844_v41, %s7145_s15  ;;  %v6228_v40 = vpack.i.b16 %v6217_v35, %v6217_v35  ;;  %v6219_v41 = vcombine.high %v6217_v35, %v6217_v35  ;;  %v6235_v46 = vpack.i.b16 %v6218_v17, %v6218_v17 }
 0x1b8   : > { %5806 = vrot.lane.b32.xlu1 %v6845_v44, %s7145_s15  ;;  %6699 = vmatmul.mubr.msk.bf16.vlgmr.msra.gmra.mrb[0].mxu0 %vm527_vm14, %v6693_v38 }
 0x1b9   : > { %3636 = vmatprep.mubr.bf16.mxu0 %v7137_v3  ;;  %v6233_v53 = vrot.slane %v6228_v40, %v7233_v20  ;;  %v6242_v54 = vpack.i.b16 %v6219_v41, %v6219_v41  ;;  %v6240_v2 = vrot.slane %v6235_v46, %v7233_v20  ;;  %v5282_v46 = vld [vmem:[#allocation2 + $0x1c] sm:$0x33] }
 0x1bb   : > { %4710 = vrot.lane.b32.xlu0 %v6777_v55, %s7146_s20  ;;  %v6872_v8 = vcombine.low %v6226_v1, %v6233_v53 }
 0x1bc   : > { %4712 = vrot.lane.b32.xlu1 %v6778_v15, %s7146_s20 }
 0x1bd   : > { %6701 = vmatmul.mubr.msk.bf16.vlgmr.msra.gmra.mrb[0].mxu1 %vm527_vm14, %v6693_v38 }
 0x1be   : > { %3677 = vmatprep.mubr.bf16.mxu1 %v7137_v3 }
 0x1bf   : > { %4714 = vrot.lane.b32.xlu0 %v6779_v4, %s7146_s20  ;;  %v6247_v4 = vrot.slane %v6242_v54, %v7233_v20 }
 0x1c0   : > { %4716 = vrot.lane.b32.xlu1 %v6780_v5, %s7146_s20 }
 0x1c1   : > { %v6873_v20 = vcombine.low %v6240_v2, %v6247_v4 }
 0x1c3   : > { %4718 = vrot.lane.b32.xlu0 %v6781_v6, %s7146_s20 }
 0x1c4   : > { %6031 = vrot.lane.b32.xlu1 %v6858_v11, %s7146_s20  ;;  %v6720_v11 = vld [vmem:[%s8365_s3 + $0x3c] sm:$0xf] }
 0x1c7   : > { %6033 = vrot.lane.b32.xlu0 %v6859_v12, %s7146_s20 }
 0x1e9   : > { %v3582_v25 = vpop.permute.xlu0 %3581  ;;  %v3580_v26 = vpop.permute.xlu1 %3579 }
 0x1ea   : > { %v3586_v22 = vsel %vm3117_vm15, %v3578_v18, %v3580_v26  ;;  %v3587_v29 = vsel %vm3117_vm15, %v3580_v26, %v3582_v25 }
 0x1eb   : > { %6712 = vmatprep.subr.msk.bf16.mxu0 %vm531_vm13, %v3586_v22  ;;  %v3599_v61 = vsel %vm531_vm13, %v3587_v29, 0 }
 0x1ec   : > { %3605 = vmatpush1.bf16.msra.mxu0 %v3593_v28  ;;  %v5054_v28 = vld [vmem:[#allocation2 + $0x14] sm:$0xf] }
 0x1ed   : > { %v4897_v31 = vpop.permute.xlu0 %4896  ;;  %v3584_v19 = vpop.permute.xlu1 %3583 }
 0x1ee   : > { %v4900_v33 = vrot.slane %v4897_v31, 4  ;;  %v3588_v34 = vsel %vm3117_vm15, %v3582_v25, %v3584_v19 }
 0x1ef   : > { %6714 = vmatprep.subr.msk.bf16.mxu1 %vm531_vm13, %v3588_v34  ;;  %6713 = vmatmul.mubr.msk.bf16.vlgmr.msra.gmra.mrb[0].mxu0 %vm527_vm14, %v6706_v30  ;;  %v5056_v34 = vld [vmem:[#allocation2 + $0x24] sm:$0x33] }
 0x1f0   : > { %v4902_v51 = vsel %vm836_vm3, %v4900_v33, %v4897_v31  ;;  %3646 = vmatpush1.bf16.msra.mxu1 %v3599_v61  ;;  %3863 = vmatprep.mubr.bf16.mxu0 %v7137_v3  ;;  %v5057_v31 = vld [vmem:[#allocation2 + $0x2c] sm:$0x3] }
 0x1f1   : > { %v4908_v56 = vmul.bf16 %v4902_v51, %v8094_v50  ;;  %v4911_v32 = vmul.bf16 %v4902_v51, %v4828_v36  ;;  %v4899_v57 = vpop.permute.xlu1 %4898 }
 0x1f2   : > { %v4901_v39 = vrot.slane %v4899_v57, 4 }
 0x1f3   : > { %v6791_v9 = vcombine.low %v4908_v56, %v4911_v32  ;;  %v6792_v42 = vcombine.high %v4908_v56, %v4911_v32  ;;  %6715 = vmatmul.mubr.msk.bf16.vlgmr.msra.gmra.mrb[0].mxu1 %vm527_vm14, %v6706_v30 }
 0x1f4   : > { %v4903_v44 = vsel %vm392_vm1, %v4900_v33, %v4901_v39  ;;  %v3803_v58 = vpop.permute.xlu0 %3802  ;;  %3904 = vmatprep.mubr.bf16.mxu1 %v7137_v3  ;;  %v4910_v55 = vmul.bf16 %v4901_v39, %v4827_v43  ;;  %v4913_v49 = vmul.bf16 %v4901_v39, %v4830_v63 }
 0x1f5   : > { %v4904_v38 = vsel %vm836_vm3, %v4903_v44, %v4899_v57  ;;  %4937 = vrot.lane.b32.xlu1 %v6791_v9, %s7145_s15  ;;  %4939 = vrot.lane.b32.xlu0 %v6792_v42, %s7145_s15  ;;  %v3805_v0 = vpop.permute.xlu1 %3804 }
 0x1f6   : > { %v4909_v48 = vmul.bf16 %v4904_v38, %v7818_v27  ;;  %v4912_v52 = vmul.bf16 %v4904_v38, %v4829_v45  ;;  %v3812_v16 = vsel %vm2888_vm12, %v3803_v58, %v3805_v0  ;;  %v6795_v10 = vcombine.low %v4910_v55, %v4913_v49  ;;  %v8158_v55 = vld [vmem:[#allocation2 + $0xc] sm:$0xff]  ;;  %v5283_v49 = vld [vmem:[#allocation2 + $0x24] sm:$0x33] }
 0x1f7   : > { %v3820_v5 = vsel %vm531_vm13, %v3812_v16, 0 }
 0x1f8   : > { %v6793_v14 = vcombine.low %v4909_v48, %v4912_v52  ;;  %v6794_v15 = vcombine.high %v4909_v48, %v4912_v52  ;;  %v3807_v47 = vpop.permute.xlu0 %3806 }
 0x1f9   : > { %v3813_v59 = vsel %vm2888_vm12, %v3805_v0, %v3807_v47  ;;  %v3809_v60 = vpop.permute.xlu1 %3808 }
 0x1fa   : > { %4943 = vrot.lane.b32.xlu0 %v6794_v15, %s7145_s15  ;;  %4941 = vrot.lane.b32.xlu1 %v6793_v14, %s7145_s15  ;;  %v3814_v6 = vsel %vm2888_vm12, %v3807_v47, %v3809_v60 }
 0x1fb   : > { %6726 = vmatprep.subr.msk.bf16.mxu0 %vm531_vm13, %v3813_v59  ;;  %v3826_v23 = vsel %vm531_vm13, %v3814_v6, 0 }
 0x1fc   : > { %3832 = vmatpush1.bf16.msra.mxu0 %v3820_v5  ;;  %v3811_v7 = vpop.permute.xlu0 %3810 }
 0x1fd   : > { %v3815_v12 = vsel %vm2888_vm12, %v3809_v60, %v3811_v7  ;;  %v5124_v13 = vpop.permute.xlu1 %5123  ;;  %v5281_v60 = vld [vmem:[#allocation2 + $0x14] sm:$0xf]  ;;  %vm8378_vm12 = vcmask 580608  }
 0x1fe   : > { %v5127_v18 = vrot.slane %v5124_v13, 4  ;;  %6258 = vrot.lane.b32.xlu0 %v6872_v8, %s7147_s25  ;;  %4945 = vrot.lane.b32.xlu1 %v6795_v10, %s7145_s15  ;;  %v5284_v8 = vld [vmem:[#allocation2 + $0x2c] sm:$0x3]  ;;  %vm8379_vm15 = vmmov %vm8378_vm12 }
 0x1ff   : > { %6728 = vmatprep.subr.msk.bf16.mxu1 %vm531_vm13, %v3815_v12  ;;  %6727 = vmatmul.mubr.msk.bf16.vlgmr.msra.gmra.mrb[0].mxu0 %vm527_vm14, %v6720_v11 }
 0x200   : > { %v5129_v25 = vsel %vm1065_vm4, %v5127_v18, %v5124_v13  ;;  %3873 = vmatpush1.bf16.msra.mxu1 %v3826_v23  ;;  %v5126_v26 = vpop.permute.xlu0 %5125  ;;  %4090 = vmatprep.mubr.bf16.mxu0 %v7137_v3 }
 0x201   : > { %v5135_v22 = vmul.bf16 %v5129_v25, %v8094_v50  ;;  %v5138_v62 = vmul.bf16 %v5129_v25, %v5055_v24  ;;  %v5128_v29 = vrot.slane %v5126_v26, 4  ;;  %v4030_v30 = vpop.permute.xlu1 %4029  ;;  %v6748_v24 = vld [vmem:[%s8365_s3 + $0x44] sm:$0xf] }
 0x202   : > { %6260 = vrot.lane.b32.xlu1 %v6873_v20, %s7147_s25 }
 0x203   : > { %v6805_v19 = vcombine.low %v5135_v22, %v5138_v62  ;;  %v6806_v21 = vcombine.high %v5135_v22, %v5138_v62  ;;  %v5130_v33 = vsel %vm392_vm1, %v5127_v18, %v5128_v29  ;;  %6729 = vmatmul.mubr.msk.bf16.vlgmr.msra.gmra.mrb[0].mxu1 %vm527_vm14, %v6720_v11  ;;  %v5137_v61 = vmul.bf16 %v5128_v29, %v5054_v28 }
 0x204   : > { %v5131_v35 = vsel %vm1065_vm4, %v5130_v33, %v5126_v26  ;;  %v4032_v36 = vpop.permute.xlu0 %4031  ;;  %4131 = vmatprep.mubr.bf16.mxu1 %v7137_v3  ;;  %v5140_v32 = vmul.bf16 %v5128_v29, %v5057_v31 }
 0x205   : > { %v5136_v51 = vmul.bf16 %v5131_v35, %v7818_v27  ;;  %v5139_v56 = vmul.bf16 %v5131_v35, %v5056_v34  ;;  %v4039_v57 = vsel %vm2659_vm11, %v4030_v30, %v4032_v36  ;;  %5164 = vrot.lane.b32.xlu0 %v6805_v19, %s7144_s12  ;;  %v4034_v37 = vpop.permute.xlu1 %4033  ;;  %v6734_v27 = vld [vmem:[%s8365_s3 + $0x40] sm:$0xf]  ;;  %v5508_v34 = vld [vmem:[#allocation2 + $0x14] sm:$0xf]  ;;  %v5511_v35 = vld [vmem:[#allocation2 + $0x2c] sm:$0x3] }
 0x206   : > { %v4047_v17 = vsel %vm531_vm13, %v4039_v57, 0  ;;  %v4040_v39 = vsel %vm2659_vm11, %v4032_v36, %v4034_v37  ;;  %5166 = vrot.lane.b32.xlu1 %v6806_v21, %s7144_s12  ;;  %v6809_v44 = vcombine.low %v5137_v61, %v5140_v32  ;;  %v5509_v30 = vld [vmem:[#allocation2 + $0x1c] sm:$0x33]  ;;  %v5510_v57 = vld [vmem:[#allocation2 + $0x24] sm:$0x33] }
 0x207   : > { %v6807_v40 = vcombine.low %v5136_v51, %v5139_v56  ;;  %v6808_v41 = vcombine.high %v5136_v51, %v5139_v56  ;;  %6740 = vmatprep.subr.msk.bf16.mxu0 %vm531_vm13, %v4040_v39 }
 0x208   : > { %v4036_v9 = vpop.permute.xlu0 %4035  ;;  %4059 = vmatpush1.bf16.msra.mxu0 %v4047_v17 }
 0x209   : > { %v4041_v42 = vsel %vm2659_vm11, %v4034_v37, %v4036_v9  ;;  %5168 = vrot.lane.b32.xlu0 %v6807_v40, %s7144_s12  ;;  %v4038_v43 = vpop.permute.xlu1 %4037 }
 0x20a   : > { %v4053_v58 = vsel %vm531_vm13, %v4041_v42, 0  ;;  %v4042_v45 = vsel %vm2659_vm11, %v4036_v9, %v4038_v43  ;;  %5170 = vrot.lane.b32.xlu1 %v6808_v41, %s7144_s12  ;;  %vm8377_vm11 = vmmov %vm8374_vm8 }
 0x20b   : > { %6742 = vmatprep.subr.msk.bf16.mxu1 %vm531_vm13, %v4042_v45  ;;  %6741 = vmatmul.mubr.msk.bf16.vlgmr.msra.gmra.mrb[0].mxu0 %vm527_vm14, %v6734_v27 }
 0x20c   : > { %v5351_v63 = vpop.permute.xlu0 %5350  ;;  %4100 = vmatpush1.bf16.msra.mxu1 %v4053_v58  ;;  %4317 = vmatprep.mubr.bf16.mxu0 %v7137_v3 }
 0x20d   : > { %v5354_v38 = vrot.slane %v5351_v63, 4  ;;  %5172 = vrot.lane.b32.xlu0 %v6809_v44, %s7144_s12  ;;  %v5353_v0 = vpop.permute.xlu1 %5352 }
 0x20e   : > { %v5355_v1 = vrot.slane %v5353_v0, 4 }
 0x20f   : > { %v5356_v48 = vsel %vm1294_vm5, %v5354_v38, %v5351_v63  ;;  %6743 = vmatmul.mubr.msk.bf16.vlgmr.msra.gmra.mrb[0].mxu1 %vm527_vm14, %v6734_v27 }
 0x210   : > { %v5362_v52 = vmul.bf16 %v5356_v48, %v8094_v50  ;;  %v5365_v53 = vmul.bf16 %v5356_v48, %v5282_v46  ;;  %v5357_v54 = vsel %vm392_vm1, %v5354_v38, %v5355_v1  ;;  %4358 = vmatprep.mubr.bf16.mxu1 %v7137_v3  ;;  %v5364_v6 = vmul.bf16 %v5355_v1, %v5281_v60  ;;  %v6762_v38 = vld [vmem:[%s8365_s3 + $0x48] sm:$0xf] }
 0x211   : > { %v5358_v14 = vsel %vm1294_vm5, %v5357_v54, %v5353_v0  ;;  %v4257_v15 = vpop.permute.xlu0 %4256  ;;  %v4259_v16 = vpop.permute.xlu1 %4258  ;;  %v5367_v7 = vmul.bf16 %v5355_v1, %v5284_v8 }
 0x212   : > { %v6819_v47 = vcombine.low %v5362_v52, %v5365_v53  ;;  %v6820_v59 = vcombine.high %v5362_v52, %v5365_v53  ;;  %v5363_v2 = vmul.bf16 %v5358_v14, %v8158_v55  ;;  %v5366_v4 = vmul.bf16 %v5358_v14, %v5283_v49 }
 0x213   : > { %v4266_v5 = vsel %vm2430_vm10, %v4257_v15, %v4259_v16  ;;  %v6823_v26 = vcombine.low %v5364_v6, %v5367_v7  ;;  %v5736_v15 = vld [vmem:[#allocation2 + $0x1c] sm:$0x33] }
 0x214   : > { %5391 = vrot.lane.b32.xlu1 %v6819_v47, %s7143_s9  ;;  %5393 = vrot.lane.b32.xlu0 %v6820_v59, %s7143_s9  ;;  %v6822_v11 = vcombine.high %v5363_v2, %v5366_v4  ;;  %v6821_v18 = vcombine.low %v5363_v2, %v5366_v4  ;;  %v4274_v20 = vsel %vm531_vm13, %v4266_v5, 0  ;;  %v5735_v2 = vld [vmem:[#allocation2 + $0x14] sm:$0xf]  ;;  %v5737_v4 = vld [vmem:[#allocation2 + $0x24] sm:$0x33] }
 0x215   : > { %v4261_v10 = vpop.permute.xlu0 %4260  ;;  %v5738_v5 = vld [vmem:[#allocation2 + $0x2c] sm:$0x3] }
 0x216   : > { %v4267_v12 = vsel %vm2430_vm10, %v4259_v16, %v4261_v10  ;;  %v4263_v13 = vpop.permute.xlu1 %4262 }
 0x217   : > { %6754 = vmatprep.subr.msk.bf16.mxu0 %vm531_vm13, %v4267_v12  ;;  %v4268_v23 = vsel %vm2430_vm10, %v4261_v10, %v4263_v13 }
 0x218   : > { %4286 = vmatpush1.bf16.msra.mxu0 %v4274_v20  ;;  %5397 = vrot.lane.b32.xlu0 %v6822_v11, %s7143_s9  ;;  %v4280_v28 = vsel %vm531_vm13, %v4268_v23, 0 }
 0x219   : > { %v4265_v25 = vpop.permute.xlu0 %4264  ;;  %5395 = vrot.lane.b32.xlu1 %v6821_v18, %s7143_s9 }
 0x21a   : > { %v4269_v22 = vsel %vm2430_vm10, %v4263_v13, %v4265_v25  ;;  %v5578_v62 = vpop.permute.xlu1 %5577  ;;  %vm8376_vm10 = vmmov %vm8374_vm8 }
 0x21b   : > { %v5581_v29 = vrot.slane %v5578_v62, 4  ;;  %6756 = vmatprep.subr.msk.bf16.mxu1 %vm531_vm13, %v4269_v22  ;;  %6755 = vmatmul.mubr.msk.bf16.vlgmr.msra.gmra.mrb[0].mxu0 %vm527_vm14, %v6748_v24 }
 0x21c   : > { %4327 = vmatpush1.bf16.msra.mxu1 %v4280_v28  ;;  %4544 = vmatprep.mubr.bf16.mxu0 %v7137_v3 }
 0x21d   : > { %v5583_v31 = vsel %vm8372_vm6, %v5581_v29, %v5578_v62  ;;  %v5580_v19 = vpop.permute.xlu0 %5579  ;;  %5399 = vrot.lane.b32.xlu1 %v6823_v26, %s7143_s9  ;;  %vm8380_vm6 = vcmask 588800  }
 0x21e   : > { %v5589_v21 = vmul.bf16 %v5583_v31, %v8094_v50  ;;  %v5592_v33 = vmul.bf16 %v5583_v31, %v5509_v30  ;;  %v5582_v61 = vrot.slane %v5580_v19, 4  ;;  %v4484_v36 = vpop.permute.xlu1 %4483  ;;  %v6776_v30 = vld [vmem:[%s8365_s3 + $0x4c] sm:$0xf] }
 0x21f   : > { %6757 = vmatmul.mubr.msk.bf16.vlgmr.msra.gmra.mrb[0].mxu1 %vm527_vm14, %v6748_v24 }
 0x220   : > { %v6833_v51 = vcombine.low %v5589_v21, %v5592_v33  ;;  %v6834_v56 = vcombine.high %v5589_v21, %v5592_v33  ;;  %v5584_v32 = vsel %vm392_vm1, %v5581_v29, %v5582_v61  ;;  %4585 = vmatprep.mubr.bf16.mxu1 %v7137_v3  ;;  %v5591_v17 = vmul.bf16 %v5582_v61, %v5508_v34 }
 0x221   : > { %v5585_v37 = vsel %vm8373_vm7, %v5584_v32, %v5580_v19  ;;  %v5594_v39 = vmul.bf16 %v5582_v61, %v5511_v35  ;;  %v4486_v40 = vpop.permute.xlu0 %4485  ;;  %vm8381_vm7 = vmmov %vm8380_vm6  ;;  %v5963_v61 = vld [vmem:[#allocation2 + $0x1c] sm:$0x33] }
 0x222   : > { %v5590_v41 = vmul.bf16 %v5585_v37, %v8158_v55  ;;  %v5593_v9 = vmul.bf16 %v5585_v37, %v5510_v57  ;;  %v4493_v27 = vsel %vm8374_vm8, %v4484_v36, %v4486_v40  ;;  %5620 = vrot.lane.b32.xlu1 %v6834_v56, %s7142_s6  ;;  %5618 = vrot.lane.b32.xlu0 %v6833_v51, %s7142_s6  ;;  %v4488_v42 = vpop.permute.xlu1 %4487  ;;  %vm8382_vm8 = vmmov %vm8380_vm6  ;;  %v5962_v57 = vld [vmem:[#allocation2 + $0x14] sm:$0xf] }
 0x223   : > { %v4501_v43 = vsel %vm531_vm13, %v4493_v27, 0  ;;  %v4494_v44 = vsel %vm8375_vm9, %v4486_v40, %v4488_v42  ;;  %v6837_v46 = vcombine.low %v5591_v17, %v5594_v39  ;;  %vm8383_vm9 = vmmov %vm8380_vm6  ;;  %v5965_v17 = vld [vmem:[#allocation2 + $0x2c] sm:$0x3] }
 0x224   : > { %v6835_v58 = vcombine.low %v5590_v41, %v5593_v9  ;;  %v6836_v45 = vcombine.high %v5590_v41, %v5593_v9  ;;  %6768 = vmatprep.subr.msk.bf16.mxu0 %vm531_vm13, %v4494_v44  ;;  %v5964_v9 = vld [vmem:[#allocation2 + $0x24] sm:$0x33] }
 0x225   : > { %v4490_v63 = vpop.permute.xlu0 %4489  ;;  %4513 = vmatpush1.bf16.msra.mxu0 %v4501_v43 }
 0x226   : > { %v4495_v0 = vsel %vm8376_vm10, %v4488_v42, %v4490_v63  ;;  %5624 = vrot.lane.b32.xlu1 %v6836_v45, %s7142_s6  ;;  %5622 = vrot.lane.b32.xlu0 %v6835_v58, %s7142_s6  ;;  %v4492_v1 = vpop.permute.xlu1 %4491  ;;  %vm8384_vm10 = vmmov %vm8380_vm6 }
 0x227   : > { %v4507_v48 = vsel %vm531_vm13, %v4495_v0, 0  ;;  %v4496_v52 = vsel %vm8377_vm11, %v4490_v63, %v4492_v1  ;;  %vm8385_vm11 = vmmov %vm8380_vm6 }
 0x228   : > { %6770 = vmatprep.subr.msk.bf16.mxu1 %vm531_vm13, %v4496_v52  ;;  %6769 = vmatmul.mubr.msk.bf16.vlgmr.msra.gmra.mrb[0].mxu0 %vm527_vm14, %v6762_v38 }
 0x229   : > { %v5805_v53 = vpop.permute.xlu0 %5804  ;;  %4554 = vmatpush1.bf16.msra.mxu1 %v4507_v48  ;;  %4771 = vmatprep.mubr.bf16.mxu0 %v7137_v3 }
 0x22a   : > { %v5808_v54 = vrot.slane %v5805_v53, 4  ;;  %5626 = vrot.lane.b32.xlu0 %v6837_v46, %s7142_s6  ;;  %v5807_v49 = vpop.permute.xlu1 %5806 }
 0x22b   : > { %v5809_v14 = vrot.slane %v5807_v49, 4 }
 0x22c   : > { %v5810_v16 = vsel %vm8378_vm12, %v5808_v54, %v5805_v53  ;;  %6771 = vmatmul.mubr.msk.bf16.vlgmr.msra.gmra.mrb[0].mxu1 %vm527_vm14, %v6762_v38 }
 0x22d   : > { %v5816_v47 = vmul.bf16 %v5810_v16, %v8094_v50  ;;  %v5819_v59 = vmul.bf16 %v5810_v16, %v5736_v15  ;;  %v5811_v60 = vsel %vm392_vm1, %v5808_v54, %v5809_v14  ;;  %v4711_v8 = vpop.permute.xlu0 %4710  ;;  %4812 = vmatprep.mubr.bf16.mxu1 %v7137_v3  ;;  %v5818_v20 = vmul.bf16 %v5809_v14, %v5735_v2 }
 0x22e   : > { %v5812_v6 = vsel %vm8379_vm15, %v5811_v60, %v5807_v49  ;;  %v4713_v7 = vpop.permute.xlu1 %4712  ;;  %v5821_v23 = vmul.bf16 %v5809_v14, %v5738_v5  ;;  %vm8386_vm15 = vmmov %vm8378_vm12  ;;  %v6790_v14 = vld [vmem:[%s8365_s3 + $0x50] sm:$0xf] }
 0x22f   : > { %v6847_v10 = vcombine.low %v5816_v47, %v5819_v59  ;;  %v6848_v11 = vcombine.high %v5816_v47, %v5819_v59  ;;  %v5817_v12 = vmul.bf16 %v5812_v6, %v8158_v55  ;;  %v5820_v13 = vmul.bf16 %v5812_v6, %v5737_v4 }
 0x230   : > { %v4720_v18 = vsel %vm8380_vm6, %v4711_v8, %v4713_v7  ;;  %v6851_v19 = vcombine.low %v5818_v20, %v5821_v23  ;;  %vm8387_vm6 = vmmov %vm8378_vm12  ;;  %v6190_v8 = vld [vmem:[#allocation2 + $0x1c] sm:$0x33]  ;;  %v6191_v20 = vld [vmem:[#allocation2 + $0x24] sm:$0x33] }
 0x231   : > { %v4715_v24 = vpop.permute.xlu0 %4714  ;;  %5845 = vrot.lane.b32.xlu1 %v6847_v10, %s7141_s28  ;;  %5847 = vrot.lane.b32.xlu0 %v6848_v11, %s7141_s28  ;;  %v6849_v22 = vcombine.low %v5817_v12, %v5820_v13  ;;  %v6850_v62 = vcombine.high %v5817_v12, %v5820_v13  ;;  %v4728_v28 = vsel %vm531_vm13, %v4720_v18, 0  ;;  %v6189_v12 = vld [vmem:[#allocation2 + $0x14] sm:$0xf]  ;;  %v6192_v23 = vld [vmem:[#allocation2 + $0x2c] sm:$0x3] }
 0x232   : > { %v4721_v25 = vsel %vm8381_vm7, %v4713_v7, %v4715_v24  ;;  %v4717_v26 = vpop.permute.xlu1 %4716  ;;  %vm8388_vm7 = vmmov %vm8387_vm6 }
 0x233   : > { %6782 = vmatprep.subr.msk.bf16.mxu0 %vm531_vm13, %v4721_v25  ;;  %v4722_v29 = vsel %vm8382_vm8, %v4715_v24, %v4717_v26  ;;  %vm8389_vm8 = vcmask 596992  }
 0x234   : > { %4740 = vmatpush1.bf16.msra.mxu0 %v4728_v28  ;;  %v4734_v34 = vsel %vm531_vm13, %v4722_v29, 0 }
 0x235   : > { %v4719_v31 = vpop.permute.xlu0 %4718  ;;  %5851 = vrot.lane.b32.xlu0 %v6850_v62, %s7141_s28  ;;  %5849 = vrot.lane.b32.xlu1 %v6849_v22, %s7141_s28 }
 0x236   : > { %v4723_v21 = vsel %vm8383_vm9, %v4717_v26, %v4719_v31  ;;  %v6032_v33 = vpop.permute.xlu1 %6031  ;;  %vm8390_vm9 = vmmov %vm8389_vm8 }
 0x237   : > { %v6035_v35 = vrot.slane %v6032_v33, 4  ;;  %6784 = vmatprep.subr.msk.bf16.mxu1 %vm531_vm13, %v4723_v21  ;;  %6783 = vmatmul.mubr.msk.bf16.vlgmr.msra.gmra.mrb[0].mxu0 %vm527_vm14, %v6776_v30 }
 0x238   : > { %4781 = vmatpush1.bf16.msra.mxu1 %v4734_v34  ;;  %4998 = vmatprep.mubr.bf16.mxu0 %v7137_v3 }
 0x239   : > { %v6037_v36 = vsel %vm8384_vm10, %v6035_v35, %v6032_v33  ;;  %v6034_v51 = vpop.permute.xlu0 %6033  ;;  %5853 = vrot.lane.b32.xlu1 %v6851_v19, %s7141_s28 }
 0x23a   : > { %v6043_v56 = vmul.bf16 %v6037_v36, %v8094_v50  ;;  %v6046_v32 = vmul.bf16 %v6037_v36, %v5963_v61  ;;  %v6036_v37 = vrot.slane %v6034_v51, 4  ;;  %v6804_v61 = vld [vmem:[%s8365_s3 + $0x54] sm:$0xf] }
 0x23b   : > { %6785 = vmatmul.mubr.msk.bf16.vlgmr.msra.gmra.mrb[0].mxu1 %vm527_vm14, %v6776_v30 }
 0x23c   : > { %v6861_v39 = vcombine.low %v6043_v56, %v6046_v32  ;;  %v6862_v40 = vcombine.high %v6043_v56, %v6046_v32  ;;  %v6038_v41 = vsel %vm392_vm1, %v6035_v35, %v6036_v37  ;;  %5039 = vmatprep.mubr.bf16.mxu1 %v7137_v3  ;;  %v6045_v42 = vmul.bf16 %v6036_v37, %v5962_v57 }
 0x23d   : > { %v6039_v27 = vsel %vm8385_vm11, %v6038_v41, %v6034_v51  ;;  %v6048_v58 = vmul.bf16 %v6036_v37, %v5965_v17 }
 0x23e   : > { %v6044_v43 = vmul.bf16 %v6039_v27, %v8158_v55  ;;  %v6047_v44 = vmul.bf16 %v6039_v27, %v5964_v9  ;;  %6074 = vrot.lane.b32.xlu1 %v6862_v40, %s7139_s22  ;;  %6072 = vrot.lane.b32.xlu0 %v6861_v39, %s7139_s22  ;;  %v6818_v9 = vld [vmem:[%s8365_s3 + $0x58] sm:$0xf] }
 0x23f   : > { %v6865_v38 = vcombine.low %v6045_v42, %v6048_v58 }
 0x240   : > { %v6863_v45 = vcombine.low %v6044_v43, %v6047_v44  ;;  %v6864_v63 = vcombine.high %v6044_v43, %v6047_v44 }
 0x242   : > { %6078 = vrot.lane.b32.xlu1 %v6864_v63, %s7139_s22  ;;  %6076 = vrot.lane.b32.xlu0 %v6863_v45, %s7139_s22 }
 0x246   : > { %6080 = vrot.lane.b32.xlu0 %v6865_v38, %s7139_s22 }
 0x267   : > { %v4940_v0 = vpop.permute.xlu0 %4939  ;;  %v4938_v1 = vpop.permute.xlu1 %4937 }
 0x268   : > { %v4947_v46 = vsel %vm8378_vm12, %v4938_v1, %v4940_v0 }
 0x269   : > { %v4955_v54 = vsel %vm531_vm13, %v4947_v46, 0 }
 0x26c   : > { %v4944_v48 = vpop.permute.xlu0 %4943  ;;  %v4942_v52 = vpop.permute.xlu1 %4941 }
 0x26d   : > { %v4948_v53 = vsel %vm8386_vm15, %v4940_v0, %v4942_v52  ;;  %v4949_v49 = vsel %vm8387_vm6, %v4942_v52, %v4944_v48 }
 0x26e   : > { %6796 = vmatprep.subr.msk.bf16.mxu0 %vm531_vm13, %v4948_v53  ;;  %v4961_v60 = vsel %vm531_vm13, %v4949_v49, 0 }
 0x26f   : > { %4967 = vmatpush1.bf16.msra.mxu0 %v4955_v54 }
 0x270   : > { %v6259_v15 = vpop.permute.xlu0 %6258  ;;  %v4946_v16 = vpop.permute.xlu1 %4945 }
 0x271   : > { %v6262_v47 = vrot.slane %v6259_v15, 4  ;;  %v4950_v59 = vsel %vm8388_vm7, %v4944_v48, %v4946_v16  ;;  %v6832_v48 = vld [vmem:[%s8365_s3 + $0x5c] sm:$0xf] }
 0x272   : > { %6798 = vmatprep.subr.msk.bf16.mxu1 %vm531_vm13, %v4950_v59  ;;  %6797 = vmatmul.mubr.msk.bf16.vlgmr.msra.gmra.mrb[0].mxu0 %vm527_vm14, %v6790_v14 }
 0x273   : > { %v6264_v2 = vsel %vm8389_vm8, %v6262_v47, %v6259_v15  ;;  %5008 = vmatpush1.bf16.msra.mxu1 %v4961_v60  ;;  %5225 = vmatprep.mubr.bf16.mxu0 %v7137_v3 }
 0x274   : > { %v6270_v4 = vmul.bf16 %v6264_v2, %v8094_v50  ;;  %v6273_v5 = vmul.bf16 %v6264_v2, %v6190_v8  ;;  %v6261_v6 = vpop.permute.xlu1 %6260  ;;  %v6846_v2 = vld [vmem:[%s8365_s3 + $0x60] sm:$0xf] }
 0x275   : > { %v6263_v7 = vrot.slane %v6261_v6, 4 }
 0x276   : > { %v6875_v10 = vcombine.low %v6270_v4, %v6273_v5  ;;  %v6876_v11 = vcombine.high %v6270_v4, %v6273_v5  ;;  %6799 = vmatmul.mubr.msk.bf16.vlgmr.msra.gmra.mrb[0].mxu1 %vm527_vm14, %v6790_v14 }
 0x277   : > { %v6265_v13 = vsel %vm392_vm1, %v6262_v47, %v6263_v7  ;;  %v5165_v18 = vpop.permute.xlu0 %5164  ;;  %5266 = vmatprep.mubr.bf16.mxu1 %v7137_v3  ;;  %v6272_v22 = vmul.bf16 %v6263_v7, %v6189_v12  ;;  %v6275_v62 = vmul.bf16 %v6263_v7, %v6192_v23  ;;  %vm8391_vm1 = vcmask 531456  }
 0x278   : > { %v6266_v24 = vsel %vm8390_vm9, %v6265_v13, %v6261_v6  ;;  %6299 = vrot.lane.b32.xlu1 %v6875_v10, %s7140_s23  ;;  %6301 = vrot.lane.b32.xlu0 %v6876_v11, %s7140_s23  ;;  %v5167_v50 = vpop.permute.xlu1 %5166  ;;  %vm8392_vm10 = vmmov %vm8391_vm1 }
 0x279   : > { %v6271_v25 = vmul.bf16 %v6266_v24, %v8158_v55  ;;  %v6274_v26 = vmul.bf16 %v6266_v24, %v6191_v20  ;;  %v5174_v30 = vsel %vm8391_vm1, %v5165_v18, %v5167_v50  ;;  %vm8393_vm11 = vmmov %vm8391_vm1  ;;  %v6879_v35 = vcombine.low %v6272_v22, %v6275_v62  ;;  %v6860_v24 = vld [vmem:[%s8365_s3 + $0x64] sm:$0xf] }
 0x27a   : > { %v5182_v33 = vsel %vm531_vm13, %v5174_v30, 0  ;;  %vm8394_vm12 = vmmov %vm8391_vm1 }
 0x27b   : > { %v6877_v28 = vcombine.low %v6271_v25, %v6274_v26  ;;  %v6878_v29 = vcombine.high %v6271_v25, %v6274_v26  ;;  %v5169_v31 = vpop.permute.xlu0 %5168 }
 0x27c   : > { %v5175_v19 = vsel %vm8392_vm10, %v5167_v50, %v5169_v31  ;;  %v5171_v21 = vpop.permute.xlu1 %5170 }
 0x27d   : > { %6305 = vrot.lane.b32.xlu0 %v6878_v29, %s7140_s23  ;;  %6303 = vrot.lane.b32.xlu1 %v6877_v28, %s7140_s23  ;;  %v5176_v34 = vsel %vm8393_vm11, %v5169_v31, %v5171_v21 }
 0x27e   : > { %6810 = vmatprep.subr.msk.bf16.mxu0 %vm531_vm13, %v5175_v19  ;;  %v5188_v51 = vsel %vm531_vm13, %v5176_v34, 0 }
 0x27f   : > { %5194 = vmatpush1.bf16.msra.mxu0 %v5182_v33  ;;  %v5173_v55 = vpop.permute.xlu0 %5172 }
 0x280   : > { %v5177_v36 = vsel %vm8394_vm12, %v5171_v21, %v5173_v55 }
 0x281   : > { %6307 = vrot.lane.b32.xlu1 %v6879_v35, %s7140_s23  ;;  %6812 = vmatprep.subr.msk.bf16.mxu1 %vm531_vm13, %v5177_v36 }
 0x282   : > { %5235 = vmatpush1.bf16.msra.mxu1 %v5188_v51  ;;  %6811 = vmatmul.mubr.msk.bf16.vlgmr.msra.gmra.mrb[0].mxu0 %vm527_vm14, %v6804_v61 }
 0x283   : > { %5452 = vmatprep.mubr.bf16.mxu0 %v7137_v3 }
 0x285   : > { %6813 = vmatmul.mubr.msk.bf16.vlgmr.msra.gmra.mrb[0].mxu1 %vm527_vm14, %v6804_v61 }
 0x286   : > { %v5394_v56 = vpop.permute.xlu0 %5393  ;;  %v5392_v32 = vpop.permute.xlu1 %5391  ;;  %5493 = vmatprep.mubr.bf16.mxu1 %v7137_v3 }
 0x287   : > { %v5401_v57 = vsel %vm1294_vm5, %v5392_v32, %v5394_v56 }
 0x288   : > { %v5409_v40 = vsel %vm531_vm13, %v5401_v57, 0 }
 0x28a   : > { %v5398_v37 = vpop.permute.xlu0 %5397 }
 0x28b   : > { %v5396_v17 = vpop.permute.xlu1 %5395 }
 0x28c   : > { %v5402_v39 = vsel %vm1294_vm5, %v5394_v56, %v5396_v17  ;;  %v5403_v41 = vsel %vm1294_vm5, %v5396_v17, %v5398_v37 }
 0x28d   : > { %6824 = vmatprep.subr.msk.bf16.mxu0 %vm531_vm13, %v5402_v39  ;;  %v5415_v43 = vsel %vm531_vm13, %v5403_v41, 0 }
 0x28e   : > { %5421 = vmatpush1.bf16.msra.mxu0 %v5409_v40 }
 0x28f   : > { %v5400_v27 = vpop.permute.xlu1 %5399 }
 0x290   : > { %v5404_v42 = vsel %vm1294_vm5, %v5398_v37, %v5400_v27 }
 0x291   : > { %6826 = vmatprep.subr.msk.bf16.mxu1 %vm531_vm13, %v5404_v42  ;;  %6825 = vmatmul.mubr.msk.bf16.vlgmr.msra.gmra.mrb[0].mxu0 %vm527_vm14, %v6818_v9 }
 0x292   : > { %5462 = vmatpush1.bf16.msra.mxu1 %v5415_v43  ;;  %5679 = vmatprep.mubr.bf16.mxu0 %v7137_v3 }
 0x294   : > { %v5619_v44 = vpop.permute.xlu0 %5618  ;;  %v5621_v58 = vpop.permute.xlu1 %5620 }
 0x295   : > { %6827 = vmatmul.mubr.msk.bf16.vlgmr.msra.gmra.mrb[0].mxu1 %vm527_vm14, %v6818_v9  ;;  %v5628_v45 = vsel %vm1065_vm4, %v5619_v44, %v5621_v58 }
 0x296   : > { %5720 = vmatprep.mubr.bf16.mxu1 %v7137_v3  ;;  %v5636_v1 = vsel %vm531_vm13, %v5628_v45, 0 }
 0x298   : > { %v5623_v63 = vpop.permute.xlu0 %5622  ;;  %v5625_v38 = vpop.permute.xlu1 %5624 }
 0x299   : > { %v5629_v0 = vsel %vm1065_vm4, %v5621_v58, %v5623_v63  ;;  %v5630_v46 = vsel %vm1065_vm4, %v5623_v63, %v5625_v38 }
 0x29a   : > { %6838 = vmatprep.subr.msk.bf16.mxu0 %vm531_vm13, %v5629_v0  ;;  %v5642_v54 = vsel %vm531_vm13, %v5630_v46, 0 }
 0x29b   : > { %5648 = vmatpush1.bf16.msra.mxu0 %v5636_v1 }
 0x29c   : > { %v5627_v52 = vpop.permute.xlu0 %5626 }
 0x29d   : > { %v5631_v53 = vsel %vm1065_vm4, %v5625_v38, %v5627_v52 }
 0x29e   : > { %6840 = vmatprep.subr.msk.bf16.mxu1 %vm531_vm13, %v5631_v53  ;;  %6839 = vmatmul.mubr.msk.bf16.vlgmr.msra.gmra.mrb[0].mxu0 %vm527_vm14, %v6832_v48 }
 0x29f   : > { %5689 = vmatpush1.bf16.msra.mxu1 %v5642_v54  ;;  %5906 = vmatprep.mubr.bf16.mxu0 %v7137_v3 }
 0x2a2   : > { %6841 = vmatmul.mubr.msk.bf16.vlgmr.msra.gmra.mrb[0].mxu1 %vm527_vm14, %v6832_v48 }
 0x2a3   : > { %v5848_v49 = vpop.permute.xlu0 %5847  ;;  %v5846_v14 = vpop.permute.xlu1 %5845  ;;  %5947 = vmatprep.mubr.bf16.mxu1 %v7137_v3 }
 0x2a4   : > { %v5855_v15 = vsel %vm836_vm3, %v5846_v14, %v5848_v49 }
 0x2a5   : > { %v5863_v60 = vsel %vm531_vm13, %v5855_v15, 0 }
 0x2a7   : > { %v5852_v16 = vpop.permute.xlu0 %5851  ;;  %v5850_v47 = vpop.permute.xlu1 %5849 }
 0x2a8   : > { %v5856_v59 = vsel %vm836_vm3, %v5848_v49, %v5850_v47  ;;  %v5857_v8 = vsel %vm836_vm3, %v5850_v47, %v5852_v16 }
 0x2a9   : > { %6852 = vmatprep.subr.msk.bf16.mxu0 %vm531_vm13, %v5856_v59  ;;  %v5869_v6 = vsel %vm531_vm13, %v5857_v8, 0 }
 0x2aa   : > { %5875 = vmatpush1.bf16.msra.mxu0 %v5863_v60 }
 0x2ab   : > { %v5854_v4 = vpop.permute.xlu1 %5853 }
 0x2ac   : > { %v5858_v5 = vsel %vm836_vm3, %v5852_v16, %v5854_v4 }
 0x2ad   : > { %6854 = vmatprep.subr.msk.bf16.mxu1 %vm531_vm13, %v5858_v5  ;;  %6853 = vmatmul.mubr.msk.bf16.vlgmr.msra.gmra.mrb[0].mxu0 %vm527_vm14, %v6846_v2 }
 0x2ae   : > { %5916 = vmatpush1.bf16.msra.mxu1 %v5869_v6  ;;  %6133 = vmatprep.mubr.bf16.mxu0 %v7137_v3 }
 0x2b0   : > { %v6073_v7 = vpop.permute.xlu0 %6072  ;;  %v6075_v10 = vpop.permute.xlu1 %6074 }
 0x2b1   : > { %6855 = vmatmul.mubr.msk.bf16.vlgmr.msra.gmra.mrb[0].mxu1 %vm527_vm14, %v6846_v2  ;;  %v6082_v11 = vsel %vm476_vm0, %v6073_v7, %v6075_v10 }
 0x2b2   : > { %6174 = vmatprep.mubr.bf16.mxu1 %v7137_v3  ;;  %v6090_v20 = vsel %vm531_vm13, %v6082_v11, 0 }
 0x2b4   : > { %v6077_v12 = vpop.permute.xlu0 %6076  ;;  %v6079_v13 = vpop.permute.xlu1 %6078 }
 0x2b5   : > { %v6083_v18 = vsel %vm476_vm0, %v6075_v10, %v6077_v12  ;;  %v6084_v23 = vsel %vm476_vm0, %v6077_v12, %v6079_v13 }
 0x2b6   : > { %6866 = vmatprep.subr.msk.bf16.mxu0 %vm531_vm13, %v6083_v18  ;;  %v6096_v26 = vsel %vm531_vm13, %v6084_v23, 0 }
 0x2b7   : > { %6102 = vmatpush1.bf16.msra.mxu0 %v6090_v20 }
 0x2b8   : > { %v6081_v50 = vpop.permute.xlu0 %6080 }
 0x2b9   : > { %v6085_v25 = vsel %vm476_vm0, %v6079_v13, %v6081_v50 }
 0x2ba   : > { %6868 = vmatprep.subr.msk.bf16.mxu1 %vm531_vm13, %v6085_v25  ;;  %6867 = vmatmul.mubr.msk.bf16.vlgmr.msra.gmra.mrb[0].mxu0 %vm527_vm14, %v6860_v24 }
 0x2bb   : > { %6143 = vmatpush1.bf16.msra.mxu1 %v6096_v26  ;;  %6360 = vmatprep.mubr.bf16.mxu0 %v7137_v3 }
 0x2be   : > { %6869 = vmatmul.mubr.msk.bf16.vlgmr.msra.gmra.mrb[0].mxu1 %vm527_vm14, %v6860_v24 }
 0x2bf   : > { %6401 = vmatprep.mubr.bf16.mxu1 %v7137_v3  ;;  %v6874_v3 = vld [vmem:[%s8365_s3 + $0x68] sm:$0xf] }
 0x2ea   : > { %v6302_v22 = vpop.permute.xlu0 %6301  ;;  %v6300_v62 = vpop.permute.xlu1 %6299 }
 0x2eb   : > { %v6309_v28 = vsel %vm390_vm2, %v6300_v62, %v6302_v22 }
 0x2ec   : > { %v6317_v19 = vsel %vm531_vm13, %v6309_v28, 0 }
 0x2ef   : > { %v6306_v29 = vpop.permute.xlu0 %6305  ;;  %v6304_v30 = vpop.permute.xlu1 %6303 }
 0x2f0   : > { %v6310_v31 = vsel %vm390_vm2, %v6302_v22, %v6304_v30  ;;  %v6311_v21 = vsel %vm390_vm2, %v6304_v30, %v6306_v29 }
 0x2f1   : > { %6880 = vmatprep.subr.msk.bf16.mxu0 %vm531_vm13, %v6310_v31  ;;  %v6323_v55 = vsel %vm531_vm13, %v6311_v21, 0 }
 0x2f2   : > { %6329 = vmatpush1.bf16.msra.mxu0 %v6317_v19 }
 0x2f3   : > { %v6308_v33 = vpop.permute.xlu1 %6307 }
 0x2f4   : > { %v6312_v34 = vsel %vm390_vm2, %v6306_v29, %v6308_v33 }
 0x2f5   : > { %6881 = vmatmul.mubr.msk.bf16.vlgmr.msra.gmra.mrb[0].mxu0 %vm527_vm14, %v6874_v3  ;;  %6882 = vmatprep.subr.msk.bf16.mxu1 %vm531_vm13, %v6312_v34 }
 0x2f6   : > { %6370 = vmatpush1.bf16.msra.mxu1 %v6323_v55 }
 0x2f9   : > { %6883 = vmatmul.mubr.msk.bf16.vlgmr.msra.gmra.mrb[0].mxu1 %vm527_vm14, %v6874_v3 }
 0x3c8   : > { %v6362_v35 = vpop.f32.mrb[0].mxu0 }
 0x3c9   : > { %v6426_v61 = vrot.slane %v6362_v35, 4  ;;  %v6364_v36 = vpop.f32.mrb[1].mxu0 }
 0x3ca   : > { %v6427_v51 = vrot.slane %v6364_v36, 4  ;;  %v6366_v56 = vpop.f32.mrb[2].mxu0 }
 0x3cb   : > { %6434 = vst [vmem:[%s7265_s19 + $0x40] ss:$-28 sps:$4 sm:$0xff] %v6426_v61   ;;  %v6367_v32 = vpop.f32.mrb[3].mxu0 }
 0x3cc   : > { %6435 = vst [vmem:[%s7265_s19 + $0x48] ss:$-28 sps:$4 sm:$0xff] %v6427_v51   ;;  %v6403_v57 = vpop.f32.mrb[0].mxu1 }
 0x3cd   : > { %v6428_v37 = vrot.slane %v6403_v57, 4  ;;  %v6405_v17 = vpop.f32.mrb[1].mxu1 }
 0x3ce   : > { %v6429_v39 = vrot.slane %v6405_v17, 4  ;;  %v6407_v40 = vpop.f32.mrb[2].mxu1 }
 0x3cf   : > { %6436 = vst [vmem:[%s7265_s19 + $0x50] ss:$-28 sps:$4 sm:$0xff] %v6428_v37   ;;  %v6408_v41 = vpop.f32.mrb[3].mxu1 }
 0x3d0   : > { %6437 = vst [vmem:[%s7265_s19 + $0x58] ss:$-28 sps:$4 sm:$0xff] %v6429_v39  }
 0x3d1 PF: > { %s15_s18 = sadd.s32 1, %s7135_s18  }
 0x3d2   : > { %p12_p4 = scmp.ge.s32.totalorder %s15_s18, 4  }
 0x3d4   :  { %14 = sbr.rel (!%p12_p4) target bundleno = 1 (0x1), region = 122 }

</bundles_post_ra>
